<compile_context>
chip_gen: v7x
topology: tpu7x:2x2x1
jax: 0.10.0
libtpu: 0.0.40
codegen_flags: <defaults>
</compile_context>

<pallas_src>
import jax
import jax.numpy as jnp
from jax import lax
from jax.experimental import pallas as pl
from jax.experimental.pallas import tpu as pltpu

CIN, COUT1, COUT2 = 3, 64, 2
K = 3                  # all convs are 3x3
STRIDE2 = 10           # stride of conv2 / conv3
MP_K, MP_S = 3, 2      # MaxPool2d(3x3, stride 2)
AP_K, AP_S = 3, 2      # AvgPool2d(3x3, stride 2)


def _fused_kernel(x_ref, w1_ref, b1_ref, w23_ref, b23_ref, o_ref, c1_scr):
    # x_ref   : (1, H, W, CIN)          one batch element, NHWC
    # w1_ref  : (K, K, CIN, COUT1)      conv1 weights (HWIO)
    # b1_ref  : (1, COUT1)
    # w23_ref : (K, K, COUT1, COUT2)    fused conv2+conv3 weights
    # b23_ref : (1, COUT2)
    # o_ref   : (1, AH, AW, COUT2)      final output
    # c1_scr  : (K, OW, COUT1)          the conv1 rows one head row needs
    H, W = x_ref.shape[1], x_ref.shape[2]
    OH, OW = H - K + 1, W - K + 1        # conv1 output size
    CH = (OH - K) // STRIDE2 + 1         # head (conv2+3) output height
    CW = (OW - K) // STRIDE2 + 1         # head output width
    MH = (CH - MP_K) // MP_S + 1         # maxpool output
    MW = (CW - MP_K) // MP_S + 1
    AH = (MH - AP_K) // AP_S + 1         # avgpool output
    AW = (MW - AP_K) // AP_S + 1

    # Hoisted loads (reused across all unrolled iterations).
    b1r = b1_ref[...]                    # (1, COUT1)
    b23r = b23_ref[...]                  # (1, COUT2)
    w1_taps = [[w1_ref[ky, kx] for kx in range(K)] for ky in range(K)]     # (CIN, COUT1)
    w23_taps = [[w23_ref[ky, kx] for kx in range(K)] for ky in range(K)]   # (COUT1, COUT2)

    head_rows = []                       # CH entries, each (CW, COUT2)
    for oh in range(CH):
        base = oh * STRIDE2

        # conv1 at rows base..base+K-1 (the only rows this head row reads),
        # batched over those K rows: one (K*OW, CIN) @ (CIN, COUT1) matmul per tap.
        acc = jnp.zeros((K * OW, COUT1), jnp.float32)
        for ky in range(K):
            for kx in range(K):
                patch = x_ref[0, pl.ds(base + ky, K), pl.ds(kx, OW), :]    # (K, OW, CIN)
                acc += jnp.dot(patch.reshape(K * OW, CIN), w1_taps[ky][kx],
                               preferred_element_type=jnp.float32)
        c1_scr[:, :, :] = (acc + b1r).reshape(K, OW, COUT1)

        # Fused conv2+conv3 (3x3, stride 10): strided column gather + small matmuls.
        hacc = jnp.zeros((CW, COUT2), jnp.float32)
        for kx in range(K):
            picked = c1_scr[:, pl.ds(kx, CW, stride=STRIDE2), :]           # (K, CW, COUT1)
            for ky in range(K):
                hacc += jnp.dot(picked[ky], w23_taps[ky][kx],
                                preferred_element_type=jnp.float32)
        head_rows.append(hacc + b23r)                                      # (CW, COUT2)

    # MaxPool2d((3,3), stride=(2,2)): elementwise max over whole rows, then small
    # window reductions over columns.
    mp = []                              # mp[i][j] : (1, COUT2)
    for i in range(MH):
        r = head_rows[MP_S * i]
        for d in range(1, MP_K):
            r = jnp.maximum(r, head_rows[MP_S * i + d])                    # (CW, COUT2)
        mp.append([jnp.max(r[MP_S * j: MP_S * j + MP_K, :], axis=0, keepdims=True)
                   for j in range(MW)])

    # AvgPool2d((3,3), stride=(2,2), count_include_pad=False) + ReLU.
    # padding=0, so count_include_pad has no effect; divisor is always 9.
    out_rows = []
    for ai in range(AH):
        cols = []
        for aj in range(AW):
            s = mp[AP_S * ai][AP_S * aj]
            for di in range(AP_K):
                for dj in range(AP_K):
                    if (di, dj) != (0, 0):
                        s = s + mp[AP_S * ai + di][AP_S * aj + dj]
            cols.append(jnp.maximum(s * (1.0 / (AP_K * AP_K)), 0.0))       # (1, COUT2)
        out_rows.append(cols[0] if AW == 1 else jnp.concatenate(cols, axis=0))
    o_ref[0, :, :, :] = jnp.stack(out_rows, axis=0)                        # (AH, AW, COUT2)


def model_forward(x_nchw, params):
    """Forward pass; accepts / returns PyTorch-style NCHW."""
    w1, b1, w2, b2, w3, b3 = params                  # HWIO weights
    x = jnp.transpose(x_nchw, (0, 2, 3, 1))          # NCHW -> NHWC (layout glue)
    n, h, w, _ = x.shape

    oh, ow = h - K + 1, w - K + 1
    ch = (oh - K) // STRIDE2 + 1
    cw = (ow - K) // STRIDE2 + 1
    mh = (ch - MP_K) // MP_S + 1
    mw = (cw - MP_K) // MP_S + 1
    ah = (mh - AP_K) // AP_S + 1
    aw = (mw - AP_K) // AP_S + 1
    assert ch >= MP_K and cw >= MP_K and mh >= AP_K and mw >= AP_K, \
        "input too small: every pooling stage must be non-empty"

    out = pl.pallas_call(
        _fused_kernel,
        out_shape=jax.ShapeDtypeStruct((n, ah, aw, COUT2), jnp.float32),
        grid_spec=pltpu.PrefetchScalarGridSpec(
            num_scalar_prefetch=0,
            grid=(n,),
            in_specs=[
                pl.BlockSpec((1, h, w, CIN), lambda i: (i, 0, 0, 0)),
                pl.BlockSpec((K, K, CIN, COUT1), lambda i: (0, 0, 0, 0)),
                pl.BlockSpec((1, COUT1), lambda i: (0, 0)),
                pl.BlockSpec((K, K, COUT1, COUT2), lambda i: (0, 0, 0, 0)),
                pl.BlockSpec((1, COUT2), lambda i: (0, 0)),
            ],
            out_specs=pl.BlockSpec((1, ah, aw, COUT2), lambda i: (i, 0, 0, 0)),
            scratch_shapes=[pltpu.VMEM((K, ow, COUT1), jnp.float32)],
        ),
        compiler_params=pltpu.CompilerParams(
            # batch axis parallel: lets v7x shard the N=2 batch across its 2 TCs
            dimension_semantics=("parallel",)),
    )(x, w1, b1.reshape(1, COUT1), w2 + w3, (b2 + b3).reshape(1, COUT2))

    return jnp.transpose(out, (0, 3, 1, 2))          # NHWC -> NCHW


# --------------------------------------------------------------------------
# Pure-JAX reference (numerical sanity check)
# --------------------------------------------------------------------------
def reference(x_nchw, params):
    w1, b1, w2, b2, w3, b3 = params
    dn = ('NCHW', 'HWIO', 'NCHW')
    y = lax.conv_general_dilated(x_nchw, w1, (1, 1), 'VALID',
                                 dimension_numbers=dn) + b1[None, :, None, None]
    x1 = lax.conv_general_dilated(y, w2, (STRIDE2, STRIDE2), 'VALID',
                                  dimension_numbers=dn) + b2[None, :, None, None]
    x2 = lax.conv_general_dilated(y, w3, (STRIDE2, STRIDE2), 'VALID',
                                  dimension_numbers=dn) + b3[None, :, None, None]
    x = x1 + x2
    x = lax.reduce_window(x, -jnp.inf, lax.max, (1, 1, 3, 3), (1, 1, 2, 2), 'VALID')
    x = lax.reduce_window(x, 0.0, lax.add, (1, 1, 3, 3), (1, 1, 2, 2), 'VALID') / 9.0
    return jnp.maximum(x, 0.0)


if __name__ == "__main__":
    key = jax.random.PRNGKey(0)
    k = jax.random.split(key, 7)

    # Deterministic synthetic parameters (HWIO layout), shapes from the module __init__.
    w1 = jax.random.normal(k[0], (K, K, CIN, COUT1), jnp.float32) * 0.10
    b1 = jax.random.normal(k[1], (COUT1,), jnp.float32) * 0.10
    w2 = jax.random.normal(k[2], (K, K, COUT1, COUT2), jnp.float32) * 0.05
    b2 = jax.random.normal(k[3], (COUT2,), jnp.float32) * 0.10
    w3 = jax.random.normal(k[4], (K, K, COUT1, COUT2), jnp.float32) * 0.05
    b3 = jax.random.normal(k[5], (COUT2,), jnp.float32) * 0.10
    params = (w1, b1, w2, b2, w3, b3)

    # Smallest clean input for which every pooling stage is non-empty and conv1's
    # output width (64) stays sublane-aligned:  66 -> 64 -> 7 -> 3 -> 1
    x = jax.random.normal(k[6], (2, CIN, 66, 66), jnp.float32)   # NCHW like PyTorch

    out = jax.block_until_ready(jax.jit(model_forward)(x, params))
    ref = jax.block_until_ready(reference(x, params))

    assert out.shape == (2, COUT2, 1, 1), out.shape
    assert jnp.allclose(out, ref, rtol=5e-2, atol=5e-2), (out, ref)
    print("KERNEL_OK")
</pallas_src>

<mosaic_0001>
module attributes {stable_mosaic.version = 11 : i64} {
  func.func @_fused_kernel(%arg0: i32, %arg1: memref<1x66x66x3xf32, #tpu.memory_space<vmem>>, %arg2: memref<3x3x3x64xf32, #tpu.memory_space<vmem>>, %arg3: memref<1x64xf32, #tpu.memory_space<vmem>>, %arg4: memref<3x3x64x2xf32, #tpu.memory_space<vmem>>, %arg5: memref<1x2xf32, #tpu.memory_space<vmem>>, %arg6: memref<1x1x1x2xf32, #tpu.memory_space<vmem>>, %arg7: memref<3x64x64xf32, #tpu.memory_space<vmem>>) attributes {dimension_semantics = [#tpu.dimension_semantics<parallel>], iteration_bounds = array<i64: 2>, scalar_prefetch = 0 : i64, scratch_operands = 1 : i64, tpu.core_type = #tpu.core_type<tc>, window_params = [{transform_indices = @transform_0, window_bounds = array<i64: 1, 66, 66, 3>}, {pipeline_mode = #tpu.pipeline_mode<synchronous>, transform_indices = @transform_1, window_bounds = array<i64: 3, 3, 3, 64>}, {pipeline_mode = #tpu.pipeline_mode<synchronous>, transform_indices = @transform_2, window_bounds = array<i64: 1, 64>}, {pipeline_mode = #tpu.pipeline_mode<synchronous>, transform_indices = @transform_3, window_bounds = array<i64: 3, 3, 64, 2>}, {pipeline_mode = #tpu.pipeline_mode<synchronous>, transform_indices = @transform_4, window_bounds = array<i64: 1, 2>}, {transform_indices = @transform_5, window_bounds = array<i64: 1, 1, 1, 2>}]} {
    %c0 = arith.constant 0 : index
    %c0_0 = arith.constant 0 : index
    %0 = vector.load %arg3[%c0, %c0_0] : memref<1x64xf32, #tpu.memory_space<vmem>>, vector<1x64xf32>
    %c0_1 = arith.constant 0 : index
    %c0_2 = arith.constant 0 : index
    %1 = vector.load %arg5[%c0_1, %c0_2] : memref<1x2xf32, #tpu.memory_space<vmem>>, vector<1x2xf32>
    %c0_3 = arith.constant 0 : index
    %c0_4 = arith.constant 0 : index
    %c0_5 = arith.constant 0 : index
    %c0_6 = arith.constant 0 : index
    %2 = vector.load %arg2[%c0_3, %c0_4, %c0_5, %c0_6] : memref<3x3x3x64xf32, #tpu.memory_space<vmem>>, vector<1x1x3x64xf32>
    %3 = vector.shape_cast %2 : vector<1x1x3x64xf32> to vector<3x64xf32>
    %c0_7 = arith.constant 0 : index
    %c1 = arith.constant 1 : index
    %c0_8 = arith.constant 0 : index
    %c0_9 = arith.constant 0 : index
    %4 = vector.load %arg2[%c0_7, %c1, %c0_8, %c0_9] : memref<3x3x3x64xf32, #tpu.memory_space<vmem>>, vector<1x1x3x64xf32>
    %5 = vector.shape_cast %4 : vector<1x1x3x64xf32> to vector<3x64xf32>
    %c0_10 = arith.constant 0 : index
    %c2 = arith.constant 2 : index
    %c0_11 = arith.constant 0 : index
    %c0_12 = arith.constant 0 : index
    %6 = vector.load %arg2[%c0_10, %c2, %c0_11, %c0_12] : memref<3x3x3x64xf32, #tpu.memory_space<vmem>>, vector<1x1x3x64xf32>
    %7 = vector.shape_cast %6 : vector<1x1x3x64xf32> to vector<3x64xf32>
    %c1_13 = arith.constant 1 : index
    %c0_14 = arith.constant 0 : index
    %c0_15 = arith.constant 0 : index
    %c0_16 = arith.constant 0 : index
    %8 = vector.load %arg2[%c1_13, %c0_14, %c0_15, %c0_16] : memref<3x3x3x64xf32, #tpu.memory_space<vmem>>, vector<1x1x3x64xf32>
    %9 = vector.shape_cast %8 : vector<1x1x3x64xf32> to vector<3x64xf32>
    %c1_17 = arith.constant 1 : index
    %c1_18 = arith.constant 1 : index
    %c0_19 = arith.constant 0 : index
    %c0_20 = arith.constant 0 : index
    %10 = vector.load %arg2[%c1_17, %c1_18, %c0_19, %c0_20] : memref<3x3x3x64xf32, #tpu.memory_space<vmem>>, vector<1x1x3x64xf32>
    %11 = vector.shape_cast %10 : vector<1x1x3x64xf32> to vector<3x64xf32>
    %c1_21 = arith.constant 1 : index
    %c2_22 = arith.constant 2 : index
    %c0_23 = arith.constant 0 : index
    %c0_24 = arith.constant 0 : index
    %12 = vector.load %arg2[%c1_21, %c2_22, %c0_23, %c0_24] : memref<3x3x3x64xf32, #tpu.memory_space<vmem>>, vector<1x1x3x64xf32>
    %13 = vector.shape_cast %12 : vector<1x1x3x64xf32> to vector<3x64xf32>
    %c2_25 = arith.constant 2 : index
    %c0_26 = arith.constant 0 : index
    %c0_27 = arith.constant 0 : index
    %c0_28 = arith.constant 0 : index
    %14 = vector.load %arg2[%c2_25, %c0_26, %c0_27, %c0_28] : memref<3x3x3x64xf32, #tpu.memory_space<vmem>>, vector<1x1x3x64xf32>
    %15 = vector.shape_cast %14 : vector<1x1x3x64xf32> to vector<3x64xf32>
    %c2_29 = arith.constant 2 : index
    %c1_30 = arith.constant 1 : index
    %c0_31 = arith.constant 0 : index
    %c0_32 = arith.constant 0 : index
    %16 = vector.load %arg2[%c2_29, %c1_30, %c0_31, %c0_32] : memref<3x3x3x64xf32, #tpu.memory_space<vmem>>, vector<1x1x3x64xf32>
    %17 = vector.shape_cast %16 : vector<1x1x3x64xf32> to vector<3x64xf32>
    %c2_33 = arith.constant 2 : index
    %c2_34 = arith.constant 2 : index
    %c0_35 = arith.constant 0 : index
    %c0_36 = arith.constant 0 : index
    %18 = vector.load %arg2[%c2_33, %c2_34, %c0_35, %c0_36] : memref<3x3x3x64xf32, #tpu.memory_space<vmem>>, vector<1x1x3x64xf32>
    %19 = vector.shape_cast %18 : vector<1x1x3x64xf32> to vector<3x64xf32>
    %c0_37 = arith.constant 0 : index
    %c0_38 = arith.constant 0 : index
    %c0_39 = arith.constant 0 : index
    %c0_40 = arith.constant 0 : index
    %20 = vector.load %arg4[%c0_37, %c0_38, %c0_39, %c0_40] : memref<3x3x64x2xf32, #tpu.memory_space<vmem>>, vector<1x1x64x2xf32>
    %21 = vector.shape_cast %20 : vector<1x1x64x2xf32> to vector<64x2xf32>
    %c0_41 = arith.constant 0 : index
    %c1_42 = arith.constant 1 : index
    %c0_43 = arith.constant 0 : index
    %c0_44 = arith.constant 0 : index
    %22 = vector.load %arg4[%c0_41, %c1_42, %c0_43, %c0_44] : memref<3x3x64x2xf32, #tpu.memory_space<vmem>>, vector<1x1x64x2xf32>
    %23 = vector.shape_cast %22 : vector<1x1x64x2xf32> to vector<64x2xf32>
    %c0_45 = arith.constant 0 : index
    %c2_46 = arith.constant 2 : index
    %c0_47 = arith.constant 0 : index
    %c0_48 = arith.constant 0 : index
    %24 = vector.load %arg4[%c0_45, %c2_46, %c0_47, %c0_48] : memref<3x3x64x2xf32, #tpu.memory_space<vmem>>, vector<1x1x64x2xf32>
    %25 = vector.shape_cast %24 : vector<1x1x64x2xf32> to vector<64x2xf32>
    %c1_49 = arith.constant 1 : index
    %c0_50 = arith.constant 0 : index
    %c0_51 = arith.constant 0 : index
    %c0_52 = arith.constant 0 : index
    %26 = vector.load %arg4[%c1_49, %c0_50, %c0_51, %c0_52] : memref<3x3x64x2xf32, #tpu.memory_space<vmem>>, vector<1x1x64x2xf32>
    %27 = vector.shape_cast %26 : vector<1x1x64x2xf32> to vector<64x2xf32>
    %c1_53 = arith.constant 1 : index
    %c1_54 = arith.constant 1 : index
    %c0_55 = arith.constant 0 : index
    %c0_56 = arith.constant 0 : index
    %28 = vector.load %arg4[%c1_53, %c1_54, %c0_55, %c0_56] : memref<3x3x64x2xf32, #tpu.memory_space<vmem>>, vector<1x1x64x2xf32>
    %29 = vector.shape_cast %28 : vector<1x1x64x2xf32> to vector<64x2xf32>
    %c1_57 = arith.constant 1 : index
    %c2_58 = arith.constant 2 : index
    %c0_59 = arith.constant 0 : index
    %c0_60 = arith.constant 0 : index
    %30 = vector.load %arg4[%c1_57, %c2_58, %c0_59, %c0_60] : memref<3x3x64x2xf32, #tpu.memory_space<vmem>>, vector<1x1x64x2xf32>
    %31 = vector.shape_cast %30 : vector<1x1x64x2xf32> to vector<64x2xf32>
    %c2_61 = arith.constant 2 : index
    %c0_62 = arith.constant 0 : index
    %c0_63 = arith.constant 0 : index
    %c0_64 = arith.constant 0 : index
    %32 = vector.load %arg4[%c2_61, %c0_62, %c0_63, %c0_64] : memref<3x3x64x2xf32, #tpu.memory_space<vmem>>, vector<1x1x64x2xf32>
    %33 = vector.shape_cast %32 : vector<1x1x64x2xf32> to vector<64x2xf32>
    %c2_65 = arith.constant 2 : index
    %c1_66 = arith.constant 1 : index
    %c0_67 = arith.constant 0 : index
    %c0_68 = arith.constant 0 : index
    %34 = vector.load %arg4[%c2_65, %c1_66, %c0_67, %c0_68] : memref<3x3x64x2xf32, #tpu.memory_space<vmem>>, vector<1x1x64x2xf32>
    %35 = vector.shape_cast %34 : vector<1x1x64x2xf32> to vector<64x2xf32>
    %c2_69 = arith.constant 2 : index
    %c2_70 = arith.constant 2 : index
    %c0_71 = arith.constant 0 : index
    %c0_72 = arith.constant 0 : index
    %36 = vector.load %arg4[%c2_69, %c2_70, %c0_71, %c0_72] : memref<3x3x64x2xf32, #tpu.memory_space<vmem>>, vector<1x1x64x2xf32>
    %37 = vector.shape_cast %36 : vector<1x1x64x2xf32> to vector<64x2xf32>
    %cst = arith.constant 0.000000e+00 : f32
    %38 = vector.broadcast %cst : f32 to vector<192x64xf32>
    %c0_73 = arith.constant 0 : index
    %c0_74 = arith.constant 0 : index
    %c0_75 = arith.constant 0 : index
    %c0_76 = arith.constant 0 : index
    %39 = vector.load %arg1[%c0_73, %c0_74, %c0_75, %c0_76] : memref<1x66x66x3xf32, #tpu.memory_space<vmem>>, vector<1x3x64x3xf32>
    %40 = vector.shape_cast %39 : vector<1x3x64x3xf32> to vector<3x64x3xf32>
    %41 = vector.shape_cast %40 : vector<3x64x3xf32> to vector<192x3xf32>
    %cst_77 = arith.constant dense<0.000000e+00> : vector<192x64xf32>
    %42 = tpu.matmul %41, %3, %cst_77 {dimension_numbers = #tpu.dot_dimension_numbers<[1], [0], [0], [1], [0, 0, 1, 1], [], []>} : vector<192x3xf32>, vector<3x64xf32>, vector<192x64xf32> -> vector<192x64xf32>
    %43 = arith.addf %38, %42 : vector<192x64xf32>
    %c0_78 = arith.constant 0 : index
    %c0_79 = arith.constant 0 : index
    %c1_80 = arith.constant 1 : index
    %c0_81 = arith.constant 0 : index
    %44 = vector.load %arg1[%c0_78, %c0_79, %c1_80, %c0_81] : memref<1x66x66x3xf32, #tpu.memory_space<vmem>>, vector<1x3x64x3xf32>
    %45 = vector.shape_cast %44 : vector<1x3x64x3xf32> to vector<3x64x3xf32>
    %46 = vector.shape_cast %45 : vector<3x64x3xf32> to vector<192x3xf32>
    %cst_82 = arith.constant dense<0.000000e+00> : vector<192x64xf32>
    %47 = tpu.matmul %46, %5, %cst_82 {dimension_numbers = #tpu.dot_dimension_numbers<[1], [0], [0], [1], [0, 0, 1, 1], [], []>} : vector<192x3xf32>, vector<3x64xf32>, vector<192x64xf32> -> vector<192x64xf32>
    %48 = arith.addf %43, %47 : vector<192x64xf32>
    %c0_83 = arith.constant 0 : index
    %c0_84 = arith.constant 0 : index
    %c2_85 = arith.constant 2 : index
    %c0_86 = arith.constant 0 : index
    %49 = vector.load %arg1[%c0_83, %c0_84, %c2_85, %c0_86] : memref<1x66x66x3xf32, #tpu.memory_space<vmem>>, vector<1x3x64x3xf32>
    %50 = vector.shape_cast %49 : vector<1x3x64x3xf32> to vector<3x64x3xf32>
    %51 = vector.shape_cast %50 : vector<3x64x3xf32> to vector<192x3xf32>
    %cst_87 = arith.constant dense<0.000000e+00> : vector<192x64xf32>
    %52 = tpu.matmul %51, %7, %cst_87 {dimension_numbers = #tpu.dot_dimension_numbers<[1], [0], [0], [1], [0, 0, 1, 1], [], []>} : vector<192x3xf32>, vector<3x64xf32>, vector<192x64xf32> -> vector<192x64xf32>
    %53 = arith.addf %48, %52 : vector<192x64xf32>
    %c0_88 = arith.constant 0 : index
    %c1_89 = arith.constant 1 : index
    %c0_90 = arith.constant 0 : index
    %c0_91 = arith.constant 0 : index
    %54 = vector.load %arg1[%c0_88, %c1_89, %c0_90, %c0_91] : memref<1x66x66x3xf32, #tpu.memory_space<vmem>>, vector<1x3x64x3xf32>
    %55 = vector.shape_cast %54 : vector<1x3x64x3xf32> to vector<3x64x3xf32>
    %56 = vector.shape_cast %55 : vector<3x64x3xf32> to vector<192x3xf32>
    %cst_92 = arith.constant dense<0.000000e+00> : vector<192x64xf32>
    %57 = tpu.matmul %56, %9, %cst_92 {dimension_numbers = #tpu.dot_dimension_numbers<[1], [0], [0], [1], [0, 0, 1, 1], [], []>} : vector<192x3xf32>, vector<3x64xf32>, vector<192x64xf32> -> vector<192x64xf32>
    %58 = arith.addf %53, %57 : vector<192x64xf32>
    %c0_93 = arith.constant 0 : index
    %c1_94 = arith.constant 1 : index
    %c1_95 = arith.constant 1 : index
    %c0_96 = arith.constant 0 : index
    %59 = vector.load %arg1[%c0_93, %c1_94, %c1_95, %c0_96] : memref<1x66x66x3xf32, #tpu.memory_space<vmem>>, vector<1x3x64x3xf32>
    %60 = vector.shape_cast %59 : vector<1x3x64x3xf32> to vector<3x64x3xf32>
    %61 = vector.shape_cast %60 : vector<3x64x3xf32> to vector<192x3xf32>
    %cst_97 = arith.constant dense<0.000000e+00> : vector<192x64xf32>
    %62 = tpu.matmul %61, %11, %cst_97 {dimension_numbers = #tpu.dot_dimension_numbers<[1], [0], [0], [1], [0, 0, 1, 1], [], []>} : vector<192x3xf32>, vector<3x64xf32>, vector<192x64xf32> -> vector<192x64xf32>
    %63 = arith.addf %58, %62 : vector<192x64xf32>
    %c0_98 = arith.constant 0 : index
    %c1_99 = arith.constant 1 : index
    %c2_100 = arith.constant 2 : index
    %c0_101 = arith.constant 0 : index
    %64 = vector.load %arg1[%c0_98, %c1_99, %c2_100, %c0_101] : memref<1x66x66x3xf32, #tpu.memory_space<vmem>>, vector<1x3x64x3xf32>
    %65 = vector.shape_cast %64 : vector<1x3x64x3xf32> to vector<3x64x3xf32>
    %66 = vector.shape_cast %65 : vector<3x64x3xf32> to vector<192x3xf32>
    %cst_102 = arith.constant dense<0.000000e+00> : vector<192x64xf32>
    %67 = tpu.matmul %66, %13, %cst_102 {dimension_numbers = #tpu.dot_dimension_numbers<[1], [0], [0], [1], [0, 0, 1, 1], [], []>} : vector<192x3xf32>, vector<3x64xf32>, vector<192x64xf32> -> vector<192x64xf32>
    %68 = arith.addf %63, %67 : vector<192x64xf32>
    %c0_103 = arith.constant 0 : index
    %c2_104 = arith.constant 2 : index
    %c0_105 = arith.constant 0 : index
    %c0_106 = arith.constant 0 : index
    %69 = vector.load %arg1[%c0_103, %c2_104, %c0_105, %c0_106] : memref<1x66x66x3xf32, #tpu.memory_space<vmem>>, vector<1x3x64x3xf32>
    %70 = vector.shape_cast %69 : vector<1x3x64x3xf32> to vector<3x64x3xf32>
    %71 = vector.shape_cast %70 : vector<3x64x3xf32> to vector<192x3xf32>
    %cst_107 = arith.constant dense<0.000000e+00> : vector<192x64xf32>
    %72 = tpu.matmul %71, %15, %cst_107 {dimension_numbers = #tpu.dot_dimension_numbers<[1], [0], [0], [1], [0, 0, 1, 1], [], []>} : vector<192x3xf32>, vector<3x64xf32>, vector<192x64xf32> -> vector<192x64xf32>
    %73 = arith.addf %68, %72 : vector<192x64xf32>
    %c0_108 = arith.constant 0 : index
    %c2_109 = arith.constant 2 : index
    %c1_110 = arith.constant 1 : index
    %c0_111 = arith.constant 0 : index
    %74 = vector.load %arg1[%c0_108, %c2_109, %c1_110, %c0_111] : memref<1x66x66x3xf32, #tpu.memory_space<vmem>>, vector<1x3x64x3xf32>
    %75 = vector.shape_cast %74 : vector<1x3x64x3xf32> to vector<3x64x3xf32>
    %76 = vector.shape_cast %75 : vector<3x64x3xf32> to vector<192x3xf32>
    %cst_112 = arith.constant dense<0.000000e+00> : vector<192x64xf32>
    %77 = tpu.matmul %76, %17, %cst_112 {dimension_numbers = #tpu.dot_dimension_numbers<[1], [0], [0], [1], [0, 0, 1, 1], [], []>} : vector<192x3xf32>, vector<3x64xf32>, vector<192x64xf32> -> vector<192x64xf32>
    %78 = arith.addf %73, %77 : vector<192x64xf32>
    %c0_113 = arith.constant 0 : index
    %c2_114 = arith.constant 2 : index
    %c2_115 = arith.constant 2 : index
    %c0_116 = arith.constant 0 : index
    %79 = vector.load %arg1[%c0_113, %c2_114, %c2_115, %c0_116] : memref<1x66x66x3xf32, #tpu.memory_space<vmem>>, vector<1x3x64x3xf32>
    %80 = vector.shape_cast %79 : vector<1x3x64x3xf32> to vector<3x64x3xf32>
    %81 = vector.shape_cast %80 : vector<3x64x3xf32> to vector<192x3xf32>
    %cst_117 = arith.constant dense<0.000000e+00> : vector<192x64xf32>
    %82 = tpu.matmul %81, %19, %cst_117 {dimension_numbers = #tpu.dot_dimension_numbers<[1], [0], [0], [1], [0, 0, 1, 1], [], []>} : vector<192x3xf32>, vector<3x64xf32>, vector<192x64xf32> -> vector<192x64xf32>
    %83 = arith.addf %78, %82 : vector<192x64xf32>
    %84 = vector.broadcast %0 : vector<1x64xf32> to vector<192x64xf32>
    %85 = arith.addf %83, %84 : vector<192x64xf32>
    %86 = vector.shape_cast %85 : vector<192x64xf32> to vector<3x64x64xf32>
    %c0_118 = arith.constant 0 : index
    %c0_119 = arith.constant 0 : index
    %c0_120 = arith.constant 0 : index
    %87 = vector.load %arg7[%c0_118, %c0_119, %c0_120] : memref<3x64x64xf32, #tpu.memory_space<vmem>>, vector<3x64x64xf32>
    tpu.vector_store %arg7[%c0_118, %c0_119, %c0_120], %86 {strides = array<i32>} : memref<3x64x64xf32, #tpu.memory_space<vmem>>, vector<3x64x64xf32>,
    %cst_121 = arith.constant 0.000000e+00 : f32
    %88 = vector.broadcast %cst_121 : f32 to vector<7x2xf32>
    %c0_122 = arith.constant 0 : index
    %c0_123 = arith.constant 0 : index
    %c0_124 = arith.constant 0 : index
    %89 = tpu.strided_load %arg7[%c0_122, %c0_123, %c0_124] {strides = array<i32: 1, 10, 1>} : memref<3x64x64xf32, #tpu.memory_space<vmem>>, vector<3x7x64xf32>
    %90 = vector.extract_strided_slice %89 {offsets = [0, 0, 0], sizes = [1, 7, 64], strides = [1, 1, 1]} : vector<3x7x64xf32> to vector<1x7x64xf32>
    %91 = vector.shape_cast %90 : vector<1x7x64xf32> to vector<7x64xf32>
    %cst_125 = arith.constant dense<0.000000e+00> : vector<7x2xf32>
    %92 = tpu.matmul %91, %21, %cst_125 {dimension_numbers = #tpu.dot_dimension_numbers<[1], [0], [0], [1], [0, 0, 1, 1], [], []>} : vector<7x64xf32>, vector<64x2xf32>, vector<7x2xf32> -> vector<7x2xf32>
    %93 = arith.addf %88, %92 : vector<7x2xf32>
    %94 = vector.extract_strided_slice %89 {offsets = [1, 0, 0], sizes = [1, 7, 64], strides = [1, 1, 1]} : vector<3x7x64xf32> to vector<1x7x64xf32>
    %95 = vector.shape_cast %94 : vector<1x7x64xf32> to vector<7x64xf32>
    %cst_126 = arith.constant dense<0.000000e+00> : vector<7x2xf32>
    %96 = tpu.matmul %95, %27, %cst_126 {dimension_numbers = #tpu.dot_dimension_numbers<[1], [0], [0], [1], [0, 0, 1, 1], [], []>} : vector<7x64xf32>, vector<64x2xf32>, vector<7x2xf32> -> vector<7x2xf32>
    %97 = arith.addf %93, %96 : vector<7x2xf32>
    %98 = vector.extract_strided_slice %89 {offsets = [2, 0, 0], sizes = [1, 7, 64], strides = [1, 1, 1]} : vector<3x7x64xf32> to vector<1x7x64xf32>
    %99 = vector.shape_cast %98 : vector<1x7x64xf32> to vector<7x64xf32>
    %cst_127 = arith.constant dense<0.000000e+00> : vector<7x2xf32>
    %100 = tpu.matmul %99, %33, %cst_127 {dimension_numbers = #tpu.dot_dimension_numbers<[1], [0], [0], [1], [0, 0, 1, 1], [], []>} : vector<7x64xf32>, vector<64x2xf32>, vector<7x2xf32> -> vector<7x2xf32>
    %101 = arith.addf %97, %100 : vector<7x2xf32>
    %c0_128 = arith.constant 0 : index
    %c1_129 = arith.constant 1 : index
    %c0_130 = arith.constant 0 : index
    %102 = tpu.strided_load %arg7[%c0_128, %c1_129, %c0_130] {strides = array<i32: 1, 10, 1>} : memref<3x64x64xf32, #tpu.memory_space<vmem>>, vector<3x7x64xf32>
    %103 = vector.extract_strided_slice %102 {offsets = [0, 0, 0], sizes = [1, 7, 64], strides = [1, 1, 1]} : vector<3x7x64xf32> to vector<1x7x64xf32>
    %104 = vector.shape_cast %103 : vector<1x7x64xf32> to vector<7x64xf32>
    %cst_131 = arith.constant dense<0.000000e+00> : vector<7x2xf32>
    %105 = tpu.matmul %104, %23, %cst_131 {dimension_numbers = #tpu.dot_dimension_numbers<[1], [0], [0], [1], [0, 0, 1, 1], [], []>} : vector<7x64xf32>, vector<64x2xf32>, vector<7x2xf32> -> vector<7x2xf32>
    %106 = arith.addf %101, %105 : vector<7x2xf32>
    %107 = vector.extract_strided_slice %102 {offsets = [1, 0, 0], sizes = [1, 7, 64], strides = [1, 1, 1]} : vector<3x7x64xf32> to vector<1x7x64xf32>
    %108 = vector.shape_cast %107 : vector<1x7x64xf32> to vector<7x64xf32>
    %cst_132 = arith.constant dense<0.000000e+00> : vector<7x2xf32>
    %109 = tpu.matmul %108, %29, %cst_132 {dimension_numbers = #tpu.dot_dimension_numbers<[1], [0], [0], [1], [0, 0, 1, 1], [], []>} : vector<7x64xf32>, vector<64x2xf32>, vector<7x2xf32> -> vector<7x2xf32>
    %110 = arith.addf %106, %109 : vector<7x2xf32>
    %111 = vector.extract_strided_slice %102 {offsets = [2, 0, 0], sizes = [1, 7, 64], strides = [1, 1, 1]} : vector<3x7x64xf32> to vector<1x7x64xf32>
    %112 = vector.shape_cast %111 : vector<1x7x64xf32> to vector<7x64xf32>
    %cst_133 = arith.constant dense<0.000000e+00> : vector<7x2xf32>
    %113 = tpu.matmul %112, %35, %cst_133 {dimension_numbers = #tpu.dot_dimension_numbers<[1], [0], [0], [1], [0, 0, 1, 1], [], []>} : vector<7x64xf32>, vector<64x2xf32>, vector<7x2xf32> -> vector<7x2xf32>
    %114 = arith.addf %110, %113 : vector<7x2xf32>
    %c0_134 = arith.constant 0 : index
    %c2_135 = arith.constant 2 : index
    %c0_136 = arith.constant 0 : index
    %115 = tpu.strided_load %arg7[%c0_134, %c2_135, %c0_136] {strides = array<i32: 1, 10, 1>} : memref<3x64x64xf32, #tpu.memory_space<vmem>>, vector<3x7x64xf32>
    %116 = vector.extract_strided_slice %115 {offsets = [0, 0, 0], sizes = [1, 7, 64], strides = [1, 1, 1]} : vector<3x7x64xf32> to vector<1x7x64xf32>
    %117 = vector.shape_cast %116 : vector<1x7x64xf32> to vector<7x64xf32>
    %cst_137 = arith.constant dense<0.000000e+00> : vector<7x2xf32>
    %118 = tpu.matmul %117, %25, %cst_137 {dimension_numbers = #tpu.dot_dimension_numbers<[1], [0], [0], [1], [0, 0, 1, 1], [], []>} : vector<7x64xf32>, vector<64x2xf32>, vector<7x2xf32> -> vector<7x2xf32>
    %119 = arith.addf %114, %118 : vector<7x2xf32>
    %120 = vector.extract_strided_slice %115 {offsets = [1, 0, 0], sizes = [1, 7, 64], strides = [1, 1, 1]} : vector<3x7x64xf32> to vector<1x7x64xf32>
    %121 = vector.shape_cast %120 : vector<1x7x64xf32> to vector<7x64xf32>
    %cst_138 = arith.constant dense<0.000000e+00> : vector<7x2xf32>
    %122 = tpu.matmul %121, %31, %cst_138 {dimension_numbers = #tpu.dot_dimension_numbers<[1], [0], [0], [1], [0, 0, 1, 1], [], []>} : vector<7x64xf32>, vector<64x2xf32>, vector<7x2xf32> -> vector<7x2xf32>
    %123 = arith.addf %119, %122 : vector<7x2xf32>
    %124 = vector.extract_strided_slice %115 {offsets = [2, 0, 0], sizes = [1, 7, 64], strides = [1, 1, 1]} : vector<3x7x64xf32> to vector<1x7x64xf32>
    %125 = vector.shape_cast %124 : vector<1x7x64xf32> to vector<7x64xf32>
    %cst_139 = arith.constant dense<0.000000e+00> : vector<7x2xf32>
    %126 = tpu.matmul %125, %37, %cst_139 {dimension_numbers = #tpu.dot_dimension_numbers<[1], [0], [0], [1], [0, 0, 1, 1], [], []>} : vector<7x64xf32>, vector<64x2xf32>, vector<7x2xf32> -> vector<7x2xf32>
    %127 = arith.addf %123, %126 : vector<7x2xf32>
    %128 = vector.broadcast %1 : vector<1x2xf32> to vector<7x2xf32>
    %129 = arith.addf %127, %128 : vector<7x2xf32>
    %cst_140 = arith.constant 0.000000e+00 : f32
    %130 = vector.broadcast %cst_140 : f32 to vector<192x64xf32>
    %c0_141 = arith.constant 0 : index
    %c10 = arith.constant 10 : index
    %c0_142 = arith.constant 0 : index
    %c0_143 = arith.constant 0 : index
    %131 = vector.load %arg1[%c0_141, %c10, %c0_142, %c0_143] : memref<1x66x66x3xf32, #tpu.memory_space<vmem>>, vector<1x3x64x3xf32>
    %132 = vector.shape_cast %131 : vector<1x3x64x3xf32> to vector<3x64x3xf32>
    %133 = vector.shape_cast %132 : vector<3x64x3xf32> to vector<192x3xf32>
    %cst_144 = arith.constant dense<0.000000e+00> : vector<192x64xf32>
    %134 = tpu.matmul %133, %3, %cst_144 {dimension_numbers = #tpu.dot_dimension_numbers<[1], [0], [0], [1], [0, 0, 1, 1], [], []>} : vector<192x3xf32>, vector<3x64xf32>, vector<192x64xf32> -> vector<192x64xf32>
    %135 = arith.addf %130, %134 : vector<192x64xf32>
    %c0_145 = arith.constant 0 : index
    %c10_146 = arith.constant 10 : index
    %c1_147 = arith.constant 1 : index
    %c0_148 = arith.constant 0 : index
    %136 = vector.load %arg1[%c0_145, %c10_146, %c1_147, %c0_148] : memref<1x66x66x3xf32, #tpu.memory_space<vmem>>, vector<1x3x64x3xf32>
    %137 = vector.shape_cast %136 : vector<1x3x64x3xf32> to vector<3x64x3xf32>
    %138 = vector.shape_cast %137 : vector<3x64x3xf32> to vector<192x3xf32>
    %cst_149 = arith.constant dense<0.000000e+00> : vector<192x64xf32>
    %139 = tpu.matmul %138, %5, %cst_149 {dimension_numbers = #tpu.dot_dimension_numbers<[1], [0], [0], [1], [0, 0, 1, 1], [], []>} : vector<192x3xf32>, vector<3x64xf32>, vector<192x64xf32> -> vector<192x64xf32>
    %140 = arith.addf %135, %139 : vector<192x64xf32>
    %c0_150 = arith.constant 0 : index
    %c10_151 = arith.constant 10 : index
    %c2_152 = arith.constant 2 : index
    %c0_153 = arith.constant 0 : index
    %141 = vector.load %arg1[%c0_150, %c10_151, %c2_152, %c0_153] : memref<1x66x66x3xf32, #tpu.memory_space<vmem>>, vector<1x3x64x3xf32>
    %142 = vector.shape_cast %141 : vector<1x3x64x3xf32> to vector<3x64x3xf32>
    %143 = vector.shape_cast %142 : vector<3x64x3xf32> to vector<192x3xf32>
    %cst_154 = arith.constant dense<0.000000e+00> : vector<192x64xf32>
    %144 = tpu.matmul %143, %7, %cst_154 {dimension_numbers = #tpu.dot_dimension_numbers<[1], [0], [0], [1], [0, 0, 1, 1], [], []>} : vector<192x3xf32>, vector<3x64xf32>, vector<192x64xf32> -> vector<192x64xf32>
    %145 = arith.addf %140, %144 : vector<192x64xf32>
    %c0_155 = arith.constant 0 : index
    %c11 = arith.constant 11 : index
    %c0_156 = arith.constant 0 : index
    %c0_157 = arith.constant 0 : index
    %146 = vector.load %arg1[%c0_155, %c11, %c0_156, %c0_157] : memref<1x66x66x3xf32, #tpu.memory_space<vmem>>, vector<1x3x64x3xf32>
    %147 = vector.shape_cast %146 : vector<1x3x64x3xf32> to vector<3x64x3xf32>
    %148 = vector.shape_cast %147 : vector<3x64x3xf32> to vector<192x3xf32>
    %cst_158 = arith.constant dense<0.000000e+00> : vector<192x64xf32>
    %149 = tpu.matmul %148, %9, %cst_158 {dimension_numbers = #tpu.dot_dimension_numbers<[1], [0], [0], [1], [0, 0, 1, 1], [], []>} : vector<192x3xf32>, vector<3x64xf32>, vector<192x64xf32> -> vector<192x64xf32>
    %150 = arith.addf %145, %149 : vector<192x64xf32>
    %c0_159 = arith.constant 0 : index
    %c11_160 = arith.constant 11 : index
    %c1_161 = arith.constant 1 : index
    %c0_162 = arith.constant 0 : index
    %151 = vector.load %arg1[%c0_159, %c11_160, %c1_161, %c0_162] : memref<1x66x66x3xf32, #tpu.memory_space<vmem>>, vector<1x3x64x3xf32>
    %152 = vector.shape_cast %151 : vector<1x3x64x3xf32> to vector<3x64x3xf32>
    %153 = vector.shape_cast %152 : vector<3x64x3xf32> to vector<192x3xf32>
    %cst_163 = arith.constant dense<0.000000e+00> : vector<192x64xf32>
    %154 = tpu.matmul %153, %11, %cst_163 {dimension_numbers = #tpu.dot_dimension_numbers<[1], [0], [0], [1], [0, 0, 1, 1], [], []>} : vector<192x3xf32>, vector<3x64xf32>, vector<192x64xf32> -> vector<192x64xf32>
    %155 = arith.addf %150, %154 : vector<192x64xf32>
    %c0_164 = arith.constant 0 : index
    %c11_165 = arith.constant 11 : index
    %c2_166 = arith.constant 2 : index
    %c0_167 = arith.constant 0 : index
    %156 = vector.load %arg1[%c0_164, %c11_165, %c2_166, %c0_167] : memref<1x66x66x3xf32, #tpu.memory_space<vmem>>, vector<1x3x64x3xf32>
    %157 = vector.shape_cast %156 : vector<1x3x64x3xf32> to vector<3x64x3xf32>
    %158 = vector.shape_cast %157 : vector<3x64x3xf32> to vector<192x3xf32>
    %cst_168 = arith.constant dense<0.000000e+00> : vector<192x64xf32>
    %159 = tpu.matmul %158, %13, %cst_168 {dimension_numbers = #tpu.dot_dimension_numbers<[1], [0], [0], [1], [0, 0, 1, 1], [], []>} : vector<192x3xf32>, vector<3x64xf32>, vector<192x64xf32> -> vector<192x64xf32>
    %160 = arith.addf %155, %159 : vector<192x64xf32>
    %c0_169 = arith.constant 0 : index
    %c12 = arith.constant 12 : index
    %c0_170 = arith.constant 0 : index
    %c0_171 = arith.constant 0 : index
    %161 = vector.load %arg1[%c0_169, %c12, %c0_170, %c0_171] : memref<1x66x66x3xf32, #tpu.memory_space<vmem>>, vector<1x3x64x3xf32>
    %162 = vector.shape_cast %161 : vector<1x3x64x3xf32> to vector<3x64x3xf32>
    %163 = vector.shape_cast %162 : vector<3x64x3xf32> to vector<192x3xf32>
    %cst_172 = arith.constant dense<0.000000e+00> : vector<192x64xf32>
    %164 = tpu.matmul %163, %15, %cst_172 {dimension_numbers = #tpu.dot_dimension_numbers<[1], [0], [0], [1], [0, 0, 1, 1], [], []>} : vector<192x3xf32>, vector<3x64xf32>, vector<192x64xf32> -> vector<192x64xf32>
    %165 = arith.addf %160, %164 : vector<192x64xf32>
    %c0_173 = arith.constant 0 : index
    %c12_174 = arith.constant 12 : index
    %c1_175 = arith.constant 1 : index
    %c0_176 = arith.constant 0 : index
    %166 = vector.load %arg1[%c0_173, %c12_174, %c1_175, %c0_176] : memref<1x66x66x3xf32, #tpu.memory_space<vmem>>, vector<1x3x64x3xf32>
    %167 = vector.shape_cast %166 : vector<1x3x64x3xf32> to vector<3x64x3xf32>
    %168 = vector.shape_cast %167 : vector<3x64x3xf32> to vector<192x3xf32>
    %cst_177 = arith.constant dense<0.000000e+00> : vector<192x64xf32>
    %169 = tpu.matmul %168, %17, %cst_177 {dimension_numbers = #tpu.dot_dimension_numbers<[1], [0], [0], [1], [0, 0, 1, 1], [], []>} : vector<192x3xf32>, vector<3x64xf32>, vector<192x64xf32> -> vector<192x64xf32>
    %170 = arith.addf %165, %169 : vector<192x64xf32>
    %c0_178 = arith.constant 0 : index
    %c12_179 = arith.constant 12 : index
    %c2_180 = arith.constant 2 : index
    %c0_181 = arith.constant 0 : index
    %171 = vector.load %arg1[%c0_178, %c12_179, %c2_180, %c0_181] : memref<1x66x66x3xf32, #tpu.memory_space<vmem>>, vector<1x3x64x3xf32>
    %172 = vector.shape_cast %171 : vector<1x3x64x3xf32> to vector<3x64x3xf32>
    %173 = vector.shape_cast %172 : vector<3x64x3xf32> to vector<192x3xf32>
    %cst_182 = arith.constant dense<0.000000e+00> : vector<192x64xf32>
    %174 = tpu.matmul %173, %19, %cst_182 {dimension_numbers = #tpu.dot_dimension_numbers<[1], [0], [0], [1], [0, 0, 1, 1], [], []>} : vector<192x3xf32>, vector<3x64xf32>, vector<192x64xf32> -> vector<192x64xf32>
    %175 = arith.addf %170, %174 : vector<192x64xf32>
    %176 = vector.broadcast %0 : vector<1x64xf32> to vector<192x64xf32>
    %177 = arith.addf %175, %176 : vector<192x64xf32>
    %178 = vector.shape_cast %177 : vector<192x64xf32> to vector<3x64x64xf32>
    %c0_183 = arith.constant 0 : index
    %c0_184 = arith.constant 0 : index
    %c0_185 = arith.constant 0 : index
    %179 = vector.load %arg7[%c0_183, %c0_184, %c0_185] : memref<3x64x64xf32, #tpu.memory_space<vmem>>, vector<3x64x64xf32>
    tpu.vector_store %arg7[%c0_183, %c0_184, %c0_185], %178 {strides = array<i32>} : memref<3x64x64xf32, #tpu.memory_space<vmem>>, vector<3x64x64xf32>,
    %cst_186 = arith.constant 0.000000e+00 : f32
    %180 = vector.broadcast %cst_186 : f32 to vector<7x2xf32>
    %c0_187 = arith.constant 0 : index
    %c0_188 = arith.constant 0 : index
    %c0_189 = arith.constant 0 : index
    %181 = tpu.strided_load %arg7[%c0_187, %c0_188, %c0_189] {strides = array<i32: 1, 10, 1>} : memref<3x64x64xf32, #tpu.memory_space<vmem>>, vector<3x7x64xf32>
    %182 = vector.extract_strided_slice %181 {offsets = [0, 0, 0], sizes = [1, 7, 64], strides = [1, 1, 1]} : vector<3x7x64xf32> to vector<1x7x64xf32>
    %183 = vector.shape_cast %182 : vector<1x7x64xf32> to vector<7x64xf32>
    %cst_190 = arith.constant dense<0.000000e+00> : vector<7x2xf32>
    %184 = tpu.matmul %183, %21, %cst_190 {dimension_numbers = #tpu.dot_dimension_numbers<[1], [0], [0], [1], [0, 0, 1, 1], [], []>} : vector<7x64xf32>, vector<64x2xf32>, vector<7x2xf32> -> vector<7x2xf32>
    %185 = arith.addf %180, %184 : vector<7x2xf32>
    %186 = vector.extract_strided_slice %181 {offsets = [1, 0, 0], sizes = [1, 7, 64], strides = [1, 1, 1]} : vector<3x7x64xf32> to vector<1x7x64xf32>
    %187 = vector.shape_cast %186 : vector<1x7x64xf32> to vector<7x64xf32>
    %cst_191 = arith.constant dense<0.000000e+00> : vector<7x2xf32>
    %188 = tpu.matmul %187, %27, %cst_191 {dimension_numbers = #tpu.dot_dimension_numbers<[1], [0], [0], [1], [0, 0, 1, 1], [], []>} : vector<7x64xf32>, vector<64x2xf32>, vector<7x2xf32> -> vector<7x2xf32>
    %189 = arith.addf %185, %188 : vector<7x2xf32>
    %190 = vector.extract_strided_slice %181 {offsets = [2, 0, 0], sizes = [1, 7, 64], strides = [1, 1, 1]} : vector<3x7x64xf32> to vector<1x7x64xf32>
    %191 = vector.shape_cast %190 : vector<1x7x64xf32> to vector<7x64xf32>
    %cst_192 = arith.constant dense<0.000000e+00> : vector<7x2xf32>
    %192 = tpu.matmul %191, %33, %cst_192 {dimension_numbers = #tpu.dot_dimension_numbers<[1], [0], [0], [1], [0, 0, 1, 1], [], []>} : vector<7x64xf32>, vector<64x2xf32>, vector<7x2xf32> -> vector<7x2xf32>
    %193 = arith.addf %189, %192 : vector<7x2xf32>
    %c0_193 = arith.constant 0 : index
    %c1_194 = arith.constant 1 : index
    %c0_195 = arith.constant 0 : index
    %194 = tpu.strided_load %arg7[%c0_193, %c1_194, %c0_195] {strides = array<i32: 1, 10, 1>} : memref<3x64x64xf32, #tpu.memory_space<vmem>>, vector<3x7x64xf32>
    %195 = vector.extract_strided_slice %194 {offsets = [0, 0, 0], sizes = [1, 7, 64], strides = [1, 1, 1]} : vector<3x7x64xf32> to vector<1x7x64xf32>
    %196 = vector.shape_cast %195 : vector<1x7x64xf32> to vector<7x64xf32>
    %cst_196 = arith.constant dense<0.000000e+00> : vector<7x2xf32>
    %197 = tpu.matmul %196, %23, %cst_196 {dimension_numbers = #tpu.dot_dimension_numbers<[1], [0], [0], [1], [0, 0, 1, 1], [], []>} : vector<7x64xf32>, vector<64x2xf32>, vector<7x2xf32> -> vector<7x2xf32>
    %198 = arith.addf %193, %197 : vector<7x2xf32>
    %199 = vector.extract_strided_slice %194 {offsets = [1, 0, 0], sizes = [1, 7, 64], strides = [1, 1, 1]} : vector<3x7x64xf32> to vector<1x7x64xf32>
    %200 = vector.shape_cast %199 : vector<1x7x64xf32> to vector<7x64xf32>
    %cst_197 = arith.constant dense<0.000000e+00> : vector<7x2xf32>
    %201 = tpu.matmul %200, %29, %cst_197 {dimension_numbers = #tpu.dot_dimension_numbers<[1], [0], [0], [1], [0, 0, 1, 1], [], []>} : vector<7x64xf32>, vector<64x2xf32>, vector<7x2xf32> -> vector<7x2xf32>
    %202 = arith.addf %198, %201 : vector<7x2xf32>
    %203 = vector.extract_strided_slice %194 {offsets = [2, 0, 0], sizes = [1, 7, 64], strides = [1, 1, 1]} : vector<3x7x64xf32> to vector<1x7x64xf32>
    %204 = vector.shape_cast %203 : vector<1x7x64xf32> to vector<7x64xf32>
    %cst_198 = arith.constant dense<0.000000e+00> : vector<7x2xf32>
    %205 = tpu.matmul %204, %35, %cst_198 {dimension_numbers = #tpu.dot_dimension_numbers<[1], [0], [0], [1], [0, 0, 1, 1], [], []>} : vector<7x64xf32>, vector<64x2xf32>, vector<7x2xf32> -> vector<7x2xf32>
    %206 = arith.addf %202, %205 : vector<7x2xf32>
    %c0_199 = arith.constant 0 : index
    %c2_200 = arith.constant 2 : index
    %c0_201 = arith.constant 0 : index
    %207 = tpu.strided_load %arg7[%c0_199, %c2_200, %c0_201] {strides = array<i32: 1, 10, 1>} : memref<3x64x64xf32, #tpu.memory_space<vmem>>, vector<3x7x64xf32>
    %208 = vector.extract_strided_slice %207 {offsets = [0, 0, 0], sizes = [1, 7, 64], strides = [1, 1, 1]} : vector<3x7x64xf32> to vector<1x7x64xf32>
    %209 = vector.shape_cast %208 : vector<1x7x64xf32> to vector<7x64xf32>
    %cst_202 = arith.constant dense<0.000000e+00> : vector<7x2xf32>
    %210 = tpu.matmul %209, %25, %cst_202 {dimension_numbers = #tpu.dot_dimension_numbers<[1], [0], [0], [1], [0, 0, 1, 1], [], []>} : vector<7x64xf32>, vector<64x2xf32>, vector<7x2xf32> -> vector<7x2xf32>
    %211 = arith.addf %206, %210 : vector<7x2xf32>
    %212 = vector.extract_strided_slice %207 {offsets = [1, 0, 0], sizes = [1, 7, 64], strides = [1, 1, 1]} : vector<3x7x64xf32> to vector<1x7x64xf32>
    %213 = vector.shape_cast %212 : vector<1x7x64xf32> to vector<7x64xf32>
    %cst_203 = arith.constant dense<0.000000e+00> : vector<7x2xf32>
    %214 = tpu.matmul %213, %31, %cst_203 {dimension_numbers = #tpu.dot_dimension_numbers<[1], [0], [0], [1], [0, 0, 1, 1], [], []>} : vector<7x64xf32>, vector<64x2xf32>, vector<7x2xf32> -> vector<7x2xf32>
    %215 = arith.addf %211, %214 : vector<7x2xf32>
    %216 = vector.extract_strided_slice %207 {offsets = [2, 0, 0], sizes = [1, 7, 64], strides = [1, 1, 1]} : vector<3x7x64xf32> to vector<1x7x64xf32>
    %217 = vector.shape_cast %216 : vector<1x7x64xf32> to vector<7x64xf32>
    %cst_204 = arith.constant dense<0.000000e+00> : vector<7x2xf32>
    %218 = tpu.matmul %217, %37, %cst_204 {dimension_numbers = #tpu.dot_dimension_numbers<[1], [0], [0], [1], [0, 0, 1, 1], [], []>} : vector<7x64xf32>, vector<64x2xf32>, vector<7x2xf32> -> vector<7x2xf32>
    %219 = arith.addf %215, %218 : vector<7x2xf32>
    %220 = vector.broadcast %1 : vector<1x2xf32> to vector<7x2xf32>
    %221 = arith.addf %219, %220 : vector<7x2xf32>
    %cst_205 = arith.constant 0.000000e+00 : f32
    %222 = vector.broadcast %cst_205 : f32 to vector<192x64xf32>
    %c0_206 = arith.constant 0 : index
    %c20 = arith.constant 20 : index
    %c0_207 = arith.constant 0 : index
    %c0_208 = arith.constant 0 : index
    %223 = vector.load %arg1[%c0_206, %c20, %c0_207, %c0_208] : memref<1x66x66x3xf32, #tpu.memory_space<vmem>>, vector<1x3x64x3xf32>
    %224 = vector.shape_cast %223 : vector<1x3x64x3xf32> to vector<3x64x3xf32>
    %225 = vector.shape_cast %224 : vector<3x64x3xf32> to vector<192x3xf32>
    %cst_209 = arith.constant dense<0.000000e+00> : vector<192x64xf32>
    %226 = tpu.matmul %225, %3, %cst_209 {dimension_numbers = #tpu.dot_dimension_numbers<[1], [0], [0], [1], [0, 0, 1, 1], [], []>} : vector<192x3xf32>, vector<3x64xf32>, vector<192x64xf32> -> vector<192x64xf32>
    %227 = arith.addf %222, %226 : vector<192x64xf32>
    %c0_210 = arith.constant 0 : index
    %c20_211 = arith.constant 20 : index
    %c1_212 = arith.constant 1 : index
    %c0_213 = arith.constant 0 : index
    %228 = vector.load %arg1[%c0_210, %c20_211, %c1_212, %c0_213] : memref<1x66x66x3xf32, #tpu.memory_space<vmem>>, vector<1x3x64x3xf32>
    %229 = vector.shape_cast %228 : vector<1x3x64x3xf32> to vector<3x64x3xf32>
    %230 = vector.shape_cast %229 : vector<3x64x3xf32> to vector<192x3xf32>
    %cst_214 = arith.constant dense<0.000000e+00> : vector<192x64xf32>
    %231 = tpu.matmul %230, %5, %cst_214 {dimension_numbers = #tpu.dot_dimension_numbers<[1], [0], [0], [1], [0, 0, 1, 1], [], []>} : vector<192x3xf32>, vector<3x64xf32>, vector<192x64xf32> -> vector<192x64xf32>
    %232 = arith.addf %227, %231 : vector<192x64xf32>
    %c0_215 = arith.constant 0 : index
    %c20_216 = arith.constant 20 : index
    %c2_217 = arith.constant 2 : index
    %c0_218 = arith.constant 0 : index
    %233 = vector.load %arg1[%c0_215, %c20_216, %c2_217, %c0_218] : memref<1x66x66x3xf32, #tpu.memory_space<vmem>>, vector<1x3x64x3xf32>
    %234 = vector.shape_cast %233 : vector<1x3x64x3xf32> to vector<3x64x3xf32>
    %235 = vector.shape_cast %234 : vector<3x64x3xf32> to vector<192x3xf32>
    %cst_219 = arith.constant dense<0.000000e+00> : vector<192x64xf32>
    %236 = tpu.matmul %235, %7, %cst_219 {dimension_numbers = #tpu.dot_dimension_numbers<[1], [0], [0], [1], [0, 0, 1, 1], [], []>} : vector<192x3xf32>, vector<3x64xf32>, vector<192x64xf32> -> vector<192x64xf32>
    %237 = arith.addf %232, %236 : vector<192x64xf32>
    %c0_220 = arith.constant 0 : index
    %c21 = arith.constant 21 : index
    %c0_221 = arith.constant 0 : index
    %c0_222 = arith.constant 0 : index
    %238 = vector.load %arg1[%c0_220, %c21, %c0_221, %c0_222] : memref<1x66x66x3xf32, #tpu.memory_space<vmem>>, vector<1x3x64x3xf32>
    %239 = vector.shape_cast %238 : vector<1x3x64x3xf32> to vector<3x64x3xf32>
    %240 = vector.shape_cast %239 : vector<3x64x3xf32> to vector<192x3xf32>
    %cst_223 = arith.constant dense<0.000000e+00> : vector<192x64xf32>
    %241 = tpu.matmul %240, %9, %cst_223 {dimension_numbers = #tpu.dot_dimension_numbers<[1], [0], [0], [1], [0, 0, 1, 1], [], []>} : vector<192x3xf32>, vector<3x64xf32>, vector<192x64xf32> -> vector<192x64xf32>
    %242 = arith.addf %237, %241 : vector<192x64xf32>
    %c0_224 = arith.constant 0 : index
    %c21_225 = arith.constant 21 : index
    %c1_226 = arith.constant 1 : index
    %c0_227 = arith.constant 0 : index
    %243 = vector.load %arg1[%c0_224, %c21_225, %c1_226, %c0_227] : memref<1x66x66x3xf32, #tpu.memory_space<vmem>>, vector<1x3x64x3xf32>
    %244 = vector.shape_cast %243 : vector<1x3x64x3xf32> to vector<3x64x3xf32>
    %245 = vector.shape_cast %244 : vector<3x64x3xf32> to vector<192x3xf32>
    %cst_228 = arith.constant dense<0.000000e+00> : vector<192x64xf32>
    %246 = tpu.matmul %245, %11, %cst_228 {dimension_numbers = #tpu.dot_dimension_numbers<[1], [0], [0], [1], [0, 0, 1, 1], [], []>} : vector<192x3xf32>, vector<3x64xf32>, vector<192x64xf32> -> vector<192x64xf32>
    %247 = arith.addf %242, %246 : vector<192x64xf32>
    %c0_229 = arith.constant 0 : index
    %c21_230 = arith.constant 21 : index
    %c2_231 = arith.constant 2 : index
    %c0_232 = arith.constant 0 : index
    %248 = vector.load %arg1[%c0_229, %c21_230, %c2_231, %c0_232] : memref<1x66x66x3xf32, #tpu.memory_space<vmem>>, vector<1x3x64x3xf32>
    %249 = vector.shape_cast %248 : vector<1x3x64x3xf32> to vector<3x64x3xf32>
    %250 = vector.shape_cast %249 : vector<3x64x3xf32> to vector<192x3xf32>
    %cst_233 = arith.constant dense<0.000000e+00> : vector<192x64xf32>
    %251 = tpu.matmul %250, %13, %cst_233 {dimension_numbers = #tpu.dot_dimension_numbers<[1], [0], [0], [1], [0, 0, 1, 1], [], []>} : vector<192x3xf32>, vector<3x64xf32>, vector<192x64xf32> -> vector<192x64xf32>
    %252 = arith.addf %247, %251 : vector<192x64xf32>
    %c0_234 = arith.constant 0 : index
    %c22 = arith.constant 22 : index
    %c0_235 = arith.constant 0 : index
    %c0_236 = arith.constant 0 : index
    %253 = vector.load %arg1[%c0_234, %c22, %c0_235, %c0_236] : memref<1x66x66x3xf32, #tpu.memory_space<vmem>>, vector<1x3x64x3xf32>
    %254 = vector.shape_cast %253 : vector<1x3x64x3xf32> to vector<3x64x3xf32>
    %255 = vector.shape_cast %254 : vector<3x64x3xf32> to vector<192x3xf32>
    %cst_237 = arith.constant dense<0.000000e+00> : vector<192x64xf32>
    %256 = tpu.matmul %255, %15, %cst_237 {dimension_numbers = #tpu.dot_dimension_numbers<[1], [0], [0], [1], [0, 0, 1, 1], [], []>} : vector<192x3xf32>, vector<3x64xf32>, vector<192x64xf32> -> vector<192x64xf32>
    %257 = arith.addf %252, %256 : vector<192x64xf32>
    %c0_238 = arith.constant 0 : index
    %c22_239 = arith.constant 22 : index
    %c1_240 = arith.constant 1 : index
    %c0_241 = arith.constant 0 : index
    %258 = vector.load %arg1[%c0_238, %c22_239, %c1_240, %c0_241] : memref<1x66x66x3xf32, #tpu.memory_space<vmem>>, vector<1x3x64x3xf32>
    %259 = vector.shape_cast %258 : vector<1x3x64x3xf32> to vector<3x64x3xf32>
    %260 = vector.shape_cast %259 : vector<3x64x3xf32> to vector<192x3xf32>
    %cst_242 = arith.constant dense<0.000000e+00> : vector<192x64xf32>
    %261 = tpu.matmul %260, %17, %cst_242 {dimension_numbers = #tpu.dot_dimension_numbers<[1], [0], [0], [1], [0, 0, 1, 1], [], []>} : vector<192x3xf32>, vector<3x64xf32>, vector<192x64xf32> -> vector<192x64xf32>
    %262 = arith.addf %257, %261 : vector<192x64xf32>
    %c0_243 = arith.constant 0 : index
    %c22_244 = arith.constant 22 : index
    %c2_245 = arith.constant 2 : index
    %c0_246 = arith.constant 0 : index
    %263 = vector.load %arg1[%c0_243, %c22_244, %c2_245, %c0_246] : memref<1x66x66x3xf32, #tpu.memory_space<vmem>>, vector<1x3x64x3xf32>
    %264 = vector.shape_cast %263 : vector<1x3x64x3xf32> to vector<3x64x3xf32>
    %265 = vector.shape_cast %264 : vector<3x64x3xf32> to vector<192x3xf32>
    %cst_247 = arith.constant dense<0.000000e+00> : vector<192x64xf32>
    %266 = tpu.matmul %265, %19, %cst_247 {dimension_numbers = #tpu.dot_dimension_numbers<[1], [0], [0], [1], [0, 0, 1, 1], [], []>} : vector<192x3xf32>, vector<3x64xf32>, vector<192x64xf32> -> vector<192x64xf32>
    %267 = arith.addf %262, %266 : vector<192x64xf32>
    %268 = vector.broadcast %0 : vector<1x64xf32> to vector<192x64xf32>
    %269 = arith.addf %267, %268 : vector<192x64xf32>
    %270 = vector.shape_cast %269 : vector<192x64xf32> to vector<3x64x64xf32>
    %c0_248 = arith.constant 0 : index
    %c0_249 = arith.constant 0 : index
    %c0_250 = arith.constant 0 : index
    %271 = vector.load %arg7[%c0_248, %c0_249, %c0_250] : memref<3x64x64xf32, #tpu.memory_space<vmem>>, vector<3x64x64xf32>
    tpu.vector_store %arg7[%c0_248, %c0_249, %c0_250], %270 {strides = array<i32>} : memref<3x64x64xf32, #tpu.memory_space<vmem>>, vector<3x64x64xf32>,
    %cst_251 = arith.constant 0.000000e+00 : f32
    %272 = vector.broadcast %cst_251 : f32 to vector<7x2xf32>
    %c0_252 = arith.constant 0 : index
    %c0_253 = arith.constant 0 : index
    %c0_254 = arith.constant 0 : index
    %273 = tpu.strided_load %arg7[%c0_252, %c0_253, %c0_254] {strides = array<i32: 1, 10, 1>} : memref<3x64x64xf32, #tpu.memory_space<vmem>>, vector<3x7x64xf32>
    %274 = vector.extract_strided_slice %273 {offsets = [0, 0, 0], sizes = [1, 7, 64], strides = [1, 1, 1]} : vector<3x7x64xf32> to vector<1x7x64xf32>
    %275 = vector.shape_cast %274 : vector<1x7x64xf32> to vector<7x64xf32>
    %cst_255 = arith.constant dense<0.000000e+00> : vector<7x2xf32>
    %276 = tpu.matmul %275, %21, %cst_255 {dimension_numbers = #tpu.dot_dimension_numbers<[1], [0], [0], [1], [0, 0, 1, 1], [], []>} : vector<7x64xf32>, vector<64x2xf32>, vector<7x2xf32> -> vector<7x2xf32>
    %277 = arith.addf %272, %276 : vector<7x2xf32>
    %278 = vector.extract_strided_slice %273 {offsets = [1, 0, 0], sizes = [1, 7, 64], strides = [1, 1, 1]} : vector<3x7x64xf32> to vector<1x7x64xf32>
    %279 = vector.shape_cast %278 : vector<1x7x64xf32> to vector<7x64xf32>
    %cst_256 = arith.constant dense<0.000000e+00> : vector<7x2xf32>
    %280 = tpu.matmul %279, %27, %cst_256 {dimension_numbers = #tpu.dot_dimension_numbers<[1], [0], [0], [1], [0, 0, 1, 1], [], []>} : vector<7x64xf32>, vector<64x2xf32>, vector<7x2xf32> -> vector<7x2xf32>
    %281 = arith.addf %277, %280 : vector<7x2xf32>
    %282 = vector.extract_strided_slice %273 {offsets = [2, 0, 0], sizes = [1, 7, 64], strides = [1, 1, 1]} : vector<3x7x64xf32> to vector<1x7x64xf32>
    %283 = vector.shape_cast %282 : vector<1x7x64xf32> to vector<7x64xf32>
    %cst_257 = arith.constant dense<0.000000e+00> : vector<7x2xf32>
    %284 = tpu.matmul %283, %33, %cst_257 {dimension_numbers = #tpu.dot_dimension_numbers<[1], [0], [0], [1], [0, 0, 1, 1], [], []>} : vector<7x64xf32>, vector<64x2xf32>, vector<7x2xf32> -> vector<7x2xf32>
    %285 = arith.addf %281, %284 : vector<7x2xf32>
    %c0_258 = arith.constant 0 : index
    %c1_259 = arith.constant 1 : index
    %c0_260 = arith.constant 0 : index
    %286 = tpu.strided_load %arg7[%c0_258, %c1_259, %c0_260] {strides = array<i32: 1, 10, 1>} : memref<3x64x64xf32, #tpu.memory_space<vmem>>, vector<3x7x64xf32>
    %287 = vector.extract_strided_slice %286 {offsets = [0, 0, 0], sizes = [1, 7, 64], strides = [1, 1, 1]} : vector<3x7x64xf32> to vector<1x7x64xf32>
    %288 = vector.shape_cast %287 : vector<1x7x64xf32> to vector<7x64xf32>
    %cst_261 = arith.constant dense<0.000000e+00> : vector<7x2xf32>
    %289 = tpu.matmul %288, %23, %cst_261 {dimension_numbers = #tpu.dot_dimension_numbers<[1], [0], [0], [1], [0, 0, 1, 1], [], []>} : vector<7x64xf32>, vector<64x2xf32>, vector<7x2xf32> -> vector<7x2xf32>
    %290 = arith.addf %285, %289 : vector<7x2xf32>
    %291 = vector.extract_strided_slice %286 {offsets = [1, 0, 0], sizes = [1, 7, 64], strides = [1, 1, 1]} : vector<3x7x64xf32> to vector<1x7x64xf32>
    %292 = vector.shape_cast %291 : vector<1x7x64xf32> to vector<7x64xf32>
    %cst_262 = arith.constant dense<0.000000e+00> : vector<7x2xf32>
    %293 = tpu.matmul %292, %29, %cst_262 {dimension_numbers = #tpu.dot_dimension_numbers<[1], [0], [0], [1], [0, 0, 1, 1], [], []>} : vector<7x64xf32>, vector<64x2xf32>, vector<7x2xf32> -> vector<7x2xf32>
    %294 = arith.addf %290, %293 : vector<7x2xf32>
    %295 = vector.extract_strided_slice %286 {offsets = [2, 0, 0], sizes = [1, 7, 64], strides = [1, 1, 1]} : vector<3x7x64xf32> to vector<1x7x64xf32>
    %296 = vector.shape_cast %295 : vector<1x7x64xf32> to vector<7x64xf32>
    %cst_263 = arith.constant dense<0.000000e+00> : vector<7x2xf32>
    %297 = tpu.matmul %296, %35, %cst_263 {dimension_numbers = #tpu.dot_dimension_numbers<[1], [0], [0], [1], [0, 0, 1, 1], [], []>} : vector<7x64xf32>, vector<64x2xf32>, vector<7x2xf32> -> vector<7x2xf32>
    %298 = arith.addf %294, %297 : vector<7x2xf32>
    %c0_264 = arith.constant 0 : index
    %c2_265 = arith.constant 2 : index
    %c0_266 = arith.constant 0 : index
    %299 = tpu.strided_load %arg7[%c0_264, %c2_265, %c0_266] {strides = array<i32: 1, 10, 1>} : memref<3x64x64xf32, #tpu.memory_space<vmem>>, vector<3x7x64xf32>
    %300 = vector.extract_strided_slice %299 {offsets = [0, 0, 0], sizes = [1, 7, 64], strides = [1, 1, 1]} : vector<3x7x64xf32> to vector<1x7x64xf32>
    %301 = vector.shape_cast %300 : vector<1x7x64xf32> to vector<7x64xf32>
    %cst_267 = arith.constant dense<0.000000e+00> : vector<7x2xf32>
    %302 = tpu.matmul %301, %25, %cst_267 {dimension_numbers = #tpu.dot_dimension_numbers<[1], [0], [0], [1], [0, 0, 1, 1], [], []>} : vector<7x64xf32>, vector<64x2xf32>, vector<7x2xf32> -> vector<7x2xf32>
    %303 = arith.addf %298, %302 : vector<7x2xf32>
    %304 = vector.extract_strided_slice %299 {offsets = [1, 0, 0], sizes = [1, 7, 64], strides = [1, 1, 1]} : vector<3x7x64xf32> to vector<1x7x64xf32>
    %305 = vector.shape_cast %304 : vector<1x7x64xf32> to vector<7x64xf32>
    %cst_268 = arith.constant dense<0.000000e+00> : vector<7x2xf32>
    %306 = tpu.matmul %305, %31, %cst_268 {dimension_numbers = #tpu.dot_dimension_numbers<[1], [0], [0], [1], [0, 0, 1, 1], [], []>} : vector<7x64xf32>, vector<64x2xf32>, vector<7x2xf32> -> vector<7x2xf32>
    %307 = arith.addf %303, %306 : vector<7x2xf32>
    %308 = vector.extract_strided_slice %299 {offsets = [2, 0, 0], sizes = [1, 7, 64], strides = [1, 1, 1]} : vector<3x7x64xf32> to vector<1x7x64xf32>
    %309 = vector.shape_cast %308 : vector<1x7x64xf32> to vector<7x64xf32>
    %cst_269 = arith.constant dense<0.000000e+00> : vector<7x2xf32>
    %310 = tpu.matmul %309, %37, %cst_269 {dimension_numbers = #tpu.dot_dimension_numbers<[1], [0], [0], [1], [0, 0, 1, 1], [], []>} : vector<7x64xf32>, vector<64x2xf32>, vector<7x2xf32> -> vector<7x2xf32>
    %311 = arith.addf %307, %310 : vector<7x2xf32>
    %312 = vector.broadcast %1 : vector<1x2xf32> to vector<7x2xf32>
    %313 = arith.addf %311, %312 : vector<7x2xf32>
    %cst_270 = arith.constant 0.000000e+00 : f32
    %314 = vector.broadcast %cst_270 : f32 to vector<192x64xf32>
    %c0_271 = arith.constant 0 : index
    %c30 = arith.constant 30 : index
    %c0_272 = arith.constant 0 : index
    %c0_273 = arith.constant 0 : index
    %315 = vector.load %arg1[%c0_271, %c30, %c0_272, %c0_273] : memref<1x66x66x3xf32, #tpu.memory_space<vmem>>, vector<1x3x64x3xf32>
    %316 = vector.shape_cast %315 : vector<1x3x64x3xf32> to vector<3x64x3xf32>
    %317 = vector.shape_cast %316 : vector<3x64x3xf32> to vector<192x3xf32>
    %cst_274 = arith.constant dense<0.000000e+00> : vector<192x64xf32>
    %318 = tpu.matmul %317, %3, %cst_274 {dimension_numbers = #tpu.dot_dimension_numbers<[1], [0], [0], [1], [0, 0, 1, 1], [], []>} : vector<192x3xf32>, vector<3x64xf32>, vector<192x64xf32> -> vector<192x64xf32>
    %319 = arith.addf %314, %318 : vector<192x64xf32>
    %c0_275 = arith.constant 0 : index
    %c30_276 = arith.constant 30 : index
    %c1_277 = arith.constant 1 : index
    %c0_278 = arith.constant 0 : index
    %320 = vector.load %arg1[%c0_275, %c30_276, %c1_277, %c0_278] : memref<1x66x66x3xf32, #tpu.memory_space<vmem>>, vector<1x3x64x3xf32>
    %321 = vector.shape_cast %320 : vector<1x3x64x3xf32> to vector<3x64x3xf32>
    %322 = vector.shape_cast %321 : vector<3x64x3xf32> to vector<192x3xf32>
    %cst_279 = arith.constant dense<0.000000e+00> : vector<192x64xf32>
    %323 = tpu.matmul %322, %5, %cst_279 {dimension_numbers = #tpu.dot_dimension_numbers<[1], [0], [0], [1], [0, 0, 1, 1], [], []>} : vector<192x3xf32>, vector<3x64xf32>, vector<192x64xf32> -> vector<192x64xf32>
    %324 = arith.addf %319, %323 : vector<192x64xf32>
    %c0_280 = arith.constant 0 : index
    %c30_281 = arith.constant 30 : index
    %c2_282 = arith.constant 2 : index
    %c0_283 = arith.constant 0 : index
    %325 = vector.load %arg1[%c0_280, %c30_281, %c2_282, %c0_283] : memref<1x66x66x3xf32, #tpu.memory_space<vmem>>, vector<1x3x64x3xf32>
    %326 = vector.shape_cast %325 : vector<1x3x64x3xf32> to vector<3x64x3xf32>
    %327 = vector.shape_cast %326 : vector<3x64x3xf32> to vector<192x3xf32>
    %cst_284 = arith.constant dense<0.000000e+00> : vector<192x64xf32>
    %328 = tpu.matmul %327, %7, %cst_284 {dimension_numbers = #tpu.dot_dimension_numbers<[1], [0], [0], [1], [0, 0, 1, 1], [], []>} : vector<192x3xf32>, vector<3x64xf32>, vector<192x64xf32> -> vector<192x64xf32>
    %329 = arith.addf %324, %328 : vector<192x64xf32>
    %c0_285 = arith.constant 0 : index
    %c31 = arith.constant 31 : index
    %c0_286 = arith.constant 0 : index
    %c0_287 = arith.constant 0 : index
    %330 = vector.load %arg1[%c0_285, %c31, %c0_286, %c0_287] : memref<1x66x66x3xf32, #tpu.memory_space<vmem>>, vector<1x3x64x3xf32>
    %331 = vector.shape_cast %330 : vector<1x3x64x3xf32> to vector<3x64x3xf32>
    %332 = vector.shape_cast %331 : vector<3x64x3xf32> to vector<192x3xf32>
    %cst_288 = arith.constant dense<0.000000e+00> : vector<192x64xf32>
    %333 = tpu.matmul %332, %9, %cst_288 {dimension_numbers = #tpu.dot_dimension_numbers<[1], [0], [0], [1], [0, 0, 1, 1], [], []>} : vector<192x3xf32>, vector<3x64xf32>, vector<192x64xf32> -> vector<192x64xf32>
    %334 = arith.addf %329, %333 : vector<192x64xf32>
    %c0_289 = arith.constant 0 : index
    %c31_290 = arith.constant 31 : index
    %c1_291 = arith.constant 1 : index
    %c0_292 = arith.constant 0 : index
    %335 = vector.load %arg1[%c0_289, %c31_290, %c1_291, %c0_292] : memref<1x66x66x3xf32, #tpu.memory_space<vmem>>, vector<1x3x64x3xf32>
    %336 = vector.shape_cast %335 : vector<1x3x64x3xf32> to vector<3x64x3xf32>
    %337 = vector.shape_cast %336 : vector<3x64x3xf32> to vector<192x3xf32>
    %cst_293 = arith.constant dense<0.000000e+00> : vector<192x64xf32>
    %338 = tpu.matmul %337, %11, %cst_293 {dimension_numbers = #tpu.dot_dimension_numbers<[1], [0], [0], [1], [0, 0, 1, 1], [], []>} : vector<192x3xf32>, vector<3x64xf32>, vector<192x64xf32> -> vector<192x64xf32>
    %339 = arith.addf %334, %338 : vector<192x64xf32>
    %c0_294 = arith.constant 0 : index
    %c31_295 = arith.constant 31 : index
    %c2_296 = arith.constant 2 : index
    %c0_297 = arith.constant 0 : index
    %340 = vector.load %arg1[%c0_294, %c31_295, %c2_296, %c0_297] : memref<1x66x66x3xf32, #tpu.memory_space<vmem>>, vector<1x3x64x3xf32>
    %341 = vector.shape_cast %340 : vector<1x3x64x3xf32> to vector<3x64x3xf32>
    %342 = vector.shape_cast %341 : vector<3x64x3xf32> to vector<192x3xf32>
    %cst_298 = arith.constant dense<0.000000e+00> : vector<192x64xf32>
    %343 = tpu.matmul %342, %13, %cst_298 {dimension_numbers = #tpu.dot_dimension_numbers<[1], [0], [0], [1], [0, 0, 1, 1], [], []>} : vector<192x3xf32>, vector<3x64xf32>, vector<192x64xf32> -> vector<192x64xf32>
    %344 = arith.addf %339, %343 : vector<192x64xf32>
    %c0_299 = arith.constant 0 : index
    %c32 = arith.constant 32 : index
    %c0_300 = arith.constant 0 : index
    %c0_301 = arith.constant 0 : index
    %345 = vector.load %arg1[%c0_299, %c32, %c0_300, %c0_301] : memref<1x66x66x3xf32, #tpu.memory_space<vmem>>, vector<1x3x64x3xf32>
    %346 = vector.shape_cast %345 : vector<1x3x64x3xf32> to vector<3x64x3xf32>
    %347 = vector.shape_cast %346 : vector<3x64x3xf32> to vector<192x3xf32>
    %cst_302 = arith.constant dense<0.000000e+00> : vector<192x64xf32>
    %348 = tpu.matmul %347, %15, %cst_302 {dimension_numbers = #tpu.dot_dimension_numbers<[1], [0], [0], [1], [0, 0, 1, 1], [], []>} : vector<192x3xf32>, vector<3x64xf32>, vector<192x64xf32> -> vector<192x64xf32>
    %349 = arith.addf %344, %348 : vector<192x64xf32>
    %c0_303 = arith.constant 0 : index
    %c32_304 = arith.constant 32 : index
    %c1_305 = arith.constant 1 : index
    %c0_306 = arith.constant 0 : index
    %350 = vector.load %arg1[%c0_303, %c32_304, %c1_305, %c0_306] : memref<1x66x66x3xf32, #tpu.memory_space<vmem>>, vector<1x3x64x3xf32>
    %351 = vector.shape_cast %350 : vector<1x3x64x3xf32> to vector<3x64x3xf32>
    %352 = vector.shape_cast %351 : vector<3x64x3xf32> to vector<192x3xf32>
    %cst_307 = arith.constant dense<0.000000e+00> : vector<192x64xf32>
    %353 = tpu.matmul %352, %17, %cst_307 {dimension_numbers = #tpu.dot_dimension_numbers<[1], [0], [0], [1], [0, 0, 1, 1], [], []>} : vector<192x3xf32>, vector<3x64xf32>, vector<192x64xf32> -> vector<192x64xf32>
    %354 = arith.addf %349, %353 : vector<192x64xf32>
    %c0_308 = arith.constant 0 : index
    %c32_309 = arith.constant 32 : index
    %c2_310 = arith.constant 2 : index
    %c0_311 = arith.constant 0 : index
    %355 = vector.load %arg1[%c0_308, %c32_309, %c2_310, %c0_311] : memref<1x66x66x3xf32, #tpu.memory_space<vmem>>, vector<1x3x64x3xf32>
    %356 = vector.shape_cast %355 : vector<1x3x64x3xf32> to vector<3x64x3xf32>
    %357 = vector.shape_cast %356 : vector<3x64x3xf32> to vector<192x3xf32>
    %cst_312 = arith.constant dense<0.000000e+00> : vector<192x64xf32>
    %358 = tpu.matmul %357, %19, %cst_312 {dimension_numbers = #tpu.dot_dimension_numbers<[1], [0], [0], [1], [0, 0, 1, 1], [], []>} : vector<192x3xf32>, vector<3x64xf32>, vector<192x64xf32> -> vector<192x64xf32>
    %359 = arith.addf %354, %358 : vector<192x64xf32>
    %360 = vector.broadcast %0 : vector<1x64xf32> to vector<192x64xf32>
    %361 = arith.addf %359, %360 : vector<192x64xf32>
    %362 = vector.shape_cast %361 : vector<192x64xf32> to vector<3x64x64xf32>
    %c0_313 = arith.constant 0 : index
    %c0_314 = arith.constant 0 : index
    %c0_315 = arith.constant 0 : index
    %363 = vector.load %arg7[%c0_313, %c0_314, %c0_315] : memref<3x64x64xf32, #tpu.memory_space<vmem>>, vector<3x64x64xf32>
    tpu.vector_store %arg7[%c0_313, %c0_314, %c0_315], %362 {strides = array<i32>} : memref<3x64x64xf32, #tpu.memory_space<vmem>>, vector<3x64x64xf32>,
    %cst_316 = arith.constant 0.000000e+00 : f32
    %364 = vector.broadcast %cst_316 : f32 to vector<7x2xf32>
    %c0_317 = arith.constant 0 : index
    %c0_318 = arith.constant 0 : index
    %c0_319 = arith.constant 0 : index
    %365 = tpu.strided_load %arg7[%c0_317, %c0_318, %c0_319] {strides = array<i32: 1, 10, 1>} : memref<3x64x64xf32, #tpu.memory_space<vmem>>, vector<3x7x64xf32>
    %366 = vector.extract_strided_slice %365 {offsets = [0, 0, 0], sizes = [1, 7, 64], strides = [1, 1, 1]} : vector<3x7x64xf32> to vector<1x7x64xf32>
    %367 = vector.shape_cast %366 : vector<1x7x64xf32> to vector<7x64xf32>
    %cst_320 = arith.constant dense<0.000000e+00> : vector<7x2xf32>
    %368 = tpu.matmul %367, %21, %cst_320 {dimension_numbers = #tpu.dot_dimension_numbers<[1], [0], [0], [1], [0, 0, 1, 1], [], []>} : vector<7x64xf32>, vector<64x2xf32>, vector<7x2xf32> -> vector<7x2xf32>
    %369 = arith.addf %364, %368 : vector<7x2xf32>
    %370 = vector.extract_strided_slice %365 {offsets = [1, 0, 0], sizes = [1, 7, 64], strides = [1, 1, 1]} : vector<3x7x64xf32> to vector<1x7x64xf32>
    %371 = vector.shape_cast %370 : vector<1x7x64xf32> to vector<7x64xf32>
    %cst_321 = arith.constant dense<0.000000e+00> : vector<7x2xf32>
    %372 = tpu.matmul %371, %27, %cst_321 {dimension_numbers = #tpu.dot_dimension_numbers<[1], [0], [0], [1], [0, 0, 1, 1], [], []>} : vector<7x64xf32>, vector<64x2xf32>, vector<7x2xf32> -> vector<7x2xf32>
    %373 = arith.addf %369, %372 : vector<7x2xf32>
    %374 = vector.extract_strided_slice %365 {offsets = [2, 0, 0], sizes = [1, 7, 64], strides = [1, 1, 1]} : vector<3x7x64xf32> to vector<1x7x64xf32>
    %375 = vector.shape_cast %374 : vector<1x7x64xf32> to vector<7x64xf32>
    %cst_322 = arith.constant dense<0.000000e+00> : vector<7x2xf32>
    %376 = tpu.matmul %375, %33, %cst_322 {dimension_numbers = #tpu.dot_dimension_numbers<[1], [0], [0], [1], [0, 0, 1, 1], [], []>} : vector<7x64xf32>, vector<64x2xf32>, vector<7x2xf32> -> vector<7x2xf32>
    %377 = arith.addf %373, %376 : vector<7x2xf32>
    %c0_323 = arith.constant 0 : index
    %c1_324 = arith.constant 1 : index
    %c0_325 = arith.constant 0 : index
    %378 = tpu.strided_load %arg7[%c0_323, %c1_324, %c0_325] {strides = array<i32: 1, 10, 1>} : memref<3x64x64xf32, #tpu.memory_space<vmem>>, vector<3x7x64xf32>
    %379 = vector.extract_strided_slice %378 {offsets = [0, 0, 0], sizes = [1, 7, 64], strides = [1, 1, 1]} : vector<3x7x64xf32> to vector<1x7x64xf32>
    %380 = vector.shape_cast %379 : vector<1x7x64xf32> to vector<7x64xf32>
    %cst_326 = arith.constant dense<0.000000e+00> : vector<7x2xf32>
    %381 = tpu.matmul %380, %23, %cst_326 {dimension_numbers = #tpu.dot_dimension_numbers<[1], [0], [0], [1], [0, 0, 1, 1], [], []>} : vector<7x64xf32>, vector<64x2xf32>, vector<7x2xf32> -> vector<7x2xf32>
    %382 = arith.addf %377, %381 : vector<7x2xf32>
    %383 = vector.extract_strided_slice %378 {offsets = [1, 0, 0], sizes = [1, 7, 64], strides = [1, 1, 1]} : vector<3x7x64xf32> to vector<1x7x64xf32>
    %384 = vector.shape_cast %383 : vector<1x7x64xf32> to vector<7x64xf32>
    %cst_327 = arith.constant dense<0.000000e+00> : vector<7x2xf32>
    %385 = tpu.matmul %384, %29, %cst_327 {dimension_numbers = #tpu.dot_dimension_numbers<[1], [0], [0], [1], [0, 0, 1, 1], [], []>} : vector<7x64xf32>, vector<64x2xf32>, vector<7x2xf32> -> vector<7x2xf32>
    %386 = arith.addf %382, %385 : vector<7x2xf32>
    %387 = vector.extract_strided_slice %378 {offsets = [2, 0, 0], sizes = [1, 7, 64], strides = [1, 1, 1]} : vector<3x7x64xf32> to vector<1x7x64xf32>
    %388 = vector.shape_cast %387 : vector<1x7x64xf32> to vector<7x64xf32>
    %cst_328 = arith.constant dense<0.000000e+00> : vector<7x2xf32>
    %389 = tpu.matmul %388, %35, %cst_328 {dimension_numbers = #tpu.dot_dimension_numbers<[1], [0], [0], [1], [0, 0, 1, 1], [], []>} : vector<7x64xf32>, vector<64x2xf32>, vector<7x2xf32> -> vector<7x2xf32>
    %390 = arith.addf %386, %389 : vector<7x2xf32>
    %c0_329 = arith.constant 0 : index
    %c2_330 = arith.constant 2 : index
    %c0_331 = arith.constant 0 : index
    %391 = tpu.strided_load %arg7[%c0_329, %c2_330, %c0_331] {strides = array<i32: 1, 10, 1>} : memref<3x64x64xf32, #tpu.memory_space<vmem>>, vector<3x7x64xf32>
    %392 = vector.extract_strided_slice %391 {offsets = [0, 0, 0], sizes = [1, 7, 64], strides = [1, 1, 1]} : vector<3x7x64xf32> to vector<1x7x64xf32>
    %393 = vector.shape_cast %392 : vector<1x7x64xf32> to vector<7x64xf32>
    %cst_332 = arith.constant dense<0.000000e+00> : vector<7x2xf32>
    %394 = tpu.matmul %393, %25, %cst_332 {dimension_numbers = #tpu.dot_dimension_numbers<[1], [0], [0], [1], [0, 0, 1, 1], [], []>} : vector<7x64xf32>, vector<64x2xf32>, vector<7x2xf32> -> vector<7x2xf32>
    %395 = arith.addf %390, %394 : vector<7x2xf32>
    %396 = vector.extract_strided_slice %391 {offsets = [1, 0, 0], sizes = [1, 7, 64], strides = [1, 1, 1]} : vector<3x7x64xf32> to vector<1x7x64xf32>
    %397 = vector.shape_cast %396 : vector<1x7x64xf32> to vector<7x64xf32>
    %cst_333 = arith.constant dense<0.000000e+00> : vector<7x2xf32>
    %398 = tpu.matmul %397, %31, %cst_333 {dimension_numbers = #tpu.dot_dimension_numbers<[1], [0], [0], [1], [0, 0, 1, 1], [], []>} : vector<7x64xf32>, vector<64x2xf32>, vector<7x2xf32> -> vector<7x2xf32>
    %399 = arith.addf %395, %398 : vector<7x2xf32>
    %400 = vector.extract_strided_slice %391 {offsets = [2, 0, 0], sizes = [1, 7, 64], strides = [1, 1, 1]} : vector<3x7x64xf32> to vector<1x7x64xf32>
    %401 = vector.shape_cast %400 : vector<1x7x64xf32> to vector<7x64xf32>
    %cst_334 = arith.constant dense<0.000000e+00> : vector<7x2xf32>
    %402 = tpu.matmul %401, %37, %cst_334 {dimension_numbers = #tpu.dot_dimension_numbers<[1], [0], [0], [1], [0, 0, 1, 1], [], []>} : vector<7x64xf32>, vector<64x2xf32>, vector<7x2xf32> -> vector<7x2xf32>
    %403 = arith.addf %399, %402 : vector<7x2xf32>
    %404 = vector.broadcast %1 : vector<1x2xf32> to vector<7x2xf32>
    %405 = arith.addf %403, %404 : vector<7x2xf32>
    %cst_335 = arith.constant 0.000000e+00 : f32
    %406 = vector.broadcast %cst_335 : f32 to vector<192x64xf32>
    %c0_336 = arith.constant 0 : index
    %c40 = arith.constant 40 : index
    %c0_337 = arith.constant 0 : index
    %c0_338 = arith.constant 0 : index
    %407 = vector.load %arg1[%c0_336, %c40, %c0_337, %c0_338] : memref<1x66x66x3xf32, #tpu.memory_space<vmem>>, vector<1x3x64x3xf32>
    %408 = vector.shape_cast %407 : vector<1x3x64x3xf32> to vector<3x64x3xf32>
    %409 = vector.shape_cast %408 : vector<3x64x3xf32> to vector<192x3xf32>
    %cst_339 = arith.constant dense<0.000000e+00> : vector<192x64xf32>
    %410 = tpu.matmul %409, %3, %cst_339 {dimension_numbers = #tpu.dot_dimension_numbers<[1], [0], [0], [1], [0, 0, 1, 1], [], []>} : vector<192x3xf32>, vector<3x64xf32>, vector<192x64xf32> -> vector<192x64xf32>
    %411 = arith.addf %406, %410 : vector<192x64xf32>
    %c0_340 = arith.constant 0 : index
    %c40_341 = arith.constant 40 : index
    %c1_342 = arith.constant 1 : index
    %c0_343 = arith.constant 0 : index
    %412 = vector.load %arg1[%c0_340, %c40_341, %c1_342, %c0_343] : memref<1x66x66x3xf32, #tpu.memory_space<vmem>>, vector<1x3x64x3xf32>
    %413 = vector.shape_cast %412 : vector<1x3x64x3xf32> to vector<3x64x3xf32>
    %414 = vector.shape_cast %413 : vector<3x64x3xf32> to vector<192x3xf32>
    %cst_344 = arith.constant dense<0.000000e+00> : vector<192x64xf32>
    %415 = tpu.matmul %414, %5, %cst_344 {dimension_numbers = #tpu.dot_dimension_numbers<[1], [0], [0], [1], [0, 0, 1, 1], [], []>} : vector<192x3xf32>, vector<3x64xf32>, vector<192x64xf32> -> vector<192x64xf32>
    %416 = arith.addf %411, %415 : vector<192x64xf32>
    %c0_345 = arith.constant 0 : index
    %c40_346 = arith.constant 40 : index
    %c2_347 = arith.constant 2 : index
    %c0_348 = arith.constant 0 : index
    %417 = vector.load %arg1[%c0_345, %c40_346, %c2_347, %c0_348] : memref<1x66x66x3xf32, #tpu.memory_space<vmem>>, vector<1x3x64x3xf32>
    %418 = vector.shape_cast %417 : vector<1x3x64x3xf32> to vector<3x64x3xf32>
    %419 = vector.shape_cast %418 : vector<3x64x3xf32> to vector<192x3xf32>
    %cst_349 = arith.constant dense<0.000000e+00> : vector<192x64xf32>
    %420 = tpu.matmul %419, %7, %cst_349 {dimension_numbers = #tpu.dot_dimension_numbers<[1], [0], [0], [1], [0, 0, 1, 1], [], []>} : vector<192x3xf32>, vector<3x64xf32>, vector<192x64xf32> -> vector<192x64xf32>
    %421 = arith.addf %416, %420 : vector<192x64xf32>
    %c0_350 = arith.constant 0 : index
    %c41 = arith.constant 41 : index
    %c0_351 = arith.constant 0 : index
    %c0_352 = arith.constant 0 : index
    %422 = vector.load %arg1[%c0_350, %c41, %c0_351, %c0_352] : memref<1x66x66x3xf32, #tpu.memory_space<vmem>>, vector<1x3x64x3xf32>
    %423 = vector.shape_cast %422 : vector<1x3x64x3xf32> to vector<3x64x3xf32>
    %424 = vector.shape_cast %423 : vector<3x64x3xf32> to vector<192x3xf32>
    %cst_353 = arith.constant dense<0.000000e+00> : vector<192x64xf32>
    %425 = tpu.matmul %424, %9, %cst_353 {dimension_numbers = #tpu.dot_dimension_numbers<[1], [0], [0], [1], [0, 0, 1, 1], [], []>} : vector<192x3xf32>, vector<3x64xf32>, vector<192x64xf32> -> vector<192x64xf32>
    %426 = arith.addf %421, %425 : vector<192x64xf32>
    %c0_354 = arith.constant 0 : index
    %c41_355 = arith.constant 41 : index
    %c1_356 = arith.constant 1 : index
    %c0_357 = arith.constant 0 : index
    %427 = vector.load %arg1[%c0_354, %c41_355, %c1_356, %c0_357] : memref<1x66x66x3xf32, #tpu.memory_space<vmem>>, vector<1x3x64x3xf32>
    %428 = vector.shape_cast %427 : vector<1x3x64x3xf32> to vector<3x64x3xf32>
    %429 = vector.shape_cast %428 : vector<3x64x3xf32> to vector<192x3xf32>
    %cst_358 = arith.constant dense<0.000000e+00> : vector<192x64xf32>
    %430 = tpu.matmul %429, %11, %cst_358 {dimension_numbers = #tpu.dot_dimension_numbers<[1], [0], [0], [1], [0, 0, 1, 1], [], []>} : vector<192x3xf32>, vector<3x64xf32>, vector<192x64xf32> -> vector<192x64xf32>
    %431 = arith.addf %426, %430 : vector<192x64xf32>
    %c0_359 = arith.constant 0 : index
    %c41_360 = arith.constant 41 : index
    %c2_361 = arith.constant 2 : index
    %c0_362 = arith.constant 0 : index
    %432 = vector.load %arg1[%c0_359, %c41_360, %c2_361, %c0_362] : memref<1x66x66x3xf32, #tpu.memory_space<vmem>>, vector<1x3x64x3xf32>
    %433 = vector.shape_cast %432 : vector<1x3x64x3xf32> to vector<3x64x3xf32>
    %434 = vector.shape_cast %433 : vector<3x64x3xf32> to vector<192x3xf32>
    %cst_363 = arith.constant dense<0.000000e+00> : vector<192x64xf32>
    %435 = tpu.matmul %434, %13, %cst_363 {dimension_numbers = #tpu.dot_dimension_numbers<[1], [0], [0], [1], [0, 0, 1, 1], [], []>} : vector<192x3xf32>, vector<3x64xf32>, vector<192x64xf32> -> vector<192x64xf32>
    %436 = arith.addf %431, %435 : vector<192x64xf32>
    %c0_364 = arith.constant 0 : index
    %c42 = arith.constant 42 : index
    %c0_365 = arith.constant 0 : index
    %c0_366 = arith.constant 0 : index
    %437 = vector.load %arg1[%c0_364, %c42, %c0_365, %c0_366] : memref<1x66x66x3xf32, #tpu.memory_space<vmem>>, vector<1x3x64x3xf32>
    %438 = vector.shape_cast %437 : vector<1x3x64x3xf32> to vector<3x64x3xf32>
    %439 = vector.shape_cast %438 : vector<3x64x3xf32> to vector<192x3xf32>
    %cst_367 = arith.constant dense<0.000000e+00> : vector<192x64xf32>
    %440 = tpu.matmul %439, %15, %cst_367 {dimension_numbers = #tpu.dot_dimension_numbers<[1], [0], [0], [1], [0, 0, 1, 1], [], []>} : vector<192x3xf32>, vector<3x64xf32>, vector<192x64xf32> -> vector<192x64xf32>
    %441 = arith.addf %436, %440 : vector<192x64xf32>
    %c0_368 = arith.constant 0 : index
    %c42_369 = arith.constant 42 : index
    %c1_370 = arith.constant 1 : index
    %c0_371 = arith.constant 0 : index
    %442 = vector.load %arg1[%c0_368, %c42_369, %c1_370, %c0_371] : memref<1x66x66x3xf32, #tpu.memory_space<vmem>>, vector<1x3x64x3xf32>
    %443 = vector.shape_cast %442 : vector<1x3x64x3xf32> to vector<3x64x3xf32>
    %444 = vector.shape_cast %443 : vector<3x64x3xf32> to vector<192x3xf32>
    %cst_372 = arith.constant dense<0.000000e+00> : vector<192x64xf32>
    %445 = tpu.matmul %444, %17, %cst_372 {dimension_numbers = #tpu.dot_dimension_numbers<[1], [0], [0], [1], [0, 0, 1, 1], [], []>} : vector<192x3xf32>, vector<3x64xf32>, vector<192x64xf32> -> vector<192x64xf32>
    %446 = arith.addf %441, %445 : vector<192x64xf32>
    %c0_373 = arith.constant 0 : index
    %c42_374 = arith.constant 42 : index
    %c2_375 = arith.constant 2 : index
    %c0_376 = arith.constant 0 : index
    %447 = vector.load %arg1[%c0_373, %c42_374, %c2_375, %c0_376] : memref<1x66x66x3xf32, #tpu.memory_space<vmem>>, vector<1x3x64x3xf32>
    %448 = vector.shape_cast %447 : vector<1x3x64x3xf32> to vector<3x64x3xf32>
    %449 = vector.shape_cast %448 : vector<3x64x3xf32> to vector<192x3xf32>
    %cst_377 = arith.constant dense<0.000000e+00> : vector<192x64xf32>
    %450 = tpu.matmul %449, %19, %cst_377 {dimension_numbers = #tpu.dot_dimension_numbers<[1], [0], [0], [1], [0, 0, 1, 1], [], []>} : vector<192x3xf32>, vector<3x64xf32>, vector<192x64xf32> -> vector<192x64xf32>
    %451 = arith.addf %446, %450 : vector<192x64xf32>
    %452 = vector.broadcast %0 : vector<1x64xf32> to vector<192x64xf32>
    %453 = arith.addf %451, %452 : vector<192x64xf32>
    %454 = vector.shape_cast %453 : vector<192x64xf32> to vector<3x64x64xf32>
    %c0_378 = arith.constant 0 : index
    %c0_379 = arith.constant 0 : index
    %c0_380 = arith.constant 0 : index
    %455 = vector.load %arg7[%c0_378, %c0_379, %c0_380] : memref<3x64x64xf32, #tpu.memory_space<vmem>>, vector<3x64x64xf32>
    tpu.vector_store %arg7[%c0_378, %c0_379, %c0_380], %454 {strides = array<i32>} : memref<3x64x64xf32, #tpu.memory_space<vmem>>, vector<3x64x64xf32>,
    %cst_381 = arith.constant 0.000000e+00 : f32
    %456 = vector.broadcast %cst_381 : f32 to vector<7x2xf32>
    %c0_382 = arith.constant 0 : index
    %c0_383 = arith.constant 0 : index
    %c0_384 = arith.constant 0 : index
    %457 = tpu.strided_load %arg7[%c0_382, %c0_383, %c0_384] {strides = array<i32: 1, 10, 1>} : memref<3x64x64xf32, #tpu.memory_space<vmem>>, vector<3x7x64xf32>
    %458 = vector.extract_strided_slice %457 {offsets = [0, 0, 0], sizes = [1, 7, 64], strides = [1, 1, 1]} : vector<3x7x64xf32> to vector<1x7x64xf32>
    %459 = vector.shape_cast %458 : vector<1x7x64xf32> to vector<7x64xf32>
    %cst_385 = arith.constant dense<0.000000e+00> : vector<7x2xf32>
    %460 = tpu.matmul %459, %21, %cst_385 {dimension_numbers = #tpu.dot_dimension_numbers<[1], [0], [0], [1], [0, 0, 1, 1], [], []>} : vector<7x64xf32>, vector<64x2xf32>, vector<7x2xf32> -> vector<7x2xf32>
    %461 = arith.addf %456, %460 : vector<7x2xf32>
    %462 = vector.extract_strided_slice %457 {offsets = [1, 0, 0], sizes = [1, 7, 64], strides = [1, 1, 1]} : vector<3x7x64xf32> to vector<1x7x64xf32>
    %463 = vector.shape_cast %462 : vector<1x7x64xf32> to vector<7x64xf32>
    %cst_386 = arith.constant dense<0.000000e+00> : vector<7x2xf32>
    %464 = tpu.matmul %463, %27, %cst_386 {dimension_numbers = #tpu.dot_dimension_numbers<[1], [0], [0], [1], [0, 0, 1, 1], [], []>} : vector<7x64xf32>, vector<64x2xf32>, vector<7x2xf32> -> vector<7x2xf32>
    %465 = arith.addf %461, %464 : vector<7x2xf32>
    %466 = vector.extract_strided_slice %457 {offsets = [2, 0, 0], sizes = [1, 7, 64], strides = [1, 1, 1]} : vector<3x7x64xf32> to vector<1x7x64xf32>
    %467 = vector.shape_cast %466 : vector<1x7x64xf32> to vector<7x64xf32>
    %cst_387 = arith.constant dense<0.000000e+00> : vector<7x2xf32>
    %468 = tpu.matmul %467, %33, %cst_387 {dimension_numbers = #tpu.dot_dimension_numbers<[1], [0], [0], [1], [0, 0, 1, 1], [], []>} : vector<7x64xf32>, vector<64x2xf32>, vector<7x2xf32> -> vector<7x2xf32>
    %469 = arith.addf %465, %468 : vector<7x2xf32>
    %c0_388 = arith.constant 0 : index
    %c1_389 = arith.constant 1 : index
    %c0_390 = arith.constant 0 : index
    %470 = tpu.strided_load %arg7[%c0_388, %c1_389, %c0_390] {strides = array<i32: 1, 10, 1>} : memref<3x64x64xf32, #tpu.memory_space<vmem>>, vector<3x7x64xf32>
    %471 = vector.extract_strided_slice %470 {offsets = [0, 0, 0], sizes = [1, 7, 64], strides = [1, 1, 1]} : vector<3x7x64xf32> to vector<1x7x64xf32>
    %472 = vector.shape_cast %471 : vector<1x7x64xf32> to vector<7x64xf32>
    %cst_391 = arith.constant dense<0.000000e+00> : vector<7x2xf32>
    %473 = tpu.matmul %472, %23, %cst_391 {dimension_numbers = #tpu.dot_dimension_numbers<[1], [0], [0], [1], [0, 0, 1, 1], [], []>} : vector<7x64xf32>, vector<64x2xf32>, vector<7x2xf32> -> vector<7x2xf32>
    %474 = arith.addf %469, %473 : vector<7x2xf32>
    %475 = vector.extract_strided_slice %470 {offsets = [1, 0, 0], sizes = [1, 7, 64], strides = [1, 1, 1]} : vector<3x7x64xf32> to vector<1x7x64xf32>
    %476 = vector.shape_cast %475 : vector<1x7x64xf32> to vector<7x64xf32>
    %cst_392 = arith.constant dense<0.000000e+00> : vector<7x2xf32>
    %477 = tpu.matmul %476, %29, %cst_392 {dimension_numbers = #tpu.dot_dimension_numbers<[1], [0], [0], [1], [0, 0, 1, 1], [], []>} : vector<7x64xf32>, vector<64x2xf32>, vector<7x2xf32> -> vector<7x2xf32>
    %478 = arith.addf %474, %477 : vector<7x2xf32>
    %479 = vector.extract_strided_slice %470 {offsets = [2, 0, 0], sizes = [1, 7, 64], strides = [1, 1, 1]} : vector<3x7x64xf32> to vector<1x7x64xf32>
    %480 = vector.shape_cast %479 : vector<1x7x64xf32> to vector<7x64xf32>
    %cst_393 = arith.constant dense<0.000000e+00> : vector<7x2xf32>
    %481 = tpu.matmul %480, %35, %cst_393 {dimension_numbers = #tpu.dot_dimension_numbers<[1], [0], [0], [1], [0, 0, 1, 1], [], []>} : vector<7x64xf32>, vector<64x2xf32>, vector<7x2xf32> -> vector<7x2xf32>
    %482 = arith.addf %478, %481 : vector<7x2xf32>
    %c0_394 = arith.constant 0 : index
    %c2_395 = arith.constant 2 : index
    %c0_396 = arith.constant 0 : index
    %483 = tpu.strided_load %arg7[%c0_394, %c2_395, %c0_396] {strides = array<i32: 1, 10, 1>} : memref<3x64x64xf32, #tpu.memory_space<vmem>>, vector<3x7x64xf32>
    %484 = vector.extract_strided_slice %483 {offsets = [0, 0, 0], sizes = [1, 7, 64], strides = [1, 1, 1]} : vector<3x7x64xf32> to vector<1x7x64xf32>
    %485 = vector.shape_cast %484 : vector<1x7x64xf32> to vector<7x64xf32>
    %cst_397 = arith.constant dense<0.000000e+00> : vector<7x2xf32>
    %486 = tpu.matmul %485, %25, %cst_397 {dimension_numbers = #tpu.dot_dimension_numbers<[1], [0], [0], [1], [0, 0, 1, 1], [], []>} : vector<7x64xf32>, vector<64x2xf32>, vector<7x2xf32> -> vector<7x2xf32>
    %487 = arith.addf %482, %486 : vector<7x2xf32>
    %488 = vector.extract_strided_slice %483 {offsets = [1, 0, 0], sizes = [1, 7, 64], strides = [1, 1, 1]} : vector<3x7x64xf32> to vector<1x7x64xf32>
    %489 = vector.shape_cast %488 : vector<1x7x64xf32> to vector<7x64xf32>
    %cst_398 = arith.constant dense<0.000000e+00> : vector<7x2xf32>
    %490 = tpu.matmul %489, %31, %cst_398 {dimension_numbers = #tpu.dot_dimension_numbers<[1], [0], [0], [1], [0, 0, 1, 1], [], []>} : vector<7x64xf32>, vector<64x2xf32>, vector<7x2xf32> -> vector<7x2xf32>
    %491 = arith.addf %487, %490 : vector<7x2xf32>
    %492 = vector.extract_strided_slice %483 {offsets = [2, 0, 0], sizes = [1, 7, 64], strides = [1, 1, 1]} : vector<3x7x64xf32> to vector<1x7x64xf32>
    %493 = vector.shape_cast %492 : vector<1x7x64xf32> to vector<7x64xf32>
    %cst_399 = arith.constant dense<0.000000e+00> : vector<7x2xf32>
    %494 = tpu.matmul %493, %37, %cst_399 {dimension_numbers = #tpu.dot_dimension_numbers<[1], [0], [0], [1], [0, 0, 1, 1], [], []>} : vector<7x64xf32>, vector<64x2xf32>, vector<7x2xf32> -> vector<7x2xf32>
    %495 = arith.addf %491, %494 : vector<7x2xf32>
    %496 = vector.broadcast %1 : vector<1x2xf32> to vector<7x2xf32>
    %497 = arith.addf %495, %496 : vector<7x2xf32>
    %cst_400 = arith.constant 0.000000e+00 : f32
    %498 = vector.broadcast %cst_400 : f32 to vector<192x64xf32>
    %c0_401 = arith.constant 0 : index
    %c50 = arith.constant 50 : index
    %c0_402 = arith.constant 0 : index
    %c0_403 = arith.constant 0 : index
    %499 = vector.load %arg1[%c0_401, %c50, %c0_402, %c0_403] : memref<1x66x66x3xf32, #tpu.memory_space<vmem>>, vector<1x3x64x3xf32>
    %500 = vector.shape_cast %499 : vector<1x3x64x3xf32> to vector<3x64x3xf32>
    %501 = vector.shape_cast %500 : vector<3x64x3xf32> to vector<192x3xf32>
    %cst_404 = arith.constant dense<0.000000e+00> : vector<192x64xf32>
    %502 = tpu.matmul %501, %3, %cst_404 {dimension_numbers = #tpu.dot_dimension_numbers<[1], [0], [0], [1], [0, 0, 1, 1], [], []>} : vector<192x3xf32>, vector<3x64xf32>, vector<192x64xf32> -> vector<192x64xf32>
    %503 = arith.addf %498, %502 : vector<192x64xf32>
    %c0_405 = arith.constant 0 : index
    %c50_406 = arith.constant 50 : index
    %c1_407 = arith.constant 1 : index
    %c0_408 = arith.constant 0 : index
    %504 = vector.load %arg1[%c0_405, %c50_406, %c1_407, %c0_408] : memref<1x66x66x3xf32, #tpu.memory_space<vmem>>, vector<1x3x64x3xf32>
    %505 = vector.shape_cast %504 : vector<1x3x64x3xf32> to vector<3x64x3xf32>
    %506 = vector.shape_cast %505 : vector<3x64x3xf32> to vector<192x3xf32>
    %cst_409 = arith.constant dense<0.000000e+00> : vector<192x64xf32>
    %507 = tpu.matmul %506, %5, %cst_409 {dimension_numbers = #tpu.dot_dimension_numbers<[1], [0], [0], [1], [0, 0, 1, 1], [], []>} : vector<192x3xf32>, vector<3x64xf32>, vector<192x64xf32> -> vector<192x64xf32>
    %508 = arith.addf %503, %507 : vector<192x64xf32>
    %c0_410 = arith.constant 0 : index
    %c50_411 = arith.constant 50 : index
    %c2_412 = arith.constant 2 : index
    %c0_413 = arith.constant 0 : index
    %509 = vector.load %arg1[%c0_410, %c50_411, %c2_412, %c0_413] : memref<1x66x66x3xf32, #tpu.memory_space<vmem>>, vector<1x3x64x3xf32>
    %510 = vector.shape_cast %509 : vector<1x3x64x3xf32> to vector<3x64x3xf32>
    %511 = vector.shape_cast %510 : vector<3x64x3xf32> to vector<192x3xf32>
    %cst_414 = arith.constant dense<0.000000e+00> : vector<192x64xf32>
    %512 = tpu.matmul %511, %7, %cst_414 {dimension_numbers = #tpu.dot_dimension_numbers<[1], [0], [0], [1], [0, 0, 1, 1], [], []>} : vector<192x3xf32>, vector<3x64xf32>, vector<192x64xf32> -> vector<192x64xf32>
    %513 = arith.addf %508, %512 : vector<192x64xf32>
    %c0_415 = arith.constant 0 : index
    %c51 = arith.constant 51 : index
    %c0_416 = arith.constant 0 : index
    %c0_417 = arith.constant 0 : index
    %514 = vector.load %arg1[%c0_415, %c51, %c0_416, %c0_417] : memref<1x66x66x3xf32, #tpu.memory_space<vmem>>, vector<1x3x64x3xf32>
    %515 = vector.shape_cast %514 : vector<1x3x64x3xf32> to vector<3x64x3xf32>
    %516 = vector.shape_cast %515 : vector<3x64x3xf32> to vector<192x3xf32>
    %cst_418 = arith.constant dense<0.000000e+00> : vector<192x64xf32>
    %517 = tpu.matmul %516, %9, %cst_418 {dimension_numbers = #tpu.dot_dimension_numbers<[1], [0], [0], [1], [0, 0, 1, 1], [], []>} : vector<192x3xf32>, vector<3x64xf32>, vector<192x64xf32> -> vector<192x64xf32>
    %518 = arith.addf %513, %517 : vector<192x64xf32>
    %c0_419 = arith.constant 0 : index
    %c51_420 = arith.constant 51 : index
    %c1_421 = arith.constant 1 : index
    %c0_422 = arith.constant 0 : index
    %519 = vector.load %arg1[%c0_419, %c51_420, %c1_421, %c0_422] : memref<1x66x66x3xf32, #tpu.memory_space<vmem>>, vector<1x3x64x3xf32>
    %520 = vector.shape_cast %519 : vector<1x3x64x3xf32> to vector<3x64x3xf32>
    %521 = vector.shape_cast %520 : vector<3x64x3xf32> to vector<192x3xf32>
    %cst_423 = arith.constant dense<0.000000e+00> : vector<192x64xf32>
    %522 = tpu.matmul %521, %11, %cst_423 {dimension_numbers = #tpu.dot_dimension_numbers<[1], [0], [0], [1], [0, 0, 1, 1], [], []>} : vector<192x3xf32>, vector<3x64xf32>, vector<192x64xf32> -> vector<192x64xf32>
    %523 = arith.addf %518, %522 : vector<192x64xf32>
    %c0_424 = arith.constant 0 : index
    %c51_425 = arith.constant 51 : index
    %c2_426 = arith.constant 2 : index
    %c0_427 = arith.constant 0 : index
    %524 = vector.load %arg1[%c0_424, %c51_425, %c2_426, %c0_427] : memref<1x66x66x3xf32, #tpu.memory_space<vmem>>, vector<1x3x64x3xf32>
    %525 = vector.shape_cast %524 : vector<1x3x64x3xf32> to vector<3x64x3xf32>
    %526 = vector.shape_cast %525 : vector<3x64x3xf32> to vector<192x3xf32>
    %cst_428 = arith.constant dense<0.000000e+00> : vector<192x64xf32>
    %527 = tpu.matmul %526, %13, %cst_428 {dimension_numbers = #tpu.dot_dimension_numbers<[1], [0], [0], [1], [0, 0, 1, 1], [], []>} : vector<192x3xf32>, vector<3x64xf32>, vector<192x64xf32> -> vector<192x64xf32>
    %528 = arith.addf %523, %527 : vector<192x64xf32>
    %c0_429 = arith.constant 0 : index
    %c52 = arith.constant 52 : index
    %c0_430 = arith.constant 0 : index
    %c0_431 = arith.constant 0 : index
    %529 = vector.load %arg1[%c0_429, %c52, %c0_430, %c0_431] : memref<1x66x66x3xf32, #tpu.memory_space<vmem>>, vector<1x3x64x3xf32>
    %530 = vector.shape_cast %529 : vector<1x3x64x3xf32> to vector<3x64x3xf32>
    %531 = vector.shape_cast %530 : vector<3x64x3xf32> to vector<192x3xf32>
    %cst_432 = arith.constant dense<0.000000e+00> : vector<192x64xf32>
    %532 = tpu.matmul %531, %15, %cst_432 {dimension_numbers = #tpu.dot_dimension_numbers<[1], [0], [0], [1], [0, 0, 1, 1], [], []>} : vector<192x3xf32>, vector<3x64xf32>, vector<192x64xf32> -> vector<192x64xf32>
    %533 = arith.addf %528, %532 : vector<192x64xf32>
    %c0_433 = arith.constant 0 : index
    %c52_434 = arith.constant 52 : index
    %c1_435 = arith.constant 1 : index
    %c0_436 = arith.constant 0 : index
    %534 = vector.load %arg1[%c0_433, %c52_434, %c1_435, %c0_436] : memref<1x66x66x3xf32, #tpu.memory_space<vmem>>, vector<1x3x64x3xf32>
    %535 = vector.shape_cast %534 : vector<1x3x64x3xf32> to vector<3x64x3xf32>
    %536 = vector.shape_cast %535 : vector<3x64x3xf32> to vector<192x3xf32>
    %cst_437 = arith.constant dense<0.000000e+00> : vector<192x64xf32>
    %537 = tpu.matmul %536, %17, %cst_437 {dimension_numbers = #tpu.dot_dimension_numbers<[1], [0], [0], [1], [0, 0, 1, 1], [], []>} : vector<192x3xf32>, vector<3x64xf32>, vector<192x64xf32> -> vector<192x64xf32>
    %538 = arith.addf %533, %537 : vector<192x64xf32>
    %c0_438 = arith.constant 0 : index
    %c52_439 = arith.constant 52 : index
    %c2_440 = arith.constant 2 : index
    %c0_441 = arith.constant 0 : index
    %539 = vector.load %arg1[%c0_438, %c52_439, %c2_440, %c0_441] : memref<1x66x66x3xf32, #tpu.memory_space<vmem>>, vector<1x3x64x3xf32>
    %540 = vector.shape_cast %539 : vector<1x3x64x3xf32> to vector<3x64x3xf32>
    %541 = vector.shape_cast %540 : vector<3x64x3xf32> to vector<192x3xf32>
    %cst_442 = arith.constant dense<0.000000e+00> : vector<192x64xf32>
    %542 = tpu.matmul %541, %19, %cst_442 {dimension_numbers = #tpu.dot_dimension_numbers<[1], [0], [0], [1], [0, 0, 1, 1], [], []>} : vector<192x3xf32>, vector<3x64xf32>, vector<192x64xf32> -> vector<192x64xf32>
    %543 = arith.addf %538, %542 : vector<192x64xf32>
    %544 = vector.broadcast %0 : vector<1x64xf32> to vector<192x64xf32>
    %545 = arith.addf %543, %544 : vector<192x64xf32>
    %546 = vector.shape_cast %545 : vector<192x64xf32> to vector<3x64x64xf32>
    %c0_443 = arith.constant 0 : index
    %c0_444 = arith.constant 0 : index
    %c0_445 = arith.constant 0 : index
    %547 = vector.load %arg7[%c0_443, %c0_444, %c0_445] : memref<3x64x64xf32, #tpu.memory_space<vmem>>, vector<3x64x64xf32>
    tpu.vector_store %arg7[%c0_443, %c0_444, %c0_445], %546 {strides = array<i32>} : memref<3x64x64xf32, #tpu.memory_space<vmem>>, vector<3x64x64xf32>,
    %cst_446 = arith.constant 0.000000e+00 : f32
    %548 = vector.broadcast %cst_446 : f32 to vector<7x2xf32>
    %c0_447 = arith.constant 0 : index
    %c0_448 = arith.constant 0 : index
    %c0_449 = arith.constant 0 : index
    %549 = tpu.strided_load %arg7[%c0_447, %c0_448, %c0_449] {strides = array<i32: 1, 10, 1>} : memref<3x64x64xf32, #tpu.memory_space<vmem>>, vector<3x7x64xf32>
    %550 = vector.extract_strided_slice %549 {offsets = [0, 0, 0], sizes = [1, 7, 64], strides = [1, 1, 1]} : vector<3x7x64xf32> to vector<1x7x64xf32>
    %551 = vector.shape_cast %550 : vector<1x7x64xf32> to vector<7x64xf32>
    %cst_450 = arith.constant dense<0.000000e+00> : vector<7x2xf32>
    %552 = tpu.matmul %551, %21, %cst_450 {dimension_numbers = #tpu.dot_dimension_numbers<[1], [0], [0], [1], [0, 0, 1, 1], [], []>} : vector<7x64xf32>, vector<64x2xf32>, vector<7x2xf32> -> vector<7x2xf32>
    %553 = arith.addf %548, %552 : vector<7x2xf32>
    %554 = vector.extract_strided_slice %549 {offsets = [1, 0, 0], sizes = [1, 7, 64], strides = [1, 1, 1]} : vector<3x7x64xf32> to vector<1x7x64xf32>
    %555 = vector.shape_cast %554 : vector<1x7x64xf32> to vector<7x64xf32>
    %cst_451 = arith.constant dense<0.000000e+00> : vector<7x2xf32>
    %556 = tpu.matmul %555, %27, %cst_451 {dimension_numbers = #tpu.dot_dimension_numbers<[1], [0], [0], [1], [0, 0, 1, 1], [], []>} : vector<7x64xf32>, vector<64x2xf32>, vector<7x2xf32> -> vector<7x2xf32>
    %557 = arith.addf %553, %556 : vector<7x2xf32>
    %558 = vector.extract_strided_slice %549 {offsets = [2, 0, 0], sizes = [1, 7, 64], strides = [1, 1, 1]} : vector<3x7x64xf32> to vector<1x7x64xf32>
    %559 = vector.shape_cast %558 : vector<1x7x64xf32> to vector<7x64xf32>
    %cst_452 = arith.constant dense<0.000000e+00> : vector<7x2xf32>
    %560 = tpu.matmul %559, %33, %cst_452 {dimension_numbers = #tpu.dot_dimension_numbers<[1], [0], [0], [1], [0, 0, 1, 1], [], []>} : vector<7x64xf32>, vector<64x2xf32>, vector<7x2xf32> -> vector<7x2xf32>
    %561 = arith.addf %557, %560 : vector<7x2xf32>
    %c0_453 = arith.constant 0 : index
    %c1_454 = arith.constant 1 : index
    %c0_455 = arith.constant 0 : index
    %562 = tpu.strided_load %arg7[%c0_453, %c1_454, %c0_455] {strides = array<i32: 1, 10, 1>} : memref<3x64x64xf32, #tpu.memory_space<vmem>>, vector<3x7x64xf32>
    %563 = vector.extract_strided_slice %562 {offsets = [0, 0, 0], sizes = [1, 7, 64], strides = [1, 1, 1]} : vector<3x7x64xf32> to vector<1x7x64xf32>
    %564 = vector.shape_cast %563 : vector<1x7x64xf32> to vector<7x64xf32>
    %cst_456 = arith.constant dense<0.000000e+00> : vector<7x2xf32>
    %565 = tpu.matmul %564, %23, %cst_456 {dimension_numbers = #tpu.dot_dimension_numbers<[1], [0], [0], [1], [0, 0, 1, 1], [], []>} : vector<7x64xf32>, vector<64x2xf32>, vector<7x2xf32> -> vector<7x2xf32>
    %566 = arith.addf %561, %565 : vector<7x2xf32>
    %567 = vector.extract_strided_slice %562 {offsets = [1, 0, 0], sizes = [1, 7, 64], strides = [1, 1, 1]} : vector<3x7x64xf32> to vector<1x7x64xf32>
    %568 = vector.shape_cast %567 : vector<1x7x64xf32> to vector<7x64xf32>
    %cst_457 = arith.constant dense<0.000000e+00> : vector<7x2xf32>
    %569 = tpu.matmul %568, %29, %cst_457 {dimension_numbers = #tpu.dot_dimension_numbers<[1], [0], [0], [1], [0, 0, 1, 1], [], []>} : vector<7x64xf32>, vector<64x2xf32>, vector<7x2xf32> -> vector<7x2xf32>
    %570 = arith.addf %566, %569 : vector<7x2xf32>
    %571 = vector.extract_strided_slice %562 {offsets = [2, 0, 0], sizes = [1, 7, 64], strides = [1, 1, 1]} : vector<3x7x64xf32> to vector<1x7x64xf32>
    %572 = vector.shape_cast %571 : vector<1x7x64xf32> to vector<7x64xf32>
    %cst_458 = arith.constant dense<0.000000e+00> : vector<7x2xf32>
    %573 = tpu.matmul %572, %35, %cst_458 {dimension_numbers = #tpu.dot_dimension_numbers<[1], [0], [0], [1], [0, 0, 1, 1], [], []>} : vector<7x64xf32>, vector<64x2xf32>, vector<7x2xf32> -> vector<7x2xf32>
    %574 = arith.addf %570, %573 : vector<7x2xf32>
    %c0_459 = arith.constant 0 : index
    %c2_460 = arith.constant 2 : index
    %c0_461 = arith.constant 0 : index
    %575 = tpu.strided_load %arg7[%c0_459, %c2_460, %c0_461] {strides = array<i32: 1, 10, 1>} : memref<3x64x64xf32, #tpu.memory_space<vmem>>, vector<3x7x64xf32>
    %576 = vector.extract_strided_slice %575 {offsets = [0, 0, 0], sizes = [1, 7, 64], strides = [1, 1, 1]} : vector<3x7x64xf32> to vector<1x7x64xf32>
    %577 = vector.shape_cast %576 : vector<1x7x64xf32> to vector<7x64xf32>
    %cst_462 = arith.constant dense<0.000000e+00> : vector<7x2xf32>
    %578 = tpu.matmul %577, %25, %cst_462 {dimension_numbers = #tpu.dot_dimension_numbers<[1], [0], [0], [1], [0, 0, 1, 1], [], []>} : vector<7x64xf32>, vector<64x2xf32>, vector<7x2xf32> -> vector<7x2xf32>
    %579 = arith.addf %574, %578 : vector<7x2xf32>
    %580 = vector.extract_strided_slice %575 {offsets = [1, 0, 0], sizes = [1, 7, 64], strides = [1, 1, 1]} : vector<3x7x64xf32> to vector<1x7x64xf32>
    %581 = vector.shape_cast %580 : vector<1x7x64xf32> to vector<7x64xf32>
    %cst_463 = arith.constant dense<0.000000e+00> : vector<7x2xf32>
    %582 = tpu.matmul %581, %31, %cst_463 {dimension_numbers = #tpu.dot_dimension_numbers<[1], [0], [0], [1], [0, 0, 1, 1], [], []>} : vector<7x64xf32>, vector<64x2xf32>, vector<7x2xf32> -> vector<7x2xf32>
    %583 = arith.addf %579, %582 : vector<7x2xf32>
    %584 = vector.extract_strided_slice %575 {offsets = [2, 0, 0], sizes = [1, 7, 64], strides = [1, 1, 1]} : vector<3x7x64xf32> to vector<1x7x64xf32>
    %585 = vector.shape_cast %584 : vector<1x7x64xf32> to vector<7x64xf32>
    %cst_464 = arith.constant dense<0.000000e+00> : vector<7x2xf32>
    %586 = tpu.matmul %585, %37, %cst_464 {dimension_numbers = #tpu.dot_dimension_numbers<[1], [0], [0], [1], [0, 0, 1, 1], [], []>} : vector<7x64xf32>, vector<64x2xf32>, vector<7x2xf32> -> vector<7x2xf32>
    %587 = arith.addf %583, %586 : vector<7x2xf32>
    %588 = vector.broadcast %1 : vector<1x2xf32> to vector<7x2xf32>
    %589 = arith.addf %587, %588 : vector<7x2xf32>
    %cst_465 = arith.constant 0.000000e+00 : f32
    %590 = vector.broadcast %cst_465 : f32 to vector<192x64xf32>
    %c0_466 = arith.constant 0 : index
    %c60 = arith.constant 60 : index
    %c0_467 = arith.constant 0 : index
    %c0_468 = arith.constant 0 : index
    %591 = vector.load %arg1[%c0_466, %c60, %c0_467, %c0_468] : memref<1x66x66x3xf32, #tpu.memory_space<vmem>>, vector<1x3x64x3xf32>
    %592 = vector.shape_cast %591 : vector<1x3x64x3xf32> to vector<3x64x3xf32>
    %593 = vector.shape_cast %592 : vector<3x64x3xf32> to vector<192x3xf32>
    %cst_469 = arith.constant dense<0.000000e+00> : vector<192x64xf32>
    %594 = tpu.matmul %593, %3, %cst_469 {dimension_numbers = #tpu.dot_dimension_numbers<[1], [0], [0], [1], [0, 0, 1, 1], [], []>} : vector<192x3xf32>, vector<3x64xf32>, vector<192x64xf32> -> vector<192x64xf32>
    %595 = arith.addf %590, %594 : vector<192x64xf32>
    %c0_470 = arith.constant 0 : index
    %c60_471 = arith.constant 60 : index
    %c1_472 = arith.constant 1 : index
    %c0_473 = arith.constant 0 : index
    %596 = vector.load %arg1[%c0_470, %c60_471, %c1_472, %c0_473] : memref<1x66x66x3xf32, #tpu.memory_space<vmem>>, vector<1x3x64x3xf32>
    %597 = vector.shape_cast %596 : vector<1x3x64x3xf32> to vector<3x64x3xf32>
    %598 = vector.shape_cast %597 : vector<3x64x3xf32> to vector<192x3xf32>
    %cst_474 = arith.constant dense<0.000000e+00> : vector<192x64xf32>
    %599 = tpu.matmul %598, %5, %cst_474 {dimension_numbers = #tpu.dot_dimension_numbers<[1], [0], [0], [1], [0, 0, 1, 1], [], []>} : vector<192x3xf32>, vector<3x64xf32>, vector<192x64xf32> -> vector<192x64xf32>
    %600 = arith.addf %595, %599 : vector<192x64xf32>
    %c0_475 = arith.constant 0 : index
    %c60_476 = arith.constant 60 : index
    %c2_477 = arith.constant 2 : index
    %c0_478 = arith.constant 0 : index
    %601 = vector.load %arg1[%c0_475, %c60_476, %c2_477, %c0_478] : memref<1x66x66x3xf32, #tpu.memory_space<vmem>>, vector<1x3x64x3xf32>
    %602 = vector.shape_cast %601 : vector<1x3x64x3xf32> to vector<3x64x3xf32>
    %603 = vector.shape_cast %602 : vector<3x64x3xf32> to vector<192x3xf32>
    %cst_479 = arith.constant dense<0.000000e+00> : vector<192x64xf32>
    %604 = tpu.matmul %603, %7, %cst_479 {dimension_numbers = #tpu.dot_dimension_numbers<[1], [0], [0], [1], [0, 0, 1, 1], [], []>} : vector<192x3xf32>, vector<3x64xf32>, vector<192x64xf32> -> vector<192x64xf32>
    %605 = arith.addf %600, %604 : vector<192x64xf32>
    %c0_480 = arith.constant 0 : index
    %c61 = arith.constant 61 : index
    %c0_481 = arith.constant 0 : index
    %c0_482 = arith.constant 0 : index
    %606 = vector.load %arg1[%c0_480, %c61, %c0_481, %c0_482] : memref<1x66x66x3xf32, #tpu.memory_space<vmem>>, vector<1x3x64x3xf32>
    %607 = vector.shape_cast %606 : vector<1x3x64x3xf32> to vector<3x64x3xf32>
    %608 = vector.shape_cast %607 : vector<3x64x3xf32> to vector<192x3xf32>
    %cst_483 = arith.constant dense<0.000000e+00> : vector<192x64xf32>
    %609 = tpu.matmul %608, %9, %cst_483 {dimension_numbers = #tpu.dot_dimension_numbers<[1], [0], [0], [1], [0, 0, 1, 1], [], []>} : vector<192x3xf32>, vector<3x64xf32>, vector<192x64xf32> -> vector<192x64xf32>
    %610 = arith.addf %605, %609 : vector<192x64xf32>
    %c0_484 = arith.constant 0 : index
    %c61_485 = arith.constant 61 : index
    %c1_486 = arith.constant 1 : index
    %c0_487 = arith.constant 0 : index
    %611 = vector.load %arg1[%c0_484, %c61_485, %c1_486, %c0_487] : memref<1x66x66x3xf32, #tpu.memory_space<vmem>>, vector<1x3x64x3xf32>
    %612 = vector.shape_cast %611 : vector<1x3x64x3xf32> to vector<3x64x3xf32>
    %613 = vector.shape_cast %612 : vector<3x64x3xf32> to vector<192x3xf32>
    %cst_488 = arith.constant dense<0.000000e+00> : vector<192x64xf32>
    %614 = tpu.matmul %613, %11, %cst_488 {dimension_numbers = #tpu.dot_dimension_numbers<[1], [0], [0], [1], [0, 0, 1, 1], [], []>} : vector<192x3xf32>, vector<3x64xf32>, vector<192x64xf32> -> vector<192x64xf32>
    %615 = arith.addf %610, %614 : vector<192x64xf32>
    %c0_489 = arith.constant 0 : index
    %c61_490 = arith.constant 61 : index
    %c2_491 = arith.constant 2 : index
    %c0_492 = arith.constant 0 : index
    %616 = vector.load %arg1[%c0_489, %c61_490, %c2_491, %c0_492] : memref<1x66x66x3xf32, #tpu.memory_space<vmem>>, vector<1x3x64x3xf32>
    %617 = vector.shape_cast %616 : vector<1x3x64x3xf32> to vector<3x64x3xf32>
    %618 = vector.shape_cast %617 : vector<3x64x3xf32> to vector<192x3xf32>
    %cst_493 = arith.constant dense<0.000000e+00> : vector<192x64xf32>
    %619 = tpu.matmul %618, %13, %cst_493 {dimension_numbers = #tpu.dot_dimension_numbers<[1], [0], [0], [1], [0, 0, 1, 1], [], []>} : vector<192x3xf32>, vector<3x64xf32>, vector<192x64xf32> -> vector<192x64xf32>
    %620 = arith.addf %615, %619 : vector<192x64xf32>
    %c0_494 = arith.constant 0 : index
    %c62 = arith.constant 62 : index
    %c0_495 = arith.constant 0 : index
    %c0_496 = arith.constant 0 : index
    %621 = vector.load %arg1[%c0_494, %c62, %c0_495, %c0_496] : memref<1x66x66x3xf32, #tpu.memory_space<vmem>>, vector<1x3x64x3xf32>
    %622 = vector.shape_cast %621 : vector<1x3x64x3xf32> to vector<3x64x3xf32>
    %623 = vector.shape_cast %622 : vector<3x64x3xf32> to vector<192x3xf32>
    %cst_497 = arith.constant dense<0.000000e+00> : vector<192x64xf32>
    %624 = tpu.matmul %623, %15, %cst_497 {dimension_numbers = #tpu.dot_dimension_numbers<[1], [0], [0], [1], [0, 0, 1, 1], [], []>} : vector<192x3xf32>, vector<3x64xf32>, vector<192x64xf32> -> vector<192x64xf32>
    %625 = arith.addf %620, %624 : vector<192x64xf32>
    %c0_498 = arith.constant 0 : index
    %c62_499 = arith.constant 62 : index
    %c1_500 = arith.constant 1 : index
    %c0_501 = arith.constant 0 : index
    %626 = vector.load %arg1[%c0_498, %c62_499, %c1_500, %c0_501] : memref<1x66x66x3xf32, #tpu.memory_space<vmem>>, vector<1x3x64x3xf32>
    %627 = vector.shape_cast %626 : vector<1x3x64x3xf32> to vector<3x64x3xf32>
    %628 = vector.shape_cast %627 : vector<3x64x3xf32> to vector<192x3xf32>
    %cst_502 = arith.constant dense<0.000000e+00> : vector<192x64xf32>
    %629 = tpu.matmul %628, %17, %cst_502 {dimension_numbers = #tpu.dot_dimension_numbers<[1], [0], [0], [1], [0, 0, 1, 1], [], []>} : vector<192x3xf32>, vector<3x64xf32>, vector<192x64xf32> -> vector<192x64xf32>
    %630 = arith.addf %625, %629 : vector<192x64xf32>
    %c0_503 = arith.constant 0 : index
    %c62_504 = arith.constant 62 : index
    %c2_505 = arith.constant 2 : index
    %c0_506 = arith.constant 0 : index
    %631 = vector.load %arg1[%c0_503, %c62_504, %c2_505, %c0_506] : memref<1x66x66x3xf32, #tpu.memory_space<vmem>>, vector<1x3x64x3xf32>
    %632 = vector.shape_cast %631 : vector<1x3x64x3xf32> to vector<3x64x3xf32>
    %633 = vector.shape_cast %632 : vector<3x64x3xf32> to vector<192x3xf32>
    %cst_507 = arith.constant dense<0.000000e+00> : vector<192x64xf32>
    %634 = tpu.matmul %633, %19, %cst_507 {dimension_numbers = #tpu.dot_dimension_numbers<[1], [0], [0], [1], [0, 0, 1, 1], [], []>} : vector<192x3xf32>, vector<3x64xf32>, vector<192x64xf32> -> vector<192x64xf32>
    %635 = arith.addf %630, %634 : vector<192x64xf32>
    %636 = vector.broadcast %0 : vector<1x64xf32> to vector<192x64xf32>
    %637 = arith.addf %635, %636 : vector<192x64xf32>
    %638 = vector.shape_cast %637 : vector<192x64xf32> to vector<3x64x64xf32>
    %c0_508 = arith.constant 0 : index
    %c0_509 = arith.constant 0 : index
    %c0_510 = arith.constant 0 : index
    %639 = vector.load %arg7[%c0_508, %c0_509, %c0_510] : memref<3x64x64xf32, #tpu.memory_space<vmem>>, vector<3x64x64xf32>
    tpu.vector_store %arg7[%c0_508, %c0_509, %c0_510], %638 {strides = array<i32>} : memref<3x64x64xf32, #tpu.memory_space<vmem>>, vector<3x64x64xf32>,
    %cst_511 = arith.constant 0.000000e+00 : f32
    %640 = vector.broadcast %cst_511 : f32 to vector<7x2xf32>
    %c0_512 = arith.constant 0 : index
    %c0_513 = arith.constant 0 : index
    %c0_514 = arith.constant 0 : index
    %641 = tpu.strided_load %arg7[%c0_512, %c0_513, %c0_514] {strides = array<i32: 1, 10, 1>} : memref<3x64x64xf32, #tpu.memory_space<vmem>>, vector<3x7x64xf32>
    %642 = vector.extract_strided_slice %641 {offsets = [0, 0, 0], sizes = [1, 7, 64], strides = [1, 1, 1]} : vector<3x7x64xf32> to vector<1x7x64xf32>
    %643 = vector.shape_cast %642 : vector<1x7x64xf32> to vector<7x64xf32>
    %cst_515 = arith.constant dense<0.000000e+00> : vector<7x2xf32>
    %644 = tpu.matmul %643, %21, %cst_515 {dimension_numbers = #tpu.dot_dimension_numbers<[1], [0], [0], [1], [0, 0, 1, 1], [], []>} : vector<7x64xf32>, vector<64x2xf32>, vector<7x2xf32> -> vector<7x2xf32>
    %645 = arith.addf %640, %644 : vector<7x2xf32>
    %646 = vector.extract_strided_slice %641 {offsets = [1, 0, 0], sizes = [1, 7, 64], strides = [1, 1, 1]} : vector<3x7x64xf32> to vector<1x7x64xf32>
    %647 = vector.shape_cast %646 : vector<1x7x64xf32> to vector<7x64xf32>
    %cst_516 = arith.constant dense<0.000000e+00> : vector<7x2xf32>
    %648 = tpu.matmul %647, %27, %cst_516 {dimension_numbers = #tpu.dot_dimension_numbers<[1], [0], [0], [1], [0, 0, 1, 1], [], []>} : vector<7x64xf32>, vector<64x2xf32>, vector<7x2xf32> -> vector<7x2xf32>
    %649 = arith.addf %645, %648 : vector<7x2xf32>
    %650 = vector.extract_strided_slice %641 {offsets = [2, 0, 0], sizes = [1, 7, 64], strides = [1, 1, 1]} : vector<3x7x64xf32> to vector<1x7x64xf32>
    %651 = vector.shape_cast %650 : vector<1x7x64xf32> to vector<7x64xf32>
    %cst_517 = arith.constant dense<0.000000e+00> : vector<7x2xf32>
    %652 = tpu.matmul %651, %33, %cst_517 {dimension_numbers = #tpu.dot_dimension_numbers<[1], [0], [0], [1], [0, 0, 1, 1], [], []>} : vector<7x64xf32>, vector<64x2xf32>, vector<7x2xf32> -> vector<7x2xf32>
    %653 = arith.addf %649, %652 : vector<7x2xf32>
    %c0_518 = arith.constant 0 : index
    %c1_519 = arith.constant 1 : index
    %c0_520 = arith.constant 0 : index
    %654 = tpu.strided_load %arg7[%c0_518, %c1_519, %c0_520] {strides = array<i32: 1, 10, 1>} : memref<3x64x64xf32, #tpu.memory_space<vmem>>, vector<3x7x64xf32>
    %655 = vector.extract_strided_slice %654 {offsets = [0, 0, 0], sizes = [1, 7, 64], strides = [1, 1, 1]} : vector<3x7x64xf32> to vector<1x7x64xf32>
    %656 = vector.shape_cast %655 : vector<1x7x64xf32> to vector<7x64xf32>
    %cst_521 = arith.constant dense<0.000000e+00> : vector<7x2xf32>
    %657 = tpu.matmul %656, %23, %cst_521 {dimension_numbers = #tpu.dot_dimension_numbers<[1], [0], [0], [1], [0, 0, 1, 1], [], []>} : vector<7x64xf32>, vector<64x2xf32>, vector<7x2xf32> -> vector<7x2xf32>
    %658 = arith.addf %653, %657 : vector<7x2xf32>
    %659 = vector.extract_strided_slice %654 {offsets = [1, 0, 0], sizes = [1, 7, 64], strides = [1, 1, 1]} : vector<3x7x64xf32> to vector<1x7x64xf32>
    %660 = vector.shape_cast %659 : vector<1x7x64xf32> to vector<7x64xf32>
    %cst_522 = arith.constant dense<0.000000e+00> : vector<7x2xf32>
    %661 = tpu.matmul %660, %29, %cst_522 {dimension_numbers = #tpu.dot_dimension_numbers<[1], [0], [0], [1], [0, 0, 1, 1], [], []>} : vector<7x64xf32>, vector<64x2xf32>, vector<7x2xf32> -> vector<7x2xf32>
    %662 = arith.addf %658, %661 : vector<7x2xf32>
    %663 = vector.extract_strided_slice %654 {offsets = [2, 0, 0], sizes = [1, 7, 64], strides = [1, 1, 1]} : vector<3x7x64xf32> to vector<1x7x64xf32>
    %664 = vector.shape_cast %663 : vector<1x7x64xf32> to vector<7x64xf32>
    %cst_523 = arith.constant dense<0.000000e+00> : vector<7x2xf32>
    %665 = tpu.matmul %664, %35, %cst_523 {dimension_numbers = #tpu.dot_dimension_numbers<[1], [0], [0], [1], [0, 0, 1, 1], [], []>} : vector<7x64xf32>, vector<64x2xf32>, vector<7x2xf32> -> vector<7x2xf32>
    %666 = arith.addf %662, %665 : vector<7x2xf32>
    %c0_524 = arith.constant 0 : index
    %c2_525 = arith.constant 2 : index
    %c0_526 = arith.constant 0 : index
    %667 = tpu.strided_load %arg7[%c0_524, %c2_525, %c0_526] {strides = array<i32: 1, 10, 1>} : memref<3x64x64xf32, #tpu.memory_space<vmem>>, vector<3x7x64xf32>
    %668 = vector.extract_strided_slice %667 {offsets = [0, 0, 0], sizes = [1, 7, 64], strides = [1, 1, 1]} : vector<3x7x64xf32> to vector<1x7x64xf32>
    %669 = vector.shape_cast %668 : vector<1x7x64xf32> to vector<7x64xf32>
    %cst_527 = arith.constant dense<0.000000e+00> : vector<7x2xf32>
    %670 = tpu.matmul %669, %25, %cst_527 {dimension_numbers = #tpu.dot_dimension_numbers<[1], [0], [0], [1], [0, 0, 1, 1], [], []>} : vector<7x64xf32>, vector<64x2xf32>, vector<7x2xf32> -> vector<7x2xf32>
    %671 = arith.addf %666, %670 : vector<7x2xf32>
    %672 = vector.extract_strided_slice %667 {offsets = [1, 0, 0], sizes = [1, 7, 64], strides = [1, 1, 1]} : vector<3x7x64xf32> to vector<1x7x64xf32>
    %673 = vector.shape_cast %672 : vector<1x7x64xf32> to vector<7x64xf32>
    %cst_528 = arith.constant dense<0.000000e+00> : vector<7x2xf32>
    %674 = tpu.matmul %673, %31, %cst_528 {dimension_numbers = #tpu.dot_dimension_numbers<[1], [0], [0], [1], [0, 0, 1, 1], [], []>} : vector<7x64xf32>, vector<64x2xf32>, vector<7x2xf32> -> vector<7x2xf32>
    %675 = arith.addf %671, %674 : vector<7x2xf32>
    %676 = vector.extract_strided_slice %667 {offsets = [2, 0, 0], sizes = [1, 7, 64], strides = [1, 1, 1]} : vector<3x7x64xf32> to vector<1x7x64xf32>
    %677 = vector.shape_cast %676 : vector<1x7x64xf32> to vector<7x64xf32>
    %cst_529 = arith.constant dense<0.000000e+00> : vector<7x2xf32>
    %678 = tpu.matmul %677, %37, %cst_529 {dimension_numbers = #tpu.dot_dimension_numbers<[1], [0], [0], [1], [0, 0, 1, 1], [], []>} : vector<7x64xf32>, vector<64x2xf32>, vector<7x2xf32> -> vector<7x2xf32>
    %679 = arith.addf %675, %678 : vector<7x2xf32>
    %680 = vector.broadcast %1 : vector<1x2xf32> to vector<7x2xf32>
    %681 = arith.addf %679, %680 : vector<7x2xf32>
    %682 = arith.maximumf %129, %221 : vector<7x2xf32>
    %683 = arith.maximumf %682, %313 : vector<7x2xf32>
    %684 = vector.extract_strided_slice %683 {offsets = [0, 0], sizes = [3, 2], strides = [1, 1]} : vector<7x2xf32> to vector<3x2xf32>
    %cst_530 = arith.constant dense<0xFF800000> : vector<2xf32>
    %685 = vector.multi_reduction <maximumf>, %684, %cst_530 [0] : vector<3x2xf32> to vector<2xf32>
    %686 = vector.shape_cast %685 : vector<2xf32> to vector<1x2xf32>
    %687 = vector.extract_strided_slice %683 {offsets = [2, 0], sizes = [3, 2], strides = [1, 1]} : vector<7x2xf32> to vector<3x2xf32>
    %cst_531 = arith.constant dense<0xFF800000> : vector<2xf32>
    %688 = vector.multi_reduction <maximumf>, %687, %cst_531 [0] : vector<3x2xf32> to vector<2xf32>
    %689 = vector.shape_cast %688 : vector<2xf32> to vector<1x2xf32>
    %690 = vector.extract_strided_slice %683 {offsets = [4, 0], sizes = [3, 2], strides = [1, 1]} : vector<7x2xf32> to vector<3x2xf32>
    %cst_532 = arith.constant dense<0xFF800000> : vector<2xf32>
    %691 = vector.multi_reduction <maximumf>, %690, %cst_532 [0] : vector<3x2xf32> to vector<2xf32>
    %692 = vector.shape_cast %691 : vector<2xf32> to vector<1x2xf32>
    %693 = arith.maximumf %313, %405 : vector<7x2xf32>
    %694 = arith.maximumf %693, %497 : vector<7x2xf32>
    %695 = vector.extract_strided_slice %694 {offsets = [0, 0], sizes = [3, 2], strides = [1, 1]} : vector<7x2xf32> to vector<3x2xf32>
    %cst_533 = arith.constant dense<0xFF800000> : vector<2xf32>
    %696 = vector.multi_reduction <maximumf>, %695, %cst_533 [0] : vector<3x2xf32> to vector<2xf32>
    %697 = vector.shape_cast %696 : vector<2xf32> to vector<1x2xf32>
    %698 = vector.extract_strided_slice %694 {offsets = [2, 0], sizes = [3, 2], strides = [1, 1]} : vector<7x2xf32> to vector<3x2xf32>
    %cst_534 = arith.constant dense<0xFF800000> : vector<2xf32>
    %699 = vector.multi_reduction <maximumf>, %698, %cst_534 [0] : vector<3x2xf32> to vector<2xf32>
    %700 = vector.shape_cast %699 : vector<2xf32> to vector<1x2xf32>
    %701 = vector.extract_strided_slice %694 {offsets = [4, 0], sizes = [3, 2], strides = [1, 1]} : vector<7x2xf32> to vector<3x2xf32>
    %cst_535 = arith.constant dense<0xFF800000> : vector<2xf32>
    %702 = vector.multi_reduction <maximumf>, %701, %cst_535 [0] : vector<3x2xf32> to vector<2xf32>
    %703 = vector.shape_cast %702 : vector<2xf32> to vector<1x2xf32>
    %704 = arith.maximumf %497, %589 : vector<7x2xf32>
    %705 = arith.maximumf %704, %681 : vector<7x2xf32>
    %706 = vector.extract_strided_slice %705 {offsets = [0, 0], sizes = [3, 2], strides = [1, 1]} : vector<7x2xf32> to vector<3x2xf32>
    %cst_536 = arith.constant dense<0xFF800000> : vector<2xf32>
    %707 = vector.multi_reduction <maximumf>, %706, %cst_536 [0] : vector<3x2xf32> to vector<2xf32>
    %708 = vector.shape_cast %707 : vector<2xf32> to vector<1x2xf32>
    %709 = vector.extract_strided_slice %705 {offsets = [2, 0], sizes = [3, 2], strides = [1, 1]} : vector<7x2xf32> to vector<3x2xf32>
    %cst_537 = arith.constant dense<0xFF800000> : vector<2xf32>
    %710 = vector.multi_reduction <maximumf>, %709, %cst_537 [0] : vector<3x2xf32> to vector<2xf32>
    %711 = vector.shape_cast %710 : vector<2xf32> to vector<1x2xf32>
    %712 = vector.extract_strided_slice %705 {offsets = [4, 0], sizes = [3, 2], strides = [1, 1]} : vector<7x2xf32> to vector<3x2xf32>
    %cst_538 = arith.constant dense<0xFF800000> : vector<2xf32>
    %713 = vector.multi_reduction <maximumf>, %712, %cst_538 [0] : vector<3x2xf32> to vector<2xf32>
    %714 = vector.shape_cast %713 : vector<2xf32> to vector<1x2xf32>
    %715 = arith.addf %686, %689 : vector<1x2xf32>
    %716 = arith.addf %715, %692 : vector<1x2xf32>
    %717 = arith.addf %716, %697 : vector<1x2xf32>
    %718 = arith.addf %717, %700 : vector<1x2xf32>
    %719 = arith.addf %718, %703 : vector<1x2xf32>
    %720 = arith.addf %719, %708 : vector<1x2xf32>
    %721 = arith.addf %720, %711 : vector<1x2xf32>
    %722 = arith.addf %721, %714 : vector<1x2xf32>
    %cst_539 = arith.constant 0.111111112 : f32
    %723 = vector.broadcast %cst_539 : f32 to vector<1x2xf32>
    %724 = arith.mulf %722, %723 : vector<1x2xf32>
    %cst_540 = arith.constant 0.000000e+00 : f32
    %725 = vector.broadcast %cst_540 : f32 to vector<1x2xf32>
    %726 = arith.maximumf %724, %725 : vector<1x2xf32>
    %727 = vector.shape_cast %726 : vector<1x2xf32> to vector<1x1x2xf32>
    %c0_541 = arith.constant 0 : index
    %c0_542 = arith.constant 0 : index
    %c0_543 = arith.constant 0 : index
    %c0_544 = arith.constant 0 : index
    %728 = vector.load %arg6[%c0_541, %c0_542, %c0_543, %c0_544] : memref<1x1x1x2xf32, #tpu.memory_space<vmem>>, vector<1x1x1x2xf32>
    %729 = vector.shape_cast %728 : vector<1x1x1x2xf32> to vector<1x1x2xf32>
    %730 = vector.shape_cast %727 : vector<1x1x2xf32> to vector<1x1x1x2xf32>
    tpu.vector_store %arg6[%c0_541, %c0_542, %c0_543, %c0_544], %730 {strides = array<i32>} : memref<1x1x1x2xf32, #tpu.memory_space<vmem>>, vector<1x1x1x2xf32>,
    return
  }
  func.func @transform_0(%arg0: i32) -> (i32, i32, i32, i32) {
    %c0_i32 = arith.constant 0 : i32
    %c0_i32_0 = arith.constant 0 : i32
    %c0_i32_1 = arith.constant 0 : i32
    %c0_i32_2 = arith.constant 0 : i32
    return %arg0, %c0_i32, %c0_i32_0, %c0_i32_1 : i32, i32, i32, i32
  }
  func.func @transform_1(%arg0: i32) -> (i32, i32, i32, i32) {
    %c0_i32 = arith.constant 0 : i32
    %c0_i32_0 = arith.constant 0 : i32
    %c0_i32_1 = arith.constant 0 : i32
    %c0_i32_2 = arith.constant 0 : i32
    %c0_i32_3 = arith.constant 0 : i32
    return %c0_i32, %c0_i32_0, %c0_i32_1, %c0_i32_2 : i32, i32, i32, i32
  }
  func.func @transform_2(%arg0: i32) -> (i32, i32) {
    %c0_i32 = arith.constant 0 : i32
    %c0_i32_0 = arith.constant 0 : i32
    %c0_i32_1 = arith.constant 0 : i32
    return %c0_i32, %c0_i32_0 : i32, i32
  }
  func.func @transform_3(%arg0: i32) -> (i32, i32, i32, i32) {
    %c0_i32 = arith.constant 0 : i32
    %c0_i32_0 = arith.constant 0 : i32
    %c0_i32_1 = arith.constant 0 : i32
    %c0_i32_2 = arith.constant 0 : i32
    %c0_i32_3 = arith.constant 0 : i32
    return %c0_i32, %c0_i32_0, %c0_i32_1, %c0_i32_2 : i32, i32, i32, i32
  }
  func.func @transform_4(%arg0: i32) -> (i32, i32) {
    %c0_i32 = arith.constant 0 : i32
    %c0_i32_0 = arith.constant 0 : i32
    %c0_i32_1 = arith.constant 0 : i32
    return %c0_i32, %c0_i32_0 : i32, i32
  }
  func.func @transform_5(%arg0: i32) -> (i32, i32, i32, i32) {
    %c0_i32 = arith.constant 0 : i32
    %c0_i32_0 = arith.constant 0 : i32
    %c0_i32_1 = arith.constant 0 : i32
    %c0_i32_2 = arith.constant 0 : i32
    return %arg0, %c0_i32, %c0_i32_0, %c0_i32_1 : i32, i32, i32, i32
  }
}

</mosaic_0001>

<bundles_post_ra>
// kernel: model_forward.1
= control target key start
LH: loop header
LB: loop body
LE: loop exit
PB: predicated region body
PF: predicated region fallthrough
CT: control target
= control target key end

     0   :  { %10 = vsyncpa [#allocation4], 0  ;;  %s42059_s0 = inlined_call_operand.vmem [shape: f32[2,66,66,3], index: 0, kind: input, shape index: {}]   ;;  %s42060_s1 = inlined_call_operand.vmem [shape: f32[3,3,3,64], index: 1, kind: input, shape index: {}]   ;;  %s42061_s2 = inlined_call_operand.vmem [shape: f32[1,64], index: 2, kind: input, shape index: {}]   ;;  %s42062_s3 = inlined_call_operand.vmem [shape: f32[3,3,64,2], index: 3, kind: input, shape index: {}]   ;;  %s42063_s4 = inlined_call_operand.vmem [shape: f32[1,2], index: 4, kind: input, shape index: {}]   ;;  %s42064_s5 = inlined_call_operand.hbm [shape: f32[2,1,1,2], index: 5, kind: output, shape index: {}]  }
   0x1   :  { %12 = vsyncpa [#allocation4 + $0x1], 0  ;;  %s35674_s18 = smov 0   ;;  %s35676_s19 = smov 0  }
   0x2   :  { %s35678_s20 = smov 0   ;;  %s35680_s21 = smov 0  }
   0x3 LB: > { %s35695_s22 = sadd.s32 4294967295, %s35638_s21   ;;  %s24476_s23 = sadd.s32 4294967294, %s35638_s21   ;;  %s35638_s21 = sphi %s35680_s21, %s42365_s21   ;;  %s35634_s20 = sphi %s35678_s20, %s42364_s20   ;;  %s35630_s19 = sphi %s35676_s19, %s42363_s19   ;;  %s35626_s18 = sphi %s35674_s18, %s42362_s18  }
   0x4   : > { %s35699_s24 = sadd.s32 1, %s35638_s21   ;;  %s135_s25 = sadd.s32 1, %s35634_s20 }
   0x5   : > { %s132_s26 = ssub.s32 %s35638_s21, %s35699_s24  ;;  %p145_p0 = scmp.ne.s32.totalorder %s35634_s20, %s35630_s19 }
   0x6   : > { %p133_p1 = scmp.eq.s32.totalorder %s132_s26, 0  ;;  %p146_p2 = scmp.eq.s32.totalorder %s35695_s22, 1 }
   0x7   : > { %p151_p3 = scmp.ne.s32.totalorder %s35630_s19, %s35626_s18  ;;  %p152_p4 = scmp.eq.s32.totalorder %s24476_s23, 1 }
   0x8   : > { %s35710_s27 = scalar_select %p133_p1, %s35634_s20, %s135_s25  }
   0x9   : > { %p35712_p5 = por %p146_p2, %p145_p0  ;;  %p35716_p6 = por %p152_p4, %p151_p3 }
   0xa   : > { %p24479_p7 = scmp.ge.s32.totalorder %s35638_s21, 1  ;;  %p190_p8 = scmp.lt.s32.totalorder %s35638_s21, 3 }
   0xc   : > { %p191_p9 = pnand %p24479_p7, %p190_p8 }
   0xe   : > { %194 = sbr.rel (%p191_p9) target bundleno = 5508 (0x1584), region = 40 }
  0x15   : > { %v24483_v0 = vld [vmem:[%s42060_s1 + $0xc] sm:$0x7]  ;;  %vm442_vm0 = vcmask 1042432   ;;  %p217_p10 = scmp.lt.s32.totalorder %s35695_s22, 1  ;;  %v24484_v1 = vld [vmem:[%s42060_s1 + $0x10] sm:$0x7] }
  0x16   : > { %29892 = vmatprep.subr.msk.mxu0 %vm442_vm0, %v24483_v0  ;;  %v24481_v2 = vld [vmem:[%s42060_s1 + $0x4] sm:$0x7]  ;;  %v224_v3 = vld [vmem:[%s42060_s1] sm:$0x7]  ;;  %vm369_vm1 = vcmask 23552   ;;  %vm35641_vm2 = vmmov 0  }
  0x17   : > { %29893 = vmatpush3.msk.msra.mxu0 %vm442_vm0, %v24483_v0  ;;  %s218_s11 = scalar_select %p217_p10, %s35695_s22, 1  ;;  %29778 = vmatprep.subr.msk.mxu1 %vm442_vm0, %v24481_v2  ;;  %v35761_v7 = vld [vmem:[%s42060_s1 + $0x14] sm:$0x7]  ;;  %v24482_v34 = vld [vmem:[%s42060_s1 + $0x8] sm:$0x7]  ;;  %vm3079_vm3 = vcmask 523264  }
  0x18   : > { %29930 = vmatprep.subr.msk.mxu0 %vm442_vm0, %v24484_v1  ;;  %29779 = vmatpush3.msk.msra.mxu1 %vm442_vm0, %v24481_v2  ;;  %v35944_v52 = vld [vmem:[%s42060_s1 + $0x18] sm:$0x7]  ;;  %vm24326_vm4 = vcmask 10240   ;;  %vm24334_vm5 = vcmask 12290   ;;  %vm24342_vm6 = vcmask 14340   ;;  %s27633_s25 = sshll.u32 %s35695_s22, 4 }
  0x19   : > { %s35469_s14 = smul.u32 4752, %s218_s11  ;;  %29816 = vmatprep.subr.msk.mxu1 %vm442_vm0, %v224_v3  ;;  %vm24406_vm7 = vcmask 8192   ;;  %s42017_s8 = scalar_lea.hbm %s42064_s5, %s27633_s25 }
  0x1a   : > { %s35643_s22 = smov [#allocation3]  }
  0x1b   : > { %s35745_s17 = scalar_lea.vmem %s42059_s0, %s35469_s14  ;;  %s35580_s11 = sshll.u32 %s35643_s22, 4  ;;  %s35581_s11 = int_to_ptr.vmem [resolvable:$false] %s35580_s11 }
  0x1c   : > { %v35748_v4 = vld [vmem:[%s35745_s17 + $0x48] sm:$0xff]  ;;  %v35751_v5 = vld [vmem:[%s35745_s17 + $0x50] sm:$0xff]  ;;  %v35754_v6 = vld [vmem:[%s35745_s17 + $0x58] sm:$0xff]  ;;  %s35582_s12 = scalar_lea.vmem %s35581_s11, 32 }
  0x1d   : > { %29894 = vmatprep.mubr.msk.f32.mxu0 %vm369_vm1, %v35748_v4  ;;  %v35769_v8 = vld [vmem:[%s35745_s17 + $0x60] sm:$0xff]  ;;  %v35772_v9 = vld [vmem:[%s35745_s17 + $0x68] sm:$0xff]  ;;  %v35781_v10 = vld [vmem:[%s35745_s17 + $0x70] sm:$0xff] }
  0x1e   : > { %29895 = vmatmul.mubr.msk.f32.vlgmr.msra.gmra.mrb[0].mxu0 %vm369_vm1, %v35751_v5  ;;  %v35784_v11 = vld [vmem:[%s35745_s17 + $0x78] sm:$0xff]  ;;  %v345_v12 = vld [vmem:[%s35745_s17 + $0x1] sm:$0xff]  ;;  %v346_v13 = vld [vmem:[%s35745_s17 + $0x9] sm:$0xff] }
  0x1f   : > { %29931 = vmatpush3.msk.msra.mxu0 %vm442_vm0, %v24484_v1  ;;  %29897 = vmatprep.mubr.msk.f32.mxu0 %vm369_vm1, %v35754_v6  ;;  %v347_v14 = vld [vmem:[%s35745_s17 + $0x11] sm:$0xff]  ;;  %v35796_v15 = vld [vmem:[%s35745_s17 + $0x80] sm:$0xff]  ;;  %v350_v20 = vld [vmem:[%s35745_s17 + $0x29] sm:$0xff] }
  0x20   : > { %29968 = vmatprep.subr.msk.mxu0 %vm442_vm0, %v35761_v7  ;;  %29780 = vmatprep.mubr.msk.f32.mxu1 %vm369_vm1, %v345_v12  ;;  %v348_v16 = vld [vmem:[%s35745_s17 + $0x19] sm:$0xff]  ;;  %v35801_v17 = vld [vmem:[%s35745_s17 + $0x90] sm:$0xff]  ;;  %v349_v18 = vld [vmem:[%s35745_s17 + $0x21] sm:$0xff] }
  0x21   : > { %29781 = vmatmul.mubr.msk.f32.vlgmr.msra.gmra.mrb[0].mxu1 %vm369_vm1, %v346_v13  ;;  %v35811_v19 = vld [vmem:[%s35745_s17 + $0x98] sm:$0xff]  ;;  %v35816_v21 = vld [vmem:[%s35745_s17 + $0xa0] sm:$0xff]  ;;  %v35825_v23 = vld [vmem:[%s35745_s17 + $0xa8] sm:$0xff] }
  0x22   : > { %29898 = vmatmul.mubr.msk.f32.gmra.mrb[2].mxu0 %vm369_vm1, %v35769_v8  ;;  %29783 = vmatprep.mubr.msk.f32.mxu1 %vm369_vm1, %v347_v14  ;;  %v351_v22 = vld [vmem:[%s35745_s17 + $0x31] sm:$0xff]  ;;  %v352_v24 = vld [vmem:[%s35745_s17 + $0x39] sm:$0xff]  ;;  %v24677_v26 = vld [vmem:[%s35745_s17 + $0x49] sm:$0xff] }
  0x23   : > { %29900 = vmatprep.mubr.msk.f32.mxu0 %vm369_vm1, %v35772_v9  ;;  %29817 = vmatpush3.msk.msra.mxu1 %vm442_vm0, %v224_v3  ;;  %v35830_v25 = vld [vmem:[%s35745_s17 + $0xb0] sm:$0xff]  ;;  %v35839_v27 = vld [vmem:[%s35745_s17 + $0xb8] sm:$0xff]  ;;  %v35843_v28 = vld [vmem:[%s35745_s17 + $0xc0] sm:$0xff] }
  0x24   : > { %v24678_v29 = vld [vmem:[%s35745_s17 + $0x51] sm:$0xff]  ;;  %v24679_v30 = vld [vmem:[%s35745_s17 + $0x59] sm:$0xff]  ;;  %v35853_v31 = vld [vmem:[%s35745_s17 + $0xc8] sm:$0xff]  ;;  %29854 = vmatprep.subr.msk.mxu1 %vm442_vm0, %v24482_v34 }
  0x25   : > { %29784 = vmatmul.mubr.msk.f32.gmra.mrb[2].mxu1 %vm369_vm1, %v348_v16  ;;  %v35857_v32 = vld [vmem:[%s35745_s17 + $0xd8] sm:$0xff]  ;;  %v24680_v33 = vld [vmem:[%s35745_s17 + $0x61] sm:$0xff]  ;;  %v24681_v35 = vld [vmem:[%s35745_s17 + $0x69] sm:$0xff] }
  0x26   : > { %29901 = vmatmul.mubr.msk.f32.gmra.mrb[4].mxu0 %vm369_vm1, %v35781_v10  ;;  %29786 = vmatprep.mubr.msk.f32.mxu1 %vm369_vm1, %v349_v18  ;;  %v35870_v36 = vld [vmem:[%s35745_s17 + $0xe0] sm:$0xff]  ;;  %v35874_v37 = vld [vmem:[%s35745_s17 + $0xe8] sm:$0xff]  ;;  %v24682_v38 = vld [vmem:[%s35745_s17 + $0x71] sm:$0xff] }
  0x27   : > { %29903 = vmatprep.mubr.msk.f32.mxu0 %vm369_vm1, %v35784_v11  ;;  %v24683_v39 = vld [vmem:[%s35745_s17 + $0x79] sm:$0xff]  ;;  %v35885_v40 = vld [vmem:[%s35745_s17 + $0xf0] sm:$0xff]  ;;  %v24684_v42 = vld [vmem:[%s35745_s17 + $0x81] sm:$0xff] }
  0x28   : > { %v35889_v41 = vld [vmem:[%s35745_s17 + $0xf8] sm:$0xff]  ;;  %v35901_v44 = vld [vmem:[%s35745_s17 + $0x100] sm:$0xff]  ;;  %v35906_v45 = vld [vmem:[%s35745_s17 + $0x108] sm:$0xff] }
  0x29   : > { %29787 = vmatmul.mubr.msk.f32.gmra.mrb[4].mxu1 %vm369_vm1, %v350_v20  ;;  %v35895_v43 = vld [vmem:[%s35745_s17 + $0x91] sm:$0xff]  ;;  %v35909_v46 = vld [vmem:[%s35745_s17 + $0x99] sm:$0xff]  ;;  %v35914_v47 = vld [vmem:[%s35745_s17 + $0xa1] sm:$0xff] }
  0x2a   : > { %29904 = vmatmul.mubr.msk.f32.gmra.mrb[6].mxu0 %vm369_vm1, %v35796_v15  ;;  %29789 = vmatprep.mubr.msk.f32.mxu1 %vm369_vm1, %v351_v22  ;;  %v35921_v48 = vld [vmem:[%s35745_s17 + $0x110] sm:$0xff]  ;;  %v35939_v51 = vld [vmem:[%s35745_s17 + $0xb9] sm:$0xff]  ;;  %v35953_v53 = vld [vmem:[%s35745_s17 + $0xc1] sm:$0xff] }
  0x2b   : > { %29906 = vmatprep.mubr.msk.f32.mxu0 %vm369_vm1, %v35801_v17  ;;  %v35926_v49 = vld [vmem:[%s35745_s17 + $0xa9] sm:$0xff]  ;;  %v35931_v50 = vld [vmem:[%s35745_s17 + $0xb1] sm:$0xff]  ;;  %v321_v54 = vld [vmem:[%s35745_s17] sm:$0xff] }
  0x2c   : > { %v35961_v55 = vld [vmem:[%s35745_s17 + $0xc9] sm:$0xff]  ;;  %v324_v58 = vld [vmem:[%s35745_s17 + $0x18] sm:$0xff]  ;;  %v325_v59 = vld [vmem:[%s35745_s17 + $0x20] sm:$0xff] }
  0x2d   : > { %29790 = vmatmul.mubr.msk.f32.gmra.mrb[6].mxu1 %vm369_vm1, %v352_v24  ;;  %v322_v56 = vld [vmem:[%s35745_s17 + $0x8] sm:$0xff]  ;;  %v323_v57 = vld [vmem:[%s35745_s17 + $0x10] sm:$0xff]  ;;  %v328_v62 = vld [vmem:[%s35745_s17 + $0x38] sm:$0xff] }
  0x2e   : > { %29907 = vmatmul.mubr.msk.f32.gmra.mrb[8].mxu0 %vm369_vm1, %v35811_v19  ;;  %29792 = vmatprep.mubr.msk.f32.mxu1 %vm369_vm1, %v24677_v26  ;;  %v326_v60 = vld [vmem:[%s35745_s17 + $0x28] sm:$0xff]  ;;  %v327_v61 = vld [vmem:[%s35745_s17 + $0x30] sm:$0xff]  ;;  %v36007_v63 = vld [vmem:[%s35745_s17 + $0xd9] sm:$0xff] }
  0x2f   : > { %29909 = vmatprep.mubr.msk.f32.mxu0 %vm369_vm1, %v35816_v21  ;;  %v36016_v0 = vld [vmem:[%s35745_s17 + $0xe1] sm:$0xff]  ;;  %v36021_v1 = vld [vmem:[%s35745_s17 + $0xe9] sm:$0xff]  ;;  %v36030_v2 = vld [vmem:[%s35745_s17 + $0xf1] sm:$0xff] }
  0x30   : > { %v36035_v3 = vld [vmem:[%s35745_s17 + $0xf9] sm:$0xff]  ;;  %v24730_v12 = vld [vmem:[%s35745_s17 + $0x6a] sm:$0xff]  ;;  %v891_v13 = vld [vmem:[%s35745_s17 + $0x2] sm:$0xff] }
  0x31   : > { %29793 = vmatmul.mubr.msk.f32.gmra.mrb[8].mxu1 %vm369_vm1, %v24678_v29  ;;  %v24731_v14 = vld [vmem:[%s35745_s17 + $0x72] sm:$0xff]  ;;  %v24732_v16 = vld [vmem:[%s35745_s17 + $0x7a] sm:$0xff]  ;;  %v24733_v20 = vld [vmem:[%s35745_s17 + $0x82] sm:$0xff] }
  0x32   : > { %29910 = vmatmul.mubr.msk.f32.gmra.mrb[10].mxu0 %vm369_vm1, %v35825_v23  ;;  %29795 = vmatprep.mubr.msk.f32.mxu1 %vm369_vm1, %v24679_v30  ;;  %v893_v18 = vld [vmem:[%s35745_s17 + $0x12] sm:$0xff]  ;;  %v894_v22 = vld [vmem:[%s35745_s17 + $0x1a] sm:$0xff] }
  0x33   : > { %29912 = vmatprep.mubr.msk.f32.mxu0 %vm369_vm1, %v35830_v25  ;;  %v36106_v24 = vld [vmem:[%s35745_s17 + $0x92] sm:$0xff] }
  0x35   : > { %29796 = vmatmul.mubr.msk.f32.gmra.mrb[10].mxu1 %vm369_vm1, %v24680_v33 }
  0x36   : > { %29913 = vmatmul.mubr.msk.f32.gmra.mrb[12].mxu0 %vm369_vm1, %v35839_v27  ;;  %29798 = vmatprep.mubr.msk.f32.mxu1 %vm369_vm1, %v24681_v35 }
  0x37   : > { %29915 = vmatprep.mubr.msk.f32.mxu0 %vm369_vm1, %v35843_v28 }
  0x39   : > { %29799 = vmatmul.mubr.msk.f32.gmra.mrb[12].mxu1 %vm369_vm1, %v24682_v38 }
  0x3a   : > { %29916 = vmatmul.mubr.msk.f32.gmra.mrb[14].mxu0 %vm369_vm1, %v35853_v31  ;;  %29801 = vmatprep.mubr.msk.f32.mxu1 %vm369_vm1, %v24683_v39 }
  0x3b   : > { %29918 = vmatprep.mubr.msk.f32.mxu0 %vm369_vm1, %v35857_v32 }
  0x3d   : > { %29802 = vmatmul.mubr.msk.f32.gmra.mrb[14].mxu1 %vm369_vm1, %v24684_v42 }
  0x3e   : > { %29919 = vmatmul.mubr.msk.f32.gmra.mrb[16].mxu0 %vm369_vm1, %v35870_v36  ;;  %29804 = vmatprep.mubr.msk.f32.mxu1 %vm369_vm1, %v35895_v43 }
  0x3f   : > { %29921 = vmatprep.mubr.msk.f32.mxu0 %vm369_vm1, %v35874_v37 }
  0x41   : > { %29805 = vmatmul.mubr.msk.f32.gmra.mrb[16].mxu1 %vm369_vm1, %v35909_v46 }
  0x42   : > { %29922 = vmatmul.mubr.msk.f32.gmra.mrb[18].mxu0 %vm369_vm1, %v35885_v40  ;;  %29807 = vmatprep.mubr.msk.f32.mxu1 %vm369_vm1, %v35914_v47 }
  0x43   : > { %29924 = vmatprep.mubr.msk.f32.mxu0 %vm369_vm1, %v35889_v41 }
  0x45   : > { %29808 = vmatmul.mubr.msk.f32.gmra.mrb[18].mxu1 %vm369_vm1, %v35926_v49 }
  0x46   : > { %29925 = vmatmul.mubr.msk.f32.gmra.mrb[20].mxu0 %vm369_vm1, %v35901_v44  ;;  %29810 = vmatprep.mubr.msk.f32.mxu1 %vm369_vm1, %v35931_v50 }
  0x47   : > { %29927 = vmatprep.mubr.msk.f32.mxu0 %vm369_vm1, %v35906_v45 }
  0x49   : > { %29811 = vmatmul.mubr.msk.f32.gmra.mrb[20].mxu1 %vm369_vm1, %v35939_v51 }
  0x4a   : > { %29928 = vmatmul.mubr.msk.f32.gmra.mrb[22].mxu0 %vm369_vm1, %v35921_v48  ;;  %29813 = vmatprep.mubr.msk.f32.mxu1 %vm369_vm1, %v35953_v53 }
  0x4b   : > { %29932 = vmatprep.mubr.msk.f32.mxu0 %vm369_vm1, %v24677_v26  ;;  %v895_v26 = vld [vmem:[%s35745_s17 + $0x22] sm:$0xff] }
  0x4d   : > { %29814 = vmatmul.mubr.msk.f32.gmra.mrb[22].mxu1 %vm369_vm1, %v35961_v55 }
  0x4e   : > { %29933 = vmatmul.mubr.msk.f32.vlgmr.msra.gmra.mrb[0].mxu0 %vm369_vm1, %v24678_v29  ;;  %29818 = vmatprep.mubr.msk.f32.mxu1 %vm369_vm1, %v321_v54  ;;  %v36114_v29 = vld [vmem:[%s35745_s17 + $0x9a] sm:$0xff]  ;;  %v36153_v54 = vld [vmem:[%s35745_s17 + $0xca] sm:$0xff] }
  0x4f   : > { %29969 = vmatpush3.msk.msra.mxu0 %vm442_vm0, %v35761_v7  ;;  %29935 = vmatprep.mubr.msk.f32.mxu0 %vm369_vm1, %v24679_v30  ;;  %v24726_v7 = vld [vmem:[%s35745_s17 + $0x4a] sm:$0xff] }
  0x50   : > { %30006 = vmatprep.subr.msk.mxu0 %vm442_vm0, %v35944_v52  ;;  %v896_v30 = vld [vmem:[%s35745_s17 + $0x2a] sm:$0xff] }
  0x51   : > { %29819 = vmatmul.mubr.msk.f32.vlgmr.msra.gmra.mrb[0].mxu1 %vm369_vm1, %v322_v56  ;;  %v36157_v56 = vld [vmem:[%s35745_s17 + $0xda] sm:$0xff] }
  0x52   : > { %29936 = vmatmul.mubr.msk.f32.gmra.mrb[2].mxu0 %vm369_vm1, %v24680_v33  ;;  %29821 = vmatprep.mubr.msk.f32.mxu1 %vm369_vm1, %v323_v57  ;;  %v36119_v33 = vld [vmem:[%s35745_s17 + $0xa2] sm:$0xff] }
  0x53   : > { %29938 = vmatprep.mubr.msk.f32.mxu0 %vm369_vm1, %v24681_v35  ;;  %29855 = vmatpush3.msk.msra.mxu1 %vm442_vm0, %v24482_v34  ;;  %v897_v34 = vld [vmem:[%s35745_s17 + $0x32] sm:$0xff]  ;;  %v36128_v35 = vld [vmem:[%s35745_s17 + $0xaa] sm:$0xff]  ;;  %v36165_v57 = vld [vmem:[%s35745_s17 + $0xe2] sm:$0xff] }
  0x55   : > { %29822 = vmatmul.mubr.msk.f32.gmra.mrb[2].mxu1 %vm369_vm1, %v324_v58  ;;  %v36169_v58 = vld [vmem:[%s35745_s17 + $0xea] sm:$0xff] }
  0x56   : > { %29939 = vmatmul.mubr.msk.f32.gmra.mrb[4].mxu0 %vm369_vm1, %v24682_v38  ;;  %29824 = vmatprep.mubr.msk.f32.mxu1 %vm369_vm1, %v325_v59  ;;  %v898_v38 = vld [vmem:[%s35745_s17 + $0x3a] sm:$0xff]  ;;  %v36177_v59 = vld [vmem:[%s35745_s17 + $0xf2] sm:$0xff] }
  0x57   : > { %29941 = vmatprep.mubr.msk.f32.mxu0 %vm369_vm1, %v24683_v39  ;;  %v36133_v39 = vld [vmem:[%s35745_s17 + $0xb2] sm:$0xff] }
  0x59   : > { %29825 = vmatmul.mubr.msk.f32.gmra.mrb[4].mxu1 %vm369_vm1, %v326_v60  ;;  %v36181_v60 = vld [vmem:[%s35745_s17 + $0xfa] sm:$0xff] }
  0x5a   : > { %29942 = vmatmul.mubr.msk.f32.gmra.mrb[6].mxu0 %vm369_vm1, %v24684_v42  ;;  %29827 = vmatprep.mubr.msk.f32.mxu1 %vm369_vm1, %v327_v61  ;;  %v36141_v42 = vld [vmem:[%s35745_s17 + $0xba] sm:$0xff]  ;;  %v36189_v61 = vld [vmem:[%s35745_s17 + $0x102] sm:$0xff] }
  0x5b   : > { %29944 = vmatprep.mubr.msk.f32.mxu0 %vm369_vm1, %v35895_v43 }
  0x5d   : > { %29828 = vmatmul.mubr.msk.f32.gmra.mrb[6].mxu1 %vm369_vm1, %v328_v62  ;;  %v36194_v62 = vld [vmem:[%s35745_s17 + $0x10a] sm:$0xff] }
  0x5e   : > { %29945 = vmatmul.mubr.msk.f32.gmra.mrb[8].mxu0 %vm369_vm1, %v35909_v46  ;;  %29830 = vmatprep.mubr.msk.f32.mxu1 %vm369_vm1, %v35748_v4  ;;  %v36044_v4 = vld [vmem:[%s35745_s17 + $0x101] sm:$0xff] }
  0x5f   : > { %29947 = vmatprep.mubr.msk.f32.mxu0 %vm369_vm1, %v35914_v47 }
  0x61   : > { %29831 = vmatmul.mubr.msk.f32.gmra.mrb[8].mxu1 %vm369_vm1, %v35751_v5  ;;  %v36049_v5 = vld [vmem:[%s35745_s17 + $0x109] sm:$0xff] }
  0x62   : > { %29948 = vmatmul.mubr.msk.f32.gmra.mrb[10].mxu0 %vm369_vm1, %v35926_v49  ;;  %29833 = vmatprep.mubr.msk.f32.mxu1 %vm369_vm1, %v35754_v6  ;;  %v36058_v6 = vld [vmem:[%s35745_s17 + $0x111] sm:$0xff] }
  0x63   : > { %29950 = vmatprep.mubr.msk.f32.mxu0 %vm369_vm1, %v35931_v50 }
  0x65   : > { %29834 = vmatmul.mubr.msk.f32.gmra.mrb[10].mxu1 %vm369_vm1, %v35769_v8  ;;  %v24727_v8 = vld [vmem:[%s35745_s17 + $0x52] sm:$0xff] }
  0x66   : > { %29951 = vmatmul.mubr.msk.f32.gmra.mrb[12].mxu0 %vm369_vm1, %v35939_v51  ;;  %29836 = vmatprep.mubr.msk.f32.mxu1 %vm369_vm1, %v35772_v9  ;;  %v24728_v9 = vld [vmem:[%s35745_s17 + $0x5a] sm:$0xff] }
  0x67   : > { %29953 = vmatprep.mubr.msk.f32.mxu0 %vm369_vm1, %v35953_v53 }
  0x69   : > { %29837 = vmatmul.mubr.msk.f32.gmra.mrb[12].mxu1 %vm369_vm1, %v35781_v10  ;;  %v36075_v10 = vld [vmem:[%s42060_s1 + $0x1c] sm:$0x7] }
  0x6a   : > { %29954 = vmatmul.mubr.msk.f32.gmra.mrb[14].mxu0 %vm369_vm1, %v35961_v55  ;;  %29839 = vmatprep.mubr.msk.f32.mxu1 %vm369_vm1, %v35784_v11  ;;  %v24729_v11 = vld [vmem:[%s35745_s17 + $0x62] sm:$0xff] }
  0x6b   : > { %29956 = vmatprep.mubr.msk.f32.mxu0 %vm369_vm1, %v36007_v63 }
  0x6d   : > { %29840 = vmatmul.mubr.msk.f32.gmra.mrb[14].mxu1 %vm369_vm1, %v35796_v15  ;;  %v892_v15 = vld [vmem:[%s35745_s17 + $0xa] sm:$0xff] }
  0x6e   : > { %29957 = vmatmul.mubr.msk.f32.gmra.mrb[16].mxu0 %vm369_vm1, %v36016_v0  ;;  %29842 = vmatprep.mubr.msk.f32.mxu1 %vm369_vm1, %v35801_v17 }
  0x6f   : > { %29959 = vmatprep.mubr.msk.f32.mxu0 %vm369_vm1, %v36021_v1 }
  0x71   : > { %29843 = vmatmul.mubr.msk.f32.gmra.mrb[16].mxu1 %vm369_vm1, %v35811_v19 }
  0x72   : > { %29960 = vmatmul.mubr.msk.f32.gmra.mrb[18].mxu0 %vm369_vm1, %v36030_v2  ;;  %29845 = vmatprep.mubr.msk.f32.mxu1 %vm369_vm1, %v35816_v21 }
  0x73   : > { %29962 = vmatprep.mubr.msk.f32.mxu0 %vm369_vm1, %v36035_v3 }
  0x75   : > { %29846 = vmatmul.mubr.msk.f32.gmra.mrb[18].mxu1 %vm369_vm1, %v35825_v23 }
  0x76   : > { %29963 = vmatmul.mubr.msk.f32.gmra.mrb[20].mxu0 %vm369_vm1, %v36044_v4  ;;  %29848 = vmatprep.mubr.msk.f32.mxu1 %vm369_vm1, %v35830_v25 }
  0x77   : > { %29965 = vmatprep.mubr.msk.f32.mxu0 %vm369_vm1, %v36049_v5 }
  0x79   : > { %29849 = vmatmul.mubr.msk.f32.gmra.mrb[20].mxu1 %vm369_vm1, %v35839_v27 }
  0x7a   : > { %29966 = vmatmul.mubr.msk.f32.gmra.mrb[22].mxu0 %vm369_vm1, %v36058_v6  ;;  %29851 = vmatprep.mubr.msk.f32.mxu1 %vm369_vm1, %v35843_v28 }
  0x7b   : > { %29970 = vmatprep.mubr.msk.f32.mxu0 %vm369_vm1, %v24726_v7 }
  0x7d   : > { %29852 = vmatmul.mubr.msk.f32.gmra.mrb[22].mxu1 %vm369_vm1, %v35853_v31 }
  0x7e   : > { %29971 = vmatmul.mubr.msk.f32.vlgmr.msra.gmra.mrb[0].mxu0 %vm369_vm1, %v24727_v8  ;;  %29856 = vmatprep.mubr.msk.f32.mxu1 %vm369_vm1, %v891_v13 }
  0x7f   : > { %30007 = vmatpush3.msk.msra.mxu0 %vm442_vm0, %v35944_v52  ;;  %29973 = vmatprep.mubr.msk.f32.mxu0 %vm369_vm1, %v24728_v9  ;;  %v36145_v52 = vld [vmem:[%s35745_s17 + $0xc2] sm:$0xff] }
  0x80   : > { %30044 = vmatprep.subr.msk.mxu0 %vm442_vm0, %v36075_v10 }
  0x81   : > { %29857 = vmatmul.mubr.msk.f32.vlgmr.msra.gmra.mrb[0].mxu1 %vm369_vm1, %v892_v15  ;;  %v24507_v15 = vld [vmem:[%s42062_s3 + $0xd0] sm:$0xff] }
  0x82   : > { %29974 = vmatmul.mubr.msk.f32.gmra.mrb[2].mxu0 %vm369_vm1, %v24729_v11  ;;  %29859 = vmatprep.mubr.msk.f32.mxu1 %vm369_vm1, %v893_v18 }
  0x83   : > { %29976 = vmatprep.mubr.msk.f32.mxu0 %vm369_vm1, %v24730_v12 }
  0x85   : > { %29860 = vmatmul.mubr.msk.f32.gmra.mrb[2].mxu1 %vm369_vm1, %v894_v22 }
  0x86   : > { %29977 = vmatmul.mubr.msk.f32.gmra.mrb[4].mxu0 %vm369_vm1, %v24731_v14  ;;  %29862 = vmatprep.mubr.msk.f32.mxu1 %vm369_vm1, %v895_v26 }
  0x87   : > { %29979 = vmatprep.mubr.msk.f32.mxu0 %vm369_vm1, %v24732_v16 }
  0x89   : > { %29863 = vmatmul.mubr.msk.f32.gmra.mrb[4].mxu1 %vm369_vm1, %v896_v30 }
  0x8a   : > { %29980 = vmatmul.mubr.msk.f32.gmra.mrb[6].mxu0 %vm369_vm1, %v24733_v20  ;;  %29865 = vmatprep.mubr.msk.f32.mxu1 %vm369_vm1, %v897_v34 }
  0x8b   : > { %29982 = vmatprep.mubr.msk.f32.mxu0 %vm369_vm1, %v36106_v24 }
  0x8d   : > { %29866 = vmatmul.mubr.msk.f32.gmra.mrb[6].mxu1 %vm369_vm1, %v898_v38  ;;  %v24510_v38 = vld [vmem:[%s42062_s3 + $0xe8] sm:$0xff] }
  0x8e   : > { %29983 = vmatmul.mubr.msk.f32.gmra.mrb[8].mxu0 %vm369_vm1, %v36114_v29  ;;  %29868 = vmatprep.mubr.msk.f32.mxu1 %vm369_vm1, %v24726_v7  ;;  %v36203_v7 = vld [vmem:[%s35745_s17 + $0x112] sm:$0xff] }
  0x8f   : > { %29985 = vmatprep.mubr.msk.f32.mxu0 %vm369_vm1, %v36119_v33 }
  0x91   : > { %29869 = vmatmul.mubr.msk.f32.gmra.mrb[8].mxu1 %vm369_vm1, %v24727_v8  ;;  %v24488_v8 = vld [vmem:[%s42060_s1 + $0x20] sm:$0x7] }
  0x92   : > { %29986 = vmatmul.mubr.msk.f32.gmra.mrb[10].mxu0 %vm369_vm1, %v36128_v35  ;;  %29871 = vmatprep.mubr.msk.f32.mxu1 %vm369_vm1, %v24728_v9 }
  0x93   : > { %29988 = vmatprep.mubr.msk.f32.mxu0 %vm369_vm1, %v36133_v39 }
  0x95   : > { %29872 = vmatmul.mubr.msk.f32.gmra.mrb[10].mxu1 %vm369_vm1, %v24729_v11 }
  0x96   : > { %29989 = vmatmul.mubr.msk.f32.gmra.mrb[12].mxu0 %vm369_vm1, %v36141_v42  ;;  %29874 = vmatprep.mubr.msk.f32.mxu1 %vm369_vm1, %v24730_v12 }
  0x97   : > { %29991 = vmatprep.mubr.msk.f32.mxu0 %vm369_vm1, %v36145_v52 }
  0x99   : > { %29875 = vmatmul.mubr.msk.f32.gmra.mrb[12].mxu1 %vm369_vm1, %v24731_v14 }
  0x9a   : > { %29992 = vmatmul.mubr.msk.f32.gmra.mrb[14].mxu0 %vm369_vm1, %v36153_v54  ;;  %29877 = vmatprep.mubr.msk.f32.mxu1 %vm369_vm1, %v24732_v16  ;;  %v24508_v16 = vld [vmem:[%s42062_s3 + $0xd8] sm:$0xff] }
  0x9b   : > { %29994 = vmatprep.mubr.msk.f32.mxu0 %vm369_vm1, %v36157_v56  ;;  %v36402_v18 = vpack.c.bf16 %v24508_v16, %v24507_v15 }
  0x9d   : > { %29878 = vmatmul.mubr.msk.f32.gmra.mrb[14].mxu1 %vm369_vm1, %v24733_v20  ;;  %42143 = vst [vmem:[#allocation6_spill] sm:$0xff] %v36402_v18 }
  0x9e   : > { %29995 = vmatmul.mubr.msk.f32.gmra.mrb[16].mxu0 %vm369_vm1, %v36165_v57  ;;  %29880 = vmatprep.mubr.msk.f32.mxu1 %vm369_vm1, %v36106_v24 }
  0x9f   : > { %29997 = vmatprep.mubr.msk.f32.mxu0 %vm369_vm1, %v36169_v58 }
  0xa1   : > { %29881 = vmatmul.mubr.msk.f32.gmra.mrb[16].mxu1 %vm369_vm1, %v36114_v29 }
  0xa2   : > { %29998 = vmatmul.mubr.msk.f32.gmra.mrb[18].mxu0 %vm369_vm1, %v36177_v59  ;;  %29883 = vmatprep.mubr.msk.f32.mxu1 %vm369_vm1, %v36119_v33 }
  0xa3   : > { %30000 = vmatprep.mubr.msk.f32.mxu0 %vm369_vm1, %v36181_v60 }
  0xa5   : > { %29884 = vmatmul.mubr.msk.f32.gmra.mrb[18].mxu1 %vm369_vm1, %v36128_v35 }
  0xa6   : > { %30001 = vmatmul.mubr.msk.f32.gmra.mrb[20].mxu0 %vm369_vm1, %v36189_v61  ;;  %29886 = vmatprep.mubr.msk.f32.mxu1 %vm369_vm1, %v36133_v39 }
  0xa7   : > { %30003 = vmatprep.mubr.msk.f32.mxu0 %vm369_vm1, %v36194_v62 }
  0xa9   : > { %29887 = vmatmul.mubr.msk.f32.gmra.mrb[20].mxu1 %vm369_vm1, %v36141_v42 }
  0xaa   : > { %30004 = vmatmul.mubr.msk.f32.gmra.mrb[22].mxu0 %vm369_vm1, %v36203_v7  ;;  %29889 = vmatprep.mubr.msk.f32.mxu1 %vm369_vm1, %v36145_v52 }
  0xab   : > { %30008 = vmatprep.mubr.msk.f32.mxu0 %vm369_vm1, %v35801_v17  ;;  %v24791_v17 = vld [vmem:[%s35745_s17 + $0x120] sm:$0xff] }
  0xad   : > { %29890 = vmatmul.mubr.msk.f32.gmra.mrb[22].mxu1 %vm369_vm1, %v36153_v54 }
  0xae   : > { %30009 = vmatmul.mubr.msk.f32.vlgmr.msra.gmra.mrb[0].mxu0 %vm369_vm1, %v35811_v19  ;;  %v24792_v19 = vld [vmem:[%s35745_s17 + $0x128] sm:$0xff] }
  0xaf   : > { %30045 = vmatpush3.msk.msra.mxu0 %vm442_vm0, %v36075_v10  ;;  %30011 = vmatprep.mubr.msk.f32.mxu0 %vm369_vm1, %v35816_v21  ;;  %v24793_v21 = vld [vmem:[%s35745_s17 + $0x130] sm:$0xff] }
  0xb0   : > { %30082 = vmatprep.subr.msk.mxu0 %vm442_vm0, %v24488_v8 }
  0xb2   : > { %30012 = vmatmul.mubr.msk.f32.gmra.mrb[2].mxu0 %vm369_vm1, %v35825_v23  ;;  %v24794_v23 = vld [vmem:[%s35745_s17 + $0x138] sm:$0xff] }
  0xb3   : > { %30014 = vmatprep.mubr.msk.f32.mxu0 %vm369_vm1, %v35830_v25  ;;  %v24795_v25 = vld [vmem:[%s35745_s17 + $0x140] sm:$0xff] }
  0xb6   : > { %30015 = vmatmul.mubr.msk.f32.gmra.mrb[4].mxu0 %vm369_vm1, %v35839_v27  ;;  %v24796_v27 = vld [vmem:[%s35745_s17 + $0x148] sm:$0xff] }
  0xb7   : > { %30017 = vmatprep.mubr.msk.f32.mxu0 %vm369_vm1, %v35843_v28  ;;  %v24797_v28 = vld [vmem:[%s35745_s17 + $0x150] sm:$0xff] }
  0xba   : > { %30018 = vmatmul.mubr.msk.f32.gmra.mrb[6].mxu0 %vm369_vm1, %v35853_v31  ;;  %v24798_v31 = vld [vmem:[%s35745_s17 + $0x158] sm:$0xff] }
  0xbb   : > { %30020 = vmatprep.mubr.msk.f32.mxu0 %vm369_vm1, %v35857_v32  ;;  %v24840_v32 = vld [vmem:[%s35745_s17 + $0x121] sm:$0xff] }
  0xbe   : > { %30021 = vmatmul.mubr.msk.f32.gmra.mrb[8].mxu0 %vm369_vm1, %v35870_v36  ;;  %v24841_v36 = vld [vmem:[%s35745_s17 + $0x129] sm:$0xff] }
  0xbf   : > { %30023 = vmatprep.mubr.msk.f32.mxu0 %vm369_vm1, %v35874_v37  ;;  %v24842_v37 = vld [vmem:[%s35745_s17 + $0x131] sm:$0xff] }
  0xc2   : > { %30024 = vmatmul.mubr.msk.f32.gmra.mrb[10].mxu0 %vm369_vm1, %v35885_v40  ;;  %v24843_v40 = vld [vmem:[%s35745_s17 + $0x139] sm:$0xff] }
  0xc3   : > { %30026 = vmatprep.mubr.msk.f32.mxu0 %vm369_vm1, %v35889_v41  ;;  %v24844_v41 = vld [vmem:[%s35745_s17 + $0x141] sm:$0xff] }
  0xc6   : > { %30027 = vmatmul.mubr.msk.f32.gmra.mrb[12].mxu0 %vm369_vm1, %v35901_v44  ;;  %v24846_v44 = vld [vmem:[%s35745_s17 + $0x151] sm:$0xff] }
  0xc7   : > { %30029 = vmatprep.mubr.msk.f32.mxu0 %vm369_vm1, %v35906_v45  ;;  %v24505_v45 = vld [vmem:[%s42062_s3 + $0xc0] sm:$0xff] }
  0xca   : > { %30030 = vmatmul.mubr.msk.f32.gmra.mrb[14].mxu0 %vm369_vm1, %v35921_v48  ;;  %v42067_v48 = vmov 0.0|0.0  }
  0xcb   : > { %30032 = vmatprep.mubr.msk.f32.mxu0 %vm369_vm1, %v24791_v17  ;;  %33369 = vmatprep.subr.bf16.mxu1 %v42067_v48 }
  0xce   : > { %30033 = vmatmul.mubr.msk.f32.gmra.mrb[16].mxu0 %vm369_vm1, %v24792_v19 }
  0xcf   : > { %30035 = vmatprep.mubr.msk.f32.mxu0 %vm369_vm1, %v24793_v21 }
  0xd2   : > { %30036 = vmatmul.mubr.msk.f32.gmra.mrb[18].mxu0 %vm369_vm1, %v24794_v23 }
  0xd3   : > { %30038 = vmatprep.mubr.msk.f32.mxu0 %vm369_vm1, %v24795_v25 }
  0xd6   : > { %30039 = vmatmul.mubr.msk.f32.gmra.mrb[20].mxu0 %vm369_vm1, %v24796_v27 }
  0xd7   : > { %30041 = vmatprep.mubr.msk.f32.mxu0 %vm369_vm1, %v24797_v28 }
  0xda   : > { %30042 = vmatmul.mubr.msk.f32.gmra.mrb[22].mxu0 %vm369_vm1, %v24798_v31 }
  0xdb   : > { %30046 = vmatprep.mubr.msk.f32.mxu0 %vm369_vm1, %v35895_v43  ;;  %v24845_v43 = vld [vmem:[%s35745_s17 + $0x149] sm:$0xff] }
  0xde   : > { %30047 = vmatmul.mubr.msk.f32.vlgmr.msra.gmra.mrb[0].mxu0 %vm369_vm1, %v35909_v46  ;;  %v24506_v46 = vld [vmem:[%s42062_s3 + $0xc8] sm:$0xff] }
  0xdf   : > { %30083 = vmatpush3.msk.msra.mxu0 %vm442_vm0, %v24488_v8  ;;  %30049 = vmatprep.mubr.msk.f32.mxu0 %vm369_vm1, %v35914_v47  ;;  %v24847_v47 = vld [vmem:[%s35745_s17 + $0x159] sm:$0xff] }
  0xe0   : > { %33477 = vmatprep.subr.bf16.mxu0 %v42067_v48 }
  0xe2   : > { %30050 = vmatmul.mubr.msk.f32.gmra.mrb[2].mxu0 %vm369_vm1, %v35926_v49  ;;  %v36328_v49 = vpack.c.bf16 %v24506_v46, %v24505_v45 }
  0xe3   : > { %30052 = vmatprep.mubr.msk.f32.mxu0 %vm369_vm1, %v35931_v50  ;;  %v24889_v50 = vld [vmem:[%s35745_s17 + $0x122] sm:$0xff] }
  0xe4   : > { %33371 = vmatpush3.bf16.msra.mxu1 %v36328_v49 }
  0xe5   : > { %33372 = vmatprep.subr.bf16.mxu1 %v42067_v48 }
  0xe6   : > { %30053 = vmatmul.mubr.msk.f32.gmra.mrb[4].mxu0 %vm369_vm1, %v35939_v51  ;;  %v24890_v51 = vld [vmem:[%s35745_s17 + $0x12a] sm:$0xff] }
  0xe7   : > { %30055 = vmatprep.mubr.msk.f32.mxu0 %vm369_vm1, %v35953_v53  ;;  %v24891_v53 = vld [vmem:[%s35745_s17 + $0x132] sm:$0xff] }
  0xe8   : > { %33374 = vmatpush3.bf16.msra.mxu1 %v36402_v18 }
  0xe9   : > { %33375 = vmatprep.subr.bf16.mxu1 %v42067_v48 }
  0xea   : > { %30056 = vmatmul.mubr.msk.f32.gmra.mrb[6].mxu0 %vm369_vm1, %v35961_v55  ;;  %v24892_v55 = vld [vmem:[%s35745_s17 + $0x13a] sm:$0xff] }
  0xeb   : > { %30058 = vmatprep.mubr.msk.f32.mxu0 %vm369_vm1, %v36007_v63  ;;  %v24893_v63 = vld [vmem:[%s35745_s17 + $0x142] sm:$0xff] }
  0xee   : > { %30059 = vmatmul.mubr.msk.f32.gmra.mrb[8].mxu0 %vm369_vm1, %v36016_v0  ;;  %v24894_v0 = vld [vmem:[%s35745_s17 + $0x14a] sm:$0xff] }
  0xef   : > { %30061 = vmatprep.mubr.msk.f32.mxu0 %vm369_vm1, %v36021_v1  ;;  %v24895_v1 = vld [vmem:[%s35745_s17 + $0x152] sm:$0xff] }
  0xf2   : > { %30062 = vmatmul.mubr.msk.f32.gmra.mrb[10].mxu0 %vm369_vm1, %v36030_v2  ;;  %v24896_v2 = vld [vmem:[%s35745_s17 + $0x15a] sm:$0xff] }
  0xf3   : > { %30064 = vmatprep.mubr.msk.f32.mxu0 %vm369_vm1, %v36035_v3 }
  0xf6   : > { %30065 = vmatmul.mubr.msk.f32.gmra.mrb[12].mxu0 %vm369_vm1, %v36044_v4 }
  0xf7   : > { %30067 = vmatprep.mubr.msk.f32.mxu0 %vm369_vm1, %v36049_v5 }
  0xfa   : > { %30068 = vmatmul.mubr.msk.f32.gmra.mrb[14].mxu0 %vm369_vm1, %v36058_v6 }
  0xfb   : > { %30070 = vmatprep.mubr.msk.f32.mxu0 %vm369_vm1, %v24840_v32 }
  0xfe   : > { %30071 = vmatmul.mubr.msk.f32.gmra.mrb[16].mxu0 %vm369_vm1, %v24841_v36 }
  0xff   : > { %30073 = vmatprep.mubr.msk.f32.mxu0 %vm369_vm1, %v24842_v37 }
 0x102   : > { %30074 = vmatmul.mubr.msk.f32.gmra.mrb[18].mxu0 %vm369_vm1, %v24843_v40 }
 0x103   : > { %30076 = vmatprep.mubr.msk.f32.mxu0 %vm369_vm1, %v24844_v41 }
 0x106   : > { %30077 = vmatmul.mubr.msk.f32.gmra.mrb[20].mxu0 %vm369_vm1, %v24845_v43 }
 0x107   : > { %30079 = vmatprep.mubr.msk.f32.mxu0 %vm369_vm1, %v24846_v44 }
 0x10a   : > { %30080 = vmatmul.mubr.msk.f32.gmra.mrb[22].mxu0 %vm369_vm1, %v24847_v47 }
 0x10b   : > { %30084 = vmatprep.mubr.msk.f32.mxu0 %vm369_vm1, %v36106_v24 }
 0x10e   : > { %30085 = vmatmul.mubr.msk.f32.vlgmr.msra.gmra.mrb[0].mxu0 %vm369_vm1, %v36114_v29 }
 0x10f   : > { %30087 = vmatprep.mubr.msk.f32.mxu0 %vm369_vm1, %v36119_v33  ;;  %33479 = vmatpush3.bf16.msra.mxu0 %v36328_v49 }
 0x110   : > { %33480 = vmatprep.subr.bf16.mxu0 %v42067_v48 }
 0x112   : > { %30088 = vmatmul.mubr.msk.f32.gmra.mrb[2].mxu0 %vm369_vm1, %v36128_v35  ;;  %v24509_v35 = vld [vmem:[%s42062_s3 + $0xe0] sm:$0xff] }
 0x113   : > { %30090 = vmatprep.mubr.msk.f32.mxu0 %vm369_vm1, %v36133_v39  ;;  %33482 = vmatpush3.bf16.msra.mxu0 %v36402_v18  ;;  %v36430_v39 = vpack.c.bf16 %v24510_v38, %v24509_v35 }
 0x114   : > { %33483 = vmatprep.subr.bf16.mxu0 %v42067_v48 }
 0x115   : > { %42144 = vst [vmem:[#allocation7_spill] sm:$0xff] %v36430_v39  ;;  %33377 = vmatpush3.bf16.msra.mxu1 %v36430_v39 }
 0x116   : > { %30091 = vmatmul.mubr.msk.f32.gmra.mrb[4].mxu0 %vm369_vm1, %v36141_v42  ;;  %33378 = vmatprep.subr.bf16.mxu1 %v42067_v48 }
 0x117   : > { %30093 = vmatprep.mubr.msk.f32.mxu0 %vm369_vm1, %v36145_v52  ;;  %33485 = vmatpush3.bf16.msra.mxu0 %v36430_v39 }
 0x118   : > { %33486 = vmatprep.subr.bf16.mxu0 %v42067_v48 }
 0x11a   : > { %30094 = vmatmul.mubr.msk.f32.gmra.mrb[6].mxu0 %vm369_vm1, %v36153_v54 }
 0x11b   : > { %30096 = vmatprep.mubr.msk.f32.mxu0 %vm369_vm1, %v36157_v56 }
 0x11e   : > { %30097 = vmatmul.mubr.msk.f32.gmra.mrb[8].mxu0 %vm369_vm1, %v36165_v57 }
 0x11f   : > { %30099 = vmatprep.mubr.msk.f32.mxu0 %vm369_vm1, %v36169_v58  ;;  %v24511_v58 = vld [vmem:[%s42062_s3 + $0xf0] sm:$0xff] }
 0x122   : > { %30100 = vmatmul.mubr.msk.f32.gmra.mrb[10].mxu0 %vm369_vm1, %v36177_v59  ;;  %v24512_v59 = vld [vmem:[%s42062_s3 + $0xf8] sm:$0xff] }
 0x123   : > { %30102 = vmatprep.mubr.msk.f32.mxu0 %vm369_vm1, %v36181_v60 }
 0x126   : > { %30103 = vmatmul.mubr.msk.f32.gmra.mrb[12].mxu0 %vm369_vm1, %v36189_v61  ;;  %v36454_v61 = vpack.c.bf16 %v24512_v59, %v24511_v58 }
 0x127   : > { %30105 = vmatprep.mubr.msk.f32.mxu0 %vm369_vm1, %v36194_v62  ;;  %v42065_v62 = vmov 0.0  }
 0x128   : > { %42145 = vst [vmem:[#allocation8_spill] sm:$0xff] %v36454_v61  ;;  %33380 = vmatpush3.bf16.msra.mxu1 %v36454_v61  ;;  %33488 = vmatpush3.bf16.msra.mxu0 %v36454_v61 }
 0x129   : > { %33381 = vmatprep.subr.bf16.mxu1 %v42067_v48  ;;  %33489 = vmatprep.subr.bf16.mxu0 %v42067_v48 }
 0x12a   : > { %30106 = vmatmul.mubr.msk.f32.gmra.mrb[14].mxu0 %vm369_vm1, %v36203_v7  ;;  %30136 = vmatprep.mubr.msk.f32.mxu1 %vm35641_vm2, %v42065_v62  ;;  %v36467_v7 = vld [vmem:[%s42061_s2] ss:$0 sm:$0xff] }
 0x12b   : > { %30108 = vmatprep.mubr.msk.f32.mxu0 %vm369_vm1, %v24889_v50 }
 0x12e   : > { %30109 = vmatmul.mubr.msk.f32.gmra.mrb[16].mxu0 %vm369_vm1, %v24890_v51 }
 0x12f   : > { %30111 = vmatprep.mubr.msk.f32.mxu0 %vm369_vm1, %v24891_v53 }
 0x132   : > { %30112 = vmatmul.mubr.msk.f32.gmra.mrb[18].mxu0 %vm369_vm1, %v24892_v55 }
 0x133   : > { %30114 = vmatprep.mubr.msk.f32.mxu0 %vm369_vm1, %v24893_v63 }
 0x136   : > { %30115 = vmatmul.mubr.msk.f32.gmra.mrb[20].mxu0 %vm369_vm1, %v24894_v0 }
 0x137   : > { %30117 = vmatprep.mubr.msk.f32.mxu0 %vm369_vm1, %v24895_v1 }
 0x13a   : > { %30118 = vmatmul.mubr.msk.f32.gmra.mrb[22].mxu0 %vm369_vm1, %v24896_v2 }
 0x13b   : > { %30649 = vmatprep.mubr.msk.f32.mxu0 %vm35641_vm2, %v42065_v62 }
 0x154   : > { %v29858_v3 = vpop.f32.mrb[0].mxu1 }
 0x155   : > { %v1056_v4 = vpop.f32.mrb[1].mxu1 }
 0x158   : > { %v29861_v5 = vpop.f32.mrb[2].mxu1 }
 0x159   : > { %v1066_v6 = vpop.f32.mrb[3].mxu1 }
 0x15c   : > { %v36384_v9 = vpop.f32.mrb[4].mxu1 }
 0x15d   : > { %v36386_v10 = vpop.f32.mrb[5].mxu1 }
 0x160   : > { %v36388_v11 = vpop.f32.mrb[6].mxu1 }
 0x161   : > { %v36390_v12 = vpop.f32.mrb[7].mxu1 }
 0x164   : > { %v36392_v13 = vpop.f32.mrb[8].mxu1 }
 0x165   : > { %v36394_v14 = vpop.f32.mrb[9].mxu1 }
 0x168   : > { %v36404_v20 = vpop.f32.mrb[10].mxu1 }
 0x169   : > { %v36406_v22 = vpop.f32.mrb[11].mxu1 }
 0x16c   : > { %v36412_v24 = vpop.f32.mrb[12].mxu1 }
 0x16d   : > { %v36414_v26 = vpop.f32.mrb[13].mxu1 }
 0x170   : > { %v36416_v29 = vpop.f32.mrb[14].mxu1 }
 0x171   : > { %v36418_v30 = vpop.f32.mrb[15].mxu1 }
 0x174   : > { %v36420_v33 = vpop.f32.mrb[16].mxu1 }
 0x175   : > { %v36422_v34 = vpop.f32.mrb[17].mxu1 }
 0x178   : > { %v36432_v42 = vpop.f32.mrb[18].mxu1 }
 0x179   : > { %v36434_v52 = vpop.f32.mrb[19].mxu1 }
 0x17c   : > { %v36440_v54 = vpop.f32.mrb[20].mxu1 }
 0x17d   : > { %v36442_v56 = vpop.f32.mrb[21].mxu1 }
 0x180   : > { %v36444_v57 = vpop.f32.mrb[22].mxu1 }
 0x181   : > { %v36452_v60 = vpop.f32.mrb[23].mxu1 }
 0x1e1   : > { %v30086_v8 = vpop.f32.mrb[0].mxu0 }
 0x1e2   : > { %v34125_v17 = vadd.f32 %v30086_v8, %v29858_v3  ;;  %v2906_v19 = vpop.f32.mrb[1].mxu0 }
 0x1e3   : > { %v34126_v21 = vadd.f32 %v2906_v19, %v1056_v4 }
 0x1e4   : > { %v3056_v23 = vadd.f32 %v34125_v17, %v36467_v7 }
 0x1e5   : > { %v3055_v25 = vadd.f32 %v34126_v21, %v36467_v7  ;;  %v30089_v27 = vpop.f32.mrb[2].mxu0 }
 0x1e6   : > { %3081 = vst.msk [vmem:[#allocation2 + $0x8] sm:$0xff] %vm3079_vm3, %v3056_v23  ;;  %v34127_v28 = vadd.f32 %v30089_v27, %v29861_v5  ;;  %v2916_v31 = vpop.f32.mrb[3].mxu0  ;;  %v241_v27 = vld [vmem:[%s42062_s3] sm:$0xff] }
 0x1e7   : > { %3080 = vst.msk [vmem:[#allocation2] sm:$0xff] %vm3079_vm3, %v3055_v25  ;;  %v34128_v32 = vadd.f32 %v2916_v31, %v1066_v6 }
 0x1e8   : > { %v3058_v36 = vadd.f32 %v34127_v28, %v36467_v7  ;;  %v242_v28 = vld [vmem:[%s42062_s3 + $0x8] sm:$0xff] }
 0x1e9   : > { %v3057_v37 = vadd.f32 %v34128_v32, %v36467_v7  ;;  %v30092_v40 = vpop.f32.mrb[4].mxu0 }
 0x1ea   : > { %3083 = vst.msk [vmem:[#allocation2 + $0x18] sm:$0xff] %vm3079_vm3, %v3058_v36  ;;  %v34129_v41 = vadd.f32 %v30092_v40, %v36384_v9  ;;  %v2926_v43 = vpop.f32.mrb[5].mxu0  ;;  %v36528_v36 = vpack.c.bf16 %v242_v28, %v241_v27  ;;  %v24515_v28 = vld [vmem:[%s42062_s3 + $0x110] sm:$0xff] }
 0x1eb   : > { %3082 = vst.msk [vmem:[#allocation2 + $0x10] sm:$0xff] %vm3079_vm3, %v3057_v37  ;;  %v34130_v44 = vadd.f32 %v2926_v43, %v36386_v10 }
 0x1ec   : > { %v3060_v45 = vadd.f32 %v34129_v41, %v36467_v7  ;;  %42146 = vst [vmem:[#allocation9_spill] sm:$0xff] %v36528_v36  ;;  %v243_v41 = vld [vmem:[%s42062_s3 + $0x10] sm:$0xff] }
 0x1ed   : > { %v3059_v46 = vadd.f32 %v34130_v44, %v36467_v7  ;;  %v30095_v47 = vpop.f32.mrb[6].mxu0 }
 0x1ee   : > { %3085 = vst.msk [vmem:[#allocation2 + $0x28] sm:$0xff] %vm3079_vm3, %v3060_v45  ;;  %v34131_v50 = vadd.f32 %v30095_v47, %v36388_v11  ;;  %v2936_v51 = vpop.f32.mrb[7].mxu0 }
 0x1ef   : > { %3084 = vst.msk [vmem:[#allocation2 + $0x20] sm:$0xff] %vm3079_vm3, %v3059_v46  ;;  %v34132_v53 = vadd.f32 %v2936_v51, %v36390_v12  ;;  %v246_v51 = vld [vmem:[%s42062_s3 + $0x28] sm:$0xff] }
 0x1f0   : > { %v3062_v55 = vadd.f32 %v34131_v50, %v36467_v7 }
 0x1f1   : > { %v3061_v63 = vadd.f32 %v34132_v53, %v36467_v7  ;;  %v30098_v0 = vpop.f32.mrb[8].mxu0 }
 0x1f2   : > { %3087 = vst.msk [vmem:[#allocation2 + $0x38] sm:$0xff] %vm3079_vm3, %v3062_v55  ;;  %v34133_v1 = vadd.f32 %v30098_v0, %v36392_v13  ;;  %v2946_v2 = vpop.f32.mrb[9].mxu0 }
 0x1f3   : > { %3086 = vst.msk [vmem:[#allocation2 + $0x30] sm:$0xff] %vm3079_vm3, %v3061_v63  ;;  %v34134_v3 = vadd.f32 %v2946_v2, %v36394_v14 }
 0x1f4   : > { %v3064_v4 = vadd.f32 %v34133_v1, %v36467_v7 }
 0x1f5   : > { %v3063_v5 = vadd.f32 %v34134_v3, %v36467_v7  ;;  %v30101_v6 = vpop.f32.mrb[10].mxu0  ;;  %v247_v3 = vld [vmem:[%s42062_s3 + $0x30] sm:$0xff] }
 0x1f6   : > { %3089 = vst.msk [vmem:[#allocation2 + $0x48] sm:$0xff] %vm3079_vm3, %v3064_v4  ;;  %v34135_v9 = vadd.f32 %v30101_v6, %v36404_v20  ;;  %v2956_v10 = vpop.f32.mrb[11].mxu0  ;;  %v24530_v4 = vld [vmem:[%s42062_s3 + $0x188] sm:$0xff]  ;;  %v24531_v6 = vld [vmem:[%s42062_s3 + $0x190] sm:$0xff] }
 0x1f7   : > { %3088 = vst.msk [vmem:[#allocation2 + $0x40] sm:$0xff] %vm3079_vm3, %v3063_v5  ;;  %v34136_v11 = vadd.f32 %v2956_v10, %v36406_v22 }
 0x1f8   : > { %v3066_v12 = vadd.f32 %v34135_v9, %v36467_v7  ;;  %v24532_v9 = vld [vmem:[%s42062_s3 + $0x198] sm:$0xff] }
 0x1f9   : > { %v3065_v13 = vadd.f32 %v34136_v11, %v36467_v7  ;;  %v30104_v15 = vpop.f32.mrb[12].mxu0  ;;  %v36596_v11 = vpack.c.bf16 %v24532_v9, %v24531_v6  ;;  %v24500_v6 = vld [vmem:[%s42062_s3 + $0x98] sm:$0xff] }
 0x1fa   : > { %3091 = vst.msk [vmem:[#allocation2 + $0x58] sm:$0xff] %vm3079_vm3, %v3066_v12  ;;  %v34137_v14 = vadd.f32 %v30104_v15, %v36412_v24  ;;  %v2966_v16 = vpop.f32.mrb[13].mxu0  ;;  %v3104_v10 = vld [vmem:[#allocation2] ss:$10 sm:$0x7f] }
 0x1fb   : > { %3090 = vst.msk [vmem:[#allocation2 + $0x50] sm:$0xff] %vm3079_vm3, %v3065_v13  ;;  %v34138_v20 = vadd.f32 %v2966_v16, %v36414_v26  ;;  %42151 = vst [vmem:[#allocation14_spill] sm:$0xff] %v36596_v11  ;;  %v24533_v12 = vld [vmem:[%s42062_s3 + $0x1a0] sm:$0xff]  ;;  %v24534_v13 = vld [vmem:[%s42062_s3 + $0x1a8] sm:$0xff] }
 0x1fc   : > { %v3068_v35 = vadd.f32 %v34137_v14, %v36467_v7  ;;  %v36608_v15 = vpack.c.bf16 %v24534_v13, %v24533_v12  ;;  %v24535_v14 = vld [vmem:[%s42062_s3 + $0x1b0] sm:$0xff]  ;;  %v24536_v16 = vld [vmem:[%s42062_s3 + $0x1b8] sm:$0xff]  ;;  %v24501_v12 = vld [vmem:[%s42062_s3 + $0xa0] sm:$0xff] }
 0x1fd   : > { %v30107_v38 = vpop.f32.mrb[14].mxu0  ;;  %v3067_v22 = vadd.f32 %v34138_v20, %v36467_v7  ;;  %v24489_v20 = vld [vmem:[%s42062_s3 + $0x40] sm:$0xff]  ;;  %v24502_v13 = vld [vmem:[%s42062_s3 + $0xa8] sm:$0xff] }
 0x1fe   : > { %3093 = vst.msk [vmem:[#allocation2 + $0x68] sm:$0xff] %vm3079_vm3, %v3068_v35  ;;  %v34139_v58 = vadd.f32 %v30107_v38, %v36416_v29  ;;  %v2976_v59 = vpop.f32.mrb[15].mxu0  ;;  %42152 = vst [vmem:[#allocation15_spill] sm:$0xff] %v36608_v15  ;;  %v36618_v35 = vpack.c.bf16 %v24536_v16, %v24535_v14  ;;  %v24490_v38 = vld [vmem:[%s42062_s3 + $0x48] sm:$0xff]  ;;  %v36780_v14 = vpack.c.bf16 %v24502_v13, %v24501_v12  ;;  %v24503_v16 = vld [vmem:[%s42062_s3 + $0xb0] sm:$0xff] }
 0x1ff   : > { %v34140_v8 = vadd.f32 %v2976_v59, %v36418_v30  ;;  %3092 = vst.msk [vmem:[#allocation2 + $0x60] sm:$0xff] %vm3079_vm3, %v3067_v22  ;;  %v36628_v22 = vpack.c.bf16 %v24490_v38, %v24489_v20  ;;  %v24492_v59 = vld [vmem:[%s42062_s3 + $0x58] sm:$0xff]  ;;  %v35513_v12 = vld [vmem:[%s42060_s1] sm:$0x7] }
 0x200   : > { %v3070_v24 = vadd.f32 %v34139_v58, %v36467_v7  ;;  %42153 = vst [vmem:[#allocation16_spill] sm:$0xff] %v36618_v35  ;;  %v24491_v58 = vld [vmem:[%s42062_s3 + $0x50] sm:$0xff]  ;;  %42168 = vst [vmem:[#allocation31_spill] sm:$0xff] %v36780_v14  ;;  %v24504_v20 = vld [vmem:[%s42062_s3 + $0xb8] sm:$0xff] }
 0x201   : > { %v3069_v17 = vadd.f32 %v34140_v8, %v36467_v7  ;;  %v30110_v19 = vpop.f32.mrb[16].mxu0  ;;  %42154 = vst [vmem:[#allocation17_spill] sm:$0xff] %v36628_v22  ;;  %v36790_v38 = vpack.c.bf16 %v24504_v20, %v24503_v16  ;;  %v24959_v13 = vld [vmem:[%s35745_s17 + $0x2e1] sm:$0xff]  ;;  %v24960_v16 = vld [vmem:[%s35745_s17 + $0x2e9] sm:$0xff]  ;;  %v24961_v20 = vld [vmem:[%s35745_s17 + $0x2f1] sm:$0xff] }
 0x202   : > { %3095 = vst.msk [vmem:[#allocation2 + $0x78] sm:$0xff] %vm3079_vm3, %v3070_v24  ;;  %v34141_v26 = vadd.f32 %v30110_v19, %v36420_v33  ;;  %v2986_v21 = vpop.f32.mrb[17].mxu0  ;;  %v36639_v24 = vpack.c.bf16 %v24492_v59, %v24491_v58  ;;  %v24494_v19 = vld [vmem:[%s42062_s3 + $0x68] sm:$0xff]  ;;  %v24521_v58 = vld [vmem:[%s42062_s3 + $0x140] sm:$0xff] }
 0x203   : > { %3094 = vst.msk [vmem:[#allocation2 + $0x70] sm:$0xff] %vm3079_vm3, %v3069_v17  ;;  %v34142_v23 = vadd.f32 %v2986_v21, %v36422_v34  ;;  %v24493_v17 = vld [vmem:[%s42062_s3 + $0x60] sm:$0xff]  ;;  %v24495_v21 = vld [vmem:[%s42062_s3 + $0x70] sm:$0xff]  ;;  %42169 = vst [vmem:[#allocation32_spill] sm:$0xff] %v36790_v38 }
 0x204   : > { %v3072_v29 = vadd.f32 %v34141_v26, %v36467_v7  ;;  %42155 = vst [vmem:[#allocation18_spill] sm:$0xff] %v36639_v24  ;;  %v36651_v26 = vpack.c.bf16 %v24494_v19, %v24493_v17  ;;  %v24522_v59 = vld [vmem:[%s42062_s3 + $0x148] sm:$0xff]  ;;  %v24523_v17 = vld [vmem:[%s42062_s3 + $0x150] sm:$0xff]  ;;  %v24524_v19 = vld [vmem:[%s42062_s3 + $0x158] sm:$0xff] }
 0x205   : > { %v3071_v30 = vadd.f32 %v34142_v23, %v36467_v7  ;;  %v30113_v25 = vpop.f32.mrb[18].mxu0  ;;  %v24496_v23 = vld [vmem:[%s42062_s3 + $0x78] sm:$0xff] }
 0x206   : > { %3097 = vst.msk [vmem:[#allocation2 + $0x88] sm:$0xff] %vm3079_vm3, %v3072_v29  ;;  %v34143_v33 = vadd.f32 %v30113_v25, %v36432_v42  ;;  %v2996_v31 = vpop.f32.mrb[19].mxu0  ;;  %v244_v42 = vld [vmem:[%s42062_s3 + $0x18] sm:$0xff]  ;;  %42156 = vst [vmem:[#allocation19_spill] sm:$0xff] %v36651_v26  ;;  %v36661_v29 = vpack.c.bf16 %v24496_v23, %v24495_v21  ;;  %v24514_v25 = vld [vmem:[%s42062_s3 + $0x108] sm:$0xff]  ;;  %v36811_v23 = vpack.c.bf16 %v24524_v19, %v24523_v17 }
 0x207   : > { %3096 = vst.msk [vmem:[#allocation2 + $0x80] sm:$0xff] %vm3079_vm3, %v3071_v30  ;;  %v34144_v34 = vadd.f32 %v2996_v31, %v36434_v52  ;;  %v36544_v47 = vpack.c.bf16 %v244_v42, %v243_v41  ;;  %v24513_v30 = vld [vmem:[%s42062_s3 + $0x100] sm:$0xff]  ;;  %v24519_v41 = vld [vmem:[%s42062_s3 + $0x130] sm:$0xff]  ;;  %v24520_v42 = vld [vmem:[%s42062_s3 + $0x138] sm:$0xff] }
 0x208   : > { %v3074_v32 = vadd.f32 %v34143_v33, %v36467_v7  ;;  %42157 = vst [vmem:[#allocation20_spill] sm:$0xff] %v36661_v29  ;;  %v36671_v27 = vpack.c.bf16 %v24514_v25, %v24513_v30  ;;  %v24516_v33 = vld [vmem:[%s42062_s3 + $0x118] sm:$0xff]  ;;  %42171 = vst [vmem:[#allocation34_spill] sm:$0xff] %v36811_v23  ;;  %v24525_v30 = vld [vmem:[%s42062_s3 + $0x160] sm:$0xff] }
 0x209   : > { %v3073_v37 = vadd.f32 %v34144_v34, %v36467_v7  ;;  %v30116_v40 = vpop.f32.mrb[20].mxu0  ;;  %42147 = vst [vmem:[#allocation10_spill] sm:$0xff] %v36544_v47  ;;  %v3330_v31 = vld [vmem:[#allocation2 + $0x1] ss:$10 sm:$0x7f]  ;;  %v36682_v34 = vpack.c.bf16 %v24516_v33, %v24515_v28 }
 0x20a   : > { %v3106_v43 = vld [vmem:[#allocation2 + $0x40] ss:$10 sm:$0x7f]  ;;  %3099 = vst.msk [vmem:[#allocation2 + $0x98] sm:$0xff] %vm3079_vm3, %v3074_v32  ;;  %v34145_v52 = vadd.f32 %v30116_v40, %v36440_v54  ;;  %v3006_v44 = vpop.f32.mrb[21].mxu0  ;;  %42158 = vst [vmem:[#allocation21_spill] sm:$0xff] %v36671_v27 }
 0x20b   : > { %3098 = vst.msk [vmem:[#allocation2 + $0x90] sm:$0xff] %vm3079_vm3, %v3073_v37  ;;  %30137 = vmatmul.mubr.msk.f32.vlgmr.msra.gmra.mrb[24].mxu1 %vm3079_vm3, %v3106_v43  ;;  %v34146_v46 = vadd.f32 %v3006_v44, %v36442_v56  ;;  %v245_v54 = vld [vmem:[%s42062_s3 + $0x20] sm:$0xff]  ;;  %42159 = vst [vmem:[#allocation22_spill] sm:$0xff] %v36682_v34  ;;  %v24518_v37 = vld [vmem:[%s42062_s3 + $0x128] sm:$0xff]  ;;  %v36704_v43 = vpack.c.bf16 %v24520_v42, %v24519_v41 }
 0x20c   : > { %v3076_v45 = vadd.f32 %v34145_v52, %v36467_v7  ;;  %33383 = vmatpush3.bf16.msra.mxu1 %v36528_v36  ;;  %30155 = vmatprep.mubr.msk.f32.mxu1 %vm35641_vm2, %v42065_v62  ;;  %v36562_v1 = vpack.c.bf16 %v246_v51, %v245_v54  ;;  %v24517_v32 = vld [vmem:[%s42062_s3 + $0x120] sm:$0xff]  ;;  %v24538_v44 = vld [vmem:[%s42062_s3 + $0x1c8] sm:$0xff]  ;;  %v24527_v33 = vld [vmem:[%s42062_s3 + $0x170] sm:$0xff] }
 0x20d   : > { %v30119_v50 = vpop.f32.mrb[22].mxu0  ;;  %33384 = vmatprep.subr.bf16.mxu1 %v42067_v48  ;;  %v3075_v56 = vadd.f32 %v34146_v46, %v36467_v7  ;;  %v36694_v40 = vpack.c.bf16 %v24518_v37, %v24517_v32  ;;  %42161 = vst [vmem:[#allocation24_spill] sm:$0xff] %v36704_v43  ;;  %v24537_v52 = vld [vmem:[%s42062_s3 + $0x1c0] sm:$0xff]  ;;  %v24539_v46 = vld [vmem:[%s42062_s3 + $0x1d0] sm:$0xff]  ;;  %v24526_v25 = vld [vmem:[%s42062_s3 + $0x168] sm:$0xff] }
 0x20e   : > { %3101 = vst.msk [vmem:[#allocation2 + $0xa8] sm:$0xff] %vm3079_vm3, %v3076_v45  ;;  %v34147_v53 = vadd.f32 %v30119_v50, %v36444_v57  ;;  %v3016_v55 = vpop.f32.mrb[23].mxu0  ;;  %42148 = vst [vmem:[#allocation11_spill] sm:$0xff] %v36562_v1  ;;  %v248_v57 = vld [vmem:[%s42062_s3 + $0x38] sm:$0xff]  ;;  %v36714_v45 = vpack.c.bf16 %v24538_v44, %v24537_v52  ;;  %v36823_v28 = vpack.c.bf16 %v24526_v25, %v24525_v30  ;;  %v24545_v37 = vld [vmem:[%s42062_s3 + $0x200] sm:$0xff] }
 0x20f   : > { %v34148_v63 = vadd.f32 %v3016_v55, %v36452_v60  ;;  %3100 = vst.msk [vmem:[#allocation2 + $0xa0] sm:$0xff] %vm3079_vm3, %v3075_v56  ;;  %v36575_v60 = vpack.c.bf16 %v248_v57, %v247_v3  ;;  %42160 = vst [vmem:[#allocation23_spill] sm:$0xff] %v36694_v40  ;;  %v24540_v50 = vld [vmem:[%s42062_s3 + $0x1d8] sm:$0xff]  ;;  %v24541_v56 = vld [vmem:[%s42062_s3 + $0x1e0] sm:$0xff] }
 0x210   : > { %v3078_v0 = vadd.f32 %v34147_v53, %v36467_v7  ;;  %33386 = vmatpush3.bf16.msra.mxu1 %v36544_v47  ;;  %42162 = vst [vmem:[#allocation25_spill] sm:$0xff] %v36714_v45  ;;  %v3332_v54 = vld [vmem:[#allocation2 + $0x41] ss:$10 sm:$0x7f]  ;;  %v36725_v51 = vpack.c.bf16 %v24540_v50, %v24539_v46  ;;  %42172 = vst [vmem:[#allocation35_spill] sm:$0xff] %v36823_v28 }
 0x211   : > { %v3077_v2 = vadd.f32 %v34148_v63, %v36467_v7  ;;  %33387 = vmatprep.subr.bf16.mxu1 %v42067_v48  ;;  %42149 = vst [vmem:[#allocation12_spill] sm:$0xff] %v36575_v60  ;;  %v24529_v7 = vld [vmem:[%s42062_s3 + $0x180] sm:$0xff]  ;;  %v24542_v53 = vld [vmem:[%s42062_s3 + $0x1e8] sm:$0xff]  ;;  %v24543_v63 = vld [vmem:[%s42062_s3 + $0x1f0] sm:$0xff] }
 0x212   : > { %3103 = vst.msk [vmem:[#allocation2 + $0xb8] sm:$0xff] %vm3079_vm3, %v3078_v0  ;;  %v36585_v5 = vpack.c.bf16 %v24530_v4, %v24529_v7  ;;  %42163 = vst [vmem:[#allocation26_spill] sm:$0xff] %v36725_v51  ;;  %v36737_v55 = vpack.c.bf16 %v24542_v53, %v24541_v56  ;;  %v24544_v0 = vld [vmem:[%s42062_s3 + $0x1f8] sm:$0xff]  ;;  %v24497_v3 = vld [vmem:[%s42062_s3 + $0x80] sm:$0xff] }
 0x213   : > { %3102 = vst.msk [vmem:[#allocation2 + $0xb0] sm:$0xff] %vm3079_vm3, %v3077_v2  ;;  %v36747_v2 = vpack.c.bf16 %v24544_v0, %v24543_v63  ;;  %v24498_v57 = vld [vmem:[%s42062_s3 + $0x88] sm:$0xff]  ;;  %v24499_v4 = vld [vmem:[%s42062_s3 + $0x90] sm:$0xff]  ;;  %v24548_v44 = vld [vmem:[%s42062_s3 + $0x218] sm:$0xff] }
 0x214   : > { %33389 = vmatpush3.bf16.msra.mxu1 %v36562_v1  ;;  %42150 = vst [vmem:[#allocation13_spill] sm:$0xff] %v36585_v5  ;;  %42164 = vst [vmem:[#allocation27_spill] sm:$0xff] %v36737_v55  ;;  %v36757_v7 = vpack.c.bf16 %v24498_v57, %v24497_v3  ;;  %v3558_v21 = vld [vmem:[#allocation2 + $0x2] ss:$10 sm:$0x7f] }
 0x215   : > { %33390 = vmatprep.subr.bf16.mxu1 %v42067_v48  ;;  %42165 = vst [vmem:[#allocation28_spill] sm:$0xff] %v36747_v2  ;;  %v24546_v41 = vld [vmem:[%s42062_s3 + $0x208] sm:$0xff]  ;;  %v24547_v52 = vld [vmem:[%s42062_s3 + $0x210] sm:$0xff]  ;;  %v24552_v0 = vld [vmem:[%s42062_s3 + $0x238] sm:$0xff] }
 0x216   : > { %42166 = vst [vmem:[#allocation29_spill] sm:$0xff] %v36757_v7  ;;  %v36843_v42 = vpack.c.bf16 %v24546_v41, %v24545_v37  ;;  %v3560_v46 = vld [vmem:[#allocation2 + $0x42] ss:$10 sm:$0x7f]  ;;  %v36854_v50 = vpack.c.bf16 %v24548_v44, %v24547_v52  ;;  %v35512_v57 = vld [vmem:[%s42060_s1 + $0x4] sm:$0x7] }
 0x217   : > { %v24550_v56 = vld [vmem:[%s42062_s3 + $0x228] sm:$0xff]  ;;  %v24551_v63 = vld [vmem:[%s42062_s3 + $0x230] sm:$0xff] }
 0x218   : > { %33392 = vmatpush3.bf16.msra.mxu1 %v36575_v60  ;;  %42174 = vst [vmem:[#allocation37_spill] sm:$0xff] %v36843_v42  ;;  %42175 = vst [vmem:[#allocation38_spill] sm:$0xff] %v36854_v50  ;;  %v36876_v3 = vpack.c.bf16 %v24552_v0, %v24551_v63  ;;  %v24963_v17 = vld [vmem:[%s35745_s17 + $0x301] sm:$0xff]  ;;  %v24964_v19 = vld [vmem:[%s35745_s17 + $0x309] sm:$0xff] }
 0x219   : > { %33393 = vmatprep.subr.bf16.mxu1 %v42067_v48  ;;  %v36917_v30 = vld [vmem:[%s35745_s17 + $0x321] sm:$0xff]  ;;  %v36920_v25 = vld [vmem:[%s35745_s17 + $0x329] sm:$0xff]  ;;  %v36947_v52 = vld [vmem:[%s35745_s17 + $0x351] sm:$0xff] }
 0x21a   : > { %v3108_v8 = vld [vmem:[#allocation2 + $0x80] ss:$10 sm:$0x7f]  ;;  %v3334_v9 = vld [vmem:[#allocation2 + $0x81] ss:$10 sm:$0x7f] }
 0x21b   : > { %30156 = vmatmul.mubr.msk.f32.vlgmr.msra.gmra.mrb[26].mxu1 %vm3079_vm3, %v3104_v10  ;;  %v36768_v10 = vpack.c.bf16 %v24500_v6, %v24499_v4  ;;  %42177 = vst [vmem:[#allocation40_spill] sm:$0xff] %v36876_v3  ;;  %v24957_v4 = vld [vmem:[%s35745_s17 + $0x2d1] sm:$0xff]  ;;  %v36937_v37 = vld [vmem:[%s35745_s17 + $0x341] sm:$0xff]  ;;  %v36940_v41 = vld [vmem:[%s35745_s17 + $0x349] sm:$0xff] }
 0x21c   : > { %33395 = vmatpush3.bf16.msra.mxu1 %v36585_v5  ;;  %30174 = vmatprep.mubr.msk.f32.mxu1 %vm35641_vm2, %v42065_v62  ;;  %v3562_v6 = vld [vmem:[#allocation2 + $0x82] ss:$10 sm:$0x7f] }
 0x21d   : > { %33396 = vmatprep.subr.bf16.mxu1 %v42067_v48  ;;  %42167 = vst [vmem:[#allocation30_spill] sm:$0xff] %v36768_v10  ;;  %v36950_v44 = vld [vmem:[%s35745_s17 + $0x361] sm:$0xff]  ;;  %v36977_v0 = vld [vmem:[%s35745_s17 + $0x389] sm:$0xff] }
 0x21e   : > { %v36970_v63 = vld [vmem:[%s35745_s17 + $0x381] sm:$0xff] }
 0x220   : > { %33398 = vmatpush3.bf16.msra.mxu1 %v36596_v11 }
 0x221   : > { %33399 = vmatprep.subr.bf16.mxu1 %v42067_v48 }
 0x224   : > { %33401 = vmatpush3.bf16.msra.mxu1 %v36608_v15  ;;  %v35517_v15 = vld [vmem:[%s42060_s1 + $0x14] sm:$0x7] }
 0x225   : > { %33402 = vmatprep.subr.bf16.mxu1 %v42067_v48 }
 0x228   : > { %33404 = vmatpush3.bf16.msra.mxu1 %v36618_v35 }
 0x229   : > { %33405 = vmatprep.subr.bf16.mxu1 %v42067_v48 }
 0x22b   : > { %30175 = vmatmul.mubr.msk.f32.vlgmr.msra.gmra.mrb[28].mxu1 %vm3079_vm3, %v3108_v8  ;;  %v36800_v8 = vpack.c.bf16 %v24522_v59, %v24521_v58  ;;  %v35514_v58 = vld [vmem:[%s42060_s1 + $0x8] sm:$0x7]  ;;  %v24962_v59 = vld [vmem:[%s35745_s17 + $0x2f9] sm:$0xff] }
 0x22c   : > { %33407 = vmatpush3.bf16.msra.mxu1 %v36628_v22  ;;  %30193 = vmatprep.mubr.msk.f32.mxu1 %vm35641_vm2, %v42065_v62 }
 0x22d   : > { %33408 = vmatprep.subr.bf16.mxu1 %v42067_v48  ;;  %42170 = vst [vmem:[#allocation33_spill] sm:$0xff] %v36800_v8 }
 0x230   : > { %33410 = vmatpush3.bf16.msra.mxu1 %v36639_v24  ;;  %v37179_v24 = vld [vmem:[%s35745_s17 + $0x38a] sm:$0xff] }
 0x231   : > { %33411 = vmatprep.subr.bf16.mxu1 %v42067_v48 }
 0x234   : > { %33413 = vmatpush3.bf16.msra.mxu1 %v36651_v26  ;;  %v37172_v26 = vld [vmem:[%s35745_s17 + $0x382] sm:$0xff] }
 0x235   : > { %33414 = vmatprep.subr.bf16.mxu1 %v42067_v48 }
 0x238   : > { %33416 = vmatpush3.bf16.msra.mxu1 %v36661_v29  ;;  %v37169_v29 = vld [vmem:[%s35745_s17 + $0x37a] sm:$0xff] }
 0x239   : > { %33417 = vmatprep.subr.bf16.mxu1 %v42067_v48 }
 0x23b   : > { %30194 = vmatmul.mubr.msk.f32.vlgmr.msra.gmra.mrb[30].mxu1 %vm3079_vm3, %v3330_v31  ;;  %v24528_v31 = vld [vmem:[%s42062_s3 + $0x178] sm:$0xff] }
 0x23c   : > { %33419 = vmatpush3.bf16.msra.mxu1 %v36671_v27  ;;  %30212 = vmatprep.mubr.msk.f32.mxu1 %vm35641_vm2, %v42065_v62  ;;  %v36833_v32 = vpack.c.bf16 %v24528_v31, %v24527_v33  ;;  %v36927_v33 = vld [vmem:[%s35745_s17 + $0x331] sm:$0xff]  ;;  %v36930_v31 = vld [vmem:[%s35745_s17 + $0x339] sm:$0xff] }
 0x23d   : > { %33420 = vmatprep.subr.bf16.mxu1 %v42067_v48 }
 0x23e   : > { %42173 = vst [vmem:[#allocation36_spill] sm:$0xff] %v36833_v32 }
 0x240   : > { %33422 = vmatpush3.bf16.msra.mxu1 %v36682_v34 }
 0x241   : > { %33423 = vmatprep.subr.bf16.mxu1 %v42067_v48 }
 0x244   : > { %33425 = vmatpush3.bf16.msra.mxu1 %v36694_v40 }
 0x245   : > { %33426 = vmatprep.subr.bf16.mxu1 %v42067_v48 }
 0x248   : > { %33428 = vmatpush3.bf16.msra.mxu1 %v36704_v43  ;;  %v37162_v43 = vld [vmem:[%s35745_s17 + $0x372] sm:$0xff] }
 0x249   : > { %33429 = vmatprep.subr.bf16.mxu1 %v42067_v48 }
 0x24b   : > { %30213 = vmatmul.mubr.msk.f32.vlgmr.msra.gmra.mrb[32].mxu1 %vm3079_vm3, %v3332_v54  ;;  %v24549_v54 = vld [vmem:[%s42062_s3 + $0x220] sm:$0xff] }
 0x24c   : > { %33431 = vmatpush3.bf16.msra.mxu1 %v36714_v45  ;;  %30231 = vmatprep.mubr.msk.f32.mxu1 %vm35641_vm2, %v42065_v62  ;;  %v36866_v53 = vpack.c.bf16 %v24550_v56, %v24549_v54  ;;  %v36960_v54 = vld [vmem:[%s35745_s17 + $0x371] sm:$0xff]  ;;  %v36967_v56 = vld [vmem:[%s35745_s17 + $0x379] sm:$0xff] }
 0x24d   : > { %33432 = vmatprep.subr.bf16.mxu1 %v42067_v48  ;;  %v37159_v45 = vld [vmem:[%s35745_s17 + $0x36a] sm:$0xff] }
 0x24e   : > { %42176 = vst [vmem:[#allocation39_spill] sm:$0xff] %v36866_v53 }
 0x250   : > { %33434 = vmatpush3.bf16.msra.mxu1 %v36725_v51  ;;  %v37152_v51 = vld [vmem:[%s35745_s17 + $0x362] sm:$0xff] }
 0x251   : > { %33435 = vmatprep.subr.bf16.mxu1 %v42067_v48 }
 0x254   : > { %33437 = vmatpush3.bf16.msra.mxu1 %v36737_v55  ;;  %v25035_v55 = vld [vmem:[%s35745_s17 + $0x2f2] sm:$0xff] }
 0x255   : > { %33438 = vmatprep.subr.bf16.mxu1 %v42067_v48 }
 0x258   : > { %33440 = vmatpush3.bf16.msra.mxu1 %v36747_v2  ;;  %v25034_v2 = vld [vmem:[%s35745_s17 + $0x2ea] sm:$0xff] }
 0x259   : > { %33441 = vmatprep.subr.bf16.mxu1 %v42067_v48 }
 0x25b   : > { %30232 = vmatmul.mubr.msk.f32.vlgmr.msra.gmra.mrb[34].mxu1 %vm3079_vm3, %v3334_v9  ;;  %v24958_v9 = vld [vmem:[%s35745_s17 + $0x2d9] sm:$0xff] }
 0x25c   : > { %33443 = vmatpush3.bf16.msra.mxu1 %v36757_v7  ;;  %30250 = vmatprep.mubr.msk.f32.mxu1 %vm35641_vm2, %v42065_v62 }
 0x25d   : > { %33444 = vmatprep.subr.bf16.mxu1 %v42067_v48 }
 0x260   : > { %33446 = vmatpush3.bf16.msra.mxu1 %v36768_v10 }
 0x261   : > { %33447 = vmatprep.subr.bf16.mxu1 %v42067_v48 }
 0x264   : > { %33449 = vmatpush3.bf16.msra.mxu1 %v36780_v14 }
 0x265   : > { %33450 = vmatprep.subr.bf16.mxu1 %v42067_v48 }
 0x268   : > { %33452 = vmatpush3.bf16.msra.mxu1 %v36790_v38  ;;  %v25033_v38 = vld [vmem:[%s35745_s17 + $0x2e2] sm:$0xff] }
 0x269   : > { %33453 = vmatprep.subr.bf16.mxu1 %v42067_v48 }
 0x26b   : > { %30251 = vmatmul.mubr.msk.f32.vlgmr.msra.gmra.mrb[36].mxu1 %vm3079_vm3, %v3558_v21  ;;  %v36911_v21 = vld [vmem:[%s35745_s17 + $0x319] sm:$0xff] }
 0x26c   : > { %33455 = vmatpush3.bf16.msra.mxu1 %v36800_v8  ;;  %30269 = vmatprep.mubr.msk.f32.mxu1 %vm35641_vm2, %v42065_v62  ;;  %v25032_v8 = vld [vmem:[%s35745_s17 + $0x2da] sm:$0xff] }
 0x26d   : > { %33456 = vmatprep.subr.bf16.mxu1 %v42067_v48 }
 0x270   : > { %33458 = vmatpush3.bf16.msra.mxu1 %v36811_v23  ;;  %v25031_v23 = vld [vmem:[%s35745_s17 + $0x2d2] sm:$0xff] }
 0x271   : > { %33459 = vmatprep.subr.bf16.mxu1 %v42067_v48 }
 0x274   : > { %33461 = vmatpush3.bf16.msra.mxu1 %v36823_v28  ;;  %v37081_v28 = vld [vmem:[%s35745_s17 + $0x390] sm:$0xff] }
 0x275   : > { %33462 = vmatprep.subr.bf16.mxu1 %v42067_v48 }
 0x278   : > { %33464 = vmatpush3.bf16.msra.mxu1 %v36833_v32  ;;  %v37078_v32 = vld [vmem:[%s35745_s17 + $0x388] sm:$0xff] }
 0x279   : > { %33465 = vmatprep.subr.bf16.mxu1 %v42067_v48 }
 0x27b   : > { %30270 = vmatmul.mubr.msk.f32.vlgmr.msra.gmra.mrb[38].mxu1 %vm3079_vm3, %v3560_v46  ;;  %v36957_v46 = vld [vmem:[%s35745_s17 + $0x369] sm:$0xff] }
 0x27c   : > { %33467 = vmatpush3.bf16.msra.mxu1 %v36843_v42  ;;  %30288 = vmatprep.mubr.msk.f32.mxu1 %vm35641_vm2, %v42065_v62  ;;  %v37058_v62 = vld [vmem:[%s35745_s17 + $0x368] sm:$0xff]  ;;  %v37071_v42 = vld [vmem:[%s35745_s17 + $0x380] sm:$0xff] }
 0x27d   : > { %33468 = vmatprep.subr.bf16.mxu1 %v42067_v48 }
 0x280   : > { %33470 = vmatpush3.bf16.msra.mxu1 %v36854_v50  ;;  %v37068_v50 = vld [vmem:[%s35745_s17 + $0x378] sm:$0xff] }
 0x281   : > { %33471 = vmatprep.subr.bf16.mxu1 %v42067_v48 }
 0x284   : > { %33473 = vmatpush3.bf16.msra.mxu1 %v36866_v53 }
 0x285   : > { %33474 = vmatprep.subr.bf16.mxu1 %v42067_v48  ;;  %v37061_v48 = vld [vmem:[%s35745_s17 + $0x370] sm:$0xff] }
 0x288   : > { %33476 = vmatpush3.bf16.msra.mxu1 %v36876_v3 }
 0x289   : > { %30291 = vmatprep.subr.msk.mxu1 %vm442_vm0, %v35512_v57 }
 0x28b   : > { %30289 = vmatmul.mubr.msk.f32.vlgmr.msra.gmra.mrb[40].mxu1 %vm3079_vm3, %v3562_v6  ;;  %v24933_v6 = vld [vmem:[%s35745_s17 + $0x2d0] sm:$0xff] }
 0x28c   : > { %30292 = vmatpush3.msk.msra.mxu1 %vm442_vm0, %v35512_v57  ;;  %30293 = vmatprep.mubr.msk.f32.mxu1 %vm369_vm1, %v24957_v4  ;;  %v36980_v57 = vld [vmem:[%s35745_s17 + $0x391] sm:$0xff]  ;;  %v36987_v4 = vld [vmem:[%s35745_s17 + $0x399] sm:$0xff] }
 0x28d   : > { %30329 = vmatprep.subr.msk.mxu1 %vm442_vm0, %v35513_v12 }
 0x28f   : > { %30294 = vmatmul.mubr.msk.f32.vlgmr.msra.gmra.mrb[42].mxu1 %vm369_vm1, %v24958_v9  ;;  %v24934_v9 = vld [vmem:[%s35745_s17 + $0x2d8] sm:$0xff] }
 0x290   : > { %30330 = vmatpush3.msk.msra.mxu1 %vm442_vm0, %v35513_v12  ;;  %30296 = vmatprep.mubr.msk.f32.mxu1 %vm369_vm1, %v24959_v13  ;;  %v24935_v12 = vld [vmem:[%s35745_s17 + $0x2e0] sm:$0xff]  ;;  %v24936_v13 = vld [vmem:[%s35745_s17 + $0x2e8] sm:$0xff] }
 0x291   : > { %30367 = vmatprep.subr.msk.mxu1 %vm442_vm0, %v35514_v58 }
 0x293   : > { %30297 = vmatmul.mubr.msk.f32.gmra.mrb[44].mxu1 %vm369_vm1, %v24960_v16  ;;  %v24937_v16 = vld [vmem:[%s35745_s17 + $0x2f0] sm:$0xff] }
 0x294   : > { %30299 = vmatprep.mubr.msk.f32.mxu1 %vm369_vm1, %v24961_v20  ;;  %v35515_v20 = vld [vmem:[%s42060_s1 + $0xc] sm:$0x7] }
 0x297   : > { %30300 = vmatmul.mubr.msk.f32.gmra.mrb[46].mxu1 %vm369_vm1, %v24962_v59  ;;  %v24938_v59 = vld [vmem:[%s35745_s17 + $0x2f8] sm:$0xff] }
 0x298   : > { %30302 = vmatprep.mubr.msk.f32.mxu1 %vm369_vm1, %v24963_v17  ;;  %v24940_v17 = vld [vmem:[%s35745_s17 + $0x308] sm:$0xff] }
 0x29b   : > { %30303 = vmatmul.mubr.msk.f32.gmra.mrb[48].mxu1 %vm369_vm1, %v24964_v19  ;;  %v37012_v19 = vld [vmem:[%s35745_s17 + $0x318] sm:$0xff] }
 0x29c   : > { %30305 = vmatprep.mubr.msk.f32.mxu1 %vm369_vm1, %v36911_v21 }
 0x29f   : > { %30306 = vmatmul.mubr.msk.f32.gmra.mrb[50].mxu1 %vm369_vm1, %v36917_v30 }
 0x2a0   : > { %30308 = vmatprep.mubr.msk.f32.mxu1 %vm369_vm1, %v36920_v25 }
 0x2a3   : > { %30309 = vmatmul.mubr.msk.f32.gmra.mrb[52].mxu1 %vm369_vm1, %v36927_v33 }
 0x2a4   : > { %30311 = vmatprep.mubr.msk.f32.mxu1 %vm369_vm1, %v36930_v31 }
 0x2a7   : > { %30312 = vmatmul.mubr.msk.f32.gmra.mrb[54].mxu1 %vm369_vm1, %v36937_v37 }
 0x2a8   : > { %30314 = vmatprep.mubr.msk.f32.mxu1 %vm369_vm1, %v36940_v41 }
 0x2ab   : > { %30315 = vmatmul.mubr.msk.f32.gmra.mrb[56].mxu1 %vm369_vm1, %v36947_v52 }
 0x2ac   : > { %30317 = vmatprep.mubr.msk.f32.mxu1 %vm369_vm1, %v36950_v44 }
 0x2af   : > { %30318 = vmatmul.mubr.msk.f32.gmra.mrb[58].mxu1 %vm369_vm1, %v36957_v46 }
 0x2b0   : > { %30320 = vmatprep.mubr.msk.f32.mxu1 %vm369_vm1, %v36960_v54 }
 0x2b3   : > { %30321 = vmatmul.mubr.msk.f32.gmra.mrb[60].mxu1 %vm369_vm1, %v36967_v56 }
 0x2b4   : > { %30323 = vmatprep.mubr.msk.f32.mxu1 %vm369_vm1, %v36970_v63 }
 0x2b7   : > { %30324 = vmatmul.mubr.msk.f32.gmra.mrb[62].mxu1 %vm369_vm1, %v36977_v0 }
 0x2b8   : > { %30326 = vmatprep.mubr.msk.f32.mxu1 %vm369_vm1, %v36980_v57 }
 0x2bb   : > { %30327 = vmatmul.mubr.msk.f32.gmra.mrb[64].mxu1 %vm369_vm1, %v36987_v4 }
 0x2bc   : > { %30331 = vmatprep.mubr.msk.f32.mxu1 %vm369_vm1, %v24933_v6  ;;  %v37018_v6 = vld [vmem:[%s35745_s17 + $0x320] sm:$0xff] }
 0x2bf   : > { %30332 = vmatmul.mubr.msk.f32.vlgmr.msra.gmra.mrb[42].mxu1 %vm369_vm1, %v24934_v9  ;;  %v37021_v9 = vld [vmem:[%s35745_s17 + $0x328] sm:$0xff] }
 0x2c0   : > { %30368 = vmatpush3.msk.msra.mxu1 %vm442_vm0, %v35514_v58  ;;  %30334 = vmatprep.mubr.msk.f32.mxu1 %vm369_vm1, %v24935_v12  ;;  %v24939_v58 = vld [vmem:[%s35745_s17 + $0x300] sm:$0xff]  ;;  %v37028_v12 = vld [vmem:[%s35745_s17 + $0x330] sm:$0xff] }
 0x2c1   : > { %30405 = vmatprep.subr.msk.mxu1 %vm442_vm0, %v35515_v20 }
 0x2c3   : > { %30335 = vmatmul.mubr.msk.f32.gmra.mrb[44].mxu1 %vm369_vm1, %v24936_v13  ;;  %v37031_v13 = vld [vmem:[%s35745_s17 + $0x338] sm:$0xff] }
 0x2c4   : > { %30337 = vmatprep.mubr.msk.f32.mxu1 %vm369_vm1, %v24937_v16  ;;  %v37038_v16 = vld [vmem:[%s35745_s17 + $0x340] sm:$0xff] }
 0x2c7   : > { %30338 = vmatmul.mubr.msk.f32.gmra.mrb[46].mxu1 %vm369_vm1, %v24938_v59  ;;  %v37041_v59 = vld [vmem:[%s35745_s17 + $0x348] sm:$0xff] }
 0x2c8   : > { %30340 = vmatprep.mubr.msk.f32.mxu1 %vm369_vm1, %v24939_v58  ;;  %v37048_v58 = vld [vmem:[%s35745_s17 + $0x350] sm:$0xff] }
 0x2cb   : > { %30341 = vmatmul.mubr.msk.f32.gmra.mrb[48].mxu1 %vm369_vm1, %v24940_v17  ;;  %v37051_v17 = vld [vmem:[%s35745_s17 + $0x360] sm:$0xff] }
 0x2cc   : > { %30343 = vmatprep.mubr.msk.f32.mxu1 %vm369_vm1, %v37012_v19 }
 0x2cf   : > { %30344 = vmatmul.mubr.msk.f32.gmra.mrb[50].mxu1 %vm369_vm1, %v37018_v6 }
 0x2d0   : > { %30346 = vmatprep.mubr.msk.f32.mxu1 %vm369_vm1, %v37021_v9 }
 0x2d3   : > { %30347 = vmatmul.mubr.msk.f32.gmra.mrb[52].mxu1 %vm369_vm1, %v37028_v12 }
 0x2d4   : > { %30349 = vmatprep.mubr.msk.f32.mxu1 %vm369_vm1, %v37031_v13 }
 0x2d7   : > { %30350 = vmatmul.mubr.msk.f32.gmra.mrb[54].mxu1 %vm369_vm1, %v37038_v16 }
 0x2d8   : > { %30352 = vmatprep.mubr.msk.f32.mxu1 %vm369_vm1, %v37041_v59 }
 0x2db   : > { %30353 = vmatmul.mubr.msk.f32.gmra.mrb[56].mxu1 %vm369_vm1, %v37048_v58 }
 0x2dc   : > { %30355 = vmatprep.mubr.msk.f32.mxu1 %vm369_vm1, %v37051_v17 }
 0x2de   : > { %v3178_v3 = vpop.f32.mrb[24].mxu1 }
 0x2df   : > { %30356 = vmatmul.mubr.msk.f32.gmra.mrb[58].mxu1 %vm369_vm1, %v37058_v62  ;;  %v30138_v53 = vpop.f32.mrb[25].mxu1 }
 0x2e0   : > { %30358 = vmatprep.mubr.msk.f32.mxu1 %vm369_vm1, %v37061_v48  ;;  %v37088_v53 = vld [vmem:[%s35745_s17 + $0x398] sm:$0xff] }
 0x2e3   : > { %30359 = vmatmul.mubr.msk.f32.gmra.mrb[60].mxu1 %vm369_vm1, %v37068_v50 }
 0x2e4   : > { %30361 = vmatprep.mubr.msk.f32.mxu1 %vm369_vm1, %v37071_v42 }
 0x2e7   : > { %30362 = vmatmul.mubr.msk.f32.gmra.mrb[62].mxu1 %vm369_vm1, %v37078_v32 }
 0x2e8   : > { %30364 = vmatprep.mubr.msk.f32.mxu1 %vm369_vm1, %v37081_v28 }
 0x2eb   : > { %30365 = vmatmul.mubr.msk.f32.gmra.mrb[64].mxu1 %vm369_vm1, %v37088_v53 }
 0x2ec   : > { %30369 = vmatprep.mubr.msk.f32.mxu1 %vm369_vm1, %v25031_v23  ;;  %v35516_v23 = vld [vmem:[%s42060_s1 + $0x10] sm:$0x7] }
 0x2ee   : > { %v3251_v14 = vpop.f32.mrb[26].mxu1 }
 0x2ef   : > { %v3252_v10 = vadd.f32 %v3251_v14, %v3178_v3  ;;  %v30157_v7 = vpop.f32.mrb[27].mxu1  ;;  %30370 = vmatmul.mubr.msk.f32.vlgmr.msra.gmra.mrb[42].mxu1 %vm369_vm1, %v25032_v8  ;;  %v25037_v14 = vld [vmem:[%s35745_s17 + $0x302] sm:$0xff]  ;;  %v37113_v8 = vld [vmem:[%s35745_s17 + $0x31a] sm:$0xff] }
 0x2f0   : > { %30406 = vmatpush3.msk.msra.mxu1 %vm442_vm0, %v35515_v20  ;;  %30372 = vmatprep.mubr.msk.f32.mxu1 %vm369_vm1, %v25033_v38  ;;  %v25036_v7 = vld [vmem:[%s35745_s17 + $0x2fa] sm:$0xff]  ;;  %v25038_v38 = vld [vmem:[%s35745_s17 + $0x30a] sm:$0xff] }
 0x2f1   : > { %30443 = vmatprep.subr.msk.mxu1 %vm442_vm0, %v35516_v23 }
 0x2f3   : > { %30373 = vmatmul.mubr.msk.f32.gmra.mrb[44].mxu1 %vm369_vm1, %v25034_v2  ;;  %v37122_v2 = vld [vmem:[%s35745_s17 + $0x32a] sm:$0xff] }
 0x2f4   : > { %30375 = vmatprep.mubr.msk.f32.mxu1 %vm369_vm1, %v25035_v55  ;;  %v37119_v55 = vld [vmem:[%s35745_s17 + $0x322] sm:$0xff] }
 0x2f7   : > { %30376 = vmatmul.mubr.msk.f32.gmra.mrb[46].mxu1 %vm369_vm1, %v25036_v7 }
 0x2f8   : > { %30378 = vmatprep.mubr.msk.f32.mxu1 %vm369_vm1, %v25037_v14  ;;  %v37129_v14 = vld [vmem:[%s35745_s17 + $0x332] sm:$0xff] }
 0x2fb   : > { %30379 = vmatmul.mubr.msk.f32.gmra.mrb[48].mxu1 %vm369_vm1, %v25038_v38  ;;  %v37132_v38 = vld [vmem:[%s35745_s17 + $0x33a] sm:$0xff] }
 0x2fc   : > { %30381 = vmatprep.mubr.msk.f32.mxu1 %vm369_vm1, %v37113_v8 }
 0x2fe   : > { %v3324_v3 = vpop.f32.mrb[28].mxu1 }
 0x2ff   : > { %v3328_v20 = vadd.f32 %v3324_v3, %v3252_v10  ;;  %v30176_v7 = vpop.f32.mrb[29].mxu1  ;;  %30382 = vmatmul.mubr.msk.f32.gmra.mrb[50].mxu1 %vm369_vm1, %v37119_v55  ;;  %v37139_v10 = vld [vmem:[%s35745_s17 + $0x342] sm:$0xff]  ;;  %v37142_v3 = vld [vmem:[%s35745_s17 + $0x34a] sm:$0xff] }
 0x300   : > { %30384 = vmatprep.mubr.msk.f32.mxu1 %vm369_vm1, %v37122_v2  ;;  %v37149_v7 = vld [vmem:[%s35745_s17 + $0x352] sm:$0xff] }
 0x303   : > { %30385 = vmatmul.mubr.msk.f32.gmra.mrb[52].mxu1 %vm369_vm1, %v37129_v14 }
 0x304   : > { %30387 = vmatprep.mubr.msk.f32.mxu1 %vm369_vm1, %v37132_v38 }
 0x307   : > { %30388 = vmatmul.mubr.msk.f32.gmra.mrb[54].mxu1 %vm369_vm1, %v37139_v10 }
 0x308   : > { %30390 = vmatprep.mubr.msk.f32.mxu1 %vm369_vm1, %v37142_v3 }
 0x30b   : > { %30391 = vmatmul.mubr.msk.f32.gmra.mrb[56].mxu1 %vm369_vm1, %v37149_v7 }
 0x30c   : > { %30393 = vmatprep.mubr.msk.f32.mxu1 %vm369_vm1, %v37152_v51 }
 0x30e   : > { %v3404_v40 = vpop.f32.mrb[30].mxu1 }
 0x30f   : > { %v3408_v34 = vadd.f32 %v3404_v40, %v3328_v20  ;;  %v30195_v27 = vpop.f32.mrb[31].mxu1  ;;  %30394 = vmatmul.mubr.msk.f32.gmra.mrb[58].mxu1 %vm369_vm1, %v37159_v45  ;;  %v37182_v40 = vld [vmem:[%s35745_s17 + $0x392] sm:$0xff] }
 0x310   : > { %30396 = vmatprep.mubr.msk.f32.mxu1 %vm369_vm1, %v37162_v43  ;;  %v37189_v27 = vld [vmem:[%s35745_s17 + $0x39a] sm:$0xff] }
 0x313   : > { %30397 = vmatmul.mubr.msk.f32.gmra.mrb[60].mxu1 %vm369_vm1, %v37169_v29 }
 0x314   : > { %30399 = vmatprep.mubr.msk.f32.mxu1 %vm369_vm1, %v37172_v26 }
 0x317   : > { %30400 = vmatmul.mubr.msk.f32.gmra.mrb[62].mxu1 %vm369_vm1, %v37179_v24 }
 0x318   : > { %30402 = vmatprep.mubr.msk.f32.mxu1 %vm369_vm1, %v37182_v40 }
 0x31b   : > { %30403 = vmatmul.mubr.msk.f32.gmra.mrb[64].mxu1 %vm369_vm1, %v37189_v27 }
 0x31c   : > { %30407 = vmatprep.mubr.msk.f32.mxu1 %vm369_vm1, %v37012_v19 }
 0x31e   : > { %v3478_v20 = vpop.f32.mrb[32].mxu1 }
 0x31f   : > { %v3482_v22 = vadd.f32 %v3478_v20, %v3408_v34  ;;  %v30214_v35 = vpop.f32.mrb[33].mxu1  ;;  %30408 = vmatmul.mubr.msk.f32.vlgmr.msra.gmra.mrb[42].mxu1 %vm369_vm1, %v37018_v6  ;;  %v37236_v6 = vld [vmem:[%s35745_s17 + $0x3b0] sm:$0xff]  ;;  %v37259_v20 = vld [vmem:[%s35745_s17 + $0x3d8] sm:$0xff] }
 0x320   : > { %30444 = vmatpush3.msk.msra.mxu1 %vm442_vm0, %v35516_v23  ;;  %30410 = vmatprep.mubr.msk.f32.mxu1 %vm369_vm1, %v37021_v9  ;;  %v37239_v9 = vld [vmem:[%s35745_s17 + $0x3b8] sm:$0xff]  ;;  %v37256_v23 = vld [vmem:[%s35745_s17 + $0x3d0] sm:$0xff] }
 0x321   : > { %30481 = vmatprep.subr.msk.mxu1 %vm442_vm0, %v35517_v15 }
 0x323   : > { %30411 = vmatmul.mubr.msk.f32.gmra.mrb[44].mxu1 %vm369_vm1, %v37028_v12 }
 0x324   : > { %30413 = vmatprep.mubr.msk.f32.mxu1 %vm369_vm1, %v37031_v13 }
 0x327   : > { %30414 = vmatmul.mubr.msk.f32.gmra.mrb[46].mxu1 %vm369_vm1, %v37038_v16 }
 0x328   : > { %30416 = vmatprep.mubr.msk.f32.mxu1 %vm369_vm1, %v37041_v59  ;;  %v37246_v59 = vld [vmem:[%s35745_s17 + $0x3c0] sm:$0xff] }
 0x32b   : > { %30417 = vmatmul.mubr.msk.f32.gmra.mrb[48].mxu1 %vm369_vm1, %v37048_v58  ;;  %v37249_v58 = vld [vmem:[%s35745_s17 + $0x3c8] sm:$0xff] }
 0x32c   : > { %30419 = vmatprep.mubr.msk.f32.mxu1 %vm369_vm1, %v37051_v17 }
 0x32e   : > { %v3552_v35 = vpop.f32.mrb[34].mxu1 }
 0x32f   : > { %v3556_v34 = vadd.f32 %v3552_v35, %v3482_v22  ;;  %v30233_v19 = vpop.f32.mrb[35].mxu1  ;;  %30420 = vmatmul.mubr.msk.f32.gmra.mrb[50].mxu1 %vm369_vm1, %v37058_v62  ;;  %v37229_v22 = vld [vmem:[%s35745_s17 + $0x3a8] sm:$0xff]  ;;  %v37266_v35 = vld [vmem:[%s35745_s17 + $0x3e0] sm:$0xff] }
 0x330   : > { %30422 = vmatprep.mubr.msk.f32.mxu1 %vm369_vm1, %v37061_v48 }
 0x333   : > { %30423 = vmatmul.mubr.msk.f32.gmra.mrb[52].mxu1 %vm369_vm1, %v37068_v50 }
 0x334   : > { %30425 = vmatprep.mubr.msk.f32.mxu1 %vm369_vm1, %v37071_v42 }
 0x337   : > { %30426 = vmatmul.mubr.msk.f32.gmra.mrb[54].mxu1 %vm369_vm1, %v37078_v32 }
 0x338   : > { %30428 = vmatprep.mubr.msk.f32.mxu1 %vm369_vm1, %v37081_v28 }
 0x33b   : > { %30429 = vmatmul.mubr.msk.f32.gmra.mrb[56].mxu1 %vm369_vm1, %v37088_v53 }
 0x33c   : > { %30431 = vmatprep.mubr.msk.f32.mxu1 %vm369_vm1, %v37229_v22 }
 0x33e   : > { %v3632_v12 = vpop.f32.mrb[36].mxu1 }
 0x33f   : > { %v3636_v13 = vadd.f32 %v3632_v12, %v3556_v34  ;;  %v30252_v16 = vpop.f32.mrb[37].mxu1  ;;  %30432 = vmatmul.mubr.msk.f32.gmra.mrb[58].mxu1 %vm369_vm1, %v37236_v6 }
 0x340   : > { %30434 = vmatprep.mubr.msk.f32.mxu1 %vm369_vm1, %v37239_v9  ;;  %v35518_v16 = vld [vmem:[%s42060_s1 + $0x18] sm:$0x7] }
 0x343   : > { %30435 = vmatmul.mubr.msk.f32.gmra.mrb[60].mxu1 %vm369_vm1, %v37246_v59 }
 0x344   : > { %30437 = vmatprep.mubr.msk.f32.mxu1 %vm369_vm1, %v37249_v58 }
 0x347   : > { %30438 = vmatmul.mubr.msk.f32.gmra.mrb[62].mxu1 %vm369_vm1, %v37256_v23 }
 0x348   : > { %30440 = vmatprep.mubr.msk.f32.mxu1 %vm369_vm1, %v37259_v20 }
 0x34b   : > { %30441 = vmatmul.mubr.msk.f32.gmra.mrb[64].mxu1 %vm369_vm1, %v37266_v35 }
 0x34c   : > { %30445 = vmatprep.mubr.msk.f32.mxu1 %vm369_vm1, %v36911_v21 }
 0x34e   : > { %v3706_v34 = vpop.f32.mrb[38].mxu1 }
 0x34f   : > { %v3710_v19 = vadd.f32 %v3706_v34, %v3636_v13  ;;  %v30271_v12 = vpop.f32.mrb[39].mxu1  ;;  %30446 = vmatmul.mubr.msk.f32.vlgmr.msra.gmra.mrb[42].mxu1 %vm369_vm1, %v36917_v30  ;;  %v37338_v13 = vld [vmem:[%s35745_s17 + $0x3d9] sm:$0xff]  ;;  %v37345_v34 = vld [vmem:[%s35745_s17 + $0x3e1] sm:$0xff] }
 0x350   : > { %30482 = vmatpush3.msk.msra.mxu1 %vm442_vm0, %v35517_v15  ;;  %30448 = vmatprep.mubr.msk.f32.mxu1 %vm369_vm1, %v36920_v25  ;;  %v37308_v25 = vld [vmem:[%s35745_s17 + $0x3a9] sm:$0xff]  ;;  %v35520_v12 = vld [vmem:[%s42060_s1 + $0x20] sm:$0x7] }
 0x351   : > { %30519 = vmatprep.subr.msk.mxu1 %vm442_vm0, %v35518_v16 }
 0x353   : > { %30449 = vmatmul.mubr.msk.f32.gmra.mrb[44].mxu1 %vm369_vm1, %v36927_v33  ;;  %v37315_v33 = vld [vmem:[%s35745_s17 + $0x3b1] sm:$0xff] }
 0x354   : > { %30451 = vmatprep.mubr.msk.f32.mxu1 %vm369_vm1, %v36930_v31  ;;  %v37318_v31 = vld [vmem:[%s35745_s17 + $0x3b9] sm:$0xff] }
 0x357   : > { %30452 = vmatmul.mubr.msk.f32.gmra.mrb[46].mxu1 %vm369_vm1, %v36937_v37  ;;  %v37325_v37 = vld [vmem:[%s35745_s17 + $0x3c1] sm:$0xff] }
 0x358   : > { %30454 = vmatprep.mubr.msk.f32.mxu1 %vm369_vm1, %v36940_v41  ;;  %v37328_v41 = vld [vmem:[%s35745_s17 + $0x3c9] sm:$0xff] }
 0x35b   : > { %30455 = vmatmul.mubr.msk.f32.gmra.mrb[48].mxu1 %vm369_vm1, %v36947_v52  ;;  %v37335_v52 = vld [vmem:[%s35745_s17 + $0x3d1] sm:$0xff] }
 0x35c   : > { %30457 = vmatprep.mubr.msk.f32.mxu1 %vm369_vm1, %v36950_v44 }
 0x35e   : > { %v3780_v15 = vpop.f32.mrb[40].mxu1 }
 0x35f   : > { %v37293_v21 = vadd.f32 %v3780_v15, %v3710_v19  ;;  %v30290_v30 = vpop.f32.mrb[41].mxu1  ;;  %30458 = vmatmul.mubr.msk.f32.gmra.mrb[50].mxu1 %vm369_vm1, %v36957_v46  ;;  %v35519_v19 = vld [vmem:[%s42060_s1 + $0x1c] sm:$0x7] }
 0x360   : > { %30460 = vmatprep.mubr.msk.f32.mxu1 %vm369_vm1, %v36960_v54 }
 0x363   : > { %30461 = vmatmul.mubr.msk.f32.gmra.mrb[52].mxu1 %vm369_vm1, %v36967_v56 }
 0x364   : > { %30463 = vmatprep.mubr.msk.f32.mxu1 %vm369_vm1, %v36970_v63 }
 0x367   : > { %30464 = vmatmul.mubr.msk.f32.gmra.mrb[54].mxu1 %vm369_vm1, %v36977_v0 }
 0x368   : > { %30466 = vmatprep.mubr.msk.f32.mxu1 %vm369_vm1, %v36980_v57 }
 0x36b   : > { %30467 = vmatmul.mubr.msk.f32.gmra.mrb[56].mxu1 %vm369_vm1, %v36987_v4 }
 0x36c   : > { %30469 = vmatprep.mubr.msk.f32.mxu1 %vm369_vm1, %v37308_v25 }
 0x36f   : > { %30470 = vmatmul.mubr.msk.f32.gmra.mrb[58].mxu1 %vm369_vm1, %v37315_v33 }
 0x370   : > { %30472 = vmatprep.mubr.msk.f32.mxu1 %vm369_vm1, %v37318_v31 }
 0x373   : > { %30473 = vmatmul.mubr.msk.f32.gmra.mrb[60].mxu1 %vm369_vm1, %v37325_v37 }
 0x374   : > { %30475 = vmatprep.mubr.msk.f32.mxu1 %vm369_vm1, %v37328_v41 }
 0x377   : > { %30476 = vmatmul.mubr.msk.f32.gmra.mrb[62].mxu1 %vm369_vm1, %v37335_v52 }
 0x378   : > { %30478 = vmatprep.mubr.msk.f32.mxu1 %vm369_vm1, %v37338_v13 }
 0x37b   : > { %30479 = vmatmul.mubr.msk.f32.gmra.mrb[64].mxu1 %vm369_vm1, %v37345_v34 }
 0x37c   : > { %30483 = vmatprep.mubr.msk.f32.mxu1 %vm369_vm1, %v37113_v8  ;;  %v37385_v8 = vld [vmem:[%s35745_s17 + $0x3aa] sm:$0xff] }
 0x37f   : > { %30484 = vmatmul.mubr.msk.f32.vlgmr.msra.gmra.mrb[42].mxu1 %vm369_vm1, %v37119_v55  ;;  %v37392_v55 = vld [vmem:[%s35745_s17 + $0x3b2] sm:$0xff] }
 0x380   : > { %30520 = vmatpush3.msk.msra.mxu1 %vm442_vm0, %v35518_v16  ;;  %30486 = vmatprep.mubr.msk.f32.mxu1 %vm369_vm1, %v37122_v2  ;;  %v37395_v2 = vld [vmem:[%s35745_s17 + $0x3ba] sm:$0xff] }
 0x381   : > { %30557 = vmatprep.subr.msk.mxu1 %vm442_vm0, %v35519_v19 }
 0x383   : > { %30487 = vmatmul.mubr.msk.f32.gmra.mrb[44].mxu1 %vm369_vm1, %v37129_v14  ;;  %v37402_v14 = vld [vmem:[%s35745_s17 + $0x3c2] sm:$0xff] }
 0x384   : > { %30489 = vmatprep.mubr.msk.f32.mxu1 %vm369_vm1, %v37132_v38  ;;  %v37405_v38 = vld [vmem:[%s35745_s17 + $0x3ca] sm:$0xff] }
 0x387   : > { %30490 = vmatmul.mubr.msk.f32.gmra.mrb[46].mxu1 %vm369_vm1, %v37139_v10  ;;  %v37412_v10 = vld [vmem:[%s35745_s17 + $0x3d2] sm:$0xff] }
 0x388   : > { %30492 = vmatprep.mubr.msk.f32.mxu1 %vm369_vm1, %v37142_v3  ;;  %v37415_v3 = vld [vmem:[%s35745_s17 + $0x3da] sm:$0xff] }
 0x38b   : > { %30493 = vmatmul.mubr.msk.f32.gmra.mrb[48].mxu1 %vm369_vm1, %v37149_v7  ;;  %v37422_v7 = vld [vmem:[%s35745_s17 + $0x3e2] sm:$0xff] }
 0x38c   : > { %30495 = vmatprep.mubr.msk.f32.mxu1 %vm369_vm1, %v37152_v51 }
 0x38f   : > { %30496 = vmatmul.mubr.msk.f32.gmra.mrb[50].mxu1 %vm369_vm1, %v37159_v45 }
 0x390   : > { %30498 = vmatprep.mubr.msk.f32.mxu1 %vm369_vm1, %v37162_v43 }
 0x393   : > { %30499 = vmatmul.mubr.msk.f32.gmra.mrb[52].mxu1 %vm369_vm1, %v37169_v29 }
 0x394   : > { %30501 = vmatprep.mubr.msk.f32.mxu1 %vm369_vm1, %v37172_v26 }
 0x397   : > { %30502 = vmatmul.mubr.msk.f32.gmra.mrb[54].mxu1 %vm369_vm1, %v37179_v24 }
 0x398   : > { %30504 = vmatprep.mubr.msk.f32.mxu1 %vm369_vm1, %v37182_v40 }
 0x39b   : > { %30505 = vmatmul.mubr.msk.f32.gmra.mrb[56].mxu1 %vm369_vm1, %v37189_v27 }
 0x39c   : > { %30507 = vmatprep.mubr.msk.f32.mxu1 %vm369_vm1, %v37385_v8 }
 0x39f   : > { %30508 = vmatmul.mubr.msk.f32.gmra.mrb[58].mxu1 %vm369_vm1, %v37392_v55 }
 0x3a0   : > { %30510 = vmatprep.mubr.msk.f32.mxu1 %vm369_vm1, %v37395_v2 }
 0x3a3   : > { %30511 = vmatmul.mubr.msk.f32.gmra.mrb[60].mxu1 %vm369_vm1, %v37402_v14 }
 0x3a4   : > { %30513 = vmatprep.mubr.msk.f32.mxu1 %vm369_vm1, %v37405_v38 }
 0x3a7   : > { %30514 = vmatmul.mubr.msk.f32.gmra.mrb[62].mxu1 %vm369_vm1, %v37412_v10 }
 0x3a8   : > { %30516 = vmatprep.mubr.msk.f32.mxu1 %vm369_vm1, %v37415_v3 }
 0x3ab   : > { %30517 = vmatmul.mubr.msk.f32.gmra.mrb[64].mxu1 %vm369_vm1, %v37422_v7 }
 0x3ac   : > { %30521 = vmatprep.mubr.msk.f32.mxu1 %vm369_vm1, %v37051_v17  ;;  %v25249_v17 = vld [vmem:[%s35745_s17 + $0x420] sm:$0xff] }
 0x3af   : > { %30522 = vmatmul.mubr.msk.f32.vlgmr.msra.gmra.mrb[42].mxu1 %vm369_vm1, %v37058_v62  ;;  %v25244_v62 = vld [vmem:[%s35745_s17 + $0x3f8] sm:$0xff] }
 0x3b0   : > { %30558 = vmatpush3.msk.msra.mxu1 %vm442_vm0, %v35519_v19  ;;  %30524 = vmatprep.mubr.msk.f32.mxu1 %vm369_vm1, %v37061_v48  ;;  %v25243_v48 = vld [vmem:[%s35745_s17 + $0x3f0] sm:$0xff] }
 0x3b1   : > { %30595 = vmatprep.subr.msk.mxu1 %vm442_vm0, %v35520_v12 }
 0x3b3   : > { %30525 = vmatmul.mubr.msk.f32.gmra.mrb[44].mxu1 %vm369_vm1, %v37068_v50  ;;  %v25248_v50 = vld [vmem:[%s35745_s17 + $0x418] sm:$0xff] }
 0x3b4   : > { %30527 = vmatprep.mubr.msk.f32.mxu1 %vm369_vm1, %v37071_v42  ;;  %v25247_v42 = vld [vmem:[%s35745_s17 + $0x410] sm:$0xff] }
 0x3b7   : > { %30528 = vmatmul.mubr.msk.f32.gmra.mrb[46].mxu1 %vm369_vm1, %v37078_v32  ;;  %v25246_v32 = vld [vmem:[%s35745_s17 + $0x408] sm:$0xff] }
 0x3b8   : > { %30530 = vmatprep.mubr.msk.f32.mxu1 %vm369_vm1, %v37081_v28  ;;  %v25245_v28 = vld [vmem:[%s35745_s17 + $0x400] sm:$0xff] }
 0x3bb   : > { %30531 = vmatmul.mubr.msk.f32.gmra.mrb[48].mxu1 %vm369_vm1, %v37088_v53  ;;  %v25250_v53 = vld [vmem:[%s35745_s17 + $0x428] sm:$0xff] }
 0x3bc   : > { %30533 = vmatprep.mubr.msk.f32.mxu1 %vm369_vm1, %v37229_v22  ;;  %v42178_v22 = vmov 0.0|0.0  }
 0x3bf   : > { %30534 = vmatmul.mubr.msk.f32.gmra.mrb[50].mxu1 %vm369_vm1, %v37236_v6  ;;  %v42179_v6 = vmov 0.0  }
 0x3c0   : > { %30536 = vmatprep.mubr.msk.f32.mxu1 %vm369_vm1, %v37239_v9 }
 0x3c3   : > { %30537 = vmatmul.mubr.msk.f32.gmra.mrb[52].mxu1 %vm369_vm1, %v37246_v59  ;;  %v37590_v59 = vld [vmem:[%s42061_s2] ss:$0 sm:$0xff] }
 0x3c4   : > { %30539 = vmatprep.mubr.msk.f32.mxu1 %vm369_vm1, %v37249_v58 }
 0x3c7   : > { %30540 = vmatmul.mubr.msk.f32.gmra.mrb[54].mxu1 %vm369_vm1, %v37256_v23 }
 0x3c8   : > { %30542 = vmatprep.mubr.msk.f32.mxu1 %vm369_vm1, %v37259_v20 }
 0x3cb   : > { %30543 = vmatmul.mubr.msk.f32.gmra.mrb[56].mxu1 %vm369_vm1, %v37266_v35 }
 0x3cc   : > { %30545 = vmatprep.mubr.msk.f32.mxu1 %vm369_vm1, %v25243_v48 }
 0x3cf   : > { %30546 = vmatmul.mubr.msk.f32.gmra.mrb[58].mxu1 %vm369_vm1, %v25244_v62 }
 0x3d0   : > { %30548 = vmatprep.mubr.msk.f32.mxu1 %vm369_vm1, %v25245_v28 }
 0x3d3   : > { %30549 = vmatmul.mubr.msk.f32.gmra.mrb[60].mxu1 %vm369_vm1, %v25246_v32 }
 0x3d4   : > { %30551 = vmatprep.mubr.msk.f32.mxu1 %vm369_vm1, %v25247_v42 }
 0x3d7   : > { %30552 = vmatmul.mubr.msk.f32.gmra.mrb[62].mxu1 %vm369_vm1, %v25248_v50 }
 0x3d8   : > { %30554 = vmatprep.mubr.msk.f32.mxu1 %vm369_vm1, %v25249_v17 }
 0x3db   : > { %30555 = vmatmul.mubr.msk.f32.gmra.mrb[64].mxu1 %vm369_vm1, %v25250_v53 }
 0x3dc   : > { %30559 = vmatprep.mubr.msk.f32.mxu1 %vm369_vm1, %v36950_v44  ;;  %v25292_v44 = vld [vmem:[%s35745_s17 + $0x3f1] sm:$0xff] }
 0x3df   : > { %30560 = vmatmul.mubr.msk.f32.vlgmr.msra.gmra.mrb[42].mxu1 %vm369_vm1, %v36957_v46  ;;  %v25293_v46 = vld [vmem:[%s35745_s17 + $0x3f9] sm:$0xff] }
 0x3e0   : > { %30596 = vmatpush3.msk.msra.mxu1 %vm442_vm0, %v35520_v12  ;;  %30562 = vmatprep.mubr.msk.f32.mxu1 %vm369_vm1, %v36960_v54  ;;  %v25294_v54 = vld [vmem:[%s35745_s17 + $0x401] sm:$0xff] }
 0x3e1   : > { %33585 = vmatprep.subr.bf16.mxu1 %v42178_v22 }
 0x3e3   : > { %30563 = vmatmul.mubr.msk.f32.gmra.mrb[44].mxu1 %vm369_vm1, %v36967_v56  ;;  %v25295_v56 = vld [vmem:[%s35745_s17 + $0x409] sm:$0xff] }
 0x3e4   : > { %30565 = vmatprep.mubr.msk.f32.mxu1 %vm369_vm1, %v36970_v63  ;;  %v25296_v63 = vld [vmem:[%s35745_s17 + $0x411] sm:$0xff] }
 0x3e7   : > { %30566 = vmatmul.mubr.msk.f32.gmra.mrb[46].mxu1 %vm369_vm1, %v36977_v0  ;;  %v25297_v0 = vld [vmem:[%s35745_s17 + $0x419] sm:$0xff] }
 0x3e8   : > { %30568 = vmatprep.mubr.msk.f32.mxu1 %vm369_vm1, %v36980_v57  ;;  %v25298_v57 = vld [vmem:[%s35745_s17 + $0x421] sm:$0xff] }
 0x3eb   : > { %30569 = vmatmul.mubr.msk.f32.gmra.mrb[48].mxu1 %vm369_vm1, %v36987_v4  ;;  %v25299_v4 = vld [vmem:[%s35745_s17 + $0x429] sm:$0xff] }
 0x3ec   : > { %30571 = vmatprep.mubr.msk.f32.mxu1 %vm369_vm1, %v37308_v25 }
 0x3ef   : > { %30572 = vmatmul.mubr.msk.f32.gmra.mrb[50].mxu1 %vm369_vm1, %v37315_v33 }
 0x3f0   : > { %30574 = vmatprep.mubr.msk.f32.mxu1 %vm369_vm1, %v37318_v31 }
 0x3f3   : > { %30575 = vmatmul.mubr.msk.f32.gmra.mrb[52].mxu1 %vm369_vm1, %v37325_v37 }
 0x3f4   : > { %30577 = vmatprep.mubr.msk.f32.mxu1 %vm369_vm1, %v37328_v41 }
 0x3f7   : > { %30578 = vmatmul.mubr.msk.f32.gmra.mrb[54].mxu1 %vm369_vm1, %v37335_v52 }
 0x3f8   : > { %30580 = vmatprep.mubr.msk.f32.mxu1 %vm369_vm1, %v37338_v13 }
 0x3fb   : > { %30581 = vmatmul.mubr.msk.f32.gmra.mrb[56].mxu1 %vm369_vm1, %v37345_v34 }
 0x3fc   : > { %30583 = vmatprep.mubr.msk.f32.mxu1 %vm369_vm1, %v25292_v44 }
 0x3ff   : > { %30584 = vmatmul.mubr.msk.f32.gmra.mrb[58].mxu1 %vm369_vm1, %v25293_v46 }
 0x400   : > { %30586 = vmatprep.mubr.msk.f32.mxu1 %vm369_vm1, %v25294_v54 }
 0x403   : > { %30587 = vmatmul.mubr.msk.f32.gmra.mrb[60].mxu1 %vm369_vm1, %v25295_v56 }
 0x404   : > { %30589 = vmatprep.mubr.msk.f32.mxu1 %vm369_vm1, %v25296_v63 }
 0x407   : > { %30590 = vmatmul.mubr.msk.f32.gmra.mrb[62].mxu1 %vm369_vm1, %v25297_v0 }
 0x408   : > { %30592 = vmatprep.mubr.msk.f32.mxu1 %vm369_vm1, %v25298_v57 }
 0x40b   : > { %30593 = vmatmul.mubr.msk.f32.gmra.mrb[64].mxu1 %vm369_vm1, %v25299_v4 }
 0x40c   : > { %30597 = vmatprep.mubr.msk.f32.mxu1 %vm369_vm1, %v37152_v51  ;;  %v25346_v51 = vld [vmem:[%s35745_s17 + $0x41a] sm:$0xff] }
 0x40f   : > { %30598 = vmatmul.mubr.msk.f32.vlgmr.msra.gmra.mrb[42].mxu1 %vm369_vm1, %v37159_v45  ;;  %v25345_v45 = vld [vmem:[%s35745_s17 + $0x412] sm:$0xff] }
 0x410   : > { %30600 = vmatprep.mubr.msk.f32.mxu1 %vm369_vm1, %v37162_v43  ;;  %33587 = vmatpush3.bf16.msra.mxu1 %v36328_v49  ;;  %v25344_v43 = vld [vmem:[%s35745_s17 + $0x40a] sm:$0xff] }
 0x411   : > { %33588 = vmatprep.subr.bf16.mxu1 %v42178_v22 }
 0x413   : > { %30601 = vmatmul.mubr.msk.f32.gmra.mrb[44].mxu1 %vm369_vm1, %v37169_v29  ;;  %v25343_v29 = vld [vmem:[%s35745_s17 + $0x402] sm:$0xff] }
 0x414   : > { %30603 = vmatprep.mubr.msk.f32.mxu1 %vm369_vm1, %v37172_v26  ;;  %33590 = vmatpush3.bf16.msra.mxu1 %v36402_v18  ;;  %v25342_v26 = vld [vmem:[%s35745_s17 + $0x3fa] sm:$0xff] }
 0x415   : > { %33591 = vmatprep.subr.bf16.mxu1 %v42178_v22 }
 0x417   : > { %30604 = vmatmul.mubr.msk.f32.gmra.mrb[46].mxu1 %vm369_vm1, %v37179_v24  ;;  %v25341_v24 = vld [vmem:[%s35745_s17 + $0x3f2] sm:$0xff] }
 0x418   : > { %30606 = vmatprep.mubr.msk.f32.mxu1 %vm369_vm1, %v37182_v40  ;;  %33593 = vmatpush3.bf16.msra.mxu1 %v36430_v39  ;;  %v25347_v40 = vld [vmem:[%s35745_s17 + $0x422] sm:$0xff] }
 0x419   : > { %33594 = vmatprep.subr.bf16.mxu1 %v42178_v22 }
 0x41b   : > { %30607 = vmatmul.mubr.msk.f32.gmra.mrb[48].mxu1 %vm369_vm1, %v37189_v27  ;;  %v25348_v27 = vld [vmem:[%s35745_s17 + $0x42a] sm:$0xff] }
 0x41c   : > { %30609 = vmatprep.mubr.msk.f32.mxu1 %vm369_vm1, %v37385_v8  ;;  %33596 = vmatpush3.bf16.msra.mxu1 %v36454_v61 }
 0x41d   : > { %33597 = vmatprep.subr.bf16.mxu1 %v42178_v22 }
 0x41f   : > { %30610 = vmatmul.mubr.msk.f32.gmra.mrb[50].mxu1 %vm369_vm1, %v37392_v55 }
 0x420   : > { %30612 = vmatprep.mubr.msk.f32.mxu1 %vm369_vm1, %v37395_v2 }
 0x423   : > { %30613 = vmatmul.mubr.msk.f32.gmra.mrb[52].mxu1 %vm369_vm1, %v37402_v14 }
 0x424   : > { %30615 = vmatprep.mubr.msk.f32.mxu1 %vm369_vm1, %v37405_v38 }
 0x427   : > { %30616 = vmatmul.mubr.msk.f32.gmra.mrb[54].mxu1 %vm369_vm1, %v37412_v10 }
 0x428   : > { %30618 = vmatprep.mubr.msk.f32.mxu1 %vm369_vm1, %v37415_v3 }
 0x42b   : > { %30619 = vmatmul.mubr.msk.f32.gmra.mrb[56].mxu1 %vm369_vm1, %v37422_v7 }
 0x42c   : > { %30621 = vmatprep.mubr.msk.f32.mxu1 %vm369_vm1, %v25341_v24 }
 0x42f   : > { %30622 = vmatmul.mubr.msk.f32.gmra.mrb[58].mxu1 %vm369_vm1, %v25342_v26 }
 0x430   : > { %30624 = vmatprep.mubr.msk.f32.mxu1 %vm369_vm1, %v25343_v29 }
 0x433   : > { %30625 = vmatmul.mubr.msk.f32.gmra.mrb[60].mxu1 %vm369_vm1, %v25344_v43 }
 0x434   : > { %30627 = vmatprep.mubr.msk.f32.mxu1 %vm369_vm1, %v25345_v45 }
 0x437   : > { %30628 = vmatmul.mubr.msk.f32.gmra.mrb[62].mxu1 %vm369_vm1, %v25346_v51 }
 0x438   : > { %30630 = vmatprep.mubr.msk.f32.mxu1 %vm369_vm1, %v25347_v40 }
 0x43b   : > { %30631 = vmatmul.mubr.msk.f32.gmra.mrb[64].mxu1 %vm369_vm1, %v25348_v27 }
 0x43c   : > { %31162 = vmatprep.mubr.msk.f32.mxu1 %vm35641_vm2, %v42179_v6 }
 0x4e2   : > { %v30599_v9 = vpop.f32.mrb[42].mxu1 }
 0x4e3   : > { %v6493_v58 = vadd.f32 %v37590_v59, %v30599_v9  ;;  %v6349_v23 = vpop.f32.mrb[43].mxu1  ;;  %v42180_v9 = vld [vmem:[#allocation15_spill] sm:$0xff] }
 0x4e4   : > { %v6492_v20 = vadd.f32 %v37590_v59, %v6349_v23  ;;  %v42182_v23 = vld [vmem:[#allocation17_spill] sm:$0xff] }
 0x4e5   : > { %6517 = vst.msk [vmem:[#allocation2 + $0x8] sm:$0xff] %vm3079_vm3, %v6493_v58 }
 0x4e6   : > { %6516 = vst.msk [vmem:[#allocation2] sm:$0xff] %vm3079_vm3, %v6492_v20  ;;  %v30602_v35 = vpop.f32.mrb[44].mxu1  ;;  %v42183_v20 = vld [vmem:[#allocation18_spill] sm:$0xff] }
 0x4e7   : > { %v6495_v16 = vadd.f32 %v37590_v59, %v30602_v35  ;;  %v6359_v15 = vpop.f32.mrb[45].mxu1  ;;  %v42184_v35 = vld [vmem:[#allocation19_spill] sm:$0xff] }
 0x4e8   : > { %v6494_v30 = vadd.f32 %v37590_v59, %v6359_v15 }
 0x4e9   : > { %6519 = vst.msk [vmem:[#allocation2 + $0x18] sm:$0xff] %vm3079_vm3, %v6495_v16  ;;  %v42185_v16 = vld [vmem:[#allocation20_spill] sm:$0xff] }
 0x4ea   : > { %6518 = vst.msk [vmem:[#allocation2 + $0x10] sm:$0xff] %vm3079_vm3, %v6494_v30  ;;  %v30605_v25 = vpop.f32.mrb[46].mxu1  ;;  %v42186_v30 = vld [vmem:[#allocation21_spill] sm:$0xff] }
 0x4eb   : > { %v6497_v33 = vadd.f32 %v37590_v59, %v30605_v25  ;;  %v6369_v31 = vpop.f32.mrb[47].mxu1  ;;  %v42187_v25 = vld [vmem:[#allocation22_spill] sm:$0xff] }
 0x4ec   : > { %v6496_v37 = vadd.f32 %v37590_v59, %v6369_v31  ;;  %v42189_v31 = vld [vmem:[#allocation24_spill] sm:$0xff] }
 0x4ed   : > { %6521 = vst.msk [vmem:[#allocation2 + $0x28] sm:$0xff] %vm3079_vm3, %v6497_v33  ;;  %v42188_v33 = vld [vmem:[#allocation23_spill] sm:$0xff] }
 0x4ee   : > { %6520 = vst.msk [vmem:[#allocation2 + $0x20] sm:$0xff] %vm3079_vm3, %v6496_v37  ;;  %v30608_v41 = vpop.f32.mrb[48].mxu1 }
 0x4ef   : > { %v6499_v52 = vadd.f32 %v37590_v59, %v30608_v41  ;;  %v6379_v13 = vpop.f32.mrb[49].mxu1  ;;  %v42190_v41 = vld [vmem:[#allocation25_spill] sm:$0xff] }
 0x4f0   : > { %v6498_v34 = vadd.f32 %v37590_v59, %v6379_v13  ;;  %v42192_v13 = vld [vmem:[#allocation27_spill] sm:$0xff] }
 0x4f1   : > { %6523 = vst.msk [vmem:[#allocation2 + $0x38] sm:$0xff] %vm3079_vm3, %v6499_v52  ;;  %v42191_v52 = vld [vmem:[#allocation26_spill] sm:$0xff] }
 0x4f2   : > { %6522 = vst.msk [vmem:[#allocation2 + $0x30] sm:$0xff] %vm3079_vm3, %v6498_v34  ;;  %v30611_v19 = vpop.f32.mrb[50].mxu1  ;;  %v42193_v34 = vld [vmem:[#allocation28_spill] sm:$0xff] }
 0x4f3   : > { %v6501_v8 = vadd.f32 %v37590_v59, %v30611_v19  ;;  %v6389_v55 = vpop.f32.mrb[51].mxu1 }
 0x4f4   : > { %v6500_v2 = vadd.f32 %v37590_v59, %v6389_v55  ;;  %v42195_v55 = vld [vmem:[#allocation30_spill] sm:$0xff] }
 0x4f5   : > { %6525 = vst.msk [vmem:[#allocation2 + $0x48] sm:$0xff] %vm3079_vm3, %v6501_v8  ;;  %v42194_v8 = vld [vmem:[#allocation29_spill] sm:$0xff] }
 0x4f6   : > { %6524 = vst.msk [vmem:[#allocation2 + $0x40] sm:$0xff] %vm3079_vm3, %v6500_v2  ;;  %v30614_v14 = vpop.f32.mrb[52].mxu1  ;;  %v42196_v2 = vld [vmem:[#allocation31_spill] sm:$0xff] }
 0x4f7   : > { %v6503_v38 = vadd.f32 %v37590_v59, %v30614_v14  ;;  %v6399_v10 = vpop.f32.mrb[53].mxu1  ;;  %v42197_v14 = vld [vmem:[#allocation32_spill] sm:$0xff] }
 0x4f8   : > { %v6502_v3 = vadd.f32 %v37590_v59, %v6399_v10  ;;  %v42198_v10 = vld [vmem:[#allocation33_spill] sm:$0xff] }
 0x4f9   : > { %6527 = vst.msk [vmem:[#allocation2 + $0x58] sm:$0xff] %vm3079_vm3, %v6503_v38  ;;  %v6540_v27 = vld [vmem:[#allocation2] ss:$10 sm:$0x7f] }
 0x4fa   : > { %6526 = vst.msk [vmem:[#allocation2 + $0x50] sm:$0xff] %vm3079_vm3, %v6502_v3  ;;  %v30617_v7 = vpop.f32.mrb[54].mxu1  ;;  %v6763_v15 = vld [vmem:[#allocation2 + $0x1] ss:$10 sm:$0x7f] }
 0x4fb   : > { %v6505_v12 = vadd.f32 %v37590_v59, %v30617_v7  ;;  %v6409_v48 = vpop.f32.mrb[55].mxu1  ;;  %v6988_v38 = vld [vmem:[#allocation2 + $0x2] ss:$10 sm:$0x7f] }
 0x4fc   : > { %v6504_v62 = vadd.f32 %v37590_v59, %v6409_v48  ;;  %v42199_v3 = vld [vmem:[#allocation34_spill] sm:$0xff]  ;;  %v42200_v7 = vld [vmem:[#allocation35_spill] sm:$0xff] }
 0x4fd   : > { %6529 = vst.msk [vmem:[#allocation2 + $0x68] sm:$0xff] %vm3079_vm3, %v6505_v12  ;;  %v42201_v12 = vld [vmem:[#allocation36_spill] sm:$0xff] }
 0x4fe   : > { %6528 = vst.msk [vmem:[#allocation2 + $0x60] sm:$0xff] %vm3079_vm3, %v6504_v62  ;;  %v30620_v28 = vpop.f32.mrb[56].mxu1  ;;  %v42202_v62 = vld [vmem:[#allocation37_spill] sm:$0xff] }
 0x4ff   : > { %v6507_v32 = vadd.f32 %v37590_v59, %v30620_v28  ;;  %v6419_v42 = vpop.f32.mrb[57].mxu1  ;;  %v42203_v28 = vld [vmem:[#allocation38_spill] sm:$0xff] }
 0x500   : > { %v6506_v50 = vadd.f32 %v37590_v59, %v6419_v42  ;;  %v42205_v42 = vld [vmem:[#allocation40_spill] sm:$0xff] }
 0x501   : > { %6531 = vst.msk [vmem:[#allocation2 + $0x78] sm:$0xff] %vm3079_vm3, %v6507_v32  ;;  %v42204_v32 = vld [vmem:[#allocation39_spill] sm:$0xff] }
 0x502   : > { %6530 = vst.msk [vmem:[#allocation2 + $0x70] sm:$0xff] %vm3079_vm3, %v6506_v50  ;;  %v30623_v17 = vpop.f32.mrb[58].mxu1  ;;  %v35522_v50 = vld [vmem:[%s42060_s1 + $0x4] sm:$0x7] }
 0x503   : > { %v6509_v53 = vadd.f32 %v37590_v59, %v30623_v17  ;;  %v6429_v44 = vpop.f32.mrb[59].mxu1  ;;  %v25407_v17 = vld [vmem:[%s35745_s17 + $0x5a1] sm:$0xff] }
 0x504   : > { %v6508_v46 = vadd.f32 %v37590_v59, %v6429_v44  ;;  %v25408_v44 = vld [vmem:[%s35745_s17 + $0x5a9] sm:$0xff] }
 0x505   : > { %6533 = vst.msk [vmem:[#allocation2 + $0x88] sm:$0xff] %vm3079_vm3, %v6509_v53 }
 0x506   : > { %6532 = vst.msk [vmem:[#allocation2 + $0x80] sm:$0xff] %vm3079_vm3, %v6508_v46  ;;  %v30626_v54 = vpop.f32.mrb[60].mxu1  ;;  %v35523_v46 = vld [vmem:[%s42060_s1] sm:$0x7] }
 0x507   : > { %v6511_v56 = vadd.f32 %v37590_v59, %v30626_v54  ;;  %v6439_v63 = vpop.f32.mrb[61].mxu1  ;;  %v25409_v54 = vld [vmem:[%s35745_s17 + $0x5b1] sm:$0xff] }
 0x508   : > { %v6510_v0 = vadd.f32 %v37590_v59, %v6439_v63  ;;  %v25411_v63 = vld [vmem:[%s35745_s17 + $0x5c1] sm:$0xff] }
 0x509   : > { %v6541_v57 = vld [vmem:[#allocation2 + $0x40] ss:$10 sm:$0x7f]  ;;  %6535 = vst.msk [vmem:[#allocation2 + $0x98] sm:$0xff] %vm3079_vm3, %v6511_v56 }
 0x50a   : > { %6534 = vst.msk [vmem:[#allocation2 + $0x90] sm:$0xff] %vm3079_vm3, %v6510_v0  ;;  %v30629_v4 = vpop.f32.mrb[62].mxu1  ;;  %30650 = vmatmul.mubr.msk.f32.vlgmr.msra.gmra.mrb[24].mxu0 %vm3079_vm3, %v6541_v57  ;;  %v6764_v37 = vld [vmem:[#allocation2 + $0x41] ss:$10 sm:$0x7f] }
 0x50b   : > { %v6513_v24 = vadd.f32 %v37590_v59, %v30629_v4  ;;  %33491 = vmatpush3.bf16.msra.mxu0 %v36528_v36  ;;  %v6449_v26 = vpop.f32.mrb[63].mxu1  ;;  %30668 = vmatprep.mubr.msk.f32.mxu0 %vm35641_vm2, %v42179_v6  ;;  %v6989_v48 = vld [vmem:[#allocation2 + $0x42] ss:$10 sm:$0x7f] }
 0x50c   : > { %v6512_v29 = vadd.f32 %v37590_v59, %v6449_v26  ;;  %33492 = vmatprep.subr.bf16.mxu0 %v42178_v22  ;;  %v25410_v56 = vld [vmem:[%s35745_s17 + $0x5b9] sm:$0xff]  ;;  %v35524_v0 = vld [vmem:[%s42060_s1 + $0x8] sm:$0x7]  ;;  %v25413_v4 = vld [vmem:[%s35745_s17 + $0x5d1] sm:$0xff] }
 0x50d   : > { %6537 = vst.msk [vmem:[#allocation2 + $0xa8] sm:$0xff] %vm3079_vm3, %v6513_v24  ;;  %v25412_v57 = vld [vmem:[%s35745_s17 + $0x5c9] sm:$0xff]  ;;  %v25414_v24 = vld [vmem:[%s35745_s17 + $0x5d9] sm:$0xff] }
 0x50e   : > { %6536 = vst.msk [vmem:[#allocation2 + $0xa0] sm:$0xff] %vm3079_vm3, %v6512_v29  ;;  %v30632_v43 = vpop.f32.mrb[64].mxu1  ;;  %v37758_v26 = vld [vmem:[%s35745_s17 + $0x5e9] sm:$0xff]  ;;  %v37764_v29 = vld [vmem:[%s35745_s17 + $0x5f1] sm:$0xff] }
 0x50f   : > { %v6515_v45 = vadd.f32 %v37590_v59, %v30632_v43  ;;  %33494 = vmatpush3.bf16.msra.mxu0 %v36544_v47  ;;  %v6459_v51 = vpop.f32.mrb[65].mxu1  ;;  %v37767_v43 = vld [vmem:[%s35745_s17 + $0x5f9] sm:$0xff] }
 0x510   : > { %v6514_v40 = vadd.f32 %v37590_v59, %v6459_v51  ;;  %33495 = vmatprep.subr.bf16.mxu0 %v42178_v22  ;;  %v42181_v59 = vld [vmem:[#allocation16_spill] sm:$0xff]  ;;  %v37777_v51 = vld [vmem:[%s35745_s17 + $0x609] sm:$0xff] }
 0x511   : > { %6539 = vst.msk [vmem:[#allocation2 + $0xb8] sm:$0xff] %vm3079_vm3, %v6515_v45  ;;  %v37774_v45 = vld [vmem:[%s35745_s17 + $0x601] sm:$0xff] }
 0x512   : > { %6538 = vst.msk [vmem:[#allocation2 + $0xb0] sm:$0xff] %vm3079_vm3, %v6514_v40  ;;  %v37784_v40 = vld [vmem:[%s35745_s17 + $0x611] sm:$0xff] }
 0x513   : > { %33497 = vmatpush3.bf16.msra.mxu0 %v36562_v1 }
 0x514   : > { %33498 = vmatprep.subr.bf16.mxu0 %v42178_v22 }
 0x517   : > { %33500 = vmatpush3.bf16.msra.mxu0 %v36575_v60  ;;  %v35527_v60 = vld [vmem:[%s42060_s1 + $0x14] sm:$0x7] }
 0x518   : > { %33501 = vmatprep.subr.bf16.mxu0 %v42178_v22 }
 0x519   : > { %v6542_v58 = vld [vmem:[#allocation2 + $0x80] ss:$10 sm:$0x7f]  ;;  %v6765_v19 = vld [vmem:[#allocation2 + $0x81] ss:$10 sm:$0x7f] }
 0x51a   : > { %30669 = vmatmul.mubr.msk.f32.vlgmr.msra.gmra.mrb[26].mxu0 %vm3079_vm3, %v6540_v27  ;;  %v6990_v53 = vld [vmem:[#allocation2 + $0x82] ss:$10 sm:$0x7f] }
 0x51b   : > { %33503 = vmatpush3.bf16.msra.mxu0 %v36585_v5  ;;  %30687 = vmatprep.mubr.msk.f32.mxu0 %vm35641_vm2, %v42179_v6  ;;  %v37787_v27 = vld [vmem:[%s35745_s17 + $0x619] sm:$0xff] }
 0x51c   : > { %33504 = vmatprep.subr.bf16.mxu0 %v42178_v22 }
 0x51f   : > { %33506 = vmatpush3.bf16.msra.mxu0 %v36596_v11 }
 0x520   : > { %33507 = vmatprep.subr.bf16.mxu0 %v42178_v22 }
 0x523   : > { %33509 = vmatpush3.bf16.msra.mxu0 %v42180_v9  ;;  %v38026_v9 = vld [vmem:[%s35745_s17 + $0x65a] sm:$0xff] }
 0x524   : > { %33510 = vmatprep.subr.bf16.mxu0 %v42178_v22 }
 0x527   : > { %33512 = vmatpush3.bf16.msra.mxu0 %v42181_v59  ;;  %v38019_v59 = vld [vmem:[%s35745_s17 + $0x652] sm:$0xff] }
 0x528   : > { %33513 = vmatprep.subr.bf16.mxu0 %v42178_v22 }
 0x52a   : > { %30688 = vmatmul.mubr.msk.f32.vlgmr.msra.gmra.mrb[28].mxu0 %vm3079_vm3, %v6542_v58  ;;  %v37794_v58 = vld [vmem:[%s35745_s17 + $0x621] sm:$0xff] }
 0x52b   : > { %33515 = vmatpush3.bf16.msra.mxu0 %v42182_v23  ;;  %30706 = vmatprep.mubr.msk.f32.mxu0 %vm35641_vm2, %v42179_v6  ;;  %v38016_v23 = vld [vmem:[%s35745_s17 + $0x64a] sm:$0xff] }
 0x52c   : > { %33516 = vmatprep.subr.bf16.mxu0 %v42178_v22 }
 0x52f   : > { %33518 = vmatpush3.bf16.msra.mxu0 %v42183_v20 }
 0x530   : > { %33519 = vmatprep.subr.bf16.mxu0 %v42178_v22 }
 0x533   : > { %33521 = vmatpush3.bf16.msra.mxu0 %v42184_v35 }
 0x534   : > { %33522 = vmatprep.subr.bf16.mxu0 %v42178_v22 }
 0x537   : > { %33524 = vmatpush3.bf16.msra.mxu0 %v42185_v16 }
 0x538   : > { %33525 = vmatprep.subr.bf16.mxu0 %v42178_v22 }
 0x53a   : > { %30707 = vmatmul.mubr.msk.f32.vlgmr.msra.gmra.mrb[30].mxu0 %vm3079_vm3, %v6763_v15  ;;  %v37797_v15 = vld [vmem:[%s35745_s17 + $0x631] sm:$0xff] }
 0x53b   : > { %33527 = vmatpush3.bf16.msra.mxu0 %v42186_v30  ;;  %30725 = vmatprep.mubr.msk.f32.mxu0 %vm35641_vm2, %v42179_v6  ;;  %v38009_v30 = vld [vmem:[%s35745_s17 + $0x642] sm:$0xff] }
 0x53c   : > { %33528 = vmatprep.subr.bf16.mxu0 %v42178_v22 }
 0x53f   : > { %33530 = vmatpush3.bf16.msra.mxu0 %v42187_v25  ;;  %v38006_v25 = vld [vmem:[%s35745_s17 + $0x63a] sm:$0xff] }
 0x540   : > { %33531 = vmatprep.subr.bf16.mxu0 %v42178_v22 }
 0x543   : > { %33533 = vmatpush3.bf16.msra.mxu0 %v42188_v33  ;;  %v37999_v33 = vld [vmem:[%s35745_s17 + $0x632] sm:$0xff] }
 0x544   : > { %33534 = vmatprep.subr.bf16.mxu0 %v42178_v22 }
 0x547   : > { %33536 = vmatpush3.bf16.msra.mxu0 %v42189_v31  ;;  %v25485_v31 = vld [vmem:[%s35745_s17 + $0x5c2] sm:$0xff] }
 0x548   : > { %33537 = vmatprep.subr.bf16.mxu0 %v42178_v22 }
 0x54a   : > { %30726 = vmatmul.mubr.msk.f32.vlgmr.msra.gmra.mrb[32].mxu0 %vm3079_vm3, %v6764_v37  ;;  %v37804_v37 = vld [vmem:[%s35745_s17 + $0x639] sm:$0xff] }
 0x54b   : > { %33539 = vmatpush3.bf16.msra.mxu0 %v42190_v41  ;;  %30744 = vmatprep.mubr.msk.f32.mxu0 %vm35641_vm2, %v42179_v6  ;;  %v25484_v41 = vld [vmem:[%s35745_s17 + $0x5ba] sm:$0xff] }
 0x54c   : > { %33540 = vmatprep.subr.bf16.mxu0 %v42178_v22 }
 0x54f   : > { %33542 = vmatpush3.bf16.msra.mxu0 %v42191_v52 }
 0x550   : > { %33543 = vmatprep.subr.bf16.mxu0 %v42178_v22 }
 0x553   : > { %33545 = vmatpush3.bf16.msra.mxu0 %v42192_v13 }
 0x554   : > { %33546 = vmatprep.subr.bf16.mxu0 %v42178_v22 }
 0x557   : > { %33548 = vmatpush3.bf16.msra.mxu0 %v42193_v34 }
 0x558   : > { %33549 = vmatprep.subr.bf16.mxu0 %v42178_v22 }
 0x55a   : > { %30745 = vmatmul.mubr.msk.f32.vlgmr.msra.gmra.mrb[34].mxu0 %vm3079_vm3, %v6765_v19  ;;  %v37807_v19 = vld [vmem:[%s35745_s17 + $0x641] sm:$0xff] }
 0x55b   : > { %33551 = vmatpush3.bf16.msra.mxu0 %v42194_v8  ;;  %30763 = vmatprep.mubr.msk.f32.mxu0 %vm35641_vm2, %v42179_v6  ;;  %v25483_v8 = vld [vmem:[%s35745_s17 + $0x5b2] sm:$0xff] }
 0x55c   : > { %33552 = vmatprep.subr.bf16.mxu0 %v42178_v22 }
 0x55f   : > { %33554 = vmatpush3.bf16.msra.mxu0 %v42195_v55  ;;  %v25482_v55 = vld [vmem:[%s35745_s17 + $0x5aa] sm:$0xff] }
 0x560   : > { %33555 = vmatprep.subr.bf16.mxu0 %v42178_v22 }
 0x563   : > { %33557 = vmatpush3.bf16.msra.mxu0 %v42196_v2  ;;  %v25481_v2 = vld [vmem:[%s35745_s17 + $0x5a2] sm:$0xff] }
 0x564   : > { %33558 = vmatprep.subr.bf16.mxu0 %v42178_v22 }
 0x567   : > { %33560 = vmatpush3.bf16.msra.mxu0 %v42197_v14  ;;  %v37928_v14 = vld [vmem:[%s35745_s17 + $0x660] sm:$0xff] }
 0x568   : > { %33561 = vmatprep.subr.bf16.mxu0 %v42178_v22 }
 0x56a   : > { %30764 = vmatmul.mubr.msk.f32.vlgmr.msra.gmra.mrb[36].mxu0 %vm3079_vm3, %v6988_v38  ;;  %v37814_v38 = vld [vmem:[%s35745_s17 + $0x649] sm:$0xff] }
 0x56b   : > { %33563 = vmatpush3.bf16.msra.mxu0 %v42198_v10  ;;  %30782 = vmatprep.mubr.msk.f32.mxu0 %vm35641_vm2, %v42179_v6  ;;  %v37925_v10 = vld [vmem:[%s35745_s17 + $0x658] sm:$0xff] }
 0x56c   : > { %33564 = vmatprep.subr.bf16.mxu0 %v42178_v22 }
 0x56f   : > { %33566 = vmatpush3.bf16.msra.mxu0 %v42199_v3  ;;  %v37918_v3 = vld [vmem:[%s35745_s17 + $0x650] sm:$0xff] }
 0x570   : > { %33567 = vmatprep.subr.bf16.mxu0 %v42178_v22 }
 0x573   : > { %33569 = vmatpush3.bf16.msra.mxu0 %v42200_v7  ;;  %v37915_v7 = vld [vmem:[%s35745_s17 + $0x648] sm:$0xff] }
 0x574   : > { %33570 = vmatprep.subr.bf16.mxu0 %v42178_v22 }
 0x577   : > { %33572 = vmatpush3.bf16.msra.mxu0 %v42201_v12 }
 0x578   : > { %33573 = vmatprep.subr.bf16.mxu0 %v42178_v22 }
 0x57a   : > { %30783 = vmatmul.mubr.msk.f32.vlgmr.msra.gmra.mrb[38].mxu0 %vm3079_vm3, %v6989_v48  ;;  %v37817_v48 = vld [vmem:[%s35745_s17 + $0x651] sm:$0xff] }
 0x57b   : > { %33575 = vmatpush3.bf16.msra.mxu0 %v42202_v62  ;;  %30801 = vmatprep.mubr.msk.f32.mxu0 %vm35641_vm2, %v42179_v6 }
 0x57c   : > { %33576 = vmatprep.subr.bf16.mxu0 %v42178_v22 }
 0x57f   : > { %33578 = vmatpush3.bf16.msra.mxu0 %v42203_v28  ;;  %v37908_v28 = vld [vmem:[%s35745_s17 + $0x640] sm:$0xff] }
 0x580   : > { %33579 = vmatprep.subr.bf16.mxu0 %v42178_v22 }
 0x583   : > { %33581 = vmatpush3.bf16.msra.mxu0 %v42204_v32  ;;  %v37905_v32 = vld [vmem:[%s35745_s17 + $0x638] sm:$0xff] }
 0x584   : > { %33582 = vmatprep.subr.bf16.mxu0 %v42178_v22 }
 0x587   : > { %33584 = vmatpush3.bf16.msra.mxu0 %v42205_v42  ;;  %v37898_v42 = vld [vmem:[%s35745_s17 + $0x630] sm:$0xff] }
 0x588   : > { %30804 = vmatprep.subr.msk.mxu0 %vm442_vm0, %v35522_v50 }
 0x58a   : > { %30802 = vmatmul.mubr.msk.f32.vlgmr.msra.gmra.mrb[40].mxu0 %vm3079_vm3, %v6990_v53  ;;  %v37834_v53 = vld [vmem:[%s35745_s17 + $0x669] sm:$0xff] }
 0x58b   : > { %30805 = vmatpush3.msk.msra.mxu0 %vm442_vm0, %v35522_v50  ;;  %30806 = vmatprep.mubr.msk.f32.mxu0 %vm369_vm1, %v25407_v17  ;;  %v37824_v50 = vld [vmem:[%s35745_s17 + $0x659] sm:$0xff]  ;;  %v37827_v17 = vld [vmem:[%s35745_s17 + $0x661] sm:$0xff] }
 0x58c   : > { %30842 = vmatprep.subr.msk.mxu0 %vm442_vm0, %v35523_v46 }
 0x58e   : > { %30807 = vmatmul.mubr.msk.f32.vlgmr.msra.gmra.mrb[42].mxu0 %vm369_vm1, %v25408_v44  ;;  %v25383_v44 = vld [vmem:[%s35745_s17 + $0x5a0] sm:$0xff] }
 0x58f   : > { %30843 = vmatpush3.msk.msra.mxu0 %vm442_vm0, %v35523_v46  ;;  %30809 = vmatprep.mubr.msk.f32.mxu0 %vm369_vm1, %v25409_v54  ;;  %v25384_v46 = vld [vmem:[%s35745_s17 + $0x5a8] sm:$0xff]  ;;  %v25385_v54 = vld [vmem:[%s35745_s17 + $0x5b0] sm:$0xff] }
 0x590   : > { %30880 = vmatprep.subr.msk.mxu0 %vm442_vm0, %v35524_v0 }
 0x592   : > { %30810 = vmatmul.mubr.msk.f32.gmra.mrb[44].mxu0 %vm369_vm1, %v25410_v56  ;;  %v25386_v56 = vld [vmem:[%s35745_s17 + $0x5b8] sm:$0xff] }
 0x593   : > { %30812 = vmatprep.mubr.msk.f32.mxu0 %vm369_vm1, %v25411_v63  ;;  %v25387_v63 = vld [vmem:[%s35745_s17 + $0x5c0] sm:$0xff] }
 0x596   : > { %30813 = vmatmul.mubr.msk.f32.gmra.mrb[46].mxu0 %vm369_vm1, %v25412_v57  ;;  %v35525_v57 = vld [vmem:[%s42060_s1 + $0xc] sm:$0x7] }
 0x597   : > { %30815 = vmatprep.mubr.msk.f32.mxu0 %vm369_vm1, %v25413_v4  ;;  %v25388_v4 = vld [vmem:[%s35745_s17 + $0x5c8] sm:$0xff] }
 0x59a   : > { %30816 = vmatmul.mubr.msk.f32.gmra.mrb[48].mxu0 %vm369_vm1, %v25414_v24  ;;  %v25390_v24 = vld [vmem:[%s35745_s17 + $0x5d8] sm:$0xff] }
 0x59b   : > { %30818 = vmatprep.mubr.msk.f32.mxu0 %vm369_vm1, %v37758_v26 }
 0x59e   : > { %30819 = vmatmul.mubr.msk.f32.gmra.mrb[50].mxu0 %vm369_vm1, %v37764_v29 }
 0x59f   : > { %30821 = vmatprep.mubr.msk.f32.mxu0 %vm369_vm1, %v37767_v43 }
 0x5a2   : > { %30822 = vmatmul.mubr.msk.f32.gmra.mrb[52].mxu0 %vm369_vm1, %v37774_v45 }
 0x5a3   : > { %30824 = vmatprep.mubr.msk.f32.mxu0 %vm369_vm1, %v37777_v51 }
 0x5a6   : > { %30825 = vmatmul.mubr.msk.f32.gmra.mrb[54].mxu0 %vm369_vm1, %v37784_v40 }
 0x5a7   : > { %30827 = vmatprep.mubr.msk.f32.mxu0 %vm369_vm1, %v37787_v27 }
 0x5aa   : > { %30828 = vmatmul.mubr.msk.f32.gmra.mrb[56].mxu0 %vm369_vm1, %v37794_v58 }
 0x5ab   : > { %30830 = vmatprep.mubr.msk.f32.mxu0 %vm369_vm1, %v37797_v15 }
 0x5ae   : > { %30831 = vmatmul.mubr.msk.f32.gmra.mrb[58].mxu0 %vm369_vm1, %v37804_v37 }
 0x5af   : > { %30833 = vmatprep.mubr.msk.f32.mxu0 %vm369_vm1, %v37807_v19 }
 0x5b2   : > { %30834 = vmatmul.mubr.msk.f32.gmra.mrb[60].mxu0 %vm369_vm1, %v37814_v38 }
 0x5b3   : > { %30836 = vmatprep.mubr.msk.f32.mxu0 %vm369_vm1, %v37817_v48 }
 0x5b6   : > { %30837 = vmatmul.mubr.msk.f32.gmra.mrb[62].mxu0 %vm369_vm1, %v37824_v50 }
 0x5b7   : > { %30839 = vmatprep.mubr.msk.f32.mxu0 %vm369_vm1, %v37827_v17 }
 0x5ba   : > { %30840 = vmatmul.mubr.msk.f32.gmra.mrb[64].mxu0 %vm369_vm1, %v37834_v53 }
 0x5bb   : > { %30844 = vmatprep.mubr.msk.f32.mxu0 %vm369_vm1, %v25383_v44  ;;  %v37859_v44 = vld [vmem:[%s35745_s17 + $0x5e8] sm:$0xff] }
 0x5be   : > { %30845 = vmatmul.mubr.msk.f32.vlgmr.msra.gmra.mrb[42].mxu0 %vm369_vm1, %v25384_v46  ;;  %v37865_v46 = vld [vmem:[%s35745_s17 + $0x5f0] sm:$0xff] }
 0x5bf   : > { %30881 = vmatpush3.msk.msra.mxu0 %vm442_vm0, %v35524_v0  ;;  %30847 = vmatprep.mubr.msk.f32.mxu0 %vm369_vm1, %v25385_v54  ;;  %v25389_v0 = vld [vmem:[%s35745_s17 + $0x5d0] sm:$0xff]  ;;  %v37868_v54 = vld [vmem:[%s35745_s17 + $0x5f8] sm:$0xff] }
 0x5c0   : > { %30918 = vmatprep.subr.msk.mxu0 %vm442_vm0, %v35525_v57 }
 0x5c2   : > { %30848 = vmatmul.mubr.msk.f32.gmra.mrb[44].mxu0 %vm369_vm1, %v25386_v56  ;;  %v37875_v56 = vld [vmem:[%s35745_s17 + $0x600] sm:$0xff] }
 0x5c3   : > { %30850 = vmatprep.mubr.msk.f32.mxu0 %vm369_vm1, %v25387_v63  ;;  %v37878_v63 = vld [vmem:[%s35745_s17 + $0x608] sm:$0xff] }
 0x5c6   : > { %30851 = vmatmul.mubr.msk.f32.gmra.mrb[46].mxu0 %vm369_vm1, %v25388_v4  ;;  %v37885_v4 = vld [vmem:[%s35745_s17 + $0x610] sm:$0xff] }
 0x5c7   : > { %30853 = vmatprep.mubr.msk.f32.mxu0 %vm369_vm1, %v25389_v0  ;;  %v37888_v0 = vld [vmem:[%s35745_s17 + $0x618] sm:$0xff] }
 0x5ca   : > { %30854 = vmatmul.mubr.msk.f32.gmra.mrb[48].mxu0 %vm369_vm1, %v25390_v24  ;;  %v37895_v24 = vld [vmem:[%s35745_s17 + $0x620] sm:$0xff] }
 0x5cb   : > { %30856 = vmatprep.mubr.msk.f32.mxu0 %vm369_vm1, %v37859_v44 }
 0x5ce   : > { %30857 = vmatmul.mubr.msk.f32.gmra.mrb[50].mxu0 %vm369_vm1, %v37865_v46 }
 0x5cf   : > { %30859 = vmatprep.mubr.msk.f32.mxu0 %vm369_vm1, %v37868_v54 }
 0x5d2   : > { %30860 = vmatmul.mubr.msk.f32.gmra.mrb[52].mxu0 %vm369_vm1, %v37875_v56 }
 0x5d3   : > { %30862 = vmatprep.mubr.msk.f32.mxu0 %vm369_vm1, %v37878_v63 }
 0x5d6   : > { %30863 = vmatmul.mubr.msk.f32.gmra.mrb[54].mxu0 %vm369_vm1, %v37885_v4 }
 0x5d7   : > { %30865 = vmatprep.mubr.msk.f32.mxu0 %vm369_vm1, %v37888_v0 }
 0x5da   : > { %30866 = vmatmul.mubr.msk.f32.gmra.mrb[56].mxu0 %vm369_vm1, %v37895_v24 }
 0x5db   : > { %30868 = vmatprep.mubr.msk.f32.mxu0 %vm369_vm1, %v37898_v42 }
 0x5dd   : > { %v6612_v62 = vpop.f32.mrb[24].mxu0 }
 0x5de   : > { %30869 = vmatmul.mubr.msk.f32.gmra.mrb[58].mxu0 %vm369_vm1, %v37905_v32  ;;  %v30651_v12 = vpop.f32.mrb[25].mxu0 }
 0x5df   : > { %30871 = vmatprep.mubr.msk.f32.mxu0 %vm369_vm1, %v37908_v28  ;;  %v37935_v12 = vld [vmem:[%s35745_s17 + $0x668] sm:$0xff] }
 0x5e2   : > { %30872 = vmatmul.mubr.msk.f32.gmra.mrb[60].mxu0 %vm369_vm1, %v37915_v7 }
 0x5e3   : > { %30874 = vmatprep.mubr.msk.f32.mxu0 %vm369_vm1, %v37918_v3 }
 0x5e6   : > { %30875 = vmatmul.mubr.msk.f32.gmra.mrb[62].mxu0 %vm369_vm1, %v37925_v10 }
 0x5e7   : > { %30877 = vmatprep.mubr.msk.f32.mxu0 %vm369_vm1, %v37928_v14 }
 0x5ea   : > { %30878 = vmatmul.mubr.msk.f32.gmra.mrb[64].mxu0 %vm369_vm1, %v37935_v12 }
 0x5eb   : > { %30882 = vmatprep.mubr.msk.f32.mxu0 %vm369_vm1, %v25481_v2  ;;  %v35526_v2 = vld [vmem:[%s42060_s1 + $0x10] sm:$0x7] }
 0x5ed   : > { %v6685_v34 = vpop.f32.mrb[26].mxu0 }
 0x5ee   : > { %v6686_v13 = vadd.f32 %v6685_v34, %v6612_v62  ;;  %v30670_v52 = vpop.f32.mrb[27].mxu0  ;;  %30883 = vmatmul.mubr.msk.f32.vlgmr.msra.gmra.mrb[42].mxu0 %vm369_vm1, %v25482_v55  ;;  %v25487_v34 = vld [vmem:[%s35745_s17 + $0x5d2] sm:$0xff]  ;;  %v37960_v55 = vld [vmem:[%s35745_s17 + $0x5ea] sm:$0xff] }
 0x5ef   : > { %30919 = vmatpush3.msk.msra.mxu0 %vm442_vm0, %v35525_v57  ;;  %30885 = vmatprep.mubr.msk.f32.mxu0 %vm369_vm1, %v25483_v8  ;;  %v25486_v52 = vld [vmem:[%s35745_s17 + $0x5ca] sm:$0xff]  ;;  %v25488_v8 = vld [vmem:[%s35745_s17 + $0x5da] sm:$0xff] }
 0x5f0   : > { %30956 = vmatprep.subr.msk.mxu0 %vm442_vm0, %v35526_v2 }
 0x5f2   : > { %30886 = vmatmul.mubr.msk.f32.gmra.mrb[44].mxu0 %vm369_vm1, %v25484_v41  ;;  %v37969_v41 = vld [vmem:[%s35745_s17 + $0x5fa] sm:$0xff] }
 0x5f3   : > { %30888 = vmatprep.mubr.msk.f32.mxu0 %vm369_vm1, %v25485_v31  ;;  %v37966_v31 = vld [vmem:[%s35745_s17 + $0x5f2] sm:$0xff] }
 0x5f6   : > { %30889 = vmatmul.mubr.msk.f32.gmra.mrb[46].mxu0 %vm369_vm1, %v25486_v52 }
 0x5f7   : > { %30891 = vmatprep.mubr.msk.f32.mxu0 %vm369_vm1, %v25487_v34  ;;  %v37976_v34 = vld [vmem:[%s35745_s17 + $0x602] sm:$0xff] }
 0x5fa   : > { %30892 = vmatmul.mubr.msk.f32.gmra.mrb[48].mxu0 %vm369_vm1, %v25488_v8  ;;  %v37979_v8 = vld [vmem:[%s35745_s17 + $0x60a] sm:$0xff] }
 0x5fb   : > { %30894 = vmatprep.mubr.msk.f32.mxu0 %vm369_vm1, %v37960_v55 }
 0x5fd   : > { %v6758_v62 = vpop.f32.mrb[28].mxu0 }
 0x5fe   : > { %v6762_v57 = vadd.f32 %v6758_v62, %v6686_v13  ;;  %v30689_v52 = vpop.f32.mrb[29].mxu0  ;;  %30895 = vmatmul.mubr.msk.f32.gmra.mrb[50].mxu0 %vm369_vm1, %v37966_v31  ;;  %v37986_v13 = vld [vmem:[%s35745_s17 + $0x612] sm:$0xff]  ;;  %v37989_v62 = vld [vmem:[%s35745_s17 + $0x61a] sm:$0xff] }
 0x5ff   : > { %30897 = vmatprep.mubr.msk.f32.mxu0 %vm369_vm1, %v37969_v41  ;;  %v37996_v52 = vld [vmem:[%s35745_s17 + $0x622] sm:$0xff] }
 0x602   : > { %30898 = vmatmul.mubr.msk.f32.gmra.mrb[52].mxu0 %vm369_vm1, %v37976_v34 }
 0x603   : > { %30900 = vmatprep.mubr.msk.f32.mxu0 %vm369_vm1, %v37979_v8 }
 0x606   : > { %30901 = vmatmul.mubr.msk.f32.gmra.mrb[54].mxu0 %vm369_vm1, %v37986_v13 }
 0x607   : > { %30903 = vmatprep.mubr.msk.f32.mxu0 %vm369_vm1, %v37989_v62 }
 0x60a   : > { %30904 = vmatmul.mubr.msk.f32.gmra.mrb[56].mxu0 %vm369_vm1, %v37996_v52 }
 0x60b   : > { %30906 = vmatprep.mubr.msk.f32.mxu0 %vm369_vm1, %v37999_v33 }
 0x60d   : > { %v6835_v16 = vpop.f32.mrb[30].mxu0 }
 0x60e   : > { %v6839_v35 = vadd.f32 %v6835_v16, %v6762_v57  ;;  %v30708_v20 = vpop.f32.mrb[31].mxu0  ;;  %30907 = vmatmul.mubr.msk.f32.gmra.mrb[58].mxu0 %vm369_vm1, %v38006_v25  ;;  %v38029_v16 = vld [vmem:[%s35745_s17 + $0x662] sm:$0xff] }
 0x60f   : > { %30909 = vmatprep.mubr.msk.f32.mxu0 %vm369_vm1, %v38009_v30  ;;  %v38036_v20 = vld [vmem:[%s35745_s17 + $0x66a] sm:$0xff] }
 0x612   : > { %30910 = vmatmul.mubr.msk.f32.gmra.mrb[60].mxu0 %vm369_vm1, %v38016_v23 }
 0x613   : > { %30912 = vmatprep.mubr.msk.f32.mxu0 %vm369_vm1, %v38019_v59 }
 0x616   : > { %30913 = vmatmul.mubr.msk.f32.gmra.mrb[62].mxu0 %vm369_vm1, %v38026_v9 }
 0x617   : > { %30915 = vmatprep.mubr.msk.f32.mxu0 %vm369_vm1, %v38029_v16 }
 0x61a   : > { %30916 = vmatmul.mubr.msk.f32.gmra.mrb[64].mxu0 %vm369_vm1, %v38036_v20 }
 0x61b   : > { %30920 = vmatprep.mubr.msk.f32.mxu0 %vm369_vm1, %v37859_v44 }
 0x61d   : > { %v6909_v57 = vpop.f32.mrb[32].mxu0 }
 0x61e   : > { %v6913_v11 = vadd.f32 %v6909_v57, %v6839_v35  ;;  %v30727_v5 = vpop.f32.mrb[33].mxu0  ;;  %30921 = vmatmul.mubr.msk.f32.vlgmr.msra.gmra.mrb[42].mxu0 %vm369_vm1, %v37865_v46  ;;  %v38083_v46 = vld [vmem:[%s35745_s17 + $0x680] sm:$0xff]  ;;  %v38106_v57 = vld [vmem:[%s35745_s17 + $0x6a8] sm:$0xff] }
 0x61f   : > { %30957 = vmatpush3.msk.msra.mxu0 %vm442_vm0, %v35526_v2  ;;  %30923 = vmatprep.mubr.msk.f32.mxu0 %vm369_vm1, %v37868_v54  ;;  %v38086_v54 = vld [vmem:[%s35745_s17 + $0x688] sm:$0xff]  ;;  %v38103_v2 = vld [vmem:[%s35745_s17 + $0x6a0] sm:$0xff] }
 0x620   : > { %30994 = vmatprep.subr.msk.mxu0 %vm442_vm0, %v35527_v60 }
 0x622   : > { %30924 = vmatmul.mubr.msk.f32.gmra.mrb[44].mxu0 %vm369_vm1, %v37875_v56 }
 0x623   : > { %30926 = vmatprep.mubr.msk.f32.mxu0 %vm369_vm1, %v37878_v63 }
 0x626   : > { %30927 = vmatmul.mubr.msk.f32.gmra.mrb[46].mxu0 %vm369_vm1, %v37885_v4 }
 0x627   : > { %30929 = vmatprep.mubr.msk.f32.mxu0 %vm369_vm1, %v37888_v0  ;;  %v38093_v0 = vld [vmem:[%s35745_s17 + $0x690] sm:$0xff] }
 0x62a   : > { %30930 = vmatmul.mubr.msk.f32.gmra.mrb[48].mxu0 %vm369_vm1, %v37895_v24  ;;  %v38096_v24 = vld [vmem:[%s35745_s17 + $0x698] sm:$0xff] }
 0x62b   : > { %30932 = vmatprep.mubr.msk.f32.mxu0 %vm369_vm1, %v37898_v42 }
 0x62d   : > { %v6983_v5 = vpop.f32.mrb[34].mxu0 }
 0x62e   : > { %v6987_v35 = vadd.f32 %v6983_v5, %v6913_v11  ;;  %v30746_v44 = vpop.f32.mrb[35].mxu0  ;;  %30933 = vmatmul.mubr.msk.f32.gmra.mrb[50].mxu0 %vm369_vm1, %v37905_v32  ;;  %v38076_v11 = vld [vmem:[%s35745_s17 + $0x678] sm:$0xff]  ;;  %v38113_v5 = vld [vmem:[%s35745_s17 + $0x6b0] sm:$0xff] }
 0x62f   : > { %30935 = vmatprep.mubr.msk.f32.mxu0 %vm369_vm1, %v37908_v28 }
 0x632   : > { %30936 = vmatmul.mubr.msk.f32.gmra.mrb[52].mxu0 %vm369_vm1, %v37915_v7 }
 0x633   : > { %30938 = vmatprep.mubr.msk.f32.mxu0 %vm369_vm1, %v37918_v3 }
 0x636   : > { %30939 = vmatmul.mubr.msk.f32.gmra.mrb[54].mxu0 %vm369_vm1, %v37925_v10 }
 0x637   : > { %30941 = vmatprep.mubr.msk.f32.mxu0 %vm369_vm1, %v37928_v14 }
 0x63a   : > { %30942 = vmatmul.mubr.msk.f32.gmra.mrb[56].mxu0 %vm369_vm1, %v37935_v12 }
 0x63b   : > { %30944 = vmatprep.mubr.msk.f32.mxu0 %vm369_vm1, %v38076_v11 }
 0x63d   : > { %v7060_v56 = vpop.f32.mrb[36].mxu0 }
 0x63e   : > { %v7064_v63 = vadd.f32 %v7060_v56, %v6987_v35  ;;  %v30765_v4 = vpop.f32.mrb[37].mxu0  ;;  %30945 = vmatmul.mubr.msk.f32.gmra.mrb[58].mxu0 %vm369_vm1, %v38083_v46 }
 0x63f   : > { %30947 = vmatprep.mubr.msk.f32.mxu0 %vm369_vm1, %v38086_v54  ;;  %v35528_v4 = vld [vmem:[%s42060_s1 + $0x18] sm:$0x7] }
 0x642   : > { %30948 = vmatmul.mubr.msk.f32.gmra.mrb[60].mxu0 %vm369_vm1, %v38093_v0 }
 0x643   : > { %30950 = vmatprep.mubr.msk.f32.mxu0 %vm369_vm1, %v38096_v24 }
 0x646   : > { %30951 = vmatmul.mubr.msk.f32.gmra.mrb[62].mxu0 %vm369_vm1, %v38103_v2 }
 0x647   : > { %30953 = vmatprep.mubr.msk.f32.mxu0 %vm369_vm1, %v38106_v57 }
 0x64a   : > { %30954 = vmatmul.mubr.msk.f32.gmra.mrb[64].mxu0 %vm369_vm1, %v38113_v5 }
 0x64b   : > { %30958 = vmatprep.mubr.msk.f32.mxu0 %vm369_vm1, %v37758_v26 }
 0x64d   : > { %v7134_v35 = vpop.f32.mrb[38].mxu0 }
 0x64e   : > { %v7138_v44 = vadd.f32 %v7134_v35, %v7064_v63  ;;  %v30784_v56 = vpop.f32.mrb[39].mxu0  ;;  %30959 = vmatmul.mubr.msk.f32.vlgmr.msra.gmra.mrb[42].mxu0 %vm369_vm1, %v37764_v29  ;;  %v38180_v63 = vld [vmem:[%s35745_s17 + $0x691] sm:$0xff]  ;;  %v38183_v35 = vld [vmem:[%s35745_s17 + $0x699] sm:$0xff] }
 0x64f   : > { %30995 = vmatpush3.msk.msra.mxu0 %vm442_vm0, %v35527_v60  ;;  %30961 = vmatprep.mubr.msk.f32.mxu0 %vm369_vm1, %v37767_v43  ;;  %v24932_v60 = vld [vmem:[%s42063_s4] ss:$0 sm:$0xff]  ;;  %v38193_v56 = vld [vmem:[%s35745_s17 + $0x6a9] sm:$0xff] }
 0x650   : > { %31032 = vmatprep.subr.msk.mxu0 %vm442_vm0, %v35528_v4 }
 0x652   : > { %30962 = vmatmul.mubr.msk.f32.gmra.mrb[44].mxu0 %vm369_vm1, %v37774_v45  ;;  %v38148_v45 = vadd.f32 %v24932_v60, %v37293_v21  ;;  %v38163_v21 = vld [vmem:[%s35745_s17 + $0x679] sm:$0xff] }
 0x653   : > { %30964 = vmatprep.mubr.msk.f32.mxu0 %vm369_vm1, %v37777_v51 }
 0x656   : > { %30965 = vmatmul.mubr.msk.f32.gmra.mrb[46].mxu0 %vm369_vm1, %v37784_v40  ;;  %v38743_v40 = vld [vmem:[%s35745_s17 + $0x8e8] sm:$0xff] }
 0x657   : > { %30967 = vmatprep.mubr.msk.f32.mxu0 %vm369_vm1, %v37787_v27  ;;  %v38170_v27 = vld [vmem:[%s35745_s17 + $0x681] sm:$0xff] }
 0x65a   : > { %30968 = vmatmul.mubr.msk.f32.gmra.mrb[48].mxu0 %vm369_vm1, %v37794_v58  ;;  %v38173_v58 = vld [vmem:[%s35745_s17 + $0x689] sm:$0xff] }
 0x65b   : > { %30970 = vmatprep.mubr.msk.f32.mxu0 %vm369_vm1, %v37797_v15 }
 0x65d   : > { %v7208_v26 = vpop.f32.mrb[40].mxu0 }
 0x65e   : > { %v7212_v29 = vadd.f32 %v7208_v26, %v7138_v44  ;;  %v30803_v43 = vpop.f32.mrb[41].mxu0  ;;  %30971 = vmatmul.mubr.msk.f32.gmra.mrb[50].mxu0 %vm369_vm1, %v37804_v37  ;;  %v38190_v44 = vld [vmem:[%s35745_s17 + $0x6a1] sm:$0xff]  ;;  %v35529_v26 = vld [vmem:[%s42060_s1 + $0x1c] sm:$0x7] }
 0x65f   : > { %30973 = vmatprep.mubr.msk.f32.mxu0 %vm369_vm1, %v37807_v19 }
 0x660   : > { %v38150_v51 = vadd.f32 %v24932_v60, %v7212_v29  ;;  %v38200_v60 = vld [vmem:[%s35745_s17 + $0x6b1] sm:$0xff] }
 0x662   : > { %30974 = vmatmul.mubr.msk.f32.gmra.mrb[52].mxu0 %vm369_vm1, %v37814_v38 }
 0x663   : > { %30976 = vmatprep.mubr.msk.f32.mxu0 %vm369_vm1, %v37817_v48 }
 0x666   : > { %30977 = vmatmul.mubr.msk.f32.gmra.mrb[54].mxu0 %vm369_vm1, %v37824_v50 }
 0x667   : > { %30979 = vmatprep.mubr.msk.f32.mxu0 %vm369_vm1, %v37827_v17 }
 0x66a   : > { %30980 = vmatmul.mubr.msk.f32.gmra.mrb[56].mxu0 %vm369_vm1, %v37834_v53 }
 0x66b   : > { %30982 = vmatprep.mubr.msk.f32.mxu0 %vm369_vm1, %v38163_v21 }
 0x66e   : > { %30983 = vmatmul.mubr.msk.f32.gmra.mrb[58].mxu0 %vm369_vm1, %v38170_v27 }
 0x66f   : > { %30985 = vmatprep.mubr.msk.f32.mxu0 %vm369_vm1, %v38173_v58 }
 0x672   : > { %30986 = vmatmul.mubr.msk.f32.gmra.mrb[60].mxu0 %vm369_vm1, %v38180_v63 }
 0x673   : > { %30988 = vmatprep.mubr.msk.f32.mxu0 %vm369_vm1, %v38183_v35 }
 0x676   : > { %30989 = vmatmul.mubr.msk.f32.gmra.mrb[62].mxu0 %vm369_vm1, %v38190_v44 }
 0x677   : > { %30991 = vmatprep.mubr.msk.f32.mxu0 %vm369_vm1, %v38193_v56 }
 0x67a   : > { %30992 = vmatmul.mubr.msk.f32.gmra.mrb[64].mxu0 %vm369_vm1, %v38200_v60 }
 0x67b   : > { %30996 = vmatprep.mubr.msk.f32.mxu0 %vm369_vm1, %v37960_v55  ;;  %v38240_v55 = vld [vmem:[%s35745_s17 + $0x67a] sm:$0xff] }
 0x67e   : > { %30997 = vmatmul.mubr.msk.f32.vlgmr.msra.gmra.mrb[42].mxu0 %vm369_vm1, %v37966_v31  ;;  %v38247_v31 = vld [vmem:[%s35745_s17 + $0x682] sm:$0xff] }
 0x67f   : > { %31033 = vmatpush3.msk.msra.mxu0 %vm442_vm0, %v35528_v4  ;;  %30999 = vmatprep.mubr.msk.f32.mxu0 %vm369_vm1, %v37969_v41  ;;  %v38250_v41 = vld [vmem:[%s35745_s17 + $0x68a] sm:$0xff]  ;;  %v35530_v4 = vld [vmem:[%s42060_s1 + $0x20] sm:$0x7] }
 0x680   : > { %31070 = vmatprep.subr.msk.mxu0 %vm442_vm0, %v35529_v26 }
 0x682   : > { %31000 = vmatmul.mubr.msk.f32.gmra.mrb[44].mxu0 %vm369_vm1, %v37976_v34  ;;  %v38257_v34 = vld [vmem:[%s35745_s17 + $0x692] sm:$0xff] }
 0x683   : > { %31002 = vmatprep.mubr.msk.f32.mxu0 %vm369_vm1, %v37979_v8  ;;  %v38260_v8 = vld [vmem:[%s35745_s17 + $0x69a] sm:$0xff] }
 0x686   : > { %31003 = vmatmul.mubr.msk.f32.gmra.mrb[46].mxu0 %vm369_vm1, %v37986_v13  ;;  %v38267_v13 = vld [vmem:[%s35745_s17 + $0x6a2] sm:$0xff] }
 0x687   : > { %31005 = vmatprep.mubr.msk.f32.mxu0 %vm369_vm1, %v37989_v62  ;;  %v38270_v62 = vld [vmem:[%s35745_s17 + $0x6aa] sm:$0xff] }
 0x68a   : > { %31006 = vmatmul.mubr.msk.f32.gmra.mrb[48].mxu0 %vm369_vm1, %v37996_v52  ;;  %v38277_v52 = vld [vmem:[%s35745_s17 + $0x6b2] sm:$0xff] }
 0x68b   : > { %31008 = vmatprep.mubr.msk.f32.mxu0 %vm369_vm1, %v37999_v33 }
 0x68e   : > { %31009 = vmatmul.mubr.msk.f32.gmra.mrb[50].mxu0 %vm369_vm1, %v38006_v25 }
 0x68f   : > { %31011 = vmatprep.mubr.msk.f32.mxu0 %vm369_vm1, %v38009_v30 }
 0x692   : > { %31012 = vmatmul.mubr.msk.f32.gmra.mrb[52].mxu0 %vm369_vm1, %v38016_v23 }
 0x693   : > { %31014 = vmatprep.mubr.msk.f32.mxu0 %vm369_vm1, %v38019_v59 }
 0x696   : > { %31015 = vmatmul.mubr.msk.f32.gmra.mrb[54].mxu0 %vm369_vm1, %v38026_v9 }
 0x697   : > { %31017 = vmatprep.mubr.msk.f32.mxu0 %vm369_vm1, %v38029_v16 }
 0x69a   : > { %31018 = vmatmul.mubr.msk.f32.gmra.mrb[56].mxu0 %vm369_vm1, %v38036_v20 }
 0x69b   : > { %31020 = vmatprep.mubr.msk.f32.mxu0 %vm369_vm1, %v38240_v55 }
 0x69e   : > { %31021 = vmatmul.mubr.msk.f32.gmra.mrb[58].mxu0 %vm369_vm1, %v38247_v31 }
 0x69f   : > { %31023 = vmatprep.mubr.msk.f32.mxu0 %vm369_vm1, %v38250_v41 }
 0x6a2   : > { %31024 = vmatmul.mubr.msk.f32.gmra.mrb[60].mxu0 %vm369_vm1, %v38257_v34 }
 0x6a3   : > { %31026 = vmatprep.mubr.msk.f32.mxu0 %vm369_vm1, %v38260_v8 }
 0x6a6   : > { %31027 = vmatmul.mubr.msk.f32.gmra.mrb[62].mxu0 %vm369_vm1, %v38267_v13 }
 0x6a7   : > { %31029 = vmatprep.mubr.msk.f32.mxu0 %vm369_vm1, %v38270_v62 }
 0x6aa   : > { %31030 = vmatmul.mubr.msk.f32.gmra.mrb[64].mxu0 %vm369_vm1, %v38277_v52 }
 0x6ab   : > { %31034 = vmatprep.mubr.msk.f32.mxu0 %vm369_vm1, %v37898_v42  ;;  %v25699_v42 = vld [vmem:[%s35745_s17 + $0x6f0] sm:$0xff] }
 0x6ae   : > { %31035 = vmatmul.mubr.msk.f32.vlgmr.msra.gmra.mrb[42].mxu0 %vm369_vm1, %v37905_v32  ;;  %v25698_v32 = vld [vmem:[%s35745_s17 + $0x6e8] sm:$0xff] }
 0x6af   : > { %31071 = vmatpush3.msk.msra.mxu0 %vm442_vm0, %v35529_v26  ;;  %31037 = vmatprep.mubr.msk.f32.mxu0 %vm369_vm1, %v37908_v28  ;;  %v25697_v28 = vld [vmem:[%s35745_s17 + $0x6e0] sm:$0xff] }
 0x6b0   : > { %31108 = vmatprep.subr.msk.mxu0 %vm442_vm0, %v35530_v4 }
 0x6b2   : > { %31038 = vmatmul.mubr.msk.f32.gmra.mrb[44].mxu0 %vm369_vm1, %v37915_v7  ;;  %v25696_v7 = vld [vmem:[%s35745_s17 + $0x6d8] sm:$0xff] }
 0x6b3   : > { %31040 = vmatprep.mubr.msk.f32.mxu0 %vm369_vm1, %v37918_v3  ;;  %v25695_v3 = vld [vmem:[%s35745_s17 + $0x6d0] sm:$0xff] }
 0x6b6   : > { %31041 = vmatmul.mubr.msk.f32.gmra.mrb[46].mxu0 %vm369_vm1, %v37925_v10  ;;  %v25694_v10 = vld [vmem:[%s35745_s17 + $0x6c8] sm:$0xff] }
 0x6b7   : > { %31043 = vmatprep.mubr.msk.f32.mxu0 %vm369_vm1, %v37928_v14  ;;  %v25693_v14 = vld [vmem:[%s35745_s17 + $0x6c0] sm:$0xff] }
 0x6ba   : > { %31044 = vmatmul.mubr.msk.f32.gmra.mrb[48].mxu0 %vm369_vm1, %v37935_v12  ;;  %v25700_v12 = vld [vmem:[%s35745_s17 + $0x6f8] sm:$0xff] }
 0x6bb   : > { %31046 = vmatprep.mubr.msk.f32.mxu0 %vm369_vm1, %v38076_v11 }
 0x6be   : > { %31047 = vmatmul.mubr.msk.f32.gmra.mrb[50].mxu0 %vm369_vm1, %v38083_v46  ;;  %v38445_v46 = vld [vmem:[%s42061_s2] ss:$0 sm:$0xff] }
 0x6bf   : > { %31049 = vmatprep.mubr.msk.f32.mxu0 %vm369_vm1, %v38086_v54 }
 0x6c2   : > { %31050 = vmatmul.mubr.msk.f32.gmra.mrb[52].mxu0 %vm369_vm1, %v38093_v0 }
 0x6c3   : > { %31052 = vmatprep.mubr.msk.f32.mxu0 %vm369_vm1, %v38096_v24 }
 0x6c6   : > { %31053 = vmatmul.mubr.msk.f32.gmra.mrb[54].mxu0 %vm369_vm1, %v38103_v2 }
 0x6c7   : > { %31055 = vmatprep.mubr.msk.f32.mxu0 %vm369_vm1, %v38106_v57 }
 0x6ca   : > { %31056 = vmatmul.mubr.msk.f32.gmra.mrb[56].mxu0 %vm369_vm1, %v38113_v5 }
 0x6cb   : > { %31058 = vmatprep.mubr.msk.f32.mxu0 %vm369_vm1, %v25693_v14 }
 0x6ce   : > { %31059 = vmatmul.mubr.msk.f32.gmra.mrb[58].mxu0 %vm369_vm1, %v25694_v10 }
 0x6cf   : > { %31061 = vmatprep.mubr.msk.f32.mxu0 %vm369_vm1, %v25695_v3 }
 0x6d2   : > { %31062 = vmatmul.mubr.msk.f32.gmra.mrb[60].mxu0 %vm369_vm1, %v25696_v7 }
 0x6d3   : > { %31064 = vmatprep.mubr.msk.f32.mxu0 %vm369_vm1, %v25697_v28 }
 0x6d6   : > { %31065 = vmatmul.mubr.msk.f32.gmra.mrb[62].mxu0 %vm369_vm1, %v25698_v32 }
 0x6d7   : > { %31067 = vmatprep.mubr.msk.f32.mxu0 %vm369_vm1, %v25699_v42 }
 0x6da   : > { %31068 = vmatmul.mubr.msk.f32.gmra.mrb[64].mxu0 %vm369_vm1, %v25700_v12 }
 0x6db   : > { %31072 = vmatprep.mubr.msk.f32.mxu0 %vm369_vm1, %v37797_v15  ;;  %v25742_v15 = vld [vmem:[%s35745_s17 + $0x6c1] sm:$0xff] }
 0x6de   : > { %31073 = vmatmul.mubr.msk.f32.vlgmr.msra.gmra.mrb[42].mxu0 %vm369_vm1, %v37804_v37  ;;  %v25743_v37 = vld [vmem:[%s35745_s17 + $0x6c9] sm:$0xff] }
 0x6df   : > { %31109 = vmatpush3.msk.msra.mxu0 %vm442_vm0, %v35530_v4  ;;  %31075 = vmatprep.mubr.msk.f32.mxu0 %vm369_vm1, %v37807_v19  ;;  %v25744_v19 = vld [vmem:[%s35745_s17 + $0x6d1] sm:$0xff] }
 0x6e0   : > { %33693 = vmatprep.subr.bf16.mxu0 %v42178_v22 }
 0x6e2   : > { %31076 = vmatmul.mubr.msk.f32.gmra.mrb[44].mxu0 %vm369_vm1, %v37814_v38  ;;  %v25745_v38 = vld [vmem:[%s35745_s17 + $0x6d9] sm:$0xff] }
 0x6e3   : > { %31078 = vmatprep.mubr.msk.f32.mxu0 %vm369_vm1, %v37817_v48  ;;  %v25746_v48 = vld [vmem:[%s35745_s17 + $0x6e1] sm:$0xff] }
 0x6e6   : > { %31079 = vmatmul.mubr.msk.f32.gmra.mrb[46].mxu0 %vm369_vm1, %v37824_v50  ;;  %v25747_v50 = vld [vmem:[%s35745_s17 + $0x6e9] sm:$0xff] }
 0x6e7   : > { %31081 = vmatprep.mubr.msk.f32.mxu0 %vm369_vm1, %v37827_v17  ;;  %v25748_v17 = vld [vmem:[%s35745_s17 + $0x6f1] sm:$0xff] }
 0x6ea   : > { %31082 = vmatmul.mubr.msk.f32.gmra.mrb[48].mxu0 %vm369_vm1, %v37834_v53  ;;  %v25749_v53 = vld [vmem:[%s35745_s17 + $0x6f9] sm:$0xff] }
 0x6eb   : > { %31084 = vmatprep.mubr.msk.f32.mxu0 %vm369_vm1, %v38163_v21 }
 0x6ee   : > { %31085 = vmatmul.mubr.msk.f32.gmra.mrb[50].mxu0 %vm369_vm1, %v38170_v27 }
 0x6ef   : > { %31087 = vmatprep.mubr.msk.f32.mxu0 %vm369_vm1, %v38173_v58 }
 0x6f2   : > { %31088 = vmatmul.mubr.msk.f32.gmra.mrb[52].mxu0 %vm369_vm1, %v38180_v63 }
 0x6f3   : > { %31090 = vmatprep.mubr.msk.f32.mxu0 %vm369_vm1, %v38183_v35 }
 0x6f6   : > { %31091 = vmatmul.mubr.msk.f32.gmra.mrb[54].mxu0 %vm369_vm1, %v38190_v44 }
 0x6f7   : > { %31093 = vmatprep.mubr.msk.f32.mxu0 %vm369_vm1, %v38193_v56 }
 0x6fa   : > { %31094 = vmatmul.mubr.msk.f32.gmra.mrb[56].mxu0 %vm369_vm1, %v38200_v60 }
 0x6fb   : > { %31096 = vmatprep.mubr.msk.f32.mxu0 %vm369_vm1, %v25742_v15 }
 0x6fe   : > { %31097 = vmatmul.mubr.msk.f32.gmra.mrb[58].mxu0 %vm369_vm1, %v25743_v37 }
 0x6ff   : > { %31099 = vmatprep.mubr.msk.f32.mxu0 %vm369_vm1, %v25744_v19 }
 0x702   : > { %31100 = vmatmul.mubr.msk.f32.gmra.mrb[60].mxu0 %vm369_vm1, %v25745_v38 }
 0x703   : > { %31102 = vmatprep.mubr.msk.f32.mxu0 %vm369_vm1, %v25746_v48 }
 0x706   : > { %31103 = vmatmul.mubr.msk.f32.gmra.mrb[62].mxu0 %vm369_vm1, %v25747_v50 }
 0x707   : > { %31105 = vmatprep.mubr.msk.f32.mxu0 %vm369_vm1, %v25748_v17 }
 0x70a   : > { %31106 = vmatmul.mubr.msk.f32.gmra.mrb[64].mxu0 %vm369_vm1, %v25749_v53 }
 0x70b   : > { %31110 = vmatprep.mubr.msk.f32.mxu0 %vm369_vm1, %v37999_v33  ;;  %v25796_v33 = vld [vmem:[%s35745_s17 + $0x6ea] sm:$0xff] }
 0x70e   : > { %31111 = vmatmul.mubr.msk.f32.vlgmr.msra.gmra.mrb[42].mxu0 %vm369_vm1, %v38006_v25  ;;  %v25795_v25 = vld [vmem:[%s35745_s17 + $0x6e2] sm:$0xff] }
 0x70f   : > { %31113 = vmatprep.mubr.msk.f32.mxu0 %vm369_vm1, %v38009_v30  ;;  %33695 = vmatpush3.bf16.msra.mxu0 %v36328_v49  ;;  %v25794_v30 = vld [vmem:[%s35745_s17 + $0x6da] sm:$0xff] }
 0x710   : > { %33696 = vmatprep.subr.bf16.mxu0 %v42178_v22 }
 0x712   : > { %31114 = vmatmul.mubr.msk.f32.gmra.mrb[44].mxu0 %vm369_vm1, %v38016_v23  ;;  %v25793_v23 = vld [vmem:[%s35745_s17 + $0x6d2] sm:$0xff] }
 0x713   : > { %31116 = vmatprep.mubr.msk.f32.mxu0 %vm369_vm1, %v38019_v59  ;;  %33698 = vmatpush3.bf16.msra.mxu0 %v36402_v18  ;;  %v25792_v59 = vld [vmem:[%s35745_s17 + $0x6ca] sm:$0xff] }
 0x714   : > { %33699 = vmatprep.subr.bf16.mxu0 %v42178_v22 }
 0x716   : > { %31117 = vmatmul.mubr.msk.f32.gmra.mrb[46].mxu0 %vm369_vm1, %v38026_v9  ;;  %v25791_v9 = vld [vmem:[%s35745_s17 + $0x6c2] sm:$0xff] }
 0x717   : > { %31119 = vmatprep.mubr.msk.f32.mxu0 %vm369_vm1, %v38029_v16  ;;  %33701 = vmatpush3.bf16.msra.mxu0 %v36430_v39  ;;  %v25797_v16 = vld [vmem:[%s35745_s17 + $0x6f2] sm:$0xff] }
 0x718   : > { %33702 = vmatprep.subr.bf16.mxu0 %v42178_v22 }
 0x71a   : > { %31120 = vmatmul.mubr.msk.f32.gmra.mrb[48].mxu0 %vm369_vm1, %v38036_v20  ;;  %v25798_v20 = vld [vmem:[%s35745_s17 + $0x6fa] sm:$0xff] }
 0x71b   : > { %31122 = vmatprep.mubr.msk.f32.mxu0 %vm369_vm1, %v38240_v55  ;;  %33704 = vmatpush3.bf16.msra.mxu0 %v36454_v61 }
 0x71c   : > { %33705 = vmatprep.subr.bf16.mxu0 %v42178_v22 }
 0x71e   : > { %31123 = vmatmul.mubr.msk.f32.gmra.mrb[50].mxu0 %vm369_vm1, %v38247_v31 }
 0x71f   : > { %31125 = vmatprep.mubr.msk.f32.mxu0 %vm369_vm1, %v38250_v41 }
 0x722   : > { %31126 = vmatmul.mubr.msk.f32.gmra.mrb[52].mxu0 %vm369_vm1, %v38257_v34 }
 0x723   : > { %31128 = vmatprep.mubr.msk.f32.mxu0 %vm369_vm1, %v38260_v8 }
 0x726   : > { %31129 = vmatmul.mubr.msk.f32.gmra.mrb[54].mxu0 %vm369_vm1, %v38267_v13 }
 0x727   : > { %31131 = vmatprep.mubr.msk.f32.mxu0 %vm369_vm1, %v38270_v62 }
 0x72a   : > { %31132 = vmatmul.mubr.msk.f32.gmra.mrb[56].mxu0 %vm369_vm1, %v38277_v52 }
 0x72b   : > { %31134 = vmatprep.mubr.msk.f32.mxu0 %vm369_vm1, %v25791_v9 }
 0x72e   : > { %31135 = vmatmul.mubr.msk.f32.gmra.mrb[58].mxu0 %vm369_vm1, %v25792_v59 }
 0x72f   : > { %31137 = vmatprep.mubr.msk.f32.mxu0 %vm369_vm1, %v25793_v23 }
 0x732   : > { %31138 = vmatmul.mubr.msk.f32.gmra.mrb[60].mxu0 %vm369_vm1, %v25794_v30 }
 0x733   : > { %31140 = vmatprep.mubr.msk.f32.mxu0 %vm369_vm1, %v25795_v25 }
 0x736   : > { %31141 = vmatmul.mubr.msk.f32.gmra.mrb[62].mxu0 %vm369_vm1, %v25796_v33 }
 0x737   : > { %31143 = vmatprep.mubr.msk.f32.mxu0 %vm369_vm1, %v25797_v16  ;;  %v42206_v16 = vld [vmem:[#allocation12_spill] sm:$0xff] }
 0x73a   : > { %31144 = vmatmul.mubr.msk.f32.gmra.mrb[64].mxu0 %vm369_vm1, %v25798_v20 }
 0x73b   : > { %31675 = vmatprep.mubr.msk.f32.mxu0 %vm35641_vm2, %v42179_v6 }
 0x7e1   : > { %v31112_v11 = vpop.f32.mrb[42].mxu0 }
 0x7e2   : > { %v9915_v54 = vadd.f32 %v38445_v46, %v31112_v11  ;;  %v9771_v0 = vpop.f32.mrb[43].mxu0  ;;  %v42207_v11 = vld [vmem:[#allocation13_spill] sm:$0xff] }
 0x7e3   : > { %v9914_v24 = vadd.f32 %v38445_v46, %v9771_v0  ;;  %v42210_v0 = vld [vmem:[#allocation16_spill] sm:$0xff] }
 0x7e4   : > { %9939 = vst.msk [vmem:[#allocation2 + $0x8] sm:$0xff] %vm3079_vm3, %v9915_v54  ;;  %v42209_v54 = vld [vmem:[#allocation15_spill] sm:$0xff] }
 0x7e5   : > { %9938 = vst.msk [vmem:[#allocation2] sm:$0xff] %vm3079_vm3, %v9914_v24  ;;  %v31115_v2 = vpop.f32.mrb[44].mxu0 }
 0x7e6   : > { %v9917_v57 = vadd.f32 %v38445_v46, %v31115_v2  ;;  %v9781_v5 = vpop.f32.mrb[45].mxu0  ;;  %v42211_v2 = vld [vmem:[#allocation17_spill] sm:$0xff] }
 0x7e7   : > { %v9916_v29 = vadd.f32 %v38445_v46, %v9781_v5  ;;  %v42213_v5 = vld [vmem:[#allocation19_spill] sm:$0xff] }
 0x7e8   : > { %9941 = vst.msk [vmem:[#allocation2 + $0x18] sm:$0xff] %vm3079_vm3, %v9917_v57  ;;  %v42212_v57 = vld [vmem:[#allocation18_spill] sm:$0xff] }
 0x7e9   : > { %9940 = vst.msk [vmem:[#allocation2 + $0x10] sm:$0xff] %vm3079_vm3, %v9916_v29  ;;  %v31118_v43 = vpop.f32.mrb[46].mxu0  ;;  %v42214_v29 = vld [vmem:[#allocation20_spill] sm:$0xff] }
 0x7ea   : > { %v9919_v21 = vadd.f32 %v38445_v46, %v31118_v43  ;;  %v9791_v27 = vpop.f32.mrb[47].mxu0 }
 0x7eb   : > { %v9918_v58 = vadd.f32 %v38445_v46, %v9791_v27  ;;  %v42216_v27 = vld [vmem:[#allocation22_spill] sm:$0xff] }
 0x7ec   : > { %9943 = vst.msk [vmem:[#allocation2 + $0x28] sm:$0xff] %vm3079_vm3, %v9919_v21  ;;  %v42215_v21 = vld [vmem:[#allocation21_spill] sm:$0xff] }
 0x7ed   : > { %9942 = vst.msk [vmem:[#allocation2 + $0x20] sm:$0xff] %vm3079_vm3, %v9918_v58  ;;  %v31121_v63 = vpop.f32.mrb[48].mxu0  ;;  %v42217_v58 = vld [vmem:[#allocation23_spill] sm:$0xff] }
 0x7ee   : > { %v9921_v35 = vadd.f32 %v38445_v46, %v31121_v63  ;;  %v9801_v44 = vpop.f32.mrb[49].mxu0  ;;  %v42218_v63 = vld [vmem:[#allocation24_spill] sm:$0xff] }
 0x7ef   : > { %v9920_v56 = vadd.f32 %v38445_v46, %v9801_v44  ;;  %v42219_v44 = vld [vmem:[#allocation25_spill] sm:$0xff] }
 0x7f0   : > { %9945 = vst.msk [vmem:[#allocation2 + $0x38] sm:$0xff] %vm3079_vm3, %v9921_v35 }
 0x7f1   : > { %9944 = vst.msk [vmem:[#allocation2 + $0x30] sm:$0xff] %vm3079_vm3, %v9920_v56  ;;  %v31124_v60 = vpop.f32.mrb[50].mxu0  ;;  %v42220_v56 = vld [vmem:[#allocation26_spill] sm:$0xff] }
 0x7f2   : > { %v9923_v26 = vadd.f32 %v38445_v46, %v31124_v60  ;;  %v9811_v55 = vpop.f32.mrb[51].mxu0  ;;  %v42221_v60 = vld [vmem:[#allocation27_spill] sm:$0xff] }
 0x7f3   : > { %v9922_v31 = vadd.f32 %v38445_v46, %v9811_v55 }
 0x7f4   : > { %9947 = vst.msk [vmem:[#allocation2 + $0x48] sm:$0xff] %vm3079_vm3, %v9923_v26  ;;  %v42222_v26 = vld [vmem:[#allocation28_spill] sm:$0xff] }
 0x7f5   : > { %9946 = vst.msk [vmem:[#allocation2 + $0x40] sm:$0xff] %vm3079_vm3, %v9922_v31  ;;  %v31127_v41 = vpop.f32.mrb[52].mxu0  ;;  %v42223_v31 = vld [vmem:[#allocation29_spill] sm:$0xff] }
 0x7f6   : > { %v9925_v34 = vadd.f32 %v38445_v46, %v31127_v41  ;;  %v9821_v8 = vpop.f32.mrb[53].mxu0  ;;  %v42224_v41 = vld [vmem:[#allocation30_spill] sm:$0xff] }
 0x7f7   : > { %v9924_v13 = vadd.f32 %v38445_v46, %v9821_v8  ;;  %v42226_v8 = vld [vmem:[#allocation32_spill] sm:$0xff] }
 0x7f8   : > { %9949 = vst.msk [vmem:[#allocation2 + $0x58] sm:$0xff] %vm3079_vm3, %v9925_v34  ;;  %v9962_v20 = vld [vmem:[#allocation2] ss:$10 sm:$0x7f] }
 0x7f9   : > { %9948 = vst.msk [vmem:[#allocation2 + $0x50] sm:$0xff] %vm3079_vm3, %v9924_v13  ;;  %v31130_v62 = vpop.f32.mrb[54].mxu0  ;;  %v10185_v43 = vld [vmem:[#allocation2 + $0x1] ss:$10 sm:$0x7f] }
 0x7fa   : > { %v9927_v52 = vadd.f32 %v38445_v46, %v31130_v62  ;;  %v9831_v4 = vpop.f32.mrb[55].mxu0  ;;  %v42225_v34 = vld [vmem:[#allocation31_spill] sm:$0xff]  ;;  %v42227_v62 = vld [vmem:[#allocation33_spill] sm:$0xff] }
 0x7fb   : > { %v9926_v14 = vadd.f32 %v38445_v46, %v9831_v4  ;;  %v10410_v13 = vld [vmem:[#allocation2 + $0x2] ss:$10 sm:$0x7f] }
 0x7fc   : > { %9951 = vst.msk [vmem:[#allocation2 + $0x68] sm:$0xff] %vm3079_vm3, %v9927_v52  ;;  %v42228_v52 = vld [vmem:[#allocation34_spill] sm:$0xff]  ;;  %v42229_v4 = vld [vmem:[#allocation35_spill] sm:$0xff] }
 0x7fd   : > { %9950 = vst.msk [vmem:[#allocation2 + $0x60] sm:$0xff] %vm3079_vm3, %v9926_v14  ;;  %v31133_v10 = vpop.f32.mrb[56].mxu0  ;;  %v42230_v14 = vld [vmem:[#allocation36_spill] sm:$0xff] }
 0x7fe   : > { %v9929_v3 = vadd.f32 %v38445_v46, %v31133_v10  ;;  %v9841_v7 = vpop.f32.mrb[57].mxu0 }
 0x7ff   : > { %v9928_v28 = vadd.f32 %v38445_v46, %v9841_v7  ;;  %v42232_v7 = vld [vmem:[#allocation38_spill] sm:$0xff] }
 0x800   : > { %9953 = vst.msk [vmem:[#allocation2 + $0x78] sm:$0xff] %vm3079_vm3, %v9929_v3  ;;  %v42231_v3 = vld [vmem:[#allocation37_spill] sm:$0xff] }
 0x801   : > { %9952 = vst.msk [vmem:[#allocation2 + $0x70] sm:$0xff] %vm3079_vm3, %v9928_v28  ;;  %v31136_v32 = vpop.f32.mrb[58].mxu0  ;;  %v42233_v28 = vld [vmem:[#allocation39_spill] sm:$0xff] }
 0x802   : > { %v9931_v42 = vadd.f32 %v38445_v46, %v31136_v32  ;;  %v9851_v12 = vpop.f32.mrb[59].mxu0  ;;  %v42234_v32 = vld [vmem:[#allocation40_spill] sm:$0xff] }
 0x803   : > { %v9930_v15 = vadd.f32 %v38445_v46, %v9851_v12  ;;  %v25857_v12 = vld [vmem:[%s35745_s17 + $0x871] sm:$0xff] }
 0x804   : > { %9955 = vst.msk [vmem:[#allocation2 + $0x88] sm:$0xff] %vm3079_vm3, %v9931_v42  ;;  %v35532_v42 = vld [vmem:[%s42060_s1 + $0x4] sm:$0x7] }
 0x805   : > { %9954 = vst.msk [vmem:[#allocation2 + $0x80] sm:$0xff] %vm3079_vm3, %v9930_v15  ;;  %v31139_v37 = vpop.f32.mrb[60].mxu0 }
 0x806   : > { %v9933_v19 = vadd.f32 %v38445_v46, %v31139_v37  ;;  %v9861_v38 = vpop.f32.mrb[61].mxu0  ;;  %v25858_v37 = vld [vmem:[%s35745_s17 + $0x879] sm:$0xff] }
 0x807   : > { %v9932_v48 = vadd.f32 %v38445_v46, %v9861_v38  ;;  %v25859_v38 = vld [vmem:[%s35745_s17 + $0x881] sm:$0xff] }
 0x808   : > { %v9963_v50 = vld [vmem:[#allocation2 + $0x40] ss:$10 sm:$0x7f]  ;;  %9957 = vst.msk [vmem:[#allocation2 + $0x98] sm:$0xff] %vm3079_vm3, %v9933_v19 }
 0x809   : > { %9956 = vst.msk [vmem:[#allocation2 + $0x90] sm:$0xff] %vm3079_vm3, %v9932_v48  ;;  %v31142_v17 = vpop.f32.mrb[62].mxu0  ;;  %31163 = vmatmul.mubr.msk.f32.vlgmr.msra.gmra.mrb[66].mxu1 %vm3079_vm3, %v9963_v50  ;;  %v10186_v35 = vld [vmem:[#allocation2 + $0x41] ss:$10 sm:$0x7f] }
 0x80a   : > { %v9935_v53 = vadd.f32 %v38445_v46, %v31142_v17  ;;  %33599 = vmatpush3.bf16.msra.mxu1 %v36528_v36  ;;  %v9871_v9 = vpop.f32.mrb[63].mxu0  ;;  %31181 = vmatprep.mubr.msk.f32.mxu1 %vm35641_vm2, %v42179_v6  ;;  %v10411_v10 = vld [vmem:[#allocation2 + $0x42] ss:$10 sm:$0x7f] }
 0x80b   : > { %v9934_v59 = vadd.f32 %v38445_v46, %v9871_v9  ;;  %33600 = vmatprep.subr.bf16.mxu1 %v42178_v22  ;;  %v35533_v19 = vld [vmem:[%s42060_s1] sm:$0x7]  ;;  %v25860_v48 = vld [vmem:[%s35745_s17 + $0x889] sm:$0xff]  ;;  %v25861_v50 = vld [vmem:[%s35745_s17 + $0x891] sm:$0xff] }
 0x80c   : > { %9959 = vst.msk [vmem:[#allocation2 + $0xa8] sm:$0xff] %vm3079_vm3, %v9935_v53  ;;  %v35534_v17 = vld [vmem:[%s42060_s1 + $0x8] sm:$0x7]  ;;  %v25862_v53 = vld [vmem:[%s35745_s17 + $0x899] sm:$0xff] }
 0x80d   : > { %9958 = vst.msk [vmem:[#allocation2 + $0xa0] sm:$0xff] %vm3079_vm3, %v9934_v59  ;;  %v31145_v23 = vpop.f32.mrb[64].mxu0  ;;  %v25863_v9 = vld [vmem:[%s35745_s17 + $0x8a1] sm:$0xff]  ;;  %v25864_v59 = vld [vmem:[%s35745_s17 + $0x8a9] sm:$0xff] }
 0x80e   : > { %v9937_v30 = vadd.f32 %v38445_v46, %v31145_v23  ;;  %33602 = vmatpush3.bf16.msra.mxu1 %v36544_v47  ;;  %v9881_v25 = vpop.f32.mrb[65].mxu0  ;;  %v38613_v23 = vld [vmem:[%s35745_s17 + $0x8b9] sm:$0xff] }
 0x80f   : > { %v9936_v33 = vadd.f32 %v38445_v46, %v9881_v25  ;;  %33603 = vmatprep.subr.bf16.mxu1 %v42178_v22  ;;  %v42208_v46 = vld [vmem:[#allocation14_spill] sm:$0xff] }
 0x810   : > { %9961 = vst.msk [vmem:[#allocation2 + $0xb8] sm:$0xff] %vm3079_vm3, %v9937_v30  ;;  %v38619_v30 = vld [vmem:[%s35745_s17 + $0x8c1] sm:$0xff]  ;;  %v38622_v25 = vld [vmem:[%s35745_s17 + $0x8c9] sm:$0xff] }
 0x811   : > { %9960 = vst.msk [vmem:[#allocation2 + $0xb0] sm:$0xff] %vm3079_vm3, %v9936_v33  ;;  %v38629_v33 = vld [vmem:[%s35745_s17 + $0x8d1] sm:$0xff] }
 0x812   : > { %33605 = vmatpush3.bf16.msra.mxu1 %v36562_v1  ;;  %v35537_v1 = vld [vmem:[%s42060_s1 + $0x14] sm:$0x7] }
 0x813   : > { %33606 = vmatprep.subr.bf16.mxu1 %v42178_v22 }
 0x816   : > { %33608 = vmatpush3.bf16.msra.mxu1 %v42206_v16 }
 0x817   : > { %33609 = vmatprep.subr.bf16.mxu1 %v42178_v22 }
 0x818   : > { %v9964_v24 = vld [vmem:[#allocation2 + $0x80] ss:$10 sm:$0x7f]  ;;  %v10187_v55 = vld [vmem:[#allocation2 + $0x81] ss:$10 sm:$0x7f] }
 0x819   : > { %31182 = vmatmul.mubr.msk.f32.vlgmr.msra.gmra.mrb[68].mxu1 %vm3079_vm3, %v9962_v20  ;;  %v10412_v15 = vld [vmem:[#allocation2 + $0x82] ss:$10 sm:$0x7f] }
 0x81a   : > { %33611 = vmatpush3.bf16.msra.mxu1 %v42207_v11  ;;  %31200 = vmatprep.mubr.msk.f32.mxu1 %vm35641_vm2, %v42179_v6  ;;  %v38632_v20 = vld [vmem:[%s35745_s17 + $0x8d9] sm:$0xff] }
 0x81b   : > { %33612 = vmatprep.subr.bf16.mxu1 %v42178_v22 }
 0x81e   : > { %33614 = vmatpush3.bf16.msra.mxu1 %v42208_v46  ;;  %v38881_v46 = vld [vmem:[%s35745_s17 + $0x92a] sm:$0xff] }
 0x81f   : > { %33615 = vmatprep.subr.bf16.mxu1 %v42178_v22 }
 0x822   : > { %33617 = vmatpush3.bf16.msra.mxu1 %v42209_v54  ;;  %v38874_v54 = vld [vmem:[%s35745_s17 + $0x922] sm:$0xff] }
 0x823   : > { %33618 = vmatprep.subr.bf16.mxu1 %v42178_v22 }
 0x826   : > { %33620 = vmatpush3.bf16.msra.mxu1 %v42210_v0  ;;  %v38871_v0 = vld [vmem:[%s35745_s17 + $0x91a] sm:$0xff] }
 0x827   : > { %33621 = vmatprep.subr.bf16.mxu1 %v42178_v22 }
 0x829   : > { %31201 = vmatmul.mubr.msk.f32.vlgmr.msra.gmra.mrb[70].mxu1 %vm3079_vm3, %v9964_v24  ;;  %v38639_v24 = vld [vmem:[%s35745_s17 + $0x8e1] sm:$0xff] }
 0x82a   : > { %33623 = vmatpush3.bf16.msra.mxu1 %v42211_v2  ;;  %31219 = vmatprep.mubr.msk.f32.mxu1 %vm35641_vm2, %v42179_v6 }
 0x82b   : > { %33624 = vmatprep.subr.bf16.mxu1 %v42178_v22 }
 0x82e   : > { %33626 = vmatpush3.bf16.msra.mxu1 %v42212_v57 }
 0x82f   : > { %33627 = vmatprep.subr.bf16.mxu1 %v42178_v22 }
 0x832   : > { %33629 = vmatpush3.bf16.msra.mxu1 %v42213_v5 }
 0x833   : > { %33630 = vmatprep.subr.bf16.mxu1 %v42178_v22 }
 0x836   : > { %33632 = vmatpush3.bf16.msra.mxu1 %v42214_v29  ;;  %v38864_v29 = vld [vmem:[%s35745_s17 + $0x912] sm:$0xff] }
 0x837   : > { %33633 = vmatprep.subr.bf16.mxu1 %v42178_v22 }
 0x839   : > { %31220 = vmatmul.mubr.msk.f32.vlgmr.msra.gmra.mrb[72].mxu1 %vm3079_vm3, %v10185_v43  ;;  %v38642_v43 = vld [vmem:[%s35745_s17 + $0x8e9] sm:$0xff] }
 0x83a   : > { %33635 = vmatpush3.bf16.msra.mxu1 %v42215_v21  ;;  %31238 = vmatprep.mubr.msk.f32.mxu1 %vm35641_vm2, %v42179_v6  ;;  %v38861_v21 = vld [vmem:[%s35745_s17 + $0x90a] sm:$0xff] }
 0x83b   : > { %33636 = vmatprep.subr.bf16.mxu1 %v42178_v22 }
 0x83e   : > { %33638 = vmatpush3.bf16.msra.mxu1 %v42216_v27  ;;  %v38854_v27 = vld [vmem:[%s35745_s17 + $0x902] sm:$0xff] }
 0x83f   : > { %33639 = vmatprep.subr.bf16.mxu1 %v42178_v22 }
 0x842   : > { %33641 = vmatpush3.bf16.msra.mxu1 %v42217_v58  ;;  %v25935_v58 = vld [vmem:[%s35745_s17 + $0x892] sm:$0xff] }
 0x843   : > { %33642 = vmatprep.subr.bf16.mxu1 %v42178_v22 }
 0x846   : > { %33644 = vmatpush3.bf16.msra.mxu1 %v42218_v63  ;;  %v25934_v63 = vld [vmem:[%s35745_s17 + $0x88a] sm:$0xff] }
 0x847   : > { %33645 = vmatprep.subr.bf16.mxu1 %v42178_v22 }
 0x849   : > { %31239 = vmatmul.mubr.msk.f32.vlgmr.msra.gmra.mrb[74].mxu1 %vm3079_vm3, %v10186_v35  ;;  %v38649_v35 = vld [vmem:[%s35745_s17 + $0x8f1] sm:$0xff] }
 0x84a   : > { %33647 = vmatpush3.bf16.msra.mxu1 %v42219_v44  ;;  %31257 = vmatprep.mubr.msk.f32.mxu1 %vm35641_vm2, %v42179_v6 }
 0x84b   : > { %33648 = vmatprep.subr.bf16.mxu1 %v42178_v22 }
 0x84e   : > { %33650 = vmatpush3.bf16.msra.mxu1 %v42220_v56 }
 0x84f   : > { %33651 = vmatprep.subr.bf16.mxu1 %v42178_v22 }
 0x852   : > { %33653 = vmatpush3.bf16.msra.mxu1 %v42221_v60 }
 0x853   : > { %33654 = vmatprep.subr.bf16.mxu1 %v42178_v22 }
 0x856   : > { %33656 = vmatpush3.bf16.msra.mxu1 %v42222_v26  ;;  %v25933_v26 = vld [vmem:[%s35745_s17 + $0x882] sm:$0xff] }
 0x857   : > { %33657 = vmatprep.subr.bf16.mxu1 %v42178_v22 }
 0x859   : > { %31258 = vmatmul.mubr.msk.f32.vlgmr.msra.gmra.mrb[76].mxu1 %vm3079_vm3, %v10187_v55  ;;  %v38652_v55 = vld [vmem:[%s35745_s17 + $0x901] sm:$0xff] }
 0x85a   : > { %33659 = vmatpush3.bf16.msra.mxu1 %v42223_v31  ;;  %31276 = vmatprep.mubr.msk.f32.mxu1 %vm35641_vm2, %v42179_v6  ;;  %v25932_v31 = vld [vmem:[%s35745_s17 + $0x87a] sm:$0xff] }
 0x85b   : > { %33660 = vmatprep.subr.bf16.mxu1 %v42178_v22 }
 0x85e   : > { %33662 = vmatpush3.bf16.msra.mxu1 %v42224_v41  ;;  %v25931_v41 = vld [vmem:[%s35745_s17 + $0x872] sm:$0xff] }
 0x85f   : > { %33663 = vmatprep.subr.bf16.mxu1 %v42178_v22 }
 0x862   : > { %33665 = vmatpush3.bf16.msra.mxu1 %v42225_v34  ;;  %v38783_v34 = vld [vmem:[%s35745_s17 + $0x930] sm:$0xff] }
 0x863   : > { %33666 = vmatprep.subr.bf16.mxu1 %v42178_v22 }
 0x866   : > { %33668 = vmatpush3.bf16.msra.mxu1 %v42226_v8  ;;  %v38780_v8 = vld [vmem:[%s35745_s17 + $0x928] sm:$0xff] }
 0x867   : > { %33669 = vmatprep.subr.bf16.mxu1 %v42178_v22 }
 0x869   : > { %31277 = vmatmul.mubr.msk.f32.vlgmr.msra.gmra.mrb[78].mxu1 %vm3079_vm3, %v10410_v13  ;;  %v38659_v13 = vld [vmem:[%s35745_s17 + $0x909] sm:$0xff] }
 0x86a   : > { %33671 = vmatpush3.bf16.msra.mxu1 %v42227_v62  ;;  %31295 = vmatprep.mubr.msk.f32.mxu1 %vm35641_vm2, %v42179_v6  ;;  %v38773_v62 = vld [vmem:[%s35745_s17 + $0x920] sm:$0xff] }
 0x86b   : > { %33672 = vmatprep.subr.bf16.mxu1 %v42178_v22 }
 0x86e   : > { %33674 = vmatpush3.bf16.msra.mxu1 %v42228_v52  ;;  %v38770_v52 = vld [vmem:[%s35745_s17 + $0x918] sm:$0xff] }
 0x86f   : > { %33675 = vmatprep.subr.bf16.mxu1 %v42178_v22 }
 0x872   : > { %33677 = vmatpush3.bf16.msra.mxu1 %v42229_v4 }
 0x873   : > { %33678 = vmatprep.subr.bf16.mxu1 %v42178_v22 }
 0x876   : > { %33680 = vmatpush3.bf16.msra.mxu1 %v42230_v14 }
 0x877   : > { %33681 = vmatprep.subr.bf16.mxu1 %v42178_v22 }
 0x879   : > { %31296 = vmatmul.mubr.msk.f32.vlgmr.msra.gmra.mrb[80].mxu1 %vm3079_vm3, %v10411_v10  ;;  %v38662_v10 = vld [vmem:[%s35745_s17 + $0x911] sm:$0xff] }
 0x87a   : > { %33683 = vmatpush3.bf16.msra.mxu1 %v42231_v3  ;;  %31314 = vmatprep.mubr.msk.f32.mxu1 %vm35641_vm2, %v42179_v6  ;;  %v38763_v3 = vld [vmem:[%s35745_s17 + $0x910] sm:$0xff] }
 0x87b   : > { %33684 = vmatprep.subr.bf16.mxu1 %v42178_v22 }
 0x87e   : > { %33686 = vmatpush3.bf16.msra.mxu1 %v42232_v7  ;;  %v38760_v7 = vld [vmem:[%s35745_s17 + $0x908] sm:$0xff] }
 0x87f   : > { %33687 = vmatprep.subr.bf16.mxu1 %v42178_v22 }
 0x882   : > { %33689 = vmatpush3.bf16.msra.mxu1 %v42233_v28  ;;  %v38753_v28 = vld [vmem:[%s35745_s17 + $0x900] sm:$0xff] }
 0x883   : > { %33690 = vmatprep.subr.bf16.mxu1 %v42178_v22 }
 0x886   : > { %33692 = vmatpush3.bf16.msra.mxu1 %v42234_v32  ;;  %v38750_v32 = vld [vmem:[%s35745_s17 + $0x8f0] sm:$0xff] }
 0x887   : > { %31317 = vmatprep.subr.msk.mxu1 %vm442_vm0, %v35532_v42 }
 0x889   : > { %31315 = vmatmul.mubr.msk.f32.vlgmr.msra.gmra.mrb[82].mxu1 %vm3079_vm3, %v10412_v15  ;;  %v38679_v15 = vld [vmem:[%s35745_s17 + $0x929] sm:$0xff] }
 0x88a   : > { %31318 = vmatpush3.msk.msra.mxu1 %vm442_vm0, %v35532_v42  ;;  %31319 = vmatprep.mubr.msk.f32.mxu1 %vm369_vm1, %v25857_v12  ;;  %v38669_v42 = vld [vmem:[%s35745_s17 + $0x919] sm:$0xff]  ;;  %v38672_v12 = vld [vmem:[%s35745_s17 + $0x921] sm:$0xff] }
 0x88b   : > { %31355 = vmatprep.subr.msk.mxu1 %vm442_vm0, %v35533_v19 }
 0x88d   : > { %31320 = vmatmul.mubr.msk.f32.vlgmr.msra.gmra.mrb[84].mxu1 %vm369_vm1, %v25858_v37  ;;  %v38682_v37 = vld [vmem:[%s35745_s17 + $0x931] sm:$0xff] }
 0x88e   : > { %31356 = vmatpush3.msk.msra.mxu1 %vm442_vm0, %v35533_v19  ;;  %31322 = vmatprep.mubr.msk.f32.mxu1 %vm369_vm1, %v25859_v38  ;;  %v38689_v19 = vld [vmem:[%s35745_s17 + $0x939] sm:$0xff]  ;;  %v25833_v38 = vld [vmem:[%s35745_s17 + $0x870] sm:$0xff] }
 0x88f   : > { %31393 = vmatprep.subr.msk.mxu1 %vm442_vm0, %v35534_v17 }
 0x891   : > { %31323 = vmatmul.mubr.msk.f32.gmra.mrb[86].mxu1 %vm369_vm1, %v25860_v48  ;;  %v25834_v48 = vld [vmem:[%s35745_s17 + $0x878] sm:$0xff] }
 0x892   : > { %31325 = vmatprep.mubr.msk.f32.mxu1 %vm369_vm1, %v25861_v50  ;;  %v25835_v50 = vld [vmem:[%s35745_s17 + $0x880] sm:$0xff] }
 0x895   : > { %31326 = vmatmul.mubr.msk.f32.gmra.mrb[88].mxu1 %vm369_vm1, %v25862_v53  ;;  %v25836_v53 = vld [vmem:[%s35745_s17 + $0x888] sm:$0xff] }
 0x896   : > { %31328 = vmatprep.mubr.msk.f32.mxu1 %vm369_vm1, %v25863_v9  ;;  %v25837_v9 = vld [vmem:[%s35745_s17 + $0x890] sm:$0xff] }
 0x899   : > { %31329 = vmatmul.mubr.msk.f32.gmra.mrb[90].mxu1 %vm369_vm1, %v25864_v59  ;;  %v35535_v59 = vld [vmem:[%s42060_s1 + $0xc] sm:$0x7] }
 0x89a   : > { %31331 = vmatprep.mubr.msk.f32.mxu1 %vm369_vm1, %v38613_v23 }
 0x89d   : > { %31332 = vmatmul.mubr.msk.f32.gmra.mrb[92].mxu1 %vm369_vm1, %v38619_v30 }
 0x89e   : > { %31334 = vmatprep.mubr.msk.f32.mxu1 %vm369_vm1, %v38622_v25 }
 0x8a1   : > { %31335 = vmatmul.mubr.msk.f32.gmra.mrb[94].mxu1 %vm369_vm1, %v38629_v33 }
 0x8a2   : > { %31337 = vmatprep.mubr.msk.f32.mxu1 %vm369_vm1, %v38632_v20 }
 0x8a5   : > { %31338 = vmatmul.mubr.msk.f32.gmra.mrb[96].mxu1 %vm369_vm1, %v38639_v24 }
 0x8a6   : > { %31340 = vmatprep.mubr.msk.f32.mxu1 %vm369_vm1, %v38642_v43 }
 0x8a9   : > { %31341 = vmatmul.mubr.msk.f32.gmra.mrb[98].mxu1 %vm369_vm1, %v38649_v35 }
 0x8aa   : > { %31343 = vmatprep.mubr.msk.f32.mxu1 %vm369_vm1, %v38652_v55 }
 0x8ad   : > { %31344 = vmatmul.mubr.msk.f32.gmra.mrb[100].mxu1 %vm369_vm1, %v38659_v13 }
 0x8ae   : > { %31346 = vmatprep.mubr.msk.f32.mxu1 %vm369_vm1, %v38662_v10 }
 0x8b1   : > { %31347 = vmatmul.mubr.msk.f32.gmra.mrb[102].mxu1 %vm369_vm1, %v38669_v42 }
 0x8b2   : > { %31349 = vmatprep.mubr.msk.f32.mxu1 %vm369_vm1, %v38672_v12 }
 0x8b5   : > { %31350 = vmatmul.mubr.msk.f32.gmra.mrb[104].mxu1 %vm369_vm1, %v38679_v15 }
 0x8b6   : > { %31352 = vmatprep.mubr.msk.f32.mxu1 %vm369_vm1, %v38682_v37 }
 0x8b9   : > { %31353 = vmatmul.mubr.msk.f32.gmra.mrb[106].mxu1 %vm369_vm1, %v38689_v19 }
 0x8ba   : > { %31357 = vmatprep.mubr.msk.f32.mxu1 %vm369_vm1, %v25833_v38  ;;  %v25838_v38 = vld [vmem:[%s35745_s17 + $0x898] sm:$0xff] }
 0x8bd   : > { %31358 = vmatmul.mubr.msk.f32.vlgmr.msra.gmra.mrb[84].mxu1 %vm369_vm1, %v25834_v48  ;;  %v25840_v48 = vld [vmem:[%s35745_s17 + $0x8a8] sm:$0xff] }
 0x8be   : > { %31394 = vmatpush3.msk.msra.mxu1 %vm442_vm0, %v35534_v17  ;;  %31360 = vmatprep.mubr.msk.f32.mxu1 %vm369_vm1, %v25835_v50  ;;  %v25839_v17 = vld [vmem:[%s35745_s17 + $0x8a0] sm:$0xff]  ;;  %v38714_v50 = vld [vmem:[%s35745_s17 + $0x8b8] sm:$0xff] }
 0x8bf   : > { %31431 = vmatprep.subr.msk.mxu1 %vm442_vm0, %v35535_v59 }
 0x8c1   : > { %31361 = vmatmul.mubr.msk.f32.gmra.mrb[86].mxu1 %vm369_vm1, %v25836_v53  ;;  %v38720_v53 = vld [vmem:[%s35745_s17 + $0x8c0] sm:$0xff] }
 0x8c2   : > { %31363 = vmatprep.mubr.msk.f32.mxu1 %vm369_vm1, %v25837_v9  ;;  %v38723_v9 = vld [vmem:[%s35745_s17 + $0x8c8] sm:$0xff] }
 0x8c5   : > { %31364 = vmatmul.mubr.msk.f32.gmra.mrb[88].mxu1 %vm369_vm1, %v25838_v38  ;;  %v38730_v38 = vld [vmem:[%s35745_s17 + $0x8d0] sm:$0xff] }
 0x8c6   : > { %31366 = vmatprep.mubr.msk.f32.mxu1 %vm369_vm1, %v25839_v17  ;;  %v38733_v17 = vld [vmem:[%s35745_s17 + $0x8d8] sm:$0xff] }
 0x8c9   : > { %31367 = vmatmul.mubr.msk.f32.gmra.mrb[90].mxu1 %vm369_vm1, %v25840_v48  ;;  %v38740_v48 = vld [vmem:[%s35745_s17 + $0x8e0] sm:$0xff] }
 0x8ca   : > { %31369 = vmatprep.mubr.msk.f32.mxu1 %vm369_vm1, %v38714_v50 }
 0x8cd   : > { %31370 = vmatmul.mubr.msk.f32.gmra.mrb[92].mxu1 %vm369_vm1, %v38720_v53 }
 0x8ce   : > { %31372 = vmatprep.mubr.msk.f32.mxu1 %vm369_vm1, %v38723_v9 }
 0x8d1   : > { %31373 = vmatmul.mubr.msk.f32.gmra.mrb[94].mxu1 %vm369_vm1, %v38730_v38 }
 0x8d2   : > { %31375 = vmatprep.mubr.msk.f32.mxu1 %vm369_vm1, %v38733_v17 }
 0x8d5   : > { %31376 = vmatmul.mubr.msk.f32.gmra.mrb[96].mxu1 %vm369_vm1, %v38740_v48 }
 0x8d6   : > { %31378 = vmatprep.mubr.msk.f32.mxu1 %vm369_vm1, %v38743_v40 }
 0x8d9   : > { %31379 = vmatmul.mubr.msk.f32.gmra.mrb[98].mxu1 %vm369_vm1, %v38750_v32 }
 0x8da   : > { %31381 = vmatprep.mubr.msk.f32.mxu1 %vm369_vm1, %v38753_v28 }
 0x8dc   : > { %v10034_v14 = vpop.f32.mrb[66].mxu1 }
 0x8dd   : > { %31382 = vmatmul.mubr.msk.f32.gmra.mrb[100].mxu1 %vm369_vm1, %v38760_v7  ;;  %v31164_v4 = vpop.f32.mrb[67].mxu1 }
 0x8de   : > { %31384 = vmatprep.mubr.msk.f32.mxu1 %vm369_vm1, %v38763_v3  ;;  %v38790_v4 = vld [vmem:[%s35745_s17 + $0x938] sm:$0xff] }
 0x8e1   : > { %31385 = vmatmul.mubr.msk.f32.gmra.mrb[102].mxu1 %vm369_vm1, %v38770_v52 }
 0x8e2   : > { %31387 = vmatprep.mubr.msk.f32.mxu1 %vm369_vm1, %v38773_v62 }
 0x8e5   : > { %31388 = vmatmul.mubr.msk.f32.gmra.mrb[104].mxu1 %vm369_vm1, %v38780_v8 }
 0x8e6   : > { %31390 = vmatprep.mubr.msk.f32.mxu1 %vm369_vm1, %v38783_v34 }
 0x8e9   : > { %31391 = vmatmul.mubr.msk.f32.gmra.mrb[106].mxu1 %vm369_vm1, %v38790_v4 }
 0x8ea   : > { %31395 = vmatprep.mubr.msk.f32.mxu1 %vm369_vm1, %v25931_v41  ;;  %v35536_v41 = vld [vmem:[%s42060_s1 + $0x10] sm:$0x7] }
 0x8ec   : > { %v10107_v60 = vpop.f32.mrb[68].mxu1 }
 0x8ed   : > { %v10108_v56 = vadd.f32 %v10107_v60, %v10034_v14  ;;  %v31183_v44 = vpop.f32.mrb[69].mxu1  ;;  %31396 = vmatmul.mubr.msk.f32.vlgmr.msra.gmra.mrb[84].mxu1 %vm369_vm1, %v25932_v31  ;;  %v25937_v60 = vld [vmem:[%s35745_s17 + $0x8a2] sm:$0xff]  ;;  %v38815_v31 = vld [vmem:[%s35745_s17 + $0x8ba] sm:$0xff] }
 0x8ee   : > { %31432 = vmatpush3.msk.msra.mxu1 %vm442_vm0, %v35535_v59  ;;  %31398 = vmatprep.mubr.msk.f32.mxu1 %vm369_vm1, %v25933_v26  ;;  %v25936_v44 = vld [vmem:[%s35745_s17 + $0x89a] sm:$0xff]  ;;  %v25938_v26 = vld [vmem:[%s35745_s17 + $0x8aa] sm:$0xff] }
 0x8ef   : > { %31469 = vmatprep.subr.msk.mxu1 %vm442_vm0, %v35536_v41 }
 0x8f1   : > { %31399 = vmatmul.mubr.msk.f32.gmra.mrb[86].mxu1 %vm369_vm1, %v25934_v63  ;;  %v38824_v63 = vld [vmem:[%s35745_s17 + $0x8ca] sm:$0xff] }
 0x8f2   : > { %31401 = vmatprep.mubr.msk.f32.mxu1 %vm369_vm1, %v25935_v58  ;;  %v38821_v58 = vld [vmem:[%s35745_s17 + $0x8c2] sm:$0xff] }
 0x8f5   : > { %31402 = vmatmul.mubr.msk.f32.gmra.mrb[88].mxu1 %vm369_vm1, %v25936_v44 }
 0x8f6   : > { %31404 = vmatprep.mubr.msk.f32.mxu1 %vm369_vm1, %v25937_v60  ;;  %v38831_v60 = vld [vmem:[%s35745_s17 + $0x8d2] sm:$0xff] }
 0x8f9   : > { %31405 = vmatmul.mubr.msk.f32.gmra.mrb[90].mxu1 %vm369_vm1, %v25938_v26  ;;  %v38834_v26 = vld [vmem:[%s35745_s17 + $0x8da] sm:$0xff] }
 0x8fa   : > { %31407 = vmatprep.mubr.msk.f32.mxu1 %vm369_vm1, %v38815_v31 }
 0x8fc   : > { %v10180_v14 = vpop.f32.mrb[70].mxu1 }
 0x8fd   : > { %v10184_v59 = vadd.f32 %v10180_v14, %v10108_v56  ;;  %v31202_v44 = vpop.f32.mrb[71].mxu1  ;;  %31408 = vmatmul.mubr.msk.f32.gmra.mrb[92].mxu1 %vm369_vm1, %v38821_v58  ;;  %v38841_v56 = vld [vmem:[%s35745_s17 + $0x8e2] sm:$0xff]  ;;  %v38844_v14 = vld [vmem:[%s35745_s17 + $0x8ea] sm:$0xff] }
 0x8fe   : > { %31410 = vmatprep.mubr.msk.f32.mxu1 %vm369_vm1, %v38824_v63  ;;  %v38851_v44 = vld [vmem:[%s35745_s17 + $0x8f2] sm:$0xff] }
 0x901   : > { %31411 = vmatmul.mubr.msk.f32.gmra.mrb[94].mxu1 %vm369_vm1, %v38831_v60 }
 0x902   : > { %31413 = vmatprep.mubr.msk.f32.mxu1 %vm369_vm1, %v38834_v26 }
 0x905   : > { %31414 = vmatmul.mubr.msk.f32.gmra.mrb[96].mxu1 %vm369_vm1, %v38841_v56 }
 0x906   : > { %31416 = vmatprep.mubr.msk.f32.mxu1 %vm369_vm1, %v38844_v14 }
 0x909   : > { %31417 = vmatmul.mubr.msk.f32.gmra.mrb[98].mxu1 %vm369_vm1, %v38851_v44 }
 0x90a   : > { %31419 = vmatprep.mubr.msk.f32.mxu1 %vm369_vm1, %v38854_v27 }
 0x90c   : > { %v10257_v5 = vpop.f32.mrb[72].mxu1 }
 0x90d   : > { %v10261_v57 = vadd.f32 %v10257_v5, %v10184_v59  ;;  %v31221_v2 = vpop.f32.mrb[73].mxu1  ;;  %31420 = vmatmul.mubr.msk.f32.gmra.mrb[100].mxu1 %vm369_vm1, %v38861_v21  ;;  %v38884_v5 = vld [vmem:[%s35745_s17 + $0x932] sm:$0xff] }
 0x90e   : > { %31422 = vmatprep.mubr.msk.f32.mxu1 %vm369_vm1, %v38864_v29  ;;  %v38891_v2 = vld [vmem:[%s35745_s17 + $0x93a] sm:$0xff] }
 0x911   : > { %31423 = vmatmul.mubr.msk.f32.gmra.mrb[102].mxu1 %vm369_vm1, %v38871_v0 }
 0x912   : > { %31425 = vmatprep.mubr.msk.f32.mxu1 %vm369_vm1, %v38874_v54 }
 0x915   : > { %31426 = vmatmul.mubr.msk.f32.gmra.mrb[104].mxu1 %vm369_vm1, %v38881_v46 }
 0x916   : > { %31428 = vmatprep.mubr.msk.f32.mxu1 %vm369_vm1, %v38884_v5 }
 0x919   : > { %31429 = vmatmul.mubr.msk.f32.gmra.mrb[106].mxu1 %vm369_vm1, %v38891_v2 }
 0x91a   : > { %31433 = vmatprep.mubr.msk.f32.mxu1 %vm369_vm1, %v38714_v50 }
 0x91c   : > { %v10331_v59 = vpop.f32.mrb[74].mxu1 }
 0x91d   : > { %v10335_v11 = vadd.f32 %v10331_v59, %v10261_v57  ;;  %v31240_v16 = vpop.f32.mrb[75].mxu1  ;;  %31434 = vmatmul.mubr.msk.f32.vlgmr.msra.gmra.mrb[84].mxu1 %vm369_vm1, %v38720_v53  ;;  %v38961_v59 = vld [vmem:[%s35745_s17 + $0x978] sm:$0xff] }
 0x91e   : > { %31470 = vmatpush3.msk.msra.mxu1 %vm442_vm0, %v35536_v41  ;;  %31436 = vmatprep.mubr.msk.f32.mxu1 %vm369_vm1, %v38723_v9  ;;  %v38958_v41 = vld [vmem:[%s35745_s17 + $0x970] sm:$0xff] }
 0x91f   : > { %31507 = vmatprep.subr.msk.mxu1 %vm442_vm0, %v35537_v1 }
 0x921   : > { %31437 = vmatmul.mubr.msk.f32.gmra.mrb[86].mxu1 %vm369_vm1, %v38730_v38 }
 0x922   : > { %31439 = vmatprep.mubr.msk.f32.mxu1 %vm369_vm1, %v38733_v17  ;;  %v38948_v17 = vld [vmem:[%s35745_s17 + $0x960] sm:$0xff] }
 0x925   : > { %31440 = vmatmul.mubr.msk.f32.gmra.mrb[88].mxu1 %vm369_vm1, %v38740_v48  ;;  %v38951_v48 = vld [vmem:[%s35745_s17 + $0x968] sm:$0xff] }
 0x926   : > { %31442 = vmatprep.mubr.msk.f32.mxu1 %vm369_vm1, %v38743_v40  ;;  %v38931_v40 = vld [vmem:[%s35745_s17 + $0x948] sm:$0xff] }
 0x929   : > { %31443 = vmatmul.mubr.msk.f32.gmra.mrb[90].mxu1 %vm369_vm1, %v38750_v32  ;;  %v38941_v32 = vld [vmem:[%s35745_s17 + $0x958] sm:$0xff] }
 0x92a   : > { %31445 = vmatprep.mubr.msk.f32.mxu1 %vm369_vm1, %v38753_v28 }
 0x92c   : > { %v10405_v16 = vpop.f32.mrb[76].mxu1 }
 0x92d   : > { %v10409_v57 = vadd.f32 %v10405_v16, %v10335_v11  ;;  %v31259_v50 = vpop.f32.mrb[77].mxu1  ;;  %31446 = vmatmul.mubr.msk.f32.gmra.mrb[92].mxu1 %vm369_vm1, %v38760_v7  ;;  %v38938_v11 = vld [vmem:[%s35745_s17 + $0x950] sm:$0xff]  ;;  %v38968_v16 = vld [vmem:[%s35745_s17 + $0x980] sm:$0xff] }
 0x92e   : > { %31448 = vmatprep.mubr.msk.f32.mxu1 %vm369_vm1, %v38763_v3 }
 0x931   : > { %31449 = vmatmul.mubr.msk.f32.gmra.mrb[94].mxu1 %vm369_vm1, %v38770_v52 }
 0x932   : > { %31451 = vmatprep.mubr.msk.f32.mxu1 %vm369_vm1, %v38773_v62 }
 0x935   : > { %31452 = vmatmul.mubr.msk.f32.gmra.mrb[96].mxu1 %vm369_vm1, %v38780_v8 }
 0x936   : > { %31454 = vmatprep.mubr.msk.f32.mxu1 %vm369_vm1, %v38783_v34 }
 0x939   : > { %31455 = vmatmul.mubr.msk.f32.gmra.mrb[98].mxu1 %vm369_vm1, %v38790_v4 }
 0x93a   : > { %31457 = vmatprep.mubr.msk.f32.mxu1 %vm369_vm1, %v38931_v40 }
 0x93c   : > { %v10482_v53 = vpop.f32.mrb[78].mxu1 }
 0x93d   : > { %v10486_v9 = vadd.f32 %v10482_v53, %v10409_v57  ;;  %v31278_v38 = vpop.f32.mrb[79].mxu1  ;;  %31458 = vmatmul.mubr.msk.f32.gmra.mrb[100].mxu1 %vm369_vm1, %v38938_v11 }
 0x93e   : > { %31460 = vmatprep.mubr.msk.f32.mxu1 %vm369_vm1, %v38941_v32  ;;  %v35538_v38 = vld [vmem:[%s42060_s1 + $0x18] sm:$0x7] }
 0x941   : > { %31461 = vmatmul.mubr.msk.f32.gmra.mrb[102].mxu1 %vm369_vm1, %v38948_v17 }
 0x942   : > { %31463 = vmatprep.mubr.msk.f32.mxu1 %vm369_vm1, %v38951_v48 }
 0x945   : > { %31464 = vmatmul.mubr.msk.f32.gmra.mrb[104].mxu1 %vm369_vm1, %v38958_v41 }
 0x946   : > { %31466 = vmatprep.mubr.msk.f32.mxu1 %vm369_vm1, %v38961_v59 }
 0x949   : > { %31467 = vmatmul.mubr.msk.f32.gmra.mrb[106].mxu1 %vm369_vm1, %v38968_v16 }
 0x94a   : > { %31471 = vmatprep.mubr.msk.f32.mxu1 %vm369_vm1, %v38613_v23 }
 0x94c   : > { %v10556_v57 = vpop.f32.mrb[80].mxu1 }
 0x94d   : > { %v10560_v50 = vadd.f32 %v10556_v57, %v10486_v9  ;;  %v31297_v53 = vpop.f32.mrb[81].mxu1  ;;  %31472 = vmatmul.mubr.msk.f32.vlgmr.msra.gmra.mrb[84].mxu1 %vm369_vm1, %v38619_v30  ;;  %v39039_v9 = vld [vmem:[%s35745_s17 + $0x969] sm:$0xff]  ;;  %v39046_v57 = vld [vmem:[%s35745_s17 + $0x971] sm:$0xff] }
 0x94e   : > { %31508 = vmatpush3.msk.msra.mxu1 %vm442_vm0, %v35537_v1  ;;  %31474 = vmatprep.mubr.msk.f32.mxu1 %vm369_vm1, %v38622_v25  ;;  %v35539_v25 = vld [vmem:[%s42063_s4] ss:$0 sm:$0xff]  ;;  %v39056_v53 = vld [vmem:[%s35745_s17 + $0x981] sm:$0xff] }
 0x94f   : > { %31545 = vmatprep.subr.msk.mxu1 %vm442_vm0, %v35538_v38 }
 0x951   : > { %31475 = vmatmul.mubr.msk.f32.gmra.mrb[86].mxu1 %vm369_vm1, %v38629_v33 }
 0x952   : > { %31477 = vmatprep.mubr.msk.f32.mxu1 %vm369_vm1, %v38632_v20  ;;  %v42235_v20 = vmax.f32 %v38148_v45, %v38150_v51  ;;  %v39026_v45 = vld [vmem:[%s35745_s17 + $0x951] sm:$0xff]  ;;  %v39029_v51 = vld [vmem:[%s35745_s17 + $0x959] sm:$0xff] }
 0x955   : > { %31478 = vmatmul.mubr.msk.f32.gmra.mrb[88].mxu1 %vm369_vm1, %v38639_v24 }
 0x956   : > { %31480 = vmatprep.mubr.msk.f32.mxu1 %vm369_vm1, %v38642_v43  ;;  %v39019_v43 = vld [vmem:[%s35745_s17 + $0x949] sm:$0xff] }
 0x959   : > { %31481 = vmatmul.mubr.msk.f32.gmra.mrb[90].mxu1 %vm369_vm1, %v38649_v35  ;;  %v39036_v35 = vld [vmem:[%s35745_s17 + $0x961] sm:$0xff] }
 0x95a   : > { %31483 = vmatprep.mubr.msk.f32.mxu1 %vm369_vm1, %v38652_v55 }
 0x95c   : > { %v10630_v1 = vpop.f32.mrb[82].mxu1 }
 0x95d   : > { %v10634_v23 = vadd.f32 %v10630_v1, %v10560_v50  ;;  %v31316_v30 = vpop.f32.mrb[83].mxu1  ;;  %31484 = vmatmul.mubr.msk.f32.gmra.mrb[92].mxu1 %vm369_vm1, %v38659_v13  ;;  %v39049_v50 = vld [vmem:[%s35745_s17 + $0x979] sm:$0xff] }
 0x95e   : > { %31486 = vmatprep.mubr.msk.f32.mxu1 %vm369_vm1, %v38662_v10  ;;  %v35540_v1 = vld [vmem:[%s42060_s1 + $0x1c] sm:$0x7] }
 0x95f   : > { %v39002_v33 = vadd.f32 %v35539_v25, %v10634_v23 }
 0x961   : > { %v39008_v24 = vmax.f32 %v42235_v20, %v39002_v33  ;;  %31487 = vmatmul.mubr.msk.f32.gmra.mrb[94].mxu1 %vm369_vm1, %v38669_v42 }
 0x962   : > { %31489 = vmatprep.mubr.msk.f32.mxu1 %vm369_vm1, %v38672_v12 }
 0x963   : > { %42236 = vst [vmem:[#allocation41_spill] sm:$0xff] %v39008_v24  ;;  %v39606_v24 = vld [vmem:[%s35745_s17 + $0xbc0] sm:$0xff] }
 0x965   : > { %31490 = vmatmul.mubr.msk.f32.gmra.mrb[96].mxu1 %vm369_vm1, %v38679_v15 }
 0x966   : > { %31492 = vmatprep.mubr.msk.f32.mxu1 %vm369_vm1, %v38682_v37 }
 0x969   : > { %31493 = vmatmul.mubr.msk.f32.gmra.mrb[98].mxu1 %vm369_vm1, %v38689_v19 }
 0x96a   : > { %31495 = vmatprep.mubr.msk.f32.mxu1 %vm369_vm1, %v39019_v43 }
 0x96d   : > { %31496 = vmatmul.mubr.msk.f32.gmra.mrb[100].mxu1 %vm369_vm1, %v39026_v45 }
 0x96e   : > { %31498 = vmatprep.mubr.msk.f32.mxu1 %vm369_vm1, %v39029_v51 }
 0x971   : > { %31499 = vmatmul.mubr.msk.f32.gmra.mrb[102].mxu1 %vm369_vm1, %v39036_v35 }
 0x972   : > { %31501 = vmatprep.mubr.msk.f32.mxu1 %vm369_vm1, %v39039_v9 }
 0x975   : > { %31502 = vmatmul.mubr.msk.f32.gmra.mrb[104].mxu1 %vm369_vm1, %v39046_v57 }
 0x976   : > { %31504 = vmatprep.mubr.msk.f32.mxu1 %vm369_vm1, %v39049_v50 }
 0x979   : > { %31505 = vmatmul.mubr.msk.f32.gmra.mrb[106].mxu1 %vm369_vm1, %v39056_v53 }
 0x97a   : > { %31509 = vmatprep.mubr.msk.f32.mxu1 %vm369_vm1, %v38815_v31  ;;  %v39096_v31 = vld [vmem:[%s35745_s17 + $0x94a] sm:$0xff] }
 0x97d   : > { %31510 = vmatmul.mubr.msk.f32.vlgmr.msra.gmra.mrb[84].mxu1 %vm369_vm1, %v38821_v58  ;;  %v39103_v58 = vld [vmem:[%s35745_s17 + $0x952] sm:$0xff] }
 0x97e   : > { %31546 = vmatpush3.msk.msra.mxu1 %vm442_vm0, %v35538_v38  ;;  %31512 = vmatprep.mubr.msk.f32.mxu1 %vm369_vm1, %v38824_v63  ;;  %v39106_v63 = vld [vmem:[%s35745_s17 + $0x95a] sm:$0xff] }
 0x97f   : > { %31583 = vmatprep.subr.msk.mxu1 %vm442_vm0, %v35540_v1  ;;  %v35541_v38 = vld [vmem:[%s42060_s1 + $0x20] sm:$0x7] }
 0x981   : > { %31513 = vmatmul.mubr.msk.f32.gmra.mrb[86].mxu1 %vm369_vm1, %v38831_v60  ;;  %v39113_v60 = vld [vmem:[%s35745_s17 + $0x962] sm:$0xff] }
 0x982   : > { %31515 = vmatprep.mubr.msk.f32.mxu1 %vm369_vm1, %v38834_v26  ;;  %v39116_v26 = vld [vmem:[%s35745_s17 + $0x96a] sm:$0xff] }
 0x985   : > { %31516 = vmatmul.mubr.msk.f32.gmra.mrb[88].mxu1 %vm369_vm1, %v38841_v56  ;;  %v39123_v56 = vld [vmem:[%s35745_s17 + $0x972] sm:$0xff] }
 0x986   : > { %31518 = vmatprep.mubr.msk.f32.mxu1 %vm369_vm1, %v38844_v14  ;;  %v39126_v14 = vld [vmem:[%s35745_s17 + $0x97a] sm:$0xff] }
 0x989   : > { %31519 = vmatmul.mubr.msk.f32.gmra.mrb[90].mxu1 %vm369_vm1, %v38851_v44  ;;  %v39133_v44 = vld [vmem:[%s35745_s17 + $0x982] sm:$0xff] }
 0x98a   : > { %31521 = vmatprep.mubr.msk.f32.mxu1 %vm369_vm1, %v38854_v27 }
 0x98d   : > { %31522 = vmatmul.mubr.msk.f32.gmra.mrb[92].mxu1 %vm369_vm1, %v38861_v21 }
 0x98e   : > { %31524 = vmatprep.mubr.msk.f32.mxu1 %vm369_vm1, %v38864_v29 }
 0x991   : > { %31525 = vmatmul.mubr.msk.f32.gmra.mrb[94].mxu1 %vm369_vm1, %v38871_v0 }
 0x992   : > { %31527 = vmatprep.mubr.msk.f32.mxu1 %vm369_vm1, %v38874_v54 }
 0x995   : > { %31528 = vmatmul.mubr.msk.f32.gmra.mrb[96].mxu1 %vm369_vm1, %v38881_v46 }
 0x996   : > { %31530 = vmatprep.mubr.msk.f32.mxu1 %vm369_vm1, %v38884_v5 }
 0x999   : > { %31531 = vmatmul.mubr.msk.f32.gmra.mrb[98].mxu1 %vm369_vm1, %v38891_v2 }
 0x99a   : > { %31533 = vmatprep.mubr.msk.f32.mxu1 %vm369_vm1, %v39096_v31 }
 0x99d   : > { %31534 = vmatmul.mubr.msk.f32.gmra.mrb[100].mxu1 %vm369_vm1, %v39103_v58 }
 0x99e   : > { %31536 = vmatprep.mubr.msk.f32.mxu1 %vm369_vm1, %v39106_v63 }
 0x9a1   : > { %31537 = vmatmul.mubr.msk.f32.gmra.mrb[102].mxu1 %vm369_vm1, %v39113_v60 }
 0x9a2   : > { %31539 = vmatprep.mubr.msk.f32.mxu1 %vm369_vm1, %v39116_v26 }
 0x9a5   : > { %31540 = vmatmul.mubr.msk.f32.gmra.mrb[104].mxu1 %vm369_vm1, %v39123_v56 }
 0x9a6   : > { %31542 = vmatprep.mubr.msk.f32.mxu1 %vm369_vm1, %v39126_v14 }
 0x9a9   : > { %31543 = vmatmul.mubr.msk.f32.gmra.mrb[106].mxu1 %vm369_vm1, %v39133_v44 }
 0x9aa   : > { %31547 = vmatprep.mubr.msk.f32.mxu1 %vm369_vm1, %v38753_v28  ;;  %v26149_v28 = vld [vmem:[%s35745_s17 + $0x9c0] sm:$0xff] }
 0x9ad   : > { %31548 = vmatmul.mubr.msk.f32.vlgmr.msra.gmra.mrb[84].mxu1 %vm369_vm1, %v38760_v7  ;;  %v26148_v7 = vld [vmem:[%s35745_s17 + $0x9b8] sm:$0xff] }
 0x9ae   : > { %31584 = vmatpush3.msk.msra.mxu1 %vm442_vm0, %v35540_v1  ;;  %31550 = vmatprep.mubr.msk.f32.mxu1 %vm369_vm1, %v38763_v3  ;;  %v26147_v3 = vld [vmem:[%s35745_s17 + $0x9b0] sm:$0xff] }
 0x9af   : > { %31621 = vmatprep.subr.msk.mxu1 %vm442_vm0, %v35541_v38 }
 0x9b1   : > { %31551 = vmatmul.mubr.msk.f32.gmra.mrb[86].mxu1 %vm369_vm1, %v38770_v52  ;;  %v26146_v52 = vld [vmem:[%s35745_s17 + $0x9a8] sm:$0xff] }
 0x9b2   : > { %31553 = vmatprep.mubr.msk.f32.mxu1 %vm369_vm1, %v38773_v62  ;;  %v26145_v62 = vld [vmem:[%s35745_s17 + $0x9a0] sm:$0xff] }
 0x9b5   : > { %31554 = vmatmul.mubr.msk.f32.gmra.mrb[88].mxu1 %vm369_vm1, %v38780_v8  ;;  %v26144_v8 = vld [vmem:[%s35745_s17 + $0x998] sm:$0xff] }
 0x9b6   : > { %31556 = vmatprep.mubr.msk.f32.mxu1 %vm369_vm1, %v38783_v34  ;;  %v26143_v34 = vld [vmem:[%s35745_s17 + $0x990] sm:$0xff] }
 0x9b9   : > { %31557 = vmatmul.mubr.msk.f32.gmra.mrb[90].mxu1 %vm369_vm1, %v38790_v4  ;;  %v26150_v4 = vld [vmem:[%s35745_s17 + $0x9c8] sm:$0xff] }
 0x9ba   : > { %31559 = vmatprep.mubr.msk.f32.mxu1 %vm369_vm1, %v38931_v40 }
 0x9bd   : > { %31560 = vmatmul.mubr.msk.f32.gmra.mrb[92].mxu1 %vm369_vm1, %v38938_v11  ;;  %v39301_v11 = vld [vmem:[%s42061_s2] ss:$0 sm:$0xff] }
 0x9be   : > { %31562 = vmatprep.mubr.msk.f32.mxu1 %vm369_vm1, %v38941_v32 }
 0x9c1   : > { %31563 = vmatmul.mubr.msk.f32.gmra.mrb[94].mxu1 %vm369_vm1, %v38948_v17 }
 0x9c2   : > { %31565 = vmatprep.mubr.msk.f32.mxu1 %vm369_vm1, %v38951_v48 }
 0x9c5   : > { %31566 = vmatmul.mubr.msk.f32.gmra.mrb[96].mxu1 %vm369_vm1, %v38958_v41 }
 0x9c6   : > { %31568 = vmatprep.mubr.msk.f32.mxu1 %vm369_vm1, %v38961_v59 }
 0x9c9   : > { %31569 = vmatmul.mubr.msk.f32.gmra.mrb[98].mxu1 %vm369_vm1, %v38968_v16 }
 0x9ca   : > { %31571 = vmatprep.mubr.msk.f32.mxu1 %vm369_vm1, %v26143_v34 }
 0x9cd   : > { %31572 = vmatmul.mubr.msk.f32.gmra.mrb[100].mxu1 %vm369_vm1, %v26144_v8 }
 0x9ce   : > { %31574 = vmatprep.mubr.msk.f32.mxu1 %vm369_vm1, %v26145_v62 }
 0x9d1   : > { %31575 = vmatmul.mubr.msk.f32.gmra.mrb[102].mxu1 %vm369_vm1, %v26146_v52 }
 0x9d2   : > { %31577 = vmatprep.mubr.msk.f32.mxu1 %vm369_vm1, %v26147_v3 }
 0x9d5   : > { %31578 = vmatmul.mubr.msk.f32.gmra.mrb[104].mxu1 %vm369_vm1, %v26148_v7 }
 0x9d6   : > { %31580 = vmatprep.mubr.msk.f32.mxu1 %vm369_vm1, %v26149_v28 }
 0x9d9   : > { %31581 = vmatmul.mubr.msk.f32.gmra.mrb[106].mxu1 %vm369_vm1, %v26150_v4 }
 0x9da   : > { %31585 = vmatprep.mubr.msk.f32.mxu1 %vm369_vm1, %v38652_v55  ;;  %v26192_v55 = vld [vmem:[%s35745_s17 + $0x991] sm:$0xff] }
 0x9dd   : > { %31586 = vmatmul.mubr.msk.f32.vlgmr.msra.gmra.mrb[84].mxu1 %vm369_vm1, %v38659_v13  ;;  %v26193_v13 = vld [vmem:[%s35745_s17 + $0x999] sm:$0xff] }
 0x9de   : > { %31622 = vmatpush3.msk.msra.mxu1 %vm442_vm0, %v35541_v38  ;;  %31588 = vmatprep.mubr.msk.f32.mxu1 %vm369_vm1, %v38662_v10  ;;  %v26194_v10 = vld [vmem:[%s35745_s17 + $0x9a1] sm:$0xff] }
 0x9df   : > { %33801 = vmatprep.subr.bf16.mxu1 %v42178_v22 }
 0x9e1   : > { %31589 = vmatmul.mubr.msk.f32.gmra.mrb[86].mxu1 %vm369_vm1, %v38669_v42  ;;  %v26195_v42 = vld [vmem:[%s35745_s17 + $0x9a9] sm:$0xff] }
 0x9e2   : > { %31591 = vmatprep.mubr.msk.f32.mxu1 %vm369_vm1, %v38672_v12  ;;  %v26196_v12 = vld [vmem:[%s35745_s17 + $0x9b1] sm:$0xff] }
 0x9e5   : > { %31592 = vmatmul.mubr.msk.f32.gmra.mrb[88].mxu1 %vm369_vm1, %v38679_v15  ;;  %v26197_v15 = vld [vmem:[%s35745_s17 + $0x9b9] sm:$0xff] }
 0x9e6   : > { %31594 = vmatprep.mubr.msk.f32.mxu1 %vm369_vm1, %v38682_v37  ;;  %v26198_v37 = vld [vmem:[%s35745_s17 + $0x9c1] sm:$0xff] }
 0x9e9   : > { %31595 = vmatmul.mubr.msk.f32.gmra.mrb[90].mxu1 %vm369_vm1, %v38689_v19  ;;  %v26199_v19 = vld [vmem:[%s35745_s17 + $0x9c9] sm:$0xff] }
 0x9ea   : > { %31597 = vmatprep.mubr.msk.f32.mxu1 %vm369_vm1, %v39019_v43 }
 0x9ed   : > { %31598 = vmatmul.mubr.msk.f32.gmra.mrb[92].mxu1 %vm369_vm1, %v39026_v45 }
 0x9ee   : > { %31600 = vmatprep.mubr.msk.f32.mxu1 %vm369_vm1, %v39029_v51 }
 0x9f1   : > { %31601 = vmatmul.mubr.msk.f32.gmra.mrb[94].mxu1 %vm369_vm1, %v39036_v35 }
 0x9f2   : > { %31603 = vmatprep.mubr.msk.f32.mxu1 %vm369_vm1, %v39039_v9 }
 0x9f5   : > { %31604 = vmatmul.mubr.msk.f32.gmra.mrb[96].mxu1 %vm369_vm1, %v39046_v57 }
 0x9f6   : > { %31606 = vmatprep.mubr.msk.f32.mxu1 %vm369_vm1, %v39049_v50 }
 0x9f9   : > { %31607 = vmatmul.mubr.msk.f32.gmra.mrb[98].mxu1 %vm369_vm1, %v39056_v53 }
 0x9fa   : > { %31609 = vmatprep.mubr.msk.f32.mxu1 %vm369_vm1, %v26192_v55 }
 0x9fd   : > { %31610 = vmatmul.mubr.msk.f32.gmra.mrb[100].mxu1 %vm369_vm1, %v26193_v13 }
 0x9fe   : > { %31612 = vmatprep.mubr.msk.f32.mxu1 %vm369_vm1, %v26194_v10 }
 0xa01   : > { %31613 = vmatmul.mubr.msk.f32.gmra.mrb[102].mxu1 %vm369_vm1, %v26195_v42 }
 0xa02   : > { %31615 = vmatprep.mubr.msk.f32.mxu1 %vm369_vm1, %v26196_v12 }
 0xa05   : > { %31616 = vmatmul.mubr.msk.f32.gmra.mrb[104].mxu1 %vm369_vm1, %v26197_v15 }
 0xa06   : > { %31618 = vmatprep.mubr.msk.f32.mxu1 %vm369_vm1, %v26198_v37 }
 0xa09   : > { %31619 = vmatmul.mubr.msk.f32.gmra.mrb[106].mxu1 %vm369_vm1, %v26199_v19 }
 0xa0a   : > { %31623 = vmatprep.mubr.msk.f32.mxu1 %vm369_vm1, %v38854_v27  ;;  %v26246_v27 = vld [vmem:[%s35745_s17 + $0x9ba] sm:$0xff] }
 0xa0d   : > { %31624 = vmatmul.mubr.msk.f32.vlgmr.msra.gmra.mrb[84].mxu1 %vm369_vm1, %v38861_v21  ;;  %v26245_v21 = vld [vmem:[%s35745_s17 + $0x9b2] sm:$0xff] }
 0xa0e   : > { %31626 = vmatprep.mubr.msk.f32.mxu1 %vm369_vm1, %v38864_v29  ;;  %33803 = vmatpush3.bf16.msra.mxu1 %v36328_v49  ;;  %v26244_v29 = vld [vmem:[%s35745_s17 + $0x9aa] sm:$0xff] }
 0xa0f   : > { %33804 = vmatprep.subr.bf16.mxu1 %v42178_v22 }
 0xa11   : > { %31627 = vmatmul.mubr.msk.f32.gmra.mrb[86].mxu1 %vm369_vm1, %v38871_v0  ;;  %v26243_v0 = vld [vmem:[%s35745_s17 + $0x9a2] sm:$0xff] }
 0xa12   : > { %31629 = vmatprep.mubr.msk.f32.mxu1 %vm369_vm1, %v38874_v54  ;;  %33806 = vmatpush3.bf16.msra.mxu1 %v36402_v18  ;;  %v26242_v54 = vld [vmem:[%s35745_s17 + $0x99a] sm:$0xff] }
 0xa13   : > { %33807 = vmatprep.subr.bf16.mxu1 %v42178_v22 }
 0xa15   : > { %31630 = vmatmul.mubr.msk.f32.gmra.mrb[88].mxu1 %vm369_vm1, %v38881_v46  ;;  %v26241_v46 = vld [vmem:[%s35745_s17 + $0x992] sm:$0xff] }
 0xa16   : > { %31632 = vmatprep.mubr.msk.f32.mxu1 %vm369_vm1, %v38884_v5  ;;  %33809 = vmatpush3.bf16.msra.mxu1 %v36430_v39  ;;  %v26247_v5 = vld [vmem:[%s35745_s17 + $0x9c2] sm:$0xff] }
 0xa17   : > { %33810 = vmatprep.subr.bf16.mxu1 %v42178_v22 }
 0xa19   : > { %31633 = vmatmul.mubr.msk.f32.gmra.mrb[90].mxu1 %vm369_vm1, %v38891_v2  ;;  %v26248_v2 = vld [vmem:[%s35745_s17 + $0x9ca] sm:$0xff] }
 0xa1a   : > { %31635 = vmatprep.mubr.msk.f32.mxu1 %vm369_vm1, %v39096_v31  ;;  %33812 = vmatpush3.bf16.msra.mxu1 %v36454_v61 }
 0xa1b   : > { %33813 = vmatprep.subr.bf16.mxu1 %v42178_v22 }
 0xa1d   : > { %31636 = vmatmul.mubr.msk.f32.gmra.mrb[92].mxu1 %vm369_vm1, %v39103_v58 }
 0xa1e   : > { %31638 = vmatprep.mubr.msk.f32.mxu1 %vm369_vm1, %v39106_v63 }
 0xa21   : > { %31639 = vmatmul.mubr.msk.f32.gmra.mrb[94].mxu1 %vm369_vm1, %v39113_v60 }
 0xa22   : > { %31641 = vmatprep.mubr.msk.f32.mxu1 %vm369_vm1, %v39116_v26 }
 0xa25   : > { %31642 = vmatmul.mubr.msk.f32.gmra.mrb[96].mxu1 %vm369_vm1, %v39123_v56 }
 0xa26   : > { %31644 = vmatprep.mubr.msk.f32.mxu1 %vm369_vm1, %v39126_v14 }
 0xa29   : > { %31645 = vmatmul.mubr.msk.f32.gmra.mrb[98].mxu1 %vm369_vm1, %v39133_v44 }
 0xa2a   : > { %31647 = vmatprep.mubr.msk.f32.mxu1 %vm369_vm1, %v26241_v46 }
 0xa2d   : > { %31648 = vmatmul.mubr.msk.f32.gmra.mrb[100].mxu1 %vm369_vm1, %v26242_v54 }
 0xa2e   : > { %31650 = vmatprep.mubr.msk.f32.mxu1 %vm369_vm1, %v26243_v0 }
 0xa31   : > { %31651 = vmatmul.mubr.msk.f32.gmra.mrb[102].mxu1 %vm369_vm1, %v26244_v29 }
 0xa32   : > { %31653 = vmatprep.mubr.msk.f32.mxu1 %vm369_vm1, %v26245_v21  ;;  %v42237_v21 = vld [vmem:[#allocation11_spill] sm:$0xff] }
 0xa35   : > { %31654 = vmatmul.mubr.msk.f32.gmra.mrb[104].mxu1 %vm369_vm1, %v26246_v27  ;;  %v42238_v27 = vld [vmem:[#allocation12_spill] sm:$0xff] }
 0xa36   : > { %31656 = vmatprep.mubr.msk.f32.mxu1 %vm369_vm1, %v26247_v5 }
 0xa39   : > { %31657 = vmatmul.mubr.msk.f32.gmra.mrb[106].mxu1 %vm369_vm1, %v26248_v2  ;;  %v42239_v2 = vld [vmem:[#allocation13_spill] sm:$0xff] }
 0xa3a   : > { %32188 = vmatprep.mubr.msk.f32.mxu1 %vm35641_vm2, %v42179_v6 }
 0xae0   : > { %v31625_v40 = vpop.f32.mrb[84].mxu1 }
 0xae1   : > { %v13337_v32 = vadd.f32 %v39301_v11, %v31625_v40  ;;  %v13193_v17 = vpop.f32.mrb[85].mxu1  ;;  %v42240_v40 = vld [vmem:[#allocation14_spill] sm:$0xff] }
 0xae2   : > { %v13336_v48 = vadd.f32 %v39301_v11, %v13193_v17 }
 0xae3   : > { %13361 = vst.msk [vmem:[#allocation2 + $0x8] sm:$0xff] %vm3079_vm3, %v13337_v32  ;;  %v42242_v32 = vld [vmem:[#allocation16_spill] sm:$0xff] }
 0xae4   : > { %13360 = vst.msk [vmem:[#allocation2] sm:$0xff] %vm3079_vm3, %v13336_v48  ;;  %v31628_v41 = vpop.f32.mrb[86].mxu1  ;;  %v42243_v48 = vld [vmem:[#allocation17_spill] sm:$0xff] }
 0xae5   : > { %v13339_v59 = vadd.f32 %v39301_v11, %v31628_v41  ;;  %v13203_v16 = vpop.f32.mrb[87].mxu1  ;;  %v42244_v41 = vld [vmem:[#allocation18_spill] sm:$0xff] }
 0xae6   : > { %v13338_v23 = vadd.f32 %v39301_v11, %v13203_v16  ;;  %v42246_v16 = vld [vmem:[#allocation20_spill] sm:$0xff] }
 0xae7   : > { %13363 = vst.msk [vmem:[#allocation2 + $0x18] sm:$0xff] %vm3079_vm3, %v13339_v59  ;;  %v42245_v59 = vld [vmem:[#allocation19_spill] sm:$0xff] }
 0xae8   : > { %13362 = vst.msk [vmem:[#allocation2 + $0x10] sm:$0xff] %vm3079_vm3, %v13338_v23  ;;  %v31631_v30 = vpop.f32.mrb[88].mxu1 }
 0xae9   : > { %v13341_v25 = vadd.f32 %v39301_v11, %v31631_v30  ;;  %v13213_v20 = vpop.f32.mrb[89].mxu1  ;;  %v42247_v30 = vld [vmem:[#allocation21_spill] sm:$0xff] }
 0xaea   : > { %v13340_v43 = vadd.f32 %v39301_v11, %v13213_v20  ;;  %v42249_v20 = vld [vmem:[#allocation23_spill] sm:$0xff] }
 0xaeb   : > { %13365 = vst.msk [vmem:[#allocation2 + $0x28] sm:$0xff] %vm3079_vm3, %v13341_v25  ;;  %v42248_v25 = vld [vmem:[#allocation22_spill] sm:$0xff] }
 0xaec   : > { %13364 = vst.msk [vmem:[#allocation2 + $0x20] sm:$0xff] %vm3079_vm3, %v13340_v43  ;;  %v31634_v45 = vpop.f32.mrb[90].mxu1  ;;  %v42250_v43 = vld [vmem:[#allocation24_spill] sm:$0xff] }
 0xaed   : > { %v13343_v51 = vadd.f32 %v39301_v11, %v31634_v45  ;;  %v13223_v35 = vpop.f32.mrb[91].mxu1 }
 0xaee   : > { %v13342_v9 = vadd.f32 %v39301_v11, %v13223_v35  ;;  %v42252_v35 = vld [vmem:[#allocation26_spill] sm:$0xff] }
 0xaef   : > { %13367 = vst.msk [vmem:[#allocation2 + $0x38] sm:$0xff] %vm3079_vm3, %v13343_v51  ;;  %v42251_v51 = vld [vmem:[#allocation25_spill] sm:$0xff] }
 0xaf0   : > { %13366 = vst.msk [vmem:[#allocation2 + $0x30] sm:$0xff] %vm3079_vm3, %v13342_v9  ;;  %v31637_v57 = vpop.f32.mrb[92].mxu1  ;;  %v42253_v9 = vld [vmem:[#allocation27_spill] sm:$0xff] }
 0xaf1   : > { %v13345_v50 = vadd.f32 %v39301_v11, %v31637_v57  ;;  %v13233_v53 = vpop.f32.mrb[93].mxu1  ;;  %v42254_v57 = vld [vmem:[#allocation28_spill] sm:$0xff] }
 0xaf2   : > { %v13344_v1 = vadd.f32 %v39301_v11, %v13233_v53  ;;  %v42255_v53 = vld [vmem:[#allocation29_spill] sm:$0xff] }
 0xaf3   : > { %13369 = vst.msk [vmem:[#allocation2 + $0x48] sm:$0xff] %vm3079_vm3, %v13345_v50 }
 0xaf4   : > { %13368 = vst.msk [vmem:[#allocation2 + $0x40] sm:$0xff] %vm3079_vm3, %v13344_v1  ;;  %v31640_v31 = vpop.f32.mrb[94].mxu1  ;;  %v42256_v1 = vld [vmem:[#allocation30_spill] sm:$0xff] }
 0xaf5   : > { %v13347_v58 = vadd.f32 %v39301_v11, %v31640_v31  ;;  %v13243_v63 = vpop.f32.mrb[95].mxu1  ;;  %v42257_v31 = vld [vmem:[#allocation31_spill] sm:$0xff] }
 0xaf6   : > { %v13346_v60 = vadd.f32 %v39301_v11, %v13243_v63 }
 0xaf7   : > { %13371 = vst.msk [vmem:[#allocation2 + $0x58] sm:$0xff] %vm3079_vm3, %v13347_v58  ;;  %v13384_v5 = vld [vmem:[#allocation2] ss:$10 sm:$0x7f] }
 0xaf8   : > { %13370 = vst.msk [vmem:[#allocation2 + $0x50] sm:$0xff] %vm3079_vm3, %v13346_v60  ;;  %v31643_v26 = vpop.f32.mrb[96].mxu1  ;;  %v13607_v23 = vld [vmem:[#allocation2 + $0x1] ss:$10 sm:$0x7f] }
 0xaf9   : > { %v13349_v56 = vadd.f32 %v39301_v11, %v31643_v26  ;;  %v13253_v14 = vpop.f32.mrb[97].mxu1  ;;  %v42258_v58 = vld [vmem:[#allocation32_spill] sm:$0xff]  ;;  %v42259_v60 = vld [vmem:[#allocation33_spill] sm:$0xff]  ;;  %v42260_v26 = vld [vmem:[#allocation34_spill] sm:$0xff] }
 0xafa   : > { %v13348_v44 = vadd.f32 %v39301_v11, %v13253_v14  ;;  %v13832_v63 = vld [vmem:[#allocation2 + $0x2] ss:$10 sm:$0x7f] }
 0xafb   : > { %13373 = vst.msk [vmem:[#allocation2 + $0x68] sm:$0xff] %vm3079_vm3, %v13349_v56  ;;  %v42261_v56 = vld [vmem:[#allocation35_spill] sm:$0xff]  ;;  %v42262_v14 = vld [vmem:[#allocation36_spill] sm:$0xff] }
 0xafc   : > { %13372 = vst.msk [vmem:[#allocation2 + $0x60] sm:$0xff] %vm3079_vm3, %v13348_v44  ;;  %v31646_v38 = vpop.f32.mrb[98].mxu1 }
 0xafd   : > { %v13351_v34 = vadd.f32 %v39301_v11, %v31646_v38  ;;  %v13263_v8 = vpop.f32.mrb[99].mxu1  ;;  %v42263_v38 = vld [vmem:[#allocation37_spill] sm:$0xff] }
 0xafe   : > { %v13350_v62 = vadd.f32 %v39301_v11, %v13263_v8  ;;  %v42265_v8 = vld [vmem:[#allocation39_spill] sm:$0xff] }
 0xaff   : > { %13375 = vst.msk [vmem:[#allocation2 + $0x78] sm:$0xff] %vm3079_vm3, %v13351_v34  ;;  %v42264_v34 = vld [vmem:[#allocation38_spill] sm:$0xff] }
 0xb00   : > { %13374 = vst.msk [vmem:[#allocation2 + $0x70] sm:$0xff] %vm3079_vm3, %v13350_v62  ;;  %v31649_v52 = vpop.f32.mrb[100].mxu1  ;;  %v42266_v62 = vld [vmem:[#allocation40_spill] sm:$0xff] }
 0xb01   : > { %v13353_v3 = vadd.f32 %v39301_v11, %v31649_v52  ;;  %v13273_v7 = vpop.f32.mrb[101].mxu1  ;;  %v35543_v52 = vld [vmem:[%s42060_s1 + $0x4] sm:$0x7] }
 0xb02   : > { %v13352_v28 = vadd.f32 %v39301_v11, %v13273_v7 }
 0xb03   : > { %13377 = vst.msk [vmem:[#allocation2 + $0x88] sm:$0xff] %vm3079_vm3, %v13353_v3  ;;  %v26307_v3 = vld [vmem:[%s35745_s17 + $0xb41] sm:$0xff] }
 0xb04   : > { %13376 = vst.msk [vmem:[#allocation2 + $0x80] sm:$0xff] %vm3079_vm3, %v13352_v28  ;;  %v31652_v4 = vpop.f32.mrb[102].mxu1  ;;  %v26308_v28 = vld [vmem:[%s35745_s17 + $0xb49] sm:$0xff] }
 0xb05   : > { %v13355_v55 = vadd.f32 %v39301_v11, %v31652_v4  ;;  %v13283_v13 = vpop.f32.mrb[103].mxu1  ;;  %v35544_v4 = vld [vmem:[%s42060_s1] sm:$0x7] }
 0xb06   : > { %v13354_v10 = vadd.f32 %v39301_v11, %v13283_v13  ;;  %v26310_v13 = vld [vmem:[%s35745_s17 + $0xb59] sm:$0xff] }
 0xb07   : > { %13379 = vst.msk [vmem:[#allocation2 + $0x98] sm:$0xff] %vm3079_vm3, %v13355_v55  ;;  %v13385_v42 = vld [vmem:[#allocation2 + $0x40] ss:$10 sm:$0x7f] }
 0xb08   : > { %13378 = vst.msk [vmem:[#allocation2 + $0x90] sm:$0xff] %vm3079_vm3, %v13354_v10  ;;  %v31655_v12 = vpop.f32.mrb[104].mxu1  ;;  %31676 = vmatmul.mubr.msk.f32.vlgmr.msra.gmra.mrb[66].mxu0 %vm3079_vm3, %v13385_v42  ;;  %v13608_v45 = vld [vmem:[#allocation2 + $0x41] ss:$10 sm:$0x7f] }
 0xb09   : > { %v13357_v15 = vadd.f32 %v39301_v11, %v31655_v12  ;;  %33707 = vmatpush3.bf16.msra.mxu0 %v36528_v36  ;;  %v13293_v37 = vpop.f32.mrb[105].mxu1  ;;  %31694 = vmatprep.mubr.msk.f32.mxu0 %vm35641_vm2, %v42179_v6  ;;  %v13833_v44 = vld [vmem:[#allocation2 + $0x42] ss:$10 sm:$0x7f] }
 0xb0a   : > { %v13356_v19 = vadd.f32 %v39301_v11, %v13293_v37  ;;  %33708 = vmatprep.subr.bf16.mxu0 %v42178_v22  ;;  %v26309_v55 = vld [vmem:[%s35745_s17 + $0xb51] sm:$0xff]  ;;  %v26311_v10 = vld [vmem:[%s35745_s17 + $0xb61] sm:$0xff]  ;;  %v26312_v12 = vld [vmem:[%s35745_s17 + $0xb69] sm:$0xff] }
 0xb0b   : > { %13381 = vst.msk [vmem:[#allocation2 + $0xa8] sm:$0xff] %vm3079_vm3, %v13357_v15  ;;  %v35545_v42 = vld [vmem:[%s42060_s1 + $0x8] sm:$0x7]  ;;  %v26313_v15 = vld [vmem:[%s35745_s17 + $0xb71] sm:$0xff]  ;;  %v26314_v37 = vld [vmem:[%s35745_s17 + $0xb79] sm:$0xff] }
 0xb0c   : > { %13380 = vst.msk [vmem:[#allocation2 + $0xa0] sm:$0xff] %vm3079_vm3, %v13356_v19  ;;  %v31658_v46 = vpop.f32.mrb[106].mxu1  ;;  %v39469_v19 = vld [vmem:[%s35745_s17 + $0xb89] sm:$0xff] }
 0xb0d   : > { %v13359_v54 = vadd.f32 %v39301_v11, %v31658_v46  ;;  %33710 = vmatpush3.bf16.msra.mxu0 %v36544_v47  ;;  %v13303_v0 = vpop.f32.mrb[107].mxu1  ;;  %v39475_v46 = vld [vmem:[%s35745_s17 + $0xb91] sm:$0xff] }
 0xb0e   : > { %v13358_v29 = vadd.f32 %v39301_v11, %v13303_v0  ;;  %33711 = vmatprep.subr.bf16.mxu0 %v42178_v22  ;;  %v42241_v11 = vld [vmem:[#allocation15_spill] sm:$0xff]  ;;  %v39485_v0 = vld [vmem:[%s35745_s17 + $0xba1] sm:$0xff] }
 0xb0f   : > { %13383 = vst.msk [vmem:[#allocation2 + $0xb8] sm:$0xff] %vm3079_vm3, %v13359_v54  ;;  %v39478_v54 = vld [vmem:[%s35745_s17 + $0xb99] sm:$0xff] }
 0xb10   : > { %13382 = vst.msk [vmem:[#allocation2 + $0xb0] sm:$0xff] %vm3079_vm3, %v13358_v29  ;;  %v39488_v29 = vld [vmem:[%s35745_s17 + $0xba9] sm:$0xff] }
 0xb11   : > { %33713 = vmatpush3.bf16.msra.mxu0 %v42237_v21 }
 0xb12   : > { %33714 = vmatprep.subr.bf16.mxu0 %v42178_v22 }
 0xb15   : > { %33716 = vmatpush3.bf16.msra.mxu0 %v42238_v27  ;;  %v35548_v27 = vld [vmem:[%s42060_s1 + $0x14] sm:$0x7] }
 0xb16   : > { %33717 = vmatprep.subr.bf16.mxu0 %v42178_v22 }
 0xb17   : > { %v13386_v17 = vld [vmem:[#allocation2 + $0x80] ss:$10 sm:$0x7f]  ;;  %v13609_v50 = vld [vmem:[#allocation2 + $0x81] ss:$10 sm:$0x7f] }
 0xb18   : > { %31695 = vmatmul.mubr.msk.f32.vlgmr.msra.gmra.mrb[68].mxu0 %vm3079_vm3, %v13384_v5  ;;  %v13834_v7 = vld [vmem:[#allocation2 + $0x82] ss:$10 sm:$0x7f] }
 0xb19   : > { %33719 = vmatpush3.bf16.msra.mxu0 %v42239_v2  ;;  %31713 = vmatprep.mubr.msk.f32.mxu0 %vm35641_vm2, %v42179_v6  ;;  %v39495_v5 = vld [vmem:[%s35745_s17 + $0xbb1] sm:$0xff] }
 0xb1a   : > { %33720 = vmatprep.subr.bf16.mxu0 %v42178_v22 }
 0xb1d   : > { %33722 = vmatpush3.bf16.msra.mxu0 %v42240_v40 }
 0xb1e   : > { %33723 = vmatprep.subr.bf16.mxu0 %v42178_v22 }
 0xb21   : > { %33725 = vmatpush3.bf16.msra.mxu0 %v42241_v11  ;;  %v39737_v11 = vld [vmem:[%s35745_s17 + $0xbfa] sm:$0xff] }
 0xb22   : > { %33726 = vmatprep.subr.bf16.mxu0 %v42178_v22 }
 0xb25   : > { %33728 = vmatpush3.bf16.msra.mxu0 %v42242_v32  ;;  %v39730_v32 = vld [vmem:[%s35745_s17 + $0xbf2] sm:$0xff] }
 0xb26   : > { %33729 = vmatprep.subr.bf16.mxu0 %v42178_v22 }
 0xb28   : > { %31714 = vmatmul.mubr.msk.f32.vlgmr.msra.gmra.mrb[70].mxu0 %vm3079_vm3, %v13386_v17  ;;  %v39498_v17 = vld [vmem:[%s35745_s17 + $0xbb9] sm:$0xff] }
 0xb29   : > { %33731 = vmatpush3.bf16.msra.mxu0 %v42243_v48  ;;  %31732 = vmatprep.mubr.msk.f32.mxu0 %vm35641_vm2, %v42179_v6  ;;  %v39727_v48 = vld [vmem:[%s35745_s17 + $0xbea] sm:$0xff] }
 0xb2a   : > { %33732 = vmatprep.subr.bf16.mxu0 %v42178_v22 }
 0xb2d   : > { %33734 = vmatpush3.bf16.msra.mxu0 %v42244_v41 }
 0xb2e   : > { %33735 = vmatprep.subr.bf16.mxu0 %v42178_v22 }
 0xb31   : > { %33737 = vmatpush3.bf16.msra.mxu0 %v42245_v59 }
 0xb32   : > { %33738 = vmatprep.subr.bf16.mxu0 %v42178_v22 }
 0xb35   : > { %33740 = vmatpush3.bf16.msra.mxu0 %v42246_v16 }
 0xb36   : > { %33741 = vmatprep.subr.bf16.mxu0 %v42178_v22 }
 0xb38   : > { %31733 = vmatmul.mubr.msk.f32.vlgmr.msra.gmra.mrb[72].mxu0 %vm3079_vm3, %v13607_v23  ;;  %v39505_v23 = vld [vmem:[%s35745_s17 + $0xbc1] sm:$0xff] }
 0xb39   : > { %33743 = vmatpush3.bf16.msra.mxu0 %v42247_v30  ;;  %31751 = vmatprep.mubr.msk.f32.mxu0 %vm35641_vm2, %v42179_v6  ;;  %v39720_v30 = vld [vmem:[%s35745_s17 + $0xbe2] sm:$0xff] }
 0xb3a   : > { %33744 = vmatprep.subr.bf16.mxu0 %v42178_v22 }
 0xb3d   : > { %33746 = vmatpush3.bf16.msra.mxu0 %v42248_v25  ;;  %v39717_v25 = vld [vmem:[%s35745_s17 + $0xbda] sm:$0xff] }
 0xb3e   : > { %33747 = vmatprep.subr.bf16.mxu0 %v42178_v22 }
 0xb41   : > { %33749 = vmatpush3.bf16.msra.mxu0 %v42249_v20  ;;  %v39710_v20 = vld [vmem:[%s35745_s17 + $0xbd2] sm:$0xff] }
 0xb42   : > { %33750 = vmatprep.subr.bf16.mxu0 %v42178_v22 }
 0xb45   : > { %33752 = vmatpush3.bf16.msra.mxu0 %v42250_v43  ;;  %v26385_v43 = vld [vmem:[%s35745_s17 + $0xb62] sm:$0xff] }
 0xb46   : > { %33753 = vmatprep.subr.bf16.mxu0 %v42178_v22 }
 0xb48   : > { %31752 = vmatmul.mubr.msk.f32.vlgmr.msra.gmra.mrb[74].mxu0 %vm3079_vm3, %v13608_v45  ;;  %v39508_v45 = vld [vmem:[%s35745_s17 + $0xbd1] sm:$0xff] }
 0xb49   : > { %33755 = vmatpush3.bf16.msra.mxu0 %v42251_v51  ;;  %31770 = vmatprep.mubr.msk.f32.mxu0 %vm35641_vm2, %v42179_v6  ;;  %v26384_v51 = vld [vmem:[%s35745_s17 + $0xb5a] sm:$0xff] }
 0xb4a   : > { %33756 = vmatprep.subr.bf16.mxu0 %v42178_v22 }
 0xb4d   : > { %33758 = vmatpush3.bf16.msra.mxu0 %v42252_v35 }
 0xb4e   : > { %33759 = vmatprep.subr.bf16.mxu0 %v42178_v22 }
 0xb51   : > { %33761 = vmatpush3.bf16.msra.mxu0 %v42253_v9 }
 0xb52   : > { %33762 = vmatprep.subr.bf16.mxu0 %v42178_v22 }
 0xb55   : > { %33764 = vmatpush3.bf16.msra.mxu0 %v42254_v57 }
 0xb56   : > { %33765 = vmatprep.subr.bf16.mxu0 %v42178_v22 }
 0xb58   : > { %31771 = vmatmul.mubr.msk.f32.vlgmr.msra.gmra.mrb[76].mxu0 %vm3079_vm3, %v13609_v50  ;;  %v39515_v50 = vld [vmem:[%s35745_s17 + $0xbd9] sm:$0xff] }
 0xb59   : > { %33767 = vmatpush3.bf16.msra.mxu0 %v42255_v53  ;;  %31789 = vmatprep.mubr.msk.f32.mxu0 %vm35641_vm2, %v42179_v6  ;;  %v26383_v53 = vld [vmem:[%s35745_s17 + $0xb52] sm:$0xff] }
 0xb5a   : > { %33768 = vmatprep.subr.bf16.mxu0 %v42178_v22 }
 0xb5d   : > { %33770 = vmatpush3.bf16.msra.mxu0 %v42256_v1  ;;  %v26382_v1 = vld [vmem:[%s35745_s17 + $0xb4a] sm:$0xff] }
 0xb5e   : > { %33771 = vmatprep.subr.bf16.mxu0 %v42178_v22 }
 0xb61   : > { %33773 = vmatpush3.bf16.msra.mxu0 %v42257_v31  ;;  %v26381_v31 = vld [vmem:[%s35745_s17 + $0xb42] sm:$0xff] }
 0xb62   : > { %33774 = vmatprep.subr.bf16.mxu0 %v42178_v22 }
 0xb65   : > { %33776 = vmatpush3.bf16.msra.mxu0 %v42258_v58  ;;  %v39639_v58 = vld [vmem:[%s35745_s17 + $0xc00] sm:$0xff] }
 0xb66   : > { %33777 = vmatprep.subr.bf16.mxu0 %v42178_v22 }
 0xb68   : > { %31790 = vmatmul.mubr.msk.f32.vlgmr.msra.gmra.mrb[78].mxu0 %vm3079_vm3, %v13832_v63  ;;  %v39518_v63 = vld [vmem:[%s35745_s17 + $0xbe1] sm:$0xff] }
 0xb69   : > { %33779 = vmatpush3.bf16.msra.mxu0 %v42259_v60  ;;  %31808 = vmatprep.mubr.msk.f32.mxu0 %vm35641_vm2, %v42179_v6  ;;  %v39636_v60 = vld [vmem:[%s35745_s17 + $0xbf8] sm:$0xff] }
 0xb6a   : > { %33780 = vmatprep.subr.bf16.mxu0 %v42178_v22 }
 0xb6d   : > { %33782 = vmatpush3.bf16.msra.mxu0 %v42260_v26  ;;  %v39629_v26 = vld [vmem:[%s35745_s17 + $0xbf0] sm:$0xff] }
 0xb6e   : > { %33783 = vmatprep.subr.bf16.mxu0 %v42178_v22 }
 0xb71   : > { %33785 = vmatpush3.bf16.msra.mxu0 %v42261_v56  ;;  %v39626_v56 = vld [vmem:[%s35745_s17 + $0xbe8] sm:$0xff] }
 0xb72   : > { %33786 = vmatprep.subr.bf16.mxu0 %v42178_v22 }
 0xb75   : > { %33788 = vmatpush3.bf16.msra.mxu0 %v42262_v14 }
 0xb76   : > { %33789 = vmatprep.subr.bf16.mxu0 %v42178_v22 }
 0xb78   : > { %31809 = vmatmul.mubr.msk.f32.vlgmr.msra.gmra.mrb[80].mxu0 %vm3079_vm3, %v13833_v44  ;;  %v39525_v44 = vld [vmem:[%s35745_s17 + $0xbe9] sm:$0xff] }
 0xb79   : > { %33791 = vmatpush3.bf16.msra.mxu0 %v42263_v38  ;;  %31827 = vmatprep.mubr.msk.f32.mxu0 %vm35641_vm2, %v42179_v6 }
 0xb7a   : > { %33792 = vmatprep.subr.bf16.mxu0 %v42178_v22 }
 0xb7d   : > { %33794 = vmatpush3.bf16.msra.mxu0 %v42264_v34  ;;  %v39619_v34 = vld [vmem:[%s35745_s17 + $0xbe0] sm:$0xff] }
 0xb7e   : > { %33795 = vmatprep.subr.bf16.mxu0 %v42178_v22 }
 0xb81   : > { %33797 = vmatpush3.bf16.msra.mxu0 %v42265_v8  ;;  %v39616_v8 = vld [vmem:[%s35745_s17 + $0xbd8] sm:$0xff] }
 0xb82   : > { %33798 = vmatprep.subr.bf16.mxu0 %v42178_v22 }
 0xb85   : > { %33800 = vmatpush3.bf16.msra.mxu0 %v42266_v62  ;;  %v39609_v62 = vld [vmem:[%s35745_s17 + $0xbd0] sm:$0xff] }
 0xb86   : > { %31830 = vmatprep.subr.msk.mxu0 %vm442_vm0, %v35543_v52 }
 0xb88   : > { %31828 = vmatmul.mubr.msk.f32.vlgmr.msra.gmra.mrb[82].mxu0 %vm3079_vm3, %v13834_v7  ;;  %v39538_v7 = vld [vmem:[%s35745_s17 + $0xc01] sm:$0xff] }
 0xb89   : > { %31831 = vmatpush3.msk.msra.mxu0 %vm442_vm0, %v35543_v52  ;;  %31832 = vmatprep.mubr.msk.f32.mxu0 %vm369_vm1, %v26307_v3  ;;  %v39528_v52 = vld [vmem:[%s35745_s17 + $0xbf1] sm:$0xff]  ;;  %v39535_v3 = vld [vmem:[%s35745_s17 + $0xbf9] sm:$0xff] }
 0xb8a   : > { %31868 = vmatprep.subr.msk.mxu0 %vm442_vm0, %v35544_v4 }
 0xb8c   : > { %31833 = vmatmul.mubr.msk.f32.vlgmr.msra.gmra.mrb[84].mxu0 %vm369_vm1, %v26308_v28  ;;  %v39545_v28 = vld [vmem:[%s35745_s17 + $0xc09] sm:$0xff] }
 0xb8d   : > { %31869 = vmatpush3.msk.msra.mxu0 %vm442_vm0, %v35544_v4  ;;  %31835 = vmatprep.mubr.msk.f32.mxu0 %vm369_vm1, %v26309_v55  ;;  %v26283_v4 = vld [vmem:[%s35745_s17 + $0xb40] sm:$0xff]  ;;  %v26284_v55 = vld [vmem:[%s35745_s17 + $0xb48] sm:$0xff] }
 0xb8e   : > { %31906 = vmatprep.subr.msk.mxu0 %vm442_vm0, %v35545_v42 }
 0xb90   : > { %31836 = vmatmul.mubr.msk.f32.gmra.mrb[86].mxu0 %vm369_vm1, %v26310_v13  ;;  %v26285_v13 = vld [vmem:[%s35745_s17 + $0xb50] sm:$0xff] }
 0xb91   : > { %31838 = vmatprep.mubr.msk.f32.mxu0 %vm369_vm1, %v26311_v10  ;;  %v26286_v10 = vld [vmem:[%s35745_s17 + $0xb58] sm:$0xff] }
 0xb94   : > { %31839 = vmatmul.mubr.msk.f32.gmra.mrb[88].mxu0 %vm369_vm1, %v26312_v12  ;;  %v26287_v12 = vld [vmem:[%s35745_s17 + $0xb60] sm:$0xff] }
 0xb95   : > { %31841 = vmatprep.mubr.msk.f32.mxu0 %vm369_vm1, %v26313_v15  ;;  %v35546_v15 = vld [vmem:[%s42060_s1 + $0xc] sm:$0x7] }
 0xb98   : > { %31842 = vmatmul.mubr.msk.f32.gmra.mrb[90].mxu0 %vm369_vm1, %v26314_v37  ;;  %v26288_v37 = vld [vmem:[%s35745_s17 + $0xb68] sm:$0xff] }
 0xb99   : > { %31844 = vmatprep.mubr.msk.f32.mxu0 %vm369_vm1, %v39469_v19 }
 0xb9c   : > { %31845 = vmatmul.mubr.msk.f32.gmra.mrb[92].mxu0 %vm369_vm1, %v39475_v46 }
 0xb9d   : > { %31847 = vmatprep.mubr.msk.f32.mxu0 %vm369_vm1, %v39478_v54 }
 0xba0   : > { %31848 = vmatmul.mubr.msk.f32.gmra.mrb[94].mxu0 %vm369_vm1, %v39485_v0 }
 0xba1   : > { %31850 = vmatprep.mubr.msk.f32.mxu0 %vm369_vm1, %v39488_v29 }
 0xba4   : > { %31851 = vmatmul.mubr.msk.f32.gmra.mrb[96].mxu0 %vm369_vm1, %v39495_v5 }
 0xba5   : > { %31853 = vmatprep.mubr.msk.f32.mxu0 %vm369_vm1, %v39498_v17 }
 0xba8   : > { %31854 = vmatmul.mubr.msk.f32.gmra.mrb[98].mxu0 %vm369_vm1, %v39505_v23 }
 0xba9   : > { %31856 = vmatprep.mubr.msk.f32.mxu0 %vm369_vm1, %v39508_v45 }
 0xbac   : > { %31857 = vmatmul.mubr.msk.f32.gmra.mrb[100].mxu0 %vm369_vm1, %v39515_v50 }
 0xbad   : > { %31859 = vmatprep.mubr.msk.f32.mxu0 %vm369_vm1, %v39518_v63 }
 0xbb0   : > { %31860 = vmatmul.mubr.msk.f32.gmra.mrb[102].mxu0 %vm369_vm1, %v39525_v44 }
 0xbb1   : > { %31862 = vmatprep.mubr.msk.f32.mxu0 %vm369_vm1, %v39528_v52 }
 0xbb4   : > { %31863 = vmatmul.mubr.msk.f32.gmra.mrb[104].mxu0 %vm369_vm1, %v39535_v3 }
 0xbb5   : > { %31865 = vmatprep.mubr.msk.f32.mxu0 %vm369_vm1, %v39538_v7 }
 0xbb8   : > { %31866 = vmatmul.mubr.msk.f32.gmra.mrb[106].mxu0 %vm369_vm1, %v39545_v28 }
 0xbb9   : > { %31870 = vmatprep.mubr.msk.f32.mxu0 %vm369_vm1, %v26283_v4  ;;  %v26290_v4 = vld [vmem:[%s35745_s17 + $0xb78] sm:$0xff] }
 0xbbc   : > { %31871 = vmatmul.mubr.msk.f32.vlgmr.msra.gmra.mrb[84].mxu0 %vm369_vm1, %v26284_v55  ;;  %v39570_v55 = vld [vmem:[%s35745_s17 + $0xb88] sm:$0xff] }
 0xbbd   : > { %31907 = vmatpush3.msk.msra.mxu0 %vm442_vm0, %v35545_v42  ;;  %31873 = vmatprep.mubr.msk.f32.mxu0 %vm369_vm1, %v26285_v13  ;;  %v26289_v42 = vld [vmem:[%s35745_s17 + $0xb70] sm:$0xff] }
 0xbbe   : > { %31944 = vmatprep.subr.msk.mxu0 %vm442_vm0, %v35546_v15  ;;  %v39576_v13 = vld [vmem:[%s35745_s17 + $0xb90] sm:$0xff] }
 0xbc0   : > { %31874 = vmatmul.mubr.msk.f32.gmra.mrb[86].mxu0 %vm369_vm1, %v26286_v10  ;;  %v39579_v10 = vld [vmem:[%s35745_s17 + $0xb98] sm:$0xff] }
 0xbc1   : > { %31876 = vmatprep.mubr.msk.f32.mxu0 %vm369_vm1, %v26287_v12  ;;  %v39586_v12 = vld [vmem:[%s35745_s17 + $0xba0] sm:$0xff] }
 0xbc4   : > { %31877 = vmatmul.mubr.msk.f32.gmra.mrb[88].mxu0 %vm369_vm1, %v26288_v37  ;;  %v39589_v37 = vld [vmem:[%s35745_s17 + $0xba8] sm:$0xff] }
 0xbc5   : > { %31879 = vmatprep.mubr.msk.f32.mxu0 %vm369_vm1, %v26289_v42  ;;  %v39596_v42 = vld [vmem:[%s35745_s17 + $0xbb0] sm:$0xff] }
 0xbc8   : > { %31880 = vmatmul.mubr.msk.f32.gmra.mrb[90].mxu0 %vm369_vm1, %v26290_v4  ;;  %v39599_v4 = vld [vmem:[%s35745_s17 + $0xbb8] sm:$0xff] }
 0xbc9   : > { %31882 = vmatprep.mubr.msk.f32.mxu0 %vm369_vm1, %v39570_v55 }
 0xbcc   : > { %31883 = vmatmul.mubr.msk.f32.gmra.mrb[92].mxu0 %vm369_vm1, %v39576_v13 }
 0xbcd   : > { %31885 = vmatprep.mubr.msk.f32.mxu0 %vm369_vm1, %v39579_v10 }
 0xbd0   : > { %31886 = vmatmul.mubr.msk.f32.gmra.mrb[94].mxu0 %vm369_vm1, %v39586_v12 }
 0xbd1   : > { %31888 = vmatprep.mubr.msk.f32.mxu0 %vm369_vm1, %v39589_v37 }
 0xbd4   : > { %31889 = vmatmul.mubr.msk.f32.gmra.mrb[96].mxu0 %vm369_vm1, %v39596_v42 }
 0xbd5   : > { %31891 = vmatprep.mubr.msk.f32.mxu0 %vm369_vm1, %v39599_v4 }
 0xbd8   : > { %31892 = vmatmul.mubr.msk.f32.gmra.mrb[98].mxu0 %vm369_vm1, %v39606_v24 }
 0xbd9   : > { %31894 = vmatprep.mubr.msk.f32.mxu0 %vm369_vm1, %v39609_v62 }
 0xbdb   : > { %v13456_v38 = vpop.f32.mrb[66].mxu0 }
 0xbdc   : > { %31895 = vmatmul.mubr.msk.f32.gmra.mrb[100].mxu0 %vm369_vm1, %v39616_v8  ;;  %v31677_v14 = vpop.f32.mrb[67].mxu0 }
 0xbdd   : > { %31897 = vmatprep.mubr.msk.f32.mxu0 %vm369_vm1, %v39619_v34  ;;  %v39646_v14 = vld [vmem:[%s35745_s17 + $0xc08] sm:$0xff] }
 0xbe0   : > { %31898 = vmatmul.mubr.msk.f32.gmra.mrb[102].mxu0 %vm369_vm1, %v39626_v56 }
 0xbe1   : > { %31900 = vmatprep.mubr.msk.f32.mxu0 %vm369_vm1, %v39629_v26 }
 0xbe4   : > { %31901 = vmatmul.mubr.msk.f32.gmra.mrb[104].mxu0 %vm369_vm1, %v39636_v60 }
 0xbe5   : > { %31903 = vmatprep.mubr.msk.f32.mxu0 %vm369_vm1, %v39639_v58 }
 0xbe8   : > { %31904 = vmatmul.mubr.msk.f32.gmra.mrb[106].mxu0 %vm369_vm1, %v39646_v14 }
 0xbe9   : > { %31908 = vmatprep.mubr.msk.f32.mxu0 %vm369_vm1, %v26381_v31  ;;  %v35547_v31 = vld [vmem:[%s42060_s1 + $0x10] sm:$0x7] }
 0xbeb   : > { %v13529_v57 = vpop.f32.mrb[68].mxu0 }
 0xbec   : > { %v13530_v9 = vadd.f32 %v13529_v57, %v13456_v38  ;;  %v31696_v35 = vpop.f32.mrb[69].mxu0  ;;  %31909 = vmatmul.mubr.msk.f32.vlgmr.msra.gmra.mrb[84].mxu0 %vm369_vm1, %v26382_v1  ;;  %v26387_v57 = vld [vmem:[%s35745_s17 + $0xb72] sm:$0xff]  ;;  %v39671_v1 = vld [vmem:[%s35745_s17 + $0xb8a] sm:$0xff] }
 0xbed   : > { %31945 = vmatpush3.msk.msra.mxu0 %vm442_vm0, %v35546_v15  ;;  %31911 = vmatprep.mubr.msk.f32.mxu0 %vm369_vm1, %v26383_v53  ;;  %v26386_v35 = vld [vmem:[%s35745_s17 + $0xb6a] sm:$0xff]  ;;  %v26388_v53 = vld [vmem:[%s35745_s17 + $0xb7a] sm:$0xff] }
 0xbee   : > { %31982 = vmatprep.subr.msk.mxu0 %vm442_vm0, %v35547_v31 }
 0xbf0   : > { %31912 = vmatmul.mubr.msk.f32.gmra.mrb[86].mxu0 %vm369_vm1, %v26384_v51  ;;  %v39680_v51 = vld [vmem:[%s35745_s17 + $0xb9a] sm:$0xff] }
 0xbf1   : > { %31914 = vmatprep.mubr.msk.f32.mxu0 %vm369_vm1, %v26385_v43  ;;  %v39677_v43 = vld [vmem:[%s35745_s17 + $0xb92] sm:$0xff] }
 0xbf4   : > { %31915 = vmatmul.mubr.msk.f32.gmra.mrb[88].mxu0 %vm369_vm1, %v26386_v35 }
 0xbf5   : > { %31917 = vmatprep.mubr.msk.f32.mxu0 %vm369_vm1, %v26387_v57  ;;  %v39687_v57 = vld [vmem:[%s35745_s17 + $0xba2] sm:$0xff] }
 0xbf8   : > { %31918 = vmatmul.mubr.msk.f32.gmra.mrb[90].mxu0 %vm369_vm1, %v26388_v53  ;;  %v39690_v53 = vld [vmem:[%s35745_s17 + $0xbaa] sm:$0xff] }
 0xbf9   : > { %31920 = vmatprep.mubr.msk.f32.mxu0 %vm369_vm1, %v39671_v1 }
 0xbfb   : > { %v13602_v38 = vpop.f32.mrb[70].mxu0 }
 0xbfc   : > { %v13606_v15 = vadd.f32 %v13602_v38, %v13530_v9  ;;  %v31715_v35 = vpop.f32.mrb[71].mxu0  ;;  %31921 = vmatmul.mubr.msk.f32.gmra.mrb[92].mxu0 %vm369_vm1, %v39677_v43  ;;  %v39697_v9 = vld [vmem:[%s35745_s17 + $0xbb2] sm:$0xff]  ;;  %v39700_v38 = vld [vmem:[%s35745_s17 + $0xbba] sm:$0xff] }
 0xbfd   : > { %31923 = vmatprep.mubr.msk.f32.mxu0 %vm369_vm1, %v39680_v51  ;;  %v39707_v35 = vld [vmem:[%s35745_s17 + $0xbc2] sm:$0xff] }
 0xc00   : > { %31924 = vmatmul.mubr.msk.f32.gmra.mrb[94].mxu0 %vm369_vm1, %v39687_v57 }
 0xc01   : > { %31926 = vmatprep.mubr.msk.f32.mxu0 %vm369_vm1, %v39690_v53 }
 0xc04   : > { %31927 = vmatmul.mubr.msk.f32.gmra.mrb[96].mxu0 %vm369_vm1, %v39697_v9 }
 0xc05   : > { %31929 = vmatprep.mubr.msk.f32.mxu0 %vm369_vm1, %v39700_v38 }
 0xc08   : > { %31930 = vmatmul.mubr.msk.f32.gmra.mrb[98].mxu0 %vm369_vm1, %v39707_v35 }
 0xc09   : > { %31932 = vmatprep.mubr.msk.f32.mxu0 %vm369_vm1, %v39710_v20 }
 0xc0b   : > { %v13679_v16 = vpop.f32.mrb[72].mxu0 }
 0xc0c   : > { %v13683_v59 = vadd.f32 %v13679_v16, %v13606_v15  ;;  %v31734_v41 = vpop.f32.mrb[73].mxu0  ;;  %31933 = vmatmul.mubr.msk.f32.gmra.mrb[100].mxu0 %vm369_vm1, %v39717_v25  ;;  %v39740_v16 = vld [vmem:[%s35745_s17 + $0xc02] sm:$0xff] }
 0xc0d   : > { %31935 = vmatprep.mubr.msk.f32.mxu0 %vm369_vm1, %v39720_v30  ;;  %v39747_v41 = vld [vmem:[%s35745_s17 + $0xc0a] sm:$0xff] }
 0xc10   : > { %31936 = vmatmul.mubr.msk.f32.gmra.mrb[102].mxu0 %vm369_vm1, %v39727_v48 }
 0xc11   : > { %31938 = vmatprep.mubr.msk.f32.mxu0 %vm369_vm1, %v39730_v32 }
 0xc14   : > { %31939 = vmatmul.mubr.msk.f32.gmra.mrb[104].mxu0 %vm369_vm1, %v39737_v11 }
 0xc15   : > { %31941 = vmatprep.mubr.msk.f32.mxu0 %vm369_vm1, %v39740_v16 }
 0xc18   : > { %31942 = vmatmul.mubr.msk.f32.gmra.mrb[106].mxu0 %vm369_vm1, %v39747_v41 }
 0xc19   : > { %31946 = vmatprep.mubr.msk.f32.mxu0 %vm369_vm1, %v39570_v55 }
 0xc1b   : > { %v13753_v15 = vpop.f32.mrb[74].mxu0 }
 0xc1c   : > { %v13757_v40 = vadd.f32 %v13753_v15, %v13683_v59  ;;  %v31753_v2 = vpop.f32.mrb[75].mxu0  ;;  %31947 = vmatmul.mubr.msk.f32.vlgmr.msra.gmra.mrb[84].mxu0 %vm369_vm1, %v39576_v13  ;;  %v39797_v13 = vld [vmem:[%s35745_s17 + $0xc28] sm:$0xff] }
 0xc1d   : > { %31983 = vmatpush3.msk.msra.mxu0 %vm442_vm0, %v35547_v31  ;;  %31949 = vmatprep.mubr.msk.f32.mxu0 %vm369_vm1, %v39579_v10  ;;  %v39814_v31 = vld [vmem:[%s35745_s17 + $0xc40] sm:$0xff]  ;;  %v39817_v15 = vld [vmem:[%s35745_s17 + $0xc48] sm:$0xff] }
 0xc1e   : > { %32020 = vmatprep.subr.msk.mxu0 %vm442_vm0, %v35548_v27 }
 0xc20   : > { %31950 = vmatmul.mubr.msk.f32.gmra.mrb[86].mxu0 %vm369_vm1, %v39586_v12 }
 0xc21   : > { %31952 = vmatprep.mubr.msk.f32.mxu0 %vm369_vm1, %v39589_v37 }
 0xc24   : > { %31953 = vmatmul.mubr.msk.f32.gmra.mrb[88].mxu0 %vm369_vm1, %v39596_v42  ;;  %v39804_v42 = vld [vmem:[%s35745_s17 + $0xc30] sm:$0xff] }
 0xc25   : > { %31955 = vmatprep.mubr.msk.f32.mxu0 %vm369_vm1, %v39599_v4  ;;  %v39807_v4 = vld [vmem:[%s35745_s17 + $0xc38] sm:$0xff] }
 0xc28   : > { %31956 = vmatmul.mubr.msk.f32.gmra.mrb[90].mxu0 %vm369_vm1, %v39606_v24  ;;  %v39787_v24 = vld [vmem:[%s35745_s17 + $0xc18] sm:$0xff] }
 0xc29   : > { %31958 = vmatprep.mubr.msk.f32.mxu0 %vm369_vm1, %v39609_v62 }
 0xc2b   : > { %v13827_v2 = vpop.f32.mrb[76].mxu0 }
 0xc2c   : > { %v13831_v59 = vadd.f32 %v13827_v2, %v13757_v40  ;;  %v31772_v55 = vpop.f32.mrb[77].mxu0  ;;  %31959 = vmatmul.mubr.msk.f32.gmra.mrb[92].mxu0 %vm369_vm1, %v39616_v8  ;;  %v39794_v40 = vld [vmem:[%s35745_s17 + $0xc20] sm:$0xff]  ;;  %v39824_v2 = vld [vmem:[%s35745_s17 + $0xc50] sm:$0xff] }
 0xc2d   : > { %31961 = vmatprep.mubr.msk.f32.mxu0 %vm369_vm1, %v39619_v34 }
 0xc30   : > { %31962 = vmatmul.mubr.msk.f32.gmra.mrb[94].mxu0 %vm369_vm1, %v39626_v56 }
 0xc31   : > { %31964 = vmatprep.mubr.msk.f32.mxu0 %vm369_vm1, %v39629_v26 }
 0xc34   : > { %31965 = vmatmul.mubr.msk.f32.gmra.mrb[96].mxu0 %vm369_vm1, %v39636_v60 }
 0xc35   : > { %31967 = vmatprep.mubr.msk.f32.mxu0 %vm369_vm1, %v39639_v58 }
 0xc38   : > { %31968 = vmatmul.mubr.msk.f32.gmra.mrb[98].mxu0 %vm369_vm1, %v39646_v14 }
 0xc39   : > { %31970 = vmatprep.mubr.msk.f32.mxu0 %vm369_vm1, %v39787_v24 }
 0xc3b   : > { %v13904_v10 = vpop.f32.mrb[78].mxu0 }
 0xc3c   : > { %v13908_v12 = vadd.f32 %v13904_v10, %v13831_v59  ;;  %v31791_v37 = vpop.f32.mrb[79].mxu0  ;;  %31971 = vmatmul.mubr.msk.f32.gmra.mrb[100].mxu0 %vm369_vm1, %v39794_v40 }
 0xc3d   : > { %31973 = vmatprep.mubr.msk.f32.mxu0 %vm369_vm1, %v39797_v13  ;;  %v35549_v37 = vld [vmem:[%s42060_s1 + $0x18] sm:$0x7] }
 0xc40   : > { %31974 = vmatmul.mubr.msk.f32.gmra.mrb[102].mxu0 %vm369_vm1, %v39804_v42 }
 0xc41   : > { %31976 = vmatprep.mubr.msk.f32.mxu0 %vm369_vm1, %v39807_v4 }
 0xc44   : > { %31977 = vmatmul.mubr.msk.f32.gmra.mrb[104].mxu0 %vm369_vm1, %v39814_v31 }
 0xc45   : > { %31979 = vmatprep.mubr.msk.f32.mxu0 %vm369_vm1, %v39817_v15 }
 0xc48   : > { %31980 = vmatmul.mubr.msk.f32.gmra.mrb[106].mxu0 %vm369_vm1, %v39824_v2 }
 0xc49   : > { %31984 = vmatprep.mubr.msk.f32.mxu0 %vm369_vm1, %v39469_v19 }
 0xc4b   : > { %v13978_v59 = vpop.f32.mrb[80].mxu0 }
 0xc4c   : > { %v13982_v55 = vadd.f32 %v13978_v59, %v13908_v12  ;;  %v31810_v10 = vpop.f32.mrb[81].mxu0  ;;  %31985 = vmatmul.mubr.msk.f32.vlgmr.msra.gmra.mrb[84].mxu0 %vm369_vm1, %v39475_v46  ;;  %v39888_v12 = vld [vmem:[%s35745_s17 + $0xc31] sm:$0xff]  ;;  %v39891_v59 = vld [vmem:[%s35745_s17 + $0xc39] sm:$0xff] }
 0xc4d   : > { %32021 = vmatpush3.msk.msra.mxu0 %vm442_vm0, %v35548_v27  ;;  %31987 = vmatprep.mubr.msk.f32.mxu0 %vm369_vm1, %v39478_v54  ;;  %v35550_v54 = vld [vmem:[%s42063_s4] ss:$0 sm:$0xff]  ;;  %v39901_v10 = vld [vmem:[%s35745_s17 + $0xc49] sm:$0xff] }
 0xc4e   : > { %32058 = vmatprep.subr.msk.mxu0 %vm442_vm0, %v35549_v37 }
 0xc50   : > { %31988 = vmatmul.mubr.msk.f32.gmra.mrb[86].mxu0 %vm369_vm1, %v39485_v0 }
 0xc51   : > { %31990 = vmatprep.mubr.msk.f32.mxu0 %vm369_vm1, %v39488_v29  ;;  %v40451_v29 = vld [vmem:[%s35745_s17 + $0xe88] sm:$0xff] }
 0xc54   : > { %31991 = vmatmul.mubr.msk.f32.gmra.mrb[88].mxu0 %vm369_vm1, %v39495_v5  ;;  %v39871_v5 = vld [vmem:[%s35745_s17 + $0xc19] sm:$0xff] }
 0xc55   : > { %31993 = vmatprep.mubr.msk.f32.mxu0 %vm369_vm1, %v39498_v17  ;;  %v39878_v17 = vld [vmem:[%s35745_s17 + $0xc21] sm:$0xff] }
 0xc58   : > { %31994 = vmatmul.mubr.msk.f32.gmra.mrb[90].mxu0 %vm369_vm1, %v39505_v23  ;;  %v39881_v23 = vld [vmem:[%s35745_s17 + $0xc29] sm:$0xff] }
 0xc59   : > { %31996 = vmatprep.mubr.msk.f32.mxu0 %vm369_vm1, %v39508_v45 }
 0xc5b   : > { %v14052_v27 = vpop.f32.mrb[82].mxu0 }
 0xc5c   : > { %v14056_v19 = vadd.f32 %v14052_v27, %v13982_v55  ;;  %v31829_v46 = vpop.f32.mrb[83].mxu0  ;;  %31997 = vmatmul.mubr.msk.f32.gmra.mrb[92].mxu0 %vm369_vm1, %v39515_v50  ;;  %v39898_v55 = vld [vmem:[%s35745_s17 + $0xc41] sm:$0xff]  ;;  %v39908_v27 = vld [vmem:[%s35745_s17 + $0xc51] sm:$0xff] }
 0xc5d   : > { %31999 = vmatprep.mubr.msk.f32.mxu0 %vm369_vm1, %v39518_v63 }
 0xc5e   : > { %v39858_v0 = vadd.f32 %v35550_v54, %v14056_v19  ;;  %v35551_v19 = vld [vmem:[%s42060_s1 + $0x1c] sm:$0x7] }
 0xc60   : > { %32000 = vmatmul.mubr.msk.f32.gmra.mrb[94].mxu0 %vm369_vm1, %v39525_v44 }
 0xc61   : > { %32002 = vmatprep.mubr.msk.f32.mxu0 %vm369_vm1, %v39528_v52 }
 0xc64   : > { %32003 = vmatmul.mubr.msk.f32.gmra.mrb[96].mxu0 %vm369_vm1, %v39535_v3 }
 0xc65   : > { %32005 = vmatprep.mubr.msk.f32.mxu0 %vm369_vm1, %v39538_v7 }
 0xc68   : > { %32006 = vmatmul.mubr.msk.f32.gmra.mrb[98].mxu0 %vm369_vm1, %v39545_v28 }
 0xc69   : > { %32008 = vmatprep.mubr.msk.f32.mxu0 %vm369_vm1, %v39871_v5 }
 0xc6c   : > { %32009 = vmatmul.mubr.msk.f32.gmra.mrb[100].mxu0 %vm369_vm1, %v39878_v17 }
 0xc6d   : > { %32011 = vmatprep.mubr.msk.f32.mxu0 %vm369_vm1, %v39881_v23 }
 0xc70   : > { %32012 = vmatmul.mubr.msk.f32.gmra.mrb[102].mxu0 %vm369_vm1, %v39888_v12 }
 0xc71   : > { %32014 = vmatprep.mubr.msk.f32.mxu0 %vm369_vm1, %v39891_v59 }
 0xc74   : > { %32015 = vmatmul.mubr.msk.f32.gmra.mrb[104].mxu0 %vm369_vm1, %v39898_v55 }
 0xc75   : > { %32017 = vmatprep.mubr.msk.f32.mxu0 %vm369_vm1, %v39901_v10 }
 0xc78   : > { %32018 = vmatmul.mubr.msk.f32.gmra.mrb[106].mxu0 %vm369_vm1, %v39908_v27 }
 0xc79   : > { %32022 = vmatprep.mubr.msk.f32.mxu0 %vm369_vm1, %v39671_v1  ;;  %v39948_v1 = vld [vmem:[%s35745_s17 + $0xc1a] sm:$0xff] }
 0xc7c   : > { %32023 = vmatmul.mubr.msk.f32.vlgmr.msra.gmra.mrb[84].mxu0 %vm369_vm1, %v39677_v43  ;;  %v39955_v43 = vld [vmem:[%s35745_s17 + $0xc22] sm:$0xff] }
 0xc7d   : > { %32059 = vmatpush3.msk.msra.mxu0 %vm442_vm0, %v35549_v37  ;;  %32025 = vmatprep.mubr.msk.f32.mxu0 %vm369_vm1, %v39680_v51  ;;  %v39958_v51 = vld [vmem:[%s35745_s17 + $0xc2a] sm:$0xff]  ;;  %v35552_v37 = vld [vmem:[%s42060_s1 + $0x20] sm:$0x7] }
 0xc7e   : > { %32096 = vmatprep.subr.msk.mxu0 %vm442_vm0, %v35551_v19 }
 0xc80   : > { %32026 = vmatmul.mubr.msk.f32.gmra.mrb[86].mxu0 %vm369_vm1, %v39687_v57  ;;  %v39965_v57 = vld [vmem:[%s35745_s17 + $0xc32] sm:$0xff] }
 0xc81   : > { %32028 = vmatprep.mubr.msk.f32.mxu0 %vm369_vm1, %v39690_v53  ;;  %v39968_v53 = vld [vmem:[%s35745_s17 + $0xc3a] sm:$0xff] }
 0xc84   : > { %32029 = vmatmul.mubr.msk.f32.gmra.mrb[88].mxu0 %vm369_vm1, %v39697_v9  ;;  %v39975_v9 = vld [vmem:[%s35745_s17 + $0xc42] sm:$0xff] }
 0xc85   : > { %32031 = vmatprep.mubr.msk.f32.mxu0 %vm369_vm1, %v39700_v38  ;;  %v39978_v38 = vld [vmem:[%s35745_s17 + $0xc4a] sm:$0xff] }
 0xc88   : > { %32032 = vmatmul.mubr.msk.f32.gmra.mrb[90].mxu0 %vm369_vm1, %v39707_v35  ;;  %v39985_v35 = vld [vmem:[%s35745_s17 + $0xc52] sm:$0xff] }
 0xc89   : > { %32034 = vmatprep.mubr.msk.f32.mxu0 %vm369_vm1, %v39710_v20 }
 0xc8c   : > { %32035 = vmatmul.mubr.msk.f32.gmra.mrb[92].mxu0 %vm369_vm1, %v39717_v25 }
 0xc8d   : > { %32037 = vmatprep.mubr.msk.f32.mxu0 %vm369_vm1, %v39720_v30 }
 0xc90   : > { %32038 = vmatmul.mubr.msk.f32.gmra.mrb[94].mxu0 %vm369_vm1, %v39727_v48 }
 0xc91   : > { %32040 = vmatprep.mubr.msk.f32.mxu0 %vm369_vm1, %v39730_v32 }
 0xc94   : > { %32041 = vmatmul.mubr.msk.f32.gmra.mrb[96].mxu0 %vm369_vm1, %v39737_v11 }
 0xc95   : > { %32043 = vmatprep.mubr.msk.f32.mxu0 %vm369_vm1, %v39740_v16 }
 0xc98   : > { %32044 = vmatmul.mubr.msk.f32.gmra.mrb[98].mxu0 %vm369_vm1, %v39747_v41 }
 0xc99   : > { %32046 = vmatprep.mubr.msk.f32.mxu0 %vm369_vm1, %v39948_v1 }
 0xc9c   : > { %32047 = vmatmul.mubr.msk.f32.gmra.mrb[100].mxu0 %vm369_vm1, %v39955_v43 }
 0xc9d   : > { %32049 = vmatprep.mubr.msk.f32.mxu0 %vm369_vm1, %v39958_v51 }
 0xca0   : > { %32050 = vmatmul.mubr.msk.f32.gmra.mrb[102].mxu0 %vm369_vm1, %v39965_v57 }
 0xca1   : > { %32052 = vmatprep.mubr.msk.f32.mxu0 %vm369_vm1, %v39968_v53 }
 0xca4   : > { %32053 = vmatmul.mubr.msk.f32.gmra.mrb[104].mxu0 %vm369_vm1, %v39975_v9 }
 0xca5   : > { %32055 = vmatprep.mubr.msk.f32.mxu0 %vm369_vm1, %v39978_v38 }
 0xca8   : > { %32056 = vmatmul.mubr.msk.f32.gmra.mrb[106].mxu0 %vm369_vm1, %v39985_v35 }
 0xca9   : > { %32060 = vmatprep.mubr.msk.f32.mxu0 %vm369_vm1, %v39609_v62  ;;  %v26599_v62 = vld [vmem:[%s35745_s17 + $0xc90] sm:$0xff] }
 0xcac   : > { %32061 = vmatmul.mubr.msk.f32.vlgmr.msra.gmra.mrb[84].mxu0 %vm369_vm1, %v39616_v8  ;;  %v26598_v8 = vld [vmem:[%s35745_s17 + $0xc88] sm:$0xff] }
 0xcad   : > { %32097 = vmatpush3.msk.msra.mxu0 %vm442_vm0, %v35551_v19  ;;  %32063 = vmatprep.mubr.msk.f32.mxu0 %vm369_vm1, %v39619_v34  ;;  %v26597_v34 = vld [vmem:[%s35745_s17 + $0xc80] sm:$0xff] }
 0xcae   : > { %32134 = vmatprep.subr.msk.mxu0 %vm442_vm0, %v35552_v37 }
 0xcb0   : > { %32064 = vmatmul.mubr.msk.f32.gmra.mrb[86].mxu0 %vm369_vm1, %v39626_v56  ;;  %v26596_v56 = vld [vmem:[%s35745_s17 + $0xc78] sm:$0xff] }
 0xcb1   : > { %32066 = vmatprep.mubr.msk.f32.mxu0 %vm369_vm1, %v39629_v26  ;;  %v26595_v26 = vld [vmem:[%s35745_s17 + $0xc70] sm:$0xff] }
 0xcb4   : > { %32067 = vmatmul.mubr.msk.f32.gmra.mrb[88].mxu0 %vm369_vm1, %v39636_v60  ;;  %v26594_v60 = vld [vmem:[%s35745_s17 + $0xc68] sm:$0xff] }
 0xcb5   : > { %32069 = vmatprep.mubr.msk.f32.mxu0 %vm369_vm1, %v39639_v58  ;;  %v26593_v58 = vld [vmem:[%s35745_s17 + $0xc60] sm:$0xff] }
 0xcb8   : > { %32070 = vmatmul.mubr.msk.f32.gmra.mrb[90].mxu0 %vm369_vm1, %v39646_v14  ;;  %v26600_v14 = vld [vmem:[%s35745_s17 + $0xc98] sm:$0xff] }
 0xcb9   : > { %32072 = vmatprep.mubr.msk.f32.mxu0 %vm369_vm1, %v39787_v24 }
 0xcbc   : > { %32073 = vmatmul.mubr.msk.f32.gmra.mrb[92].mxu0 %vm369_vm1, %v39794_v40  ;;  %v40153_v40 = vld [vmem:[%s42061_s2] ss:$0 sm:$0xff] }
 0xcbd   : > { %32075 = vmatprep.mubr.msk.f32.mxu0 %vm369_vm1, %v39797_v13 }
 0xcc0   : > { %32076 = vmatmul.mubr.msk.f32.gmra.mrb[94].mxu0 %vm369_vm1, %v39804_v42 }
 0xcc1   : > { %32078 = vmatprep.mubr.msk.f32.mxu0 %vm369_vm1, %v39807_v4 }
 0xcc4   : > { %32079 = vmatmul.mubr.msk.f32.gmra.mrb[96].mxu0 %vm369_vm1, %v39814_v31 }
 0xcc5   : > { %32081 = vmatprep.mubr.msk.f32.mxu0 %vm369_vm1, %v39817_v15 }
 0xcc8   : > { %32082 = vmatmul.mubr.msk.f32.gmra.mrb[98].mxu0 %vm369_vm1, %v39824_v2 }
 0xcc9   : > { %32084 = vmatprep.mubr.msk.f32.mxu0 %vm369_vm1, %v26593_v58 }
 0xccc   : > { %32085 = vmatmul.mubr.msk.f32.gmra.mrb[100].mxu0 %vm369_vm1, %v26594_v60 }
 0xccd   : > { %32087 = vmatprep.mubr.msk.f32.mxu0 %vm369_vm1, %v26595_v26 }
 0xcd0   : > { %32088 = vmatmul.mubr.msk.f32.gmra.mrb[102].mxu0 %vm369_vm1, %v26596_v56 }
 0xcd1   : > { %32090 = vmatprep.mubr.msk.f32.mxu0 %vm369_vm1, %v26597_v34 }
 0xcd4   : > { %32091 = vmatmul.mubr.msk.f32.gmra.mrb[104].mxu0 %vm369_vm1, %v26598_v8 }
 0xcd5   : > { %32093 = vmatprep.mubr.msk.f32.mxu0 %vm369_vm1, %v26599_v62 }
 0xcd8   : > { %32094 = vmatmul.mubr.msk.f32.gmra.mrb[106].mxu0 %vm369_vm1, %v26600_v14 }
 0xcd9   : > { %32098 = vmatprep.mubr.msk.f32.mxu0 %vm369_vm1, %v39508_v45  ;;  %v26642_v45 = vld [vmem:[%s35745_s17 + $0xc61] sm:$0xff] }
 0xcdc   : > { %32099 = vmatmul.mubr.msk.f32.vlgmr.msra.gmra.mrb[84].mxu0 %vm369_vm1, %v39515_v50  ;;  %v26643_v50 = vld [vmem:[%s35745_s17 + $0xc69] sm:$0xff] }
 0xcdd   : > { %32135 = vmatpush3.msk.msra.mxu0 %vm442_vm0, %v35552_v37  ;;  %32101 = vmatprep.mubr.msk.f32.mxu0 %vm369_vm1, %v39518_v63  ;;  %v26644_v63 = vld [vmem:[%s35745_s17 + $0xc71] sm:$0xff] }
 0xcde   : > { %33909 = vmatprep.subr.bf16.mxu0 %v42178_v22 }
 0xce0   : > { %32102 = vmatmul.mubr.msk.f32.gmra.mrb[86].mxu0 %vm369_vm1, %v39525_v44  ;;  %v26645_v44 = vld [vmem:[%s35745_s17 + $0xc79] sm:$0xff] }
 0xce1   : > { %32104 = vmatprep.mubr.msk.f32.mxu0 %vm369_vm1, %v39528_v52  ;;  %v26646_v52 = vld [vmem:[%s35745_s17 + $0xc81] sm:$0xff] }
 0xce4   : > { %32105 = vmatmul.mubr.msk.f32.gmra.mrb[88].mxu0 %vm369_vm1, %v39535_v3  ;;  %v26647_v3 = vld [vmem:[%s35745_s17 + $0xc89] sm:$0xff] }
 0xce5   : > { %32107 = vmatprep.mubr.msk.f32.mxu0 %vm369_vm1, %v39538_v7  ;;  %v26648_v7 = vld [vmem:[%s35745_s17 + $0xc91] sm:$0xff] }
 0xce8   : > { %32108 = vmatmul.mubr.msk.f32.gmra.mrb[90].mxu0 %vm369_vm1, %v39545_v28  ;;  %v26649_v28 = vld [vmem:[%s35745_s17 + $0xc99] sm:$0xff] }
 0xce9   : > { %32110 = vmatprep.mubr.msk.f32.mxu0 %vm369_vm1, %v39871_v5 }
 0xcec   : > { %32111 = vmatmul.mubr.msk.f32.gmra.mrb[92].mxu0 %vm369_vm1, %v39878_v17 }
 0xced   : > { %32113 = vmatprep.mubr.msk.f32.mxu0 %vm369_vm1, %v39881_v23 }
 0xcf0   : > { %32114 = vmatmul.mubr.msk.f32.gmra.mrb[94].mxu0 %vm369_vm1, %v39888_v12 }
 0xcf1   : > { %32116 = vmatprep.mubr.msk.f32.mxu0 %vm369_vm1, %v39891_v59 }
 0xcf4   : > { %32117 = vmatmul.mubr.msk.f32.gmra.mrb[96].mxu0 %vm369_vm1, %v39898_v55 }
 0xcf5   : > { %32119 = vmatprep.mubr.msk.f32.mxu0 %vm369_vm1, %v39901_v10 }
 0xcf8   : > { %32120 = vmatmul.mubr.msk.f32.gmra.mrb[98].mxu0 %vm369_vm1, %v39908_v27 }
 0xcf9   : > { %32122 = vmatprep.mubr.msk.f32.mxu0 %vm369_vm1, %v26642_v45 }
 0xcfc   : > { %32123 = vmatmul.mubr.msk.f32.gmra.mrb[100].mxu0 %vm369_vm1, %v26643_v50 }
 0xcfd   : > { %32125 = vmatprep.mubr.msk.f32.mxu0 %vm369_vm1, %v26644_v63 }
 0xd00   : > { %32126 = vmatmul.mubr.msk.f32.gmra.mrb[102].mxu0 %vm369_vm1, %v26645_v44 }
 0xd01   : > { %32128 = vmatprep.mubr.msk.f32.mxu0 %vm369_vm1, %v26646_v52 }
 0xd04   : > { %32129 = vmatmul.mubr.msk.f32.gmra.mrb[104].mxu0 %vm369_vm1, %v26647_v3 }
 0xd05   : > { %32131 = vmatprep.mubr.msk.f32.mxu0 %vm369_vm1, %v26648_v7 }
 0xd08   : > { %32132 = vmatmul.mubr.msk.f32.gmra.mrb[106].mxu0 %vm369_vm1, %v26649_v28 }
 0xd09   : > { %32136 = vmatprep.mubr.msk.f32.mxu0 %vm369_vm1, %v39710_v20  ;;  %v26696_v20 = vld [vmem:[%s35745_s17 + $0xc8a] sm:$0xff] }
 0xd0c   : > { %32137 = vmatmul.mubr.msk.f32.vlgmr.msra.gmra.mrb[84].mxu0 %vm369_vm1, %v39717_v25  ;;  %v26695_v25 = vld [vmem:[%s35745_s17 + $0xc82] sm:$0xff] }
 0xd0d   : > { %32139 = vmatprep.mubr.msk.f32.mxu0 %vm369_vm1, %v39720_v30  ;;  %33911 = vmatpush3.bf16.msra.mxu0 %v36328_v49  ;;  %v26694_v30 = vld [vmem:[%s35745_s17 + $0xc7a] sm:$0xff] }
 0xd0e   : > { %33912 = vmatprep.subr.bf16.mxu0 %v42178_v22 }
 0xd10   : > { %32140 = vmatmul.mubr.msk.f32.gmra.mrb[86].mxu0 %vm369_vm1, %v39727_v48  ;;  %v26693_v48 = vld [vmem:[%s35745_s17 + $0xc72] sm:$0xff] }
 0xd11   : > { %32142 = vmatprep.mubr.msk.f32.mxu0 %vm369_vm1, %v39730_v32  ;;  %33914 = vmatpush3.bf16.msra.mxu0 %v36402_v18  ;;  %v26692_v32 = vld [vmem:[%s35745_s17 + $0xc6a] sm:$0xff] }
 0xd12   : > { %33915 = vmatprep.subr.bf16.mxu0 %v42178_v22 }
 0xd14   : > { %32143 = vmatmul.mubr.msk.f32.gmra.mrb[88].mxu0 %vm369_vm1, %v39737_v11  ;;  %v26691_v11 = vld [vmem:[%s35745_s17 + $0xc62] sm:$0xff] }
 0xd15   : > { %32145 = vmatprep.mubr.msk.f32.mxu0 %vm369_vm1, %v39740_v16  ;;  %33917 = vmatpush3.bf16.msra.mxu0 %v36430_v39  ;;  %v26697_v16 = vld [vmem:[%s35745_s17 + $0xc92] sm:$0xff]  ;;  %v40737_v39 = vld [vmem:[%s35745_s17 + $0xee9] sm:$0xff] }
 0xd16   : > { %33918 = vmatprep.subr.bf16.mxu0 %v42178_v22 }
 0xd18   : > { %32146 = vmatmul.mubr.msk.f32.gmra.mrb[90].mxu0 %vm369_vm1, %v39747_v41  ;;  %v26698_v41 = vld [vmem:[%s35745_s17 + $0xc9a] sm:$0xff] }
 0xd19   : > { %32148 = vmatprep.mubr.msk.f32.mxu0 %vm369_vm1, %v39948_v1  ;;  %33920 = vmatpush3.bf16.msra.mxu0 %v36454_v61 }
 0xd1a   : > { %33921 = vmatprep.subr.bf16.mxu0 %v42178_v22 }
 0xd1c   : > { %32149 = vmatmul.mubr.msk.f32.gmra.mrb[92].mxu0 %vm369_vm1, %v39955_v43 }
 0xd1d   : > { %32151 = vmatprep.mubr.msk.f32.mxu0 %vm369_vm1, %v39958_v51 }
 0xd20   : > { %32152 = vmatmul.mubr.msk.f32.gmra.mrb[94].mxu0 %vm369_vm1, %v39965_v57 }
 0xd21   : > { %32154 = vmatprep.mubr.msk.f32.mxu0 %vm369_vm1, %v39968_v53 }
 0xd24   : > { %32155 = vmatmul.mubr.msk.f32.gmra.mrb[96].mxu0 %vm369_vm1, %v39975_v9 }
 0xd25   : > { %32157 = vmatprep.mubr.msk.f32.mxu0 %vm369_vm1, %v39978_v38 }
 0xd28   : > { %32158 = vmatmul.mubr.msk.f32.gmra.mrb[98].mxu0 %vm369_vm1, %v39985_v35 }
 0xd29   : > { %32160 = vmatprep.mubr.msk.f32.mxu0 %vm369_vm1, %v26691_v11 }
 0xd2c   : > { %32161 = vmatmul.mubr.msk.f32.gmra.mrb[100].mxu0 %vm369_vm1, %v26692_v32 }
 0xd2d   : > { %32163 = vmatprep.mubr.msk.f32.mxu0 %vm369_vm1, %v26693_v48 }
 0xd30   : > { %32164 = vmatmul.mubr.msk.f32.gmra.mrb[102].mxu0 %vm369_vm1, %v26694_v30 }
 0xd31   : > { %32166 = vmatprep.mubr.msk.f32.mxu0 %vm369_vm1, %v26695_v25 }
 0xd34   : > { %32167 = vmatmul.mubr.msk.f32.gmra.mrb[104].mxu0 %vm369_vm1, %v26696_v20 }
 0xd35   : > { %32169 = vmatprep.mubr.msk.f32.mxu0 %vm369_vm1, %v26697_v16  ;;  %v42267_v16 = vld [vmem:[#allocation12_spill] sm:$0xff] }
 0xd38   : > { %32170 = vmatmul.mubr.msk.f32.gmra.mrb[106].mxu0 %vm369_vm1, %v26698_v41 }
 0xd39   : > { %32701 = vmatprep.mubr.msk.f32.mxu0 %vm35641_vm2, %v42179_v6 }
 0xddf   : > { %v32138_v24 = vpop.f32.mrb[84].mxu0 }
 0xde0   : > { %v16759_v13 = vadd.f32 %v40153_v40, %v32138_v24  ;;  %v16615_v42 = vpop.f32.mrb[85].mxu0  ;;  %v42268_v24 = vld [vmem:[#allocation13_spill] sm:$0xff] }
 0xde1   : > { %v16758_v4 = vadd.f32 %v40153_v40, %v16615_v42  ;;  %v42271_v42 = vld [vmem:[#allocation16_spill] sm:$0xff] }
 0xde2   : > { %16783 = vst.msk [vmem:[#allocation2 + $0x8] sm:$0xff] %vm3079_vm3, %v16759_v13  ;;  %v42270_v13 = vld [vmem:[#allocation15_spill] sm:$0xff] }
 0xde3   : > { %16782 = vst.msk [vmem:[#allocation2] sm:$0xff] %vm3079_vm3, %v16758_v4  ;;  %v32141_v31 = vpop.f32.mrb[86].mxu0 }
 0xde4   : > { %v16761_v15 = vadd.f32 %v40153_v40, %v32141_v31  ;;  %v16625_v2 = vpop.f32.mrb[87].mxu0  ;;  %v42272_v31 = vld [vmem:[#allocation17_spill] sm:$0xff] }
 0xde5   : > { %v16760_v46 = vadd.f32 %v40153_v40, %v16625_v2  ;;  %v42274_v2 = vld [vmem:[#allocation19_spill] sm:$0xff] }
 0xde6   : > { %16785 = vst.msk [vmem:[#allocation2 + $0x18] sm:$0xff] %vm3079_vm3, %v16761_v15  ;;  %v42273_v15 = vld [vmem:[#allocation18_spill] sm:$0xff] }
 0xde7   : > { %16784 = vst.msk [vmem:[#allocation2 + $0x10] sm:$0xff] %vm3079_vm3, %v16760_v46  ;;  %v32144_v54 = vpop.f32.mrb[88].mxu0  ;;  %v42275_v46 = vld [vmem:[#allocation20_spill] sm:$0xff] }
 0xde8   : > { %v16763_v5 = vadd.f32 %v40153_v40, %v32144_v54  ;;  %v16635_v17 = vpop.f32.mrb[89].mxu0 }
 0xde9   : > { %v16762_v23 = vadd.f32 %v40153_v40, %v16635_v17  ;;  %v42277_v17 = vld [vmem:[#allocation22_spill] sm:$0xff] }
 0xdea   : > { %16787 = vst.msk [vmem:[#allocation2 + $0x28] sm:$0xff] %vm3079_vm3, %v16763_v5  ;;  %v42276_v5 = vld [vmem:[#allocation21_spill] sm:$0xff] }
 0xdeb   : > { %16786 = vst.msk [vmem:[#allocation2 + $0x20] sm:$0xff] %vm3079_vm3, %v16762_v23  ;;  %v32147_v12 = vpop.f32.mrb[90].mxu0  ;;  %v42278_v23 = vld [vmem:[#allocation23_spill] sm:$0xff] }
 0xdec   : > { %v16765_v59 = vadd.f32 %v40153_v40, %v32147_v12  ;;  %v16645_v55 = vpop.f32.mrb[91].mxu0  ;;  %v42279_v12 = vld [vmem:[#allocation24_spill] sm:$0xff] }
 0xded   : > { %v16764_v10 = vadd.f32 %v40153_v40, %v16645_v55  ;;  %v42280_v55 = vld [vmem:[#allocation25_spill] sm:$0xff] }
 0xdee   : > { %16789 = vst.msk [vmem:[#allocation2 + $0x38] sm:$0xff] %vm3079_vm3, %v16765_v59 }
 0xdef   : > { %16788 = vst.msk [vmem:[#allocation2 + $0x30] sm:$0xff] %vm3079_vm3, %v16764_v10  ;;  %v32150_v27 = vpop.f32.mrb[92].mxu0  ;;  %v42281_v10 = vld [vmem:[#allocation26_spill] sm:$0xff] }
 0xdf0   : > { %v16767_v19 = vadd.f32 %v40153_v40, %v32150_v27  ;;  %v16655_v1 = vpop.f32.mrb[93].mxu0  ;;  %v42282_v27 = vld [vmem:[#allocation27_spill] sm:$0xff] }
 0xdf1   : > { %v16766_v43 = vadd.f32 %v40153_v40, %v16655_v1 }
 0xdf2   : > { %16791 = vst.msk [vmem:[#allocation2 + $0x48] sm:$0xff] %vm3079_vm3, %v16767_v19  ;;  %v42283_v19 = vld [vmem:[#allocation28_spill] sm:$0xff] }
 0xdf3   : > { %16790 = vst.msk [vmem:[#allocation2 + $0x40] sm:$0xff] %vm3079_vm3, %v16766_v43  ;;  %v32153_v51 = vpop.f32.mrb[94].mxu0  ;;  %v42284_v43 = vld [vmem:[#allocation29_spill] sm:$0xff] }
 0xdf4   : > { %v16769_v57 = vadd.f32 %v40153_v40, %v32153_v51  ;;  %v16665_v53 = vpop.f32.mrb[95].mxu0  ;;  %v42285_v51 = vld [vmem:[#allocation30_spill] sm:$0xff] }
 0xdf5   : > { %v16768_v9 = vadd.f32 %v40153_v40, %v16665_v53  ;;  %v42287_v53 = vld [vmem:[#allocation32_spill] sm:$0xff] }
 0xdf6   : > { %16793 = vst.msk [vmem:[#allocation2 + $0x58] sm:$0xff] %vm3079_vm3, %v16769_v57  ;;  %v16806_v41 = vld [vmem:[#allocation2] ss:$10 sm:$0x7f] }
 0xdf7   : > { %16792 = vst.msk [vmem:[#allocation2 + $0x50] sm:$0xff] %vm3079_vm3, %v16768_v9  ;;  %v32156_v38 = vpop.f32.mrb[96].mxu0  ;;  %v17029_v54 = vld [vmem:[#allocation2 + $0x1] ss:$10 sm:$0x7f] }
 0xdf8   : > { %v16771_v35 = vadd.f32 %v40153_v40, %v32156_v38  ;;  %v16675_v37 = vpop.f32.mrb[97].mxu0  ;;  %v42286_v57 = vld [vmem:[#allocation31_spill] sm:$0xff]  ;;  %v42288_v38 = vld [vmem:[#allocation33_spill] sm:$0xff] }
 0xdf9   : > { %v16770_v58 = vadd.f32 %v40153_v40, %v16675_v37  ;;  %v17254_v9 = vld [vmem:[#allocation2 + $0x2] ss:$10 sm:$0x7f] }
 0xdfa   : > { %16795 = vst.msk [vmem:[#allocation2 + $0x68] sm:$0xff] %vm3079_vm3, %v16771_v35  ;;  %v42289_v35 = vld [vmem:[#allocation34_spill] sm:$0xff]  ;;  %v42290_v37 = vld [vmem:[#allocation35_spill] sm:$0xff] }
 0xdfb   : > { %16794 = vst.msk [vmem:[#allocation2 + $0x60] sm:$0xff] %vm3079_vm3, %v16770_v58  ;;  %v32159_v60 = vpop.f32.mrb[98].mxu0  ;;  %v42291_v58 = vld [vmem:[#allocation36_spill] sm:$0xff] }
 0xdfc   : > { %v16773_v26 = vadd.f32 %v40153_v40, %v32159_v60  ;;  %v16685_v56 = vpop.f32.mrb[99].mxu0 }
 0xdfd   : > { %v16772_v34 = vadd.f32 %v40153_v40, %v16685_v56  ;;  %v42293_v56 = vld [vmem:[#allocation38_spill] sm:$0xff] }
 0xdfe   : > { %16797 = vst.msk [vmem:[#allocation2 + $0x78] sm:$0xff] %vm3079_vm3, %v16773_v26  ;;  %v42292_v26 = vld [vmem:[#allocation37_spill] sm:$0xff] }
 0xdff   : > { %16796 = vst.msk [vmem:[#allocation2 + $0x70] sm:$0xff] %vm3079_vm3, %v16772_v34  ;;  %v32162_v8 = vpop.f32.mrb[100].mxu0  ;;  %v42294_v34 = vld [vmem:[#allocation39_spill] sm:$0xff] }
 0xe00   : > { %v16775_v62 = vadd.f32 %v40153_v40, %v32162_v8  ;;  %v16695_v14 = vpop.f32.mrb[101].mxu0  ;;  %v42295_v8 = vld [vmem:[#allocation40_spill] sm:$0xff] }
 0xe01   : > { %v16774_v45 = vadd.f32 %v40153_v40, %v16695_v14  ;;  %v26757_v14 = vld [vmem:[%s35745_s17 + $0xe11] sm:$0xff] }
 0xe02   : > { %16799 = vst.msk [vmem:[#allocation2 + $0x88] sm:$0xff] %vm3079_vm3, %v16775_v62  ;;  %v35554_v62 = vld [vmem:[%s42060_s1 + $0x4] sm:$0x7] }
 0xe03   : > { %16798 = vst.msk [vmem:[#allocation2 + $0x80] sm:$0xff] %vm3079_vm3, %v16774_v45  ;;  %v32165_v50 = vpop.f32.mrb[102].mxu0 }
 0xe04   : > { %v16777_v63 = vadd.f32 %v40153_v40, %v32165_v50  ;;  %v16705_v44 = vpop.f32.mrb[103].mxu0  ;;  %v26758_v50 = vld [vmem:[%s35745_s17 + $0xe19] sm:$0xff] }
 0xe05   : > { %v16776_v52 = vadd.f32 %v40153_v40, %v16705_v44  ;;  %v26759_v44 = vld [vmem:[%s35745_s17 + $0xe21] sm:$0xff] }
 0xe06   : > { %16801 = vst.msk [vmem:[#allocation2 + $0x98] sm:$0xff] %vm3079_vm3, %v16777_v63  ;;  %v16807_v3 = vld [vmem:[#allocation2 + $0x40] ss:$10 sm:$0x7f] }
 0xe07   : > { %16800 = vst.msk [vmem:[#allocation2 + $0x90] sm:$0xff] %vm3079_vm3, %v16776_v52  ;;  %v32168_v7 = vpop.f32.mrb[104].mxu0  ;;  %32189 = vmatmul.mubr.msk.f32.vlgmr.msra.gmra.mrb[108].mxu1 %vm3079_vm3, %v16807_v3  ;;  %v17030_v59 = vld [vmem:[#allocation2 + $0x41] ss:$10 sm:$0x7f] }
 0xe08   : > { %v16779_v28 = vadd.f32 %v40153_v40, %v32168_v7  ;;  %33815 = vmatpush3.bf16.msra.mxu1 %v36528_v36  ;;  %v16715_v11 = vpop.f32.mrb[105].mxu0  ;;  %32207 = vmatprep.mubr.msk.f32.mxu1 %vm35641_vm2, %v42179_v6  ;;  %v17255_v60 = vld [vmem:[#allocation2 + $0x42] ss:$10 sm:$0x7f] }
 0xe09   : > { %v16778_v32 = vadd.f32 %v40153_v40, %v16715_v11  ;;  %33816 = vmatprep.subr.bf16.mxu1 %v42178_v22  ;;  %v35555_v63 = vld [vmem:[%s42060_s1] sm:$0x7]  ;;  %v26760_v52 = vld [vmem:[%s35745_s17 + $0xe29] sm:$0xff]  ;;  %v26761_v3 = vld [vmem:[%s35745_s17 + $0xe31] sm:$0xff] }
 0xe0a   : > { %16803 = vst.msk [vmem:[#allocation2 + $0xa8] sm:$0xff] %vm3079_vm3, %v16779_v28  ;;  %v35556_v7 = vld [vmem:[%s42060_s1 + $0x8] sm:$0x7]  ;;  %v26762_v28 = vld [vmem:[%s35745_s17 + $0xe39] sm:$0xff] }
 0xe0b   : > { %16802 = vst.msk [vmem:[#allocation2 + $0xa0] sm:$0xff] %vm3079_vm3, %v16778_v32  ;;  %v32171_v48 = vpop.f32.mrb[106].mxu0  ;;  %v26763_v11 = vld [vmem:[%s35745_s17 + $0xe41] sm:$0xff]  ;;  %v26764_v32 = vld [vmem:[%s35745_s17 + $0xe49] sm:$0xff] }
 0xe0c   : > { %v16781_v30 = vadd.f32 %v40153_v40, %v32171_v48  ;;  %33818 = vmatpush3.bf16.msra.mxu1 %v36544_v47  ;;  %v16725_v25 = vpop.f32.mrb[107].mxu0  ;;  %v40321_v48 = vld [vmem:[%s35745_s17 + $0xe59] sm:$0xff] }
 0xe0d   : > { %v16780_v20 = vadd.f32 %v40153_v40, %v16725_v25  ;;  %33819 = vmatprep.subr.bf16.mxu1 %v42178_v22  ;;  %v42269_v40 = vld [vmem:[#allocation14_spill] sm:$0xff] }
 0xe0e   : > { %16805 = vst.msk [vmem:[#allocation2 + $0xb8] sm:$0xff] %vm3079_vm3, %v16781_v30  ;;  %v40327_v30 = vld [vmem:[%s35745_s17 + $0xe61] sm:$0xff]  ;;  %v40330_v25 = vld [vmem:[%s35745_s17 + $0xe69] sm:$0xff] }
 0xe0f   : > { %16804 = vst.msk [vmem:[#allocation2 + $0xb0] sm:$0xff] %vm3079_vm3, %v16780_v20  ;;  %v40337_v20 = vld [vmem:[%s35745_s17 + $0xe71] sm:$0xff] }
 0xe10   : > { %33821 = vmatpush3.bf16.msra.mxu1 %v42237_v21  ;;  %v35559_v21 = vld [vmem:[%s42060_s1 + $0x14] sm:$0x7] }
 0xe11   : > { %33822 = vmatprep.subr.bf16.mxu1 %v42178_v22 }
 0xe14   : > { %33824 = vmatpush3.bf16.msra.mxu1 %v42267_v16 }
 0xe15   : > { %33825 = vmatprep.subr.bf16.mxu1 %v42178_v22 }
 0xe16   : > { %v16808_v4 = vld [vmem:[#allocation2 + $0x80] ss:$10 sm:$0x7f]  ;;  %v17031_v1 = vld [vmem:[#allocation2 + $0x81] ss:$10 sm:$0x7f] }
 0xe17   : > { %32208 = vmatmul.mubr.msk.f32.vlgmr.msra.gmra.mrb[110].mxu1 %vm3079_vm3, %v16806_v41  ;;  %v17256_v45 = vld [vmem:[#allocation2 + $0x82] ss:$10 sm:$0x7f] }
 0xe18   : > { %33827 = vmatpush3.bf16.msra.mxu1 %v42268_v24  ;;  %32226 = vmatprep.mubr.msk.f32.mxu1 %vm35641_vm2, %v42179_v6  ;;  %v40340_v41 = vld [vmem:[%s35745_s17 + $0xe79] sm:$0xff] }
 0xe19   : > { %33828 = vmatprep.subr.bf16.mxu1 %v42178_v22 }
 0xe1c   : > { %33830 = vmatpush3.bf16.msra.mxu1 %v42269_v40  ;;  %v40589_v40 = vld [vmem:[%s35745_s17 + $0xeca] sm:$0xff] }
 0xe1d   : > { %33831 = vmatprep.subr.bf16.mxu1 %v42178_v22 }
 0xe20   : > { %33833 = vmatpush3.bf16.msra.mxu1 %v42270_v13  ;;  %v40582_v13 = vld [vmem:[%s35745_s17 + $0xec2] sm:$0xff] }
 0xe21   : > { %33834 = vmatprep.subr.bf16.mxu1 %v42178_v22 }
 0xe24   : > { %33836 = vmatpush3.bf16.msra.mxu1 %v42271_v42  ;;  %v40579_v42 = vld [vmem:[%s35745_s17 + $0xeba] sm:$0xff] }
 0xe25   : > { %33837 = vmatprep.subr.bf16.mxu1 %v42178_v22 }
 0xe27   : > { %32227 = vmatmul.mubr.msk.f32.vlgmr.msra.gmra.mrb[112].mxu1 %vm3079_vm3, %v16808_v4  ;;  %v40347_v4 = vld [vmem:[%s35745_s17 + $0xe81] sm:$0xff] }
 0xe28   : > { %33839 = vmatpush3.bf16.msra.mxu1 %v42272_v31  ;;  %32245 = vmatprep.mubr.msk.f32.mxu1 %vm35641_vm2, %v42179_v6 }
 0xe29   : > { %33840 = vmatprep.subr.bf16.mxu1 %v42178_v22 }
 0xe2c   : > { %33842 = vmatpush3.bf16.msra.mxu1 %v42273_v15 }
 0xe2d   : > { %33843 = vmatprep.subr.bf16.mxu1 %v42178_v22 }
 0xe30   : > { %33845 = vmatpush3.bf16.msra.mxu1 %v42274_v2 }
 0xe31   : > { %33846 = vmatprep.subr.bf16.mxu1 %v42178_v22 }
 0xe34   : > { %33848 = vmatpush3.bf16.msra.mxu1 %v42275_v46  ;;  %v40572_v46 = vld [vmem:[%s35745_s17 + $0xeb2] sm:$0xff] }
 0xe35   : > { %33849 = vmatprep.subr.bf16.mxu1 %v42178_v22 }
 0xe37   : > { %32246 = vmatmul.mubr.msk.f32.vlgmr.msra.gmra.mrb[114].mxu1 %vm3079_vm3, %v17029_v54  ;;  %v40350_v54 = vld [vmem:[%s35745_s17 + $0xe89] sm:$0xff] }
 0xe38   : > { %33851 = vmatpush3.bf16.msra.mxu1 %v42276_v5  ;;  %32264 = vmatprep.mubr.msk.f32.mxu1 %vm35641_vm2, %v42179_v6  ;;  %v40569_v5 = vld [vmem:[%s35745_s17 + $0xeaa] sm:$0xff] }
 0xe39   : > { %33852 = vmatprep.subr.bf16.mxu1 %v42178_v22 }
 0xe3c   : > { %33854 = vmatpush3.bf16.msra.mxu1 %v42277_v17  ;;  %v40562_v17 = vld [vmem:[%s35745_s17 + $0xea2] sm:$0xff] }
 0xe3d   : > { %33855 = vmatprep.subr.bf16.mxu1 %v42178_v22 }
 0xe40   : > { %33857 = vmatpush3.bf16.msra.mxu1 %v42278_v23  ;;  %v26835_v23 = vld [vmem:[%s35745_s17 + $0xe32] sm:$0xff] }
 0xe41   : > { %33858 = vmatprep.subr.bf16.mxu1 %v42178_v22 }
 0xe44   : > { %33860 = vmatpush3.bf16.msra.mxu1 %v42279_v12  ;;  %v26834_v12 = vld [vmem:[%s35745_s17 + $0xe2a] sm:$0xff] }
 0xe45   : > { %33861 = vmatprep.subr.bf16.mxu1 %v42178_v22 }
 0xe47   : > { %32265 = vmatmul.mubr.msk.f32.vlgmr.msra.gmra.mrb[116].mxu1 %vm3079_vm3, %v17030_v59  ;;  %v40357_v59 = vld [vmem:[%s35745_s17 + $0xe91] sm:$0xff] }
 0xe48   : > { %33863 = vmatpush3.bf16.msra.mxu1 %v42280_v55  ;;  %32283 = vmatprep.mubr.msk.f32.mxu1 %vm35641_vm2, %v42179_v6 }
 0xe49   : > { %33864 = vmatprep.subr.bf16.mxu1 %v42178_v22 }
 0xe4c   : > { %33866 = vmatpush3.bf16.msra.mxu1 %v42281_v10 }
 0xe4d   : > { %33867 = vmatprep.subr.bf16.mxu1 %v42178_v22 }
 0xe50   : > { %33869 = vmatpush3.bf16.msra.mxu1 %v42282_v27 }
 0xe51   : > { %33870 = vmatprep.subr.bf16.mxu1 %v42178_v22 }
 0xe54   : > { %33872 = vmatpush3.bf16.msra.mxu1 %v42283_v19  ;;  %v26833_v19 = vld [vmem:[%s35745_s17 + $0xe22] sm:$0xff] }
 0xe55   : > { %33873 = vmatprep.subr.bf16.mxu1 %v42178_v22 }
 0xe57   : > { %32284 = vmatmul.mubr.msk.f32.vlgmr.msra.gmra.mrb[118].mxu1 %vm3079_vm3, %v17031_v1  ;;  %v40360_v1 = vld [vmem:[%s35745_s17 + $0xea1] sm:$0xff] }
 0xe58   : > { %33875 = vmatpush3.bf16.msra.mxu1 %v42284_v43  ;;  %32302 = vmatprep.mubr.msk.f32.mxu1 %vm35641_vm2, %v42179_v6  ;;  %v26832_v43 = vld [vmem:[%s35745_s17 + $0xe1a] sm:$0xff] }
 0xe59   : > { %33876 = vmatprep.subr.bf16.mxu1 %v42178_v22 }
 0xe5c   : > { %33878 = vmatpush3.bf16.msra.mxu1 %v42285_v51  ;;  %v26831_v51 = vld [vmem:[%s35745_s17 + $0xe12] sm:$0xff] }
 0xe5d   : > { %33879 = vmatprep.subr.bf16.mxu1 %v42178_v22 }
 0xe60   : > { %33881 = vmatpush3.bf16.msra.mxu1 %v42286_v57  ;;  %v40491_v57 = vld [vmem:[%s35745_s17 + $0xed0] sm:$0xff] }
 0xe61   : > { %33882 = vmatprep.subr.bf16.mxu1 %v42178_v22 }
 0xe64   : > { %33884 = vmatpush3.bf16.msra.mxu1 %v42287_v53  ;;  %v40488_v53 = vld [vmem:[%s35745_s17 + $0xec8] sm:$0xff] }
 0xe65   : > { %33885 = vmatprep.subr.bf16.mxu1 %v42178_v22 }
 0xe67   : > { %32303 = vmatmul.mubr.msk.f32.vlgmr.msra.gmra.mrb[120].mxu1 %vm3079_vm3, %v17254_v9  ;;  %v40367_v9 = vld [vmem:[%s35745_s17 + $0xea9] sm:$0xff] }
 0xe68   : > { %33887 = vmatpush3.bf16.msra.mxu1 %v42288_v38  ;;  %32321 = vmatprep.mubr.msk.f32.mxu1 %vm35641_vm2, %v42179_v6  ;;  %v40481_v38 = vld [vmem:[%s35745_s17 + $0xec0] sm:$0xff] }
 0xe69   : > { %33888 = vmatprep.subr.bf16.mxu1 %v42178_v22 }
 0xe6c   : > { %33890 = vmatpush3.bf16.msra.mxu1 %v42289_v35  ;;  %v40478_v35 = vld [vmem:[%s35745_s17 + $0xeb8] sm:$0xff] }
 0xe6d   : > { %33891 = vmatprep.subr.bf16.mxu1 %v42178_v22 }
 0xe70   : > { %33893 = vmatpush3.bf16.msra.mxu1 %v42290_v37 }
 0xe71   : > { %33894 = vmatprep.subr.bf16.mxu1 %v42178_v22 }
 0xe74   : > { %33896 = vmatpush3.bf16.msra.mxu1 %v42291_v58 }
 0xe75   : > { %33897 = vmatprep.subr.bf16.mxu1 %v42178_v22 }
 0xe77   : > { %32322 = vmatmul.mubr.msk.f32.vlgmr.msra.gmra.mrb[122].mxu1 %vm3079_vm3, %v17255_v60  ;;  %v40370_v60 = vld [vmem:[%s35745_s17 + $0xeb1] sm:$0xff] }
 0xe78   : > { %33899 = vmatpush3.bf16.msra.mxu1 %v42292_v26  ;;  %32340 = vmatprep.mubr.msk.f32.mxu1 %vm35641_vm2, %v42179_v6  ;;  %v40471_v26 = vld [vmem:[%s35745_s17 + $0xeb0] sm:$0xff] }
 0xe79   : > { %33900 = vmatprep.subr.bf16.mxu1 %v42178_v22 }
 0xe7c   : > { %33902 = vmatpush3.bf16.msra.mxu1 %v42293_v56  ;;  %v40468_v56 = vld [vmem:[%s35745_s17 + $0xea8] sm:$0xff] }
 0xe7d   : > { %33903 = vmatprep.subr.bf16.mxu1 %v42178_v22 }
 0xe80   : > { %33905 = vmatpush3.bf16.msra.mxu1 %v42294_v34  ;;  %v40461_v34 = vld [vmem:[%s35745_s17 + $0xea0] sm:$0xff] }
 0xe81   : > { %33906 = vmatprep.subr.bf16.mxu1 %v42178_v22 }
 0xe84   : > { %33908 = vmatpush3.bf16.msra.mxu1 %v42295_v8  ;;  %v40458_v8 = vld [vmem:[%s35745_s17 + $0xe90] sm:$0xff] }
 0xe85   : > { %32343 = vmatprep.subr.msk.mxu1 %vm442_vm0, %v35554_v62 }
 0xe87   : > { %32341 = vmatmul.mubr.msk.f32.vlgmr.msra.gmra.mrb[124].mxu1 %vm3079_vm3, %v17256_v45  ;;  %v40387_v45 = vld [vmem:[%s35745_s17 + $0xec9] sm:$0xff] }
 0xe88   : > { %32344 = vmatpush3.msk.msra.mxu1 %vm442_vm0, %v35554_v62  ;;  %32345 = vmatprep.mubr.msk.f32.mxu1 %vm369_vm1, %v26757_v14  ;;  %v40377_v62 = vld [vmem:[%s35745_s17 + $0xeb9] sm:$0xff]  ;;  %v40380_v14 = vld [vmem:[%s35745_s17 + $0xec1] sm:$0xff] }
 0xe89   : > { %32381 = vmatprep.subr.msk.mxu1 %vm442_vm0, %v35555_v63 }
 0xe8b   : > { %32346 = vmatmul.mubr.msk.f32.vlgmr.msra.gmra.mrb[126].mxu1 %vm369_vm1, %v26758_v50  ;;  %v40390_v50 = vld [vmem:[%s35745_s17 + $0xed1] sm:$0xff] }
 0xe8c   : > { %32382 = vmatpush3.msk.msra.mxu1 %vm442_vm0, %v35555_v63  ;;  %32348 = vmatprep.mubr.msk.f32.mxu1 %vm369_vm1, %v26759_v44  ;;  %v40397_v63 = vld [vmem:[%s35745_s17 + $0xed9] sm:$0xff]  ;;  %v26733_v44 = vld [vmem:[%s35745_s17 + $0xe10] sm:$0xff] }
 0xe8d   : > { %32419 = vmatprep.subr.msk.mxu1 %vm442_vm0, %v35556_v7 }
 0xe8f   : > { %32349 = vmatmul.mubr.msk.f32.gmra.mrb[128].mxu1 %vm369_vm1, %v26760_v52  ;;  %v26734_v52 = vld [vmem:[%s35745_s17 + $0xe18] sm:$0xff] }
 0xe90   : > { %32351 = vmatprep.mubr.msk.f32.mxu1 %vm369_vm1, %v26761_v3  ;;  %v26735_v3 = vld [vmem:[%s35745_s17 + $0xe20] sm:$0xff] }
 0xe93   : > { %32352 = vmatmul.mubr.msk.f32.gmra.mrb[130].mxu1 %vm369_vm1, %v26762_v28  ;;  %v26736_v28 = vld [vmem:[%s35745_s17 + $0xe28] sm:$0xff] }
 0xe94   : > { %32354 = vmatprep.mubr.msk.f32.mxu1 %vm369_vm1, %v26763_v11  ;;  %v26737_v11 = vld [vmem:[%s35745_s17 + $0xe30] sm:$0xff] }
 0xe97   : > { %32355 = vmatmul.mubr.msk.f32.gmra.mrb[132].mxu1 %vm369_vm1, %v26764_v32  ;;  %v35557_v32 = vld [vmem:[%s42060_s1 + $0xc] sm:$0x7] }
 0xe98   : > { %32357 = vmatprep.mubr.msk.f32.mxu1 %vm369_vm1, %v40321_v48 }
 0xe9b   : > { %32358 = vmatmul.mubr.msk.f32.gmra.mrb[134].mxu1 %vm369_vm1, %v40327_v30 }
 0xe9c   : > { %32360 = vmatprep.mubr.msk.f32.mxu1 %vm369_vm1, %v40330_v25 }
 0xe9f   : > { %32361 = vmatmul.mubr.msk.f32.gmra.mrb[136].mxu1 %vm369_vm1, %v40337_v20 }
 0xea0   : > { %32363 = vmatprep.mubr.msk.f32.mxu1 %vm369_vm1, %v40340_v41 }
 0xea3   : > { %32364 = vmatmul.mubr.msk.f32.gmra.mrb[138].mxu1 %vm369_vm1, %v40347_v4 }
 0xea4   : > { %32366 = vmatprep.mubr.msk.f32.mxu1 %vm369_vm1, %v40350_v54 }
 0xea7   : > { %32367 = vmatmul.mubr.msk.f32.gmra.mrb[140].mxu1 %vm369_vm1, %v40357_v59 }
 0xea8   : > { %32369 = vmatprep.mubr.msk.f32.mxu1 %vm369_vm1, %v40360_v1 }
 0xeab   : > { %32370 = vmatmul.mubr.msk.f32.gmra.mrb[142].mxu1 %vm369_vm1, %v40367_v9 }
 0xeac   : > { %32372 = vmatprep.mubr.msk.f32.mxu1 %vm369_vm1, %v40370_v60 }
 0xeaf   : > { %32373 = vmatmul.mubr.msk.f32.gmra.mrb[144].mxu1 %vm369_vm1, %v40377_v62 }
 0xeb0   : > { %32375 = vmatprep.mubr.msk.f32.mxu1 %vm369_vm1, %v40380_v14 }
 0xeb3   : > { %32376 = vmatmul.mubr.msk.f32.gmra.mrb[146].mxu1 %vm369_vm1, %v40387_v45 }
 0xeb4   : > { %32378 = vmatprep.mubr.msk.f32.mxu1 %vm369_vm1, %v40390_v50 }
 0xeb7   : > { %32379 = vmatmul.mubr.msk.f32.gmra.mrb[148].mxu1 %vm369_vm1, %v40397_v63 }
 0xeb8   : > { %32383 = vmatprep.mubr.msk.f32.mxu1 %vm369_vm1, %v26733_v44  ;;  %v26738_v44 = vld [vmem:[%s35745_s17 + $0xe38] sm:$0xff] }
 0xebb   : > { %32384 = vmatmul.mubr.msk.f32.vlgmr.msra.gmra.mrb[126].mxu1 %vm369_vm1, %v26734_v52  ;;  %v26740_v52 = vld [vmem:[%s35745_s17 + $0xe48] sm:$0xff] }
 0xebc   : > { %32420 = vmatpush3.msk.msra.mxu1 %vm442_vm0, %v35556_v7  ;;  %32386 = vmatprep.mubr.msk.f32.mxu1 %vm369_vm1, %v26735_v3  ;;  %v26739_v7 = vld [vmem:[%s35745_s17 + $0xe40] sm:$0xff]  ;;  %v40422_v3 = vld [vmem:[%s35745_s17 + $0xe58] sm:$0xff] }
 0xebd   : > { %32457 = vmatprep.subr.msk.mxu1 %vm442_vm0, %v35557_v32 }
 0xebf   : > { %32387 = vmatmul.mubr.msk.f32.gmra.mrb[128].mxu1 %vm369_vm1, %v26736_v28  ;;  %v40428_v28 = vld [vmem:[%s35745_s17 + $0xe60] sm:$0xff] }
 0xec0   : > { %32389 = vmatprep.mubr.msk.f32.mxu1 %vm369_vm1, %v26737_v11  ;;  %v40431_v11 = vld [vmem:[%s35745_s17 + $0xe68] sm:$0xff] }
 0xec3   : > { %32390 = vmatmul.mubr.msk.f32.gmra.mrb[130].mxu1 %vm369_vm1, %v26738_v44  ;;  %v40438_v44 = vld [vmem:[%s35745_s17 + $0xe70] sm:$0xff] }
 0xec4   : > { %32392 = vmatprep.mubr.msk.f32.mxu1 %vm369_vm1, %v26739_v7  ;;  %v40441_v7 = vld [vmem:[%s35745_s17 + $0xe78] sm:$0xff] }
 0xec7   : > { %32393 = vmatmul.mubr.msk.f32.gmra.mrb[132].mxu1 %vm369_vm1, %v26740_v52  ;;  %v40448_v52 = vld [vmem:[%s35745_s17 + $0xe80] sm:$0xff] }
 0xec8   : > { %32395 = vmatprep.mubr.msk.f32.mxu1 %vm369_vm1, %v40422_v3 }
 0xecb   : > { %32396 = vmatmul.mubr.msk.f32.gmra.mrb[134].mxu1 %vm369_vm1, %v40428_v28 }
 0xecc   : > { %32398 = vmatprep.mubr.msk.f32.mxu1 %vm369_vm1, %v40431_v11 }
 0xecf   : > { %32399 = vmatmul.mubr.msk.f32.gmra.mrb[136].mxu1 %vm369_vm1, %v40438_v44 }
 0xed0   : > { %32401 = vmatprep.mubr.msk.f32.mxu1 %vm369_vm1, %v40441_v7 }
 0xed3   : > { %32402 = vmatmul.mubr.msk.f32.gmra.mrb[138].mxu1 %vm369_vm1, %v40448_v52 }
 0xed4   : > { %32404 = vmatprep.mubr.msk.f32.mxu1 %vm369_vm1, %v40451_v29 }
 0xed7   : > { %32405 = vmatmul.mubr.msk.f32.gmra.mrb[140].mxu1 %vm369_vm1, %v40458_v8 }
 0xed8   : > { %32407 = vmatprep.mubr.msk.f32.mxu1 %vm369_vm1, %v40461_v34 }
 0xeda   : > { %v16878_v58 = vpop.f32.mrb[108].mxu1 }
 0xedb   : > { %32408 = vmatmul.mubr.msk.f32.gmra.mrb[142].mxu1 %vm369_vm1, %v40468_v56  ;;  %v32190_v37 = vpop.f32.mrb[109].mxu1 }
 0xedc   : > { %32410 = vmatprep.mubr.msk.f32.mxu1 %vm369_vm1, %v40471_v26  ;;  %v40498_v37 = vld [vmem:[%s35745_s17 + $0xed8] sm:$0xff] }
 0xedf   : > { %32411 = vmatmul.mubr.msk.f32.gmra.mrb[144].mxu1 %vm369_vm1, %v40478_v35 }
 0xee0   : > { %32413 = vmatprep.mubr.msk.f32.mxu1 %vm369_vm1, %v40481_v38 }
 0xee3   : > { %32414 = vmatmul.mubr.msk.f32.gmra.mrb[146].mxu1 %vm369_vm1, %v40488_v53 }
 0xee4   : > { %32416 = vmatprep.mubr.msk.f32.mxu1 %vm369_vm1, %v40491_v57 }
 0xee7   : > { %32417 = vmatmul.mubr.msk.f32.gmra.mrb[148].mxu1 %vm369_vm1, %v40498_v37 }
 0xee8   : > { %32421 = vmatprep.mubr.msk.f32.mxu1 %vm369_vm1, %v26831_v51  ;;  %v35558_v51 = vld [vmem:[%s42060_s1 + $0x10] sm:$0x7] }
 0xeea   : > { %v16951_v27 = vpop.f32.mrb[110].mxu1 }
 0xeeb   : > { %v16952_v10 = vadd.f32 %v16951_v27, %v16878_v58  ;;  %v32209_v55 = vpop.f32.mrb[111].mxu1  ;;  %32422 = vmatmul.mubr.msk.f32.vlgmr.msra.gmra.mrb[126].mxu1 %vm369_vm1, %v26832_v43  ;;  %v26837_v27 = vld [vmem:[%s35745_s17 + $0xe42] sm:$0xff]  ;;  %v40523_v43 = vld [vmem:[%s35745_s17 + $0xe5a] sm:$0xff] }
 0xeec   : > { %32458 = vmatpush3.msk.msra.mxu1 %vm442_vm0, %v35557_v32  ;;  %32424 = vmatprep.mubr.msk.f32.mxu1 %vm369_vm1, %v26833_v19  ;;  %v26836_v55 = vld [vmem:[%s35745_s17 + $0xe3a] sm:$0xff]  ;;  %v26838_v19 = vld [vmem:[%s35745_s17 + $0xe4a] sm:$0xff] }
 0xeed   : > { %32495 = vmatprep.subr.msk.mxu1 %vm442_vm0, %v35558_v51 }
 0xeef   : > { %32425 = vmatmul.mubr.msk.f32.gmra.mrb[128].mxu1 %vm369_vm1, %v26834_v12  ;;  %v40532_v12 = vld [vmem:[%s35745_s17 + $0xe6a] sm:$0xff] }
 0xef0   : > { %32427 = vmatprep.mubr.msk.f32.mxu1 %vm369_vm1, %v26835_v23  ;;  %v40529_v23 = vld [vmem:[%s35745_s17 + $0xe62] sm:$0xff] }
 0xef3   : > { %32428 = vmatmul.mubr.msk.f32.gmra.mrb[130].mxu1 %vm369_vm1, %v26836_v55 }
 0xef4   : > { %32430 = vmatprep.mubr.msk.f32.mxu1 %vm369_vm1, %v26837_v27  ;;  %v40539_v27 = vld [vmem:[%s35745_s17 + $0xe72] sm:$0xff] }
 0xef7   : > { %32431 = vmatmul.mubr.msk.f32.gmra.mrb[132].mxu1 %vm369_vm1, %v26838_v19  ;;  %v40542_v19 = vld [vmem:[%s35745_s17 + $0xe7a] sm:$0xff] }
 0xef8   : > { %32433 = vmatprep.mubr.msk.f32.mxu1 %vm369_vm1, %v40523_v43 }
 0xefa   : > { %v17024_v58 = vpop.f32.mrb[112].mxu1 }
 0xefb   : > { %v17028_v32 = vadd.f32 %v17024_v58, %v16952_v10  ;;  %v32228_v55 = vpop.f32.mrb[113].mxu1  ;;  %32434 = vmatmul.mubr.msk.f32.gmra.mrb[134].mxu1 %vm369_vm1, %v40529_v23  ;;  %v40549_v10 = vld [vmem:[%s35745_s17 + $0xe82] sm:$0xff]  ;;  %v40552_v58 = vld [vmem:[%s35745_s17 + $0xe8a] sm:$0xff] }
 0xefc   : > { %32436 = vmatprep.mubr.msk.f32.mxu1 %vm369_vm1, %v40532_v12  ;;  %v40559_v55 = vld [vmem:[%s35745_s17 + $0xe92] sm:$0xff] }
 0xeff   : > { %32437 = vmatmul.mubr.msk.f32.gmra.mrb[136].mxu1 %vm369_vm1, %v40539_v27 }
 0xf00   : > { %32439 = vmatprep.mubr.msk.f32.mxu1 %vm369_vm1, %v40542_v19 }
 0xf03   : > { %32440 = vmatmul.mubr.msk.f32.gmra.mrb[138].mxu1 %vm369_vm1, %v40549_v10 }
 0xf04   : > { %32442 = vmatprep.mubr.msk.f32.mxu1 %vm369_vm1, %v40552_v58 }
 0xf07   : > { %32443 = vmatmul.mubr.msk.f32.gmra.mrb[140].mxu1 %vm369_vm1, %v40559_v55 }
 0xf08   : > { %32445 = vmatprep.mubr.msk.f32.mxu1 %vm369_vm1, %v40562_v17 }
 0xf0a   : > { %v17101_v2 = vpop.f32.mrb[114].mxu1 }
 0xf0b   : > { %v17105_v15 = vadd.f32 %v17101_v2, %v17028_v32  ;;  %v32247_v31 = vpop.f32.mrb[115].mxu1  ;;  %32446 = vmatmul.mubr.msk.f32.gmra.mrb[142].mxu1 %vm369_vm1, %v40569_v5  ;;  %v40592_v2 = vld [vmem:[%s35745_s17 + $0xed2] sm:$0xff] }
 0xf0c   : > { %32448 = vmatprep.mubr.msk.f32.mxu1 %vm369_vm1, %v40572_v46  ;;  %v40599_v31 = vld [vmem:[%s35745_s17 + $0xeda] sm:$0xff] }
 0xf0f   : > { %32449 = vmatmul.mubr.msk.f32.gmra.mrb[144].mxu1 %vm369_vm1, %v40579_v42 }
 0xf10   : > { %32451 = vmatprep.mubr.msk.f32.mxu1 %vm369_vm1, %v40582_v13 }
 0xf13   : > { %32452 = vmatmul.mubr.msk.f32.gmra.mrb[146].mxu1 %vm369_vm1, %v40589_v40 }
 0xf14   : > { %32454 = vmatprep.mubr.msk.f32.mxu1 %vm369_vm1, %v40592_v2 }
 0xf17   : > { %32455 = vmatmul.mubr.msk.f32.gmra.mrb[148].mxu1 %vm369_vm1, %v40599_v31 }
 0xf18   : > { %32459 = vmatprep.mubr.msk.f32.mxu1 %vm369_vm1, %v40422_v3 }
 0xf1a   : > { %v17175_v32 = vpop.f32.mrb[116].mxu1 }
 0xf1b   : > { %v17179_v24 = vadd.f32 %v17175_v32, %v17105_v15  ;;  %v32266_v16 = vpop.f32.mrb[117].mxu1  ;;  %32460 = vmatmul.mubr.msk.f32.vlgmr.msra.gmra.mrb[126].mxu1 %vm369_vm1, %v40428_v28  ;;  %v40669_v32 = vld [vmem:[%s35745_s17 + $0xf18] sm:$0xff] }
 0xf1c   : > { %32496 = vmatpush3.msk.msra.mxu1 %vm442_vm0, %v35558_v51  ;;  %32462 = vmatprep.mubr.msk.f32.mxu1 %vm369_vm1, %v40431_v11  ;;  %v40666_v51 = vld [vmem:[%s35745_s17 + $0xf10] sm:$0xff] }
 0xf1d   : > { %32533 = vmatprep.subr.msk.mxu1 %vm442_vm0, %v35559_v21 }
 0xf1f   : > { %32463 = vmatmul.mubr.msk.f32.gmra.mrb[128].mxu1 %vm369_vm1, %v40438_v44 }
 0xf20   : > { %32465 = vmatprep.mubr.msk.f32.mxu1 %vm369_vm1, %v40441_v7  ;;  %v40656_v7 = vld [vmem:[%s35745_s17 + $0xf00] sm:$0xff] }
 0xf23   : > { %32466 = vmatmul.mubr.msk.f32.gmra.mrb[130].mxu1 %vm369_vm1, %v40448_v52  ;;  %v40659_v52 = vld [vmem:[%s35745_s17 + $0xf08] sm:$0xff] }
 0xf24   : > { %32468 = vmatprep.mubr.msk.f32.mxu1 %vm369_vm1, %v40451_v29  ;;  %v40639_v29 = vld [vmem:[%s35745_s17 + $0xee8] sm:$0xff] }
 0xf27   : > { %32469 = vmatmul.mubr.msk.f32.gmra.mrb[132].mxu1 %vm369_vm1, %v40458_v8  ;;  %v40649_v8 = vld [vmem:[%s35745_s17 + $0xef8] sm:$0xff] }
 0xf28   : > { %32471 = vmatprep.mubr.msk.f32.mxu1 %vm369_vm1, %v40461_v34 }
 0xf2a   : > { %v17249_v16 = vpop.f32.mrb[118].mxu1 }
 0xf2b   : > { %v17253_v15 = vadd.f32 %v17249_v16, %v17179_v24  ;;  %v32285_v3 = vpop.f32.mrb[119].mxu1  ;;  %32472 = vmatmul.mubr.msk.f32.gmra.mrb[134].mxu1 %vm369_vm1, %v40468_v56  ;;  %v40646_v24 = vld [vmem:[%s35745_s17 + $0xef0] sm:$0xff]  ;;  %v40676_v16 = vld [vmem:[%s35745_s17 + $0xf20] sm:$0xff] }
 0xf2c   : > { %32474 = vmatprep.mubr.msk.f32.mxu1 %vm369_vm1, %v40471_v26 }
 0xf2f   : > { %32475 = vmatmul.mubr.msk.f32.gmra.mrb[136].mxu1 %vm369_vm1, %v40478_v35 }
 0xf30   : > { %32477 = vmatprep.mubr.msk.f32.mxu1 %vm369_vm1, %v40481_v38 }
 0xf33   : > { %32478 = vmatmul.mubr.msk.f32.gmra.mrb[138].mxu1 %vm369_vm1, %v40488_v53 }
 0xf34   : > { %32480 = vmatprep.mubr.msk.f32.mxu1 %vm369_vm1, %v40491_v57 }
 0xf37   : > { %32481 = vmatmul.mubr.msk.f32.gmra.mrb[140].mxu1 %vm369_vm1, %v40498_v37 }
 0xf38   : > { %32483 = vmatprep.mubr.msk.f32.mxu1 %vm369_vm1, %v40639_v29 }
 0xf3a   : > { %v17326_v28 = vpop.f32.mrb[120].mxu1 }
 0xf3b   : > { %v17330_v11 = vadd.f32 %v17326_v28, %v17253_v15  ;;  %v32304_v44 = vpop.f32.mrb[121].mxu1  ;;  %32484 = vmatmul.mubr.msk.f32.gmra.mrb[142].mxu1 %vm369_vm1, %v40646_v24 }
 0xf3c   : > { %32486 = vmatprep.mubr.msk.f32.mxu1 %vm369_vm1, %v40649_v8  ;;  %v42296_v44 = vld [vmem:[#allocation41_spill] sm:$0xff] }
 0xf3d   : > { %v24327_v47 = vsel %vm24326_vm4, %v42296_v44, -inf  ;;  %v24335_v36 = vsel %vm24334_vm5, %v42296_v44, -inf }
 0xf3f   : > { %32487 = vmatmul.mubr.msk.f32.gmra.mrb[144].mxu1 %vm369_vm1, %v40656_v7 }
 0xf40   : > { %32489 = vmatprep.mubr.msk.f32.mxu1 %vm369_vm1, %v40659_v52 }
 0xf43   : > { %32490 = vmatmul.mubr.msk.f32.gmra.mrb[146].mxu1 %vm369_vm1, %v40666_v51 }
 0xf44   : > { %32492 = vmatprep.mubr.msk.f32.mxu1 %vm369_vm1, %v40669_v32 }
 0xf47   : > { %32493 = vmatmul.mubr.msk.f32.gmra.mrb[148].mxu1 %vm369_vm1, %v40676_v16 }
 0xf48   : > { %32497 = vmatprep.mubr.msk.f32.mxu1 %vm369_vm1, %v40321_v48  ;;  %v40694_v48 = vld [vmem:[%s42060_s1 + $0x18] sm:$0x7] }
 0xf4a   : > { %v17400_v15 = vpop.f32.mrb[122].mxu1 }
 0xf4b   : > { %v17404_v3 = vadd.f32 %v17400_v15, %v17330_v11  ;;  %v32323_v28 = vpop.f32.mrb[123].mxu1  ;;  %32498 = vmatmul.mubr.msk.f32.vlgmr.msra.gmra.mrb[126].mxu1 %vm369_vm1, %v40327_v30  ;;  %v24328_v30 = vrot.slane %v24327_v47, 4  ;;  %v24336_v11 = vrot.slane %v24335_v36, 4 }
 0xf4c   : > { %32534 = vmatpush3.msk.msra.mxu1 %vm442_vm0, %v35559_v21  ;;  %32500 = vmatprep.mubr.msk.f32.mxu1 %vm369_vm1, %v40330_v25  ;;  %v24343_v25 = vsel %vm24342_vm6, %v42296_v44, -inf }
 0xf4d   : > { %32571 = vmatprep.subr.msk.mxu1 %vm442_vm0, %v40694_v48  ;;  %v24329_v21 = vmax.f32 %v24327_v47, %v24328_v30  ;;  %v24337_v15 = vmax.f32 %v24335_v36, %v24336_v11  ;;  %v24344_v28 = vrot.slane %v24343_v25, 4 }
 0xf4f   : > { %32501 = vmatmul.mubr.msk.f32.gmra.mrb[128].mxu1 %vm369_vm1, %v40337_v20  ;;  %v24330_v6 = vrot.slane %v24329_v21, 2  ;;  %v24338_v20 = vrot.slane %v24337_v15, 2  ;;  %v24345_v47 = vmax.f32 %v24343_v25, %v24344_v28 }
 0xf50   : > { %32503 = vmatprep.mubr.msk.f32.mxu1 %vm369_vm1, %v40340_v41 }
 0xf51   : > { %v24331_v30 = vmax.f32 %v24329_v21, %v24330_v6  ;;  %v24339_v36 = vmax.f32 %v24337_v15, %v24338_v20  ;;  %v42298_v6 = vmax.f32 %v39002_v33, %v39858_v0 }
 0xf53   : > { %32504 = vmatmul.mubr.msk.f32.gmra.mrb[130].mxu1 %vm369_vm1, %v40347_v4  ;;  %v35561_v4 = vld [vmem:[%s42063_s4] ss:$0 sm:$0xff]  ;;  %v24332_v11 = vrot.slane %v24331_v30, 1 }
 0xf54   : > { %32506 = vmatprep.mubr.msk.f32.mxu1 %vm369_vm1, %v40350_v54 }
 0xf55   : > { %v24333_v33 = vmax.f32 %v24331_v30, %v24332_v11 }
 0xf57   : > { %32507 = vmatmul.mubr.msk.f32.gmra.mrb[132].mxu1 %vm369_vm1, %v40357_v59  ;;  %v24346_v59 = vrot.slane %v24345_v47, 2 }
 0xf58   : > { %32509 = vmatprep.mubr.msk.f32.mxu1 %vm369_vm1, %v40360_v1 }
 0xf59   : > { %v24347_v28 = vmax.f32 %v24345_v47, %v24346_v59 }
 0xf5a   : > { %v17474_v41 = vpop.f32.mrb[124].mxu1 }
 0xf5b   : > { %v17478_v44 = vadd.f32 %v17474_v41, %v17404_v3  ;;  %v32342_v61 = vpop.f32.mrb[125].mxu1  ;;  %32510 = vmatmul.mubr.msk.f32.gmra.mrb[134].mxu1 %vm369_vm1, %v40367_v9  ;;  %v24340_v3 = vrot.slane %v24339_v36, 1 }
 0xf5c   : > { %32512 = vmatprep.mubr.msk.f32.mxu1 %vm369_vm1, %v40370_v60 }
 0xf5d   : > { %v40719_v54 = vadd.f32 %v35561_v4, %v17478_v44  ;;  %v24341_v0 = vmax.f32 %v24339_v36, %v24340_v3 }
 0xf5f   : > { %42297 = vst [vmem:[#allocation41_spill] sm:$0xff] %v40719_v54  ;;  %v24351_v61 = vmax.f32 %v42298_v6, %v40719_v54  ;;  %32513 = vmatmul.mubr.msk.f32.gmra.mrb[136].mxu1 %vm369_vm1, %v40377_v62  ;;  %v24396_v30 = vadd.f32 %v24341_v0, %v24333_v33 }
 0xf60   : > { %32515 = vmatprep.mubr.msk.f32.mxu1 %vm369_vm1, %v40380_v14 }
 0xf61   : > { %v24352_v21 = vsel %vm24326_vm4, %v24351_v61, -inf  ;;  %v24359_v25 = vsel %vm24334_vm5, %v24351_v61, -inf  ;;  %v24366_v15 = vsel %vm24342_vm6, %v24351_v61, -inf  ;;  %v24348_v61 = vrot.slane %v24347_v28, 1 }
 0xf62   : > { %v24353_v20 = vrot.slane %v24352_v21, 4  ;;  %v24360_v41 = vrot.slane %v24359_v25, 4  ;;  %v24367_v44 = vrot.slane %v24366_v15, 4 }
 0xf63   : > { %32516 = vmatmul.mubr.msk.f32.gmra.mrb[138].mxu1 %vm369_vm1, %v40387_v45 }
 0xf64   : > { %v24354_v4 = vmax.f32 %v24352_v21, %v24353_v20  ;;  %v24361_v6 = vmax.f32 %v24359_v25, %v24360_v41  ;;  %v24368_v54 = vmax.f32 %v24366_v15, %v24367_v44  ;;  %32518 = vmatprep.mubr.msk.f32.mxu1 %vm369_vm1, %v40390_v50  ;;  %v40744_v21 = vld [vmem:[%s35745_s17 + $0xef1] sm:$0xff]  ;;  %v40747_v25 = vld [vmem:[%s35745_s17 + $0xef9] sm:$0xff]  ;;  %v24349_v15 = vmax.f32 %v24347_v28, %v24348_v61 }
 0xf66   : > { %v24355_v47 = vrot.slane %v24354_v4, 2  ;;  %v24362_v59 = vrot.slane %v24361_v6, 2  ;;  %v24369_v18 = vrot.slane %v24368_v54, 2  ;;  %v24397_v44 = vadd.f32 %v24396_v30, %v24349_v15 }
 0xf67   : > { %32519 = vmatmul.mubr.msk.f32.gmra.mrb[140].mxu1 %vm369_vm1, %v40397_v63 }
 0xf68   : > { %v24356_v36 = vmax.f32 %v24354_v4, %v24355_v47  ;;  %v24363_v11 = vmax.f32 %v24361_v6, %v24362_v59  ;;  %v24370_v3 = vmax.f32 %v24368_v54, %v24369_v18  ;;  %32521 = vmatprep.mubr.msk.f32.mxu1 %vm369_vm1, %v40737_v39  ;;  %v40754_v18 = vld [vmem:[%s35745_s17 + $0xf01] sm:$0xff]  ;;  %v40757_v54 = vld [vmem:[%s35745_s17 + $0xf09] sm:$0xff]  ;;  %v40764_v47 = vld [vmem:[%s35745_s17 + $0xf11] sm:$0xff] }
 0xf69   : > { %v40767_v59 = vld [vmem:[%s35745_s17 + $0xf19] sm:$0xff] }
 0xf6a   : > { %v24357_v20 = vrot.slane %v24356_v36, 1  ;;  %v24364_v41 = vrot.slane %v24363_v11, 1  ;;  %v24371_v0 = vrot.slane %v24370_v3, 1 }
 0xf6b   : > { %32522 = vmatmul.mubr.msk.f32.gmra.mrb[142].mxu1 %vm369_vm1, %v40744_v21 }
 0xf6c   : > { %v24358_v33 = vmax.f32 %v24356_v36, %v24357_v20  ;;  %32524 = vmatprep.mubr.msk.f32.mxu1 %vm369_vm1, %v40747_v25  ;;  %v24365_v4 = vmax.f32 %v24363_v11, %v24364_v41  ;;  %v24372_v6 = vmax.f32 %v24370_v3, %v24371_v0  ;;  %v40776_v36 = vld [vmem:[%s35745_s17 + $0xf21] sm:$0xff]  ;;  %v35562_v11 = vld [vmem:[%s42060_s1 + $0x1c] sm:$0x7] }
 0xf6e   : > { %v24398_v28 = vadd.f32 %v24397_v44, %v24358_v33 }
 0xf6f   : > { %32525 = vmatmul.mubr.msk.f32.gmra.mrb[144].mxu1 %vm369_vm1, %v40754_v18 }
 0xf70   : > { %v24399_v61 = vadd.f32 %v24398_v28, %v24365_v4  ;;  %32527 = vmatprep.mubr.msk.f32.mxu1 %vm369_vm1, %v40757_v54 }
 0xf72   : > { %v40769_v30 = vadd.f32 %v24399_v61, %v24372_v6 }
 0xf73   : > { %32528 = vmatmul.mubr.msk.f32.gmra.mrb[146].mxu1 %vm369_vm1, %v40764_v47 }
 0xf74   : > { %42299 = vst [vmem:[#allocation42_spill] sm:$0xff] %v40769_v30  ;;  %32530 = vmatprep.mubr.msk.f32.mxu1 %vm369_vm1, %v40767_v59 }
 0xf77   : > { %32531 = vmatmul.mubr.msk.f32.gmra.mrb[148].mxu1 %vm369_vm1, %v40776_v36 }
 0xf78   : > { %32535 = vmatprep.mubr.msk.f32.mxu1 %vm369_vm1, %v40523_v43  ;;  %v40817_v43 = vld [vmem:[%s35745_s17 + $0xeea] sm:$0xff] }
 0xf7b   : > { %32536 = vmatmul.mubr.msk.f32.vlgmr.msra.gmra.mrb[126].mxu1 %vm369_vm1, %v40529_v23  ;;  %v40824_v23 = vld [vmem:[%s35745_s17 + $0xef2] sm:$0xff] }
 0xf7c   : > { %32572 = vmatpush3.msk.msra.mxu1 %vm442_vm0, %v40694_v48  ;;  %32538 = vmatprep.mubr.msk.f32.mxu1 %vm369_vm1, %v40532_v12  ;;  %v40827_v12 = vld [vmem:[%s35745_s17 + $0xefa] sm:$0xff] }
 0xf7d   : > { %32609 = vmatprep.subr.msk.mxu1 %vm442_vm0, %v35562_v11  ;;  %v35563_v48 = vld [vmem:[%s42060_s1 + $0x20] sm:$0x7] }
 0xf7f   : > { %32539 = vmatmul.mubr.msk.f32.gmra.mrb[128].mxu1 %vm369_vm1, %v40539_v27  ;;  %v40834_v27 = vld [vmem:[%s35745_s17 + $0xf02] sm:$0xff] }
 0xf80   : > { %32541 = vmatprep.mubr.msk.f32.mxu1 %vm369_vm1, %v40542_v19  ;;  %v40837_v19 = vld [vmem:[%s35745_s17 + $0xf0a] sm:$0xff] }
 0xf83   : > { %32542 = vmatmul.mubr.msk.f32.gmra.mrb[130].mxu1 %vm369_vm1, %v40549_v10  ;;  %v40844_v10 = vld [vmem:[%s35745_s17 + $0xf12] sm:$0xff] }
 0xf84   : > { %32544 = vmatprep.mubr.msk.f32.mxu1 %vm369_vm1, %v40552_v58  ;;  %v40847_v58 = vld [vmem:[%s35745_s17 + $0xf1a] sm:$0xff] }
 0xf87   : > { %32545 = vmatmul.mubr.msk.f32.gmra.mrb[132].mxu1 %vm369_vm1, %v40559_v55  ;;  %v40854_v55 = vld [vmem:[%s35745_s17 + $0xf22] sm:$0xff] }
 0xf88   : > { %32547 = vmatprep.mubr.msk.f32.mxu1 %vm369_vm1, %v40562_v17 }
 0xf8b   : > { %32548 = vmatmul.mubr.msk.f32.gmra.mrb[134].mxu1 %vm369_vm1, %v40569_v5 }
 0xf8c   : > { %32550 = vmatprep.mubr.msk.f32.mxu1 %vm369_vm1, %v40572_v46 }
 0xf8f   : > { %32551 = vmatmul.mubr.msk.f32.gmra.mrb[136].mxu1 %vm369_vm1, %v40579_v42 }
 0xf90   : > { %32553 = vmatprep.mubr.msk.f32.mxu1 %vm369_vm1, %v40582_v13 }
 0xf93   : > { %32554 = vmatmul.mubr.msk.f32.gmra.mrb[138].mxu1 %vm369_vm1, %v40589_v40 }
 0xf94   : > { %32556 = vmatprep.mubr.msk.f32.mxu1 %vm369_vm1, %v40592_v2 }
 0xf97   : > { %32557 = vmatmul.mubr.msk.f32.gmra.mrb[140].mxu1 %vm369_vm1, %v40599_v31 }
 0xf98   : > { %32559 = vmatprep.mubr.msk.f32.mxu1 %vm369_vm1, %v40817_v43 }
 0xf9b   : > { %32560 = vmatmul.mubr.msk.f32.gmra.mrb[142].mxu1 %vm369_vm1, %v40824_v23 }
 0xf9c   : > { %32562 = vmatprep.mubr.msk.f32.mxu1 %vm369_vm1, %v40827_v12 }
 0xf9f   : > { %32563 = vmatmul.mubr.msk.f32.gmra.mrb[144].mxu1 %vm369_vm1, %v40834_v27 }
 0xfa0   : > { %32565 = vmatprep.mubr.msk.f32.mxu1 %vm369_vm1, %v40837_v19 }
 0xfa3   : > { %32566 = vmatmul.mubr.msk.f32.gmra.mrb[146].mxu1 %vm369_vm1, %v40844_v10 }
 0xfa4   : > { %32568 = vmatprep.mubr.msk.f32.mxu1 %vm369_vm1, %v40847_v58 }
 0xfa7   : > { %32569 = vmatmul.mubr.msk.f32.gmra.mrb[148].mxu1 %vm369_vm1, %v40854_v55 }
 0xfa8   : > { %32573 = vmatprep.mubr.msk.f32.mxu1 %vm369_vm1, %v40461_v34  ;;  %v27049_v34 = vld [vmem:[%s35745_s17 + $0xf60] sm:$0xff] }
 0xfab   : > { %32574 = vmatmul.mubr.msk.f32.vlgmr.msra.gmra.mrb[126].mxu1 %vm369_vm1, %v40468_v56  ;;  %v27048_v56 = vld [vmem:[%s35745_s17 + $0xf58] sm:$0xff] }
 0xfac   : > { %32610 = vmatpush3.msk.msra.mxu1 %vm442_vm0, %v35562_v11  ;;  %32576 = vmatprep.mubr.msk.f32.mxu1 %vm369_vm1, %v40471_v26  ;;  %v27047_v26 = vld [vmem:[%s35745_s17 + $0xf50] sm:$0xff] }
 0xfad   : > { %32647 = vmatprep.subr.msk.mxu1 %vm442_vm0, %v35563_v48 }
 0xfaf   : > { %32577 = vmatmul.mubr.msk.f32.gmra.mrb[128].mxu1 %vm369_vm1, %v40478_v35  ;;  %v27046_v35 = vld [vmem:[%s35745_s17 + $0xf48] sm:$0xff] }
 0xfb0   : > { %32579 = vmatprep.mubr.msk.f32.mxu1 %vm369_vm1, %v40481_v38  ;;  %v27045_v38 = vld [vmem:[%s35745_s17 + $0xf40] sm:$0xff] }
 0xfb3   : > { %32580 = vmatmul.mubr.msk.f32.gmra.mrb[130].mxu1 %vm369_vm1, %v40488_v53  ;;  %v27044_v53 = vld [vmem:[%s35745_s17 + $0xf38] sm:$0xff] }
 0xfb4   : > { %32582 = vmatprep.mubr.msk.f32.mxu1 %vm369_vm1, %v40491_v57  ;;  %v27043_v57 = vld [vmem:[%s35745_s17 + $0xf30] sm:$0xff] }
 0xfb7   : > { %32583 = vmatmul.mubr.msk.f32.gmra.mrb[132].mxu1 %vm369_vm1, %v40498_v37  ;;  %v27050_v37 = vld [vmem:[%s35745_s17 + $0xf68] sm:$0xff] }
 0xfb8   : > { %32585 = vmatprep.mubr.msk.f32.mxu1 %vm369_vm1, %v40639_v29  ;;  %v27148_v29 = vld [vmem:[%s35745_s17 + $0xf6a] sm:$0xff] }
 0xfbb   : > { %32586 = vmatmul.mubr.msk.f32.gmra.mrb[134].mxu1 %vm369_vm1, %v40646_v24  ;;  %v42303_v24 = vmov 0.0  }
 0xfbc   : > { %32588 = vmatprep.mubr.msk.f32.mxu1 %vm369_vm1, %v40649_v8 }
 0xfbf   : > { %32589 = vmatmul.mubr.msk.f32.gmra.mrb[136].mxu1 %vm369_vm1, %v40656_v7  ;;  %v41022_v7 = vld [vmem:[%s42061_s2] ss:$0 sm:$0xff] }
 0xfc0   : > { %32591 = vmatprep.mubr.msk.f32.mxu1 %vm369_vm1, %v40659_v52 }
 0xfc3   : > { %32592 = vmatmul.mubr.msk.f32.gmra.mrb[138].mxu1 %vm369_vm1, %v40666_v51 }
 0xfc4   : > { %32594 = vmatprep.mubr.msk.f32.mxu1 %vm369_vm1, %v40669_v32 }
 0xfc7   : > { %32595 = vmatmul.mubr.msk.f32.gmra.mrb[140].mxu1 %vm369_vm1, %v40676_v16 }
 0xfc8   : > { %32597 = vmatprep.mubr.msk.f32.mxu1 %vm369_vm1, %v27043_v57 }
 0xfcb   : > { %32598 = vmatmul.mubr.msk.f32.gmra.mrb[142].mxu1 %vm369_vm1, %v27044_v53 }
 0xfcc   : > { %32600 = vmatprep.mubr.msk.f32.mxu1 %vm369_vm1, %v27045_v38 }
 0xfcf   : > { %32601 = vmatmul.mubr.msk.f32.gmra.mrb[144].mxu1 %vm369_vm1, %v27046_v35 }
 0xfd0   : > { %32603 = vmatprep.mubr.msk.f32.mxu1 %vm369_vm1, %v27047_v26 }
 0xfd3   : > { %32604 = vmatmul.mubr.msk.f32.gmra.mrb[146].mxu1 %vm369_vm1, %v27048_v56 }
 0xfd4   : > { %32606 = vmatprep.mubr.msk.f32.mxu1 %vm369_vm1, %v27049_v34 }
 0xfd7   : > { %32607 = vmatmul.mubr.msk.f32.gmra.mrb[148].mxu1 %vm369_vm1, %v27050_v37 }
 0xfd8   : > { %32611 = vmatprep.mubr.msk.f32.mxu1 %vm369_vm1, %v40360_v1  ;;  %v27093_v1 = vld [vmem:[%s35745_s17 + $0xf39] sm:$0xff] }
 0xfdb   : > { %32612 = vmatmul.mubr.msk.f32.vlgmr.msra.gmra.mrb[126].mxu1 %vm369_vm1, %v40367_v9  ;;  %v27094_v9 = vld [vmem:[%s35745_s17 + $0xf41] sm:$0xff] }
 0xfdc   : > { %32648 = vmatpush3.msk.msra.mxu1 %vm442_vm0, %v35563_v48  ;;  %32614 = vmatprep.mubr.msk.f32.mxu1 %vm369_vm1, %v40370_v60  ;;  %v27095_v60 = vld [vmem:[%s35745_s17 + $0xf49] sm:$0xff] }
 0xfdd   : > { %34017 = vmatprep.subr.bf16.mxu1 %v42178_v22 }
 0xfdf   : > { %32615 = vmatmul.mubr.msk.f32.gmra.mrb[128].mxu1 %vm369_vm1, %v40377_v62  ;;  %v27096_v62 = vld [vmem:[%s35745_s17 + $0xf51] sm:$0xff] }
 0xfe0   : > { %32617 = vmatprep.mubr.msk.f32.mxu1 %vm369_vm1, %v40380_v14  ;;  %v27097_v14 = vld [vmem:[%s35745_s17 + $0xf59] sm:$0xff] }
 0xfe3   : > { %32618 = vmatmul.mubr.msk.f32.gmra.mrb[130].mxu1 %vm369_vm1, %v40387_v45  ;;  %v27098_v45 = vld [vmem:[%s35745_s17 + $0xf61] sm:$0xff] }
 0xfe4   : > { %32620 = vmatprep.mubr.msk.f32.mxu1 %vm369_vm1, %v40390_v50  ;;  %v27099_v50 = vld [vmem:[%s35745_s17 + $0xf69] sm:$0xff] }
 0xfe7   : > { %32621 = vmatmul.mubr.msk.f32.gmra.mrb[132].mxu1 %vm369_vm1, %v40397_v63  ;;  %v42300_v63 = vld [vmem:[#allocation6_spill] sm:$0xff] }
 0xfe8   : > { %32623 = vmatprep.mubr.msk.f32.mxu1 %vm369_vm1, %v40737_v39  ;;  %v27092_v39 = vld [vmem:[%s35745_s17 + $0xf31] sm:$0xff] }
 0xfeb   : > { %32624 = vmatmul.mubr.msk.f32.gmra.mrb[134].mxu1 %vm369_vm1, %v40744_v21 }
 0xfec   : > { %32626 = vmatprep.mubr.msk.f32.mxu1 %vm369_vm1, %v40747_v25 }
 0xfef   : > { %32627 = vmatmul.mubr.msk.f32.gmra.mrb[136].mxu1 %vm369_vm1, %v40754_v18 }
 0xff0   : > { %32629 = vmatprep.mubr.msk.f32.mxu1 %vm369_vm1, %v40757_v54 }
 0xff3   : > { %32630 = vmatmul.mubr.msk.f32.gmra.mrb[138].mxu1 %vm369_vm1, %v40764_v47 }
 0xff4   : > { %32632 = vmatprep.mubr.msk.f32.mxu1 %vm369_vm1, %v40767_v59 }
 0xff7   : > { %32633 = vmatmul.mubr.msk.f32.gmra.mrb[140].mxu1 %vm369_vm1, %v40776_v36 }
 0xff8   : > { %32635 = vmatprep.mubr.msk.f32.mxu1 %vm369_vm1, %v27092_v39 }
 0xffb   : > { %32636 = vmatmul.mubr.msk.f32.gmra.mrb[142].mxu1 %vm369_vm1, %v27093_v1 }
 0xffc   : > { %32638 = vmatprep.mubr.msk.f32.mxu1 %vm369_vm1, %v27094_v9  ;;  %v42304_v9 = vld [vmem:[#allocation9_spill] sm:$0xff] }
 0xfff   : > { %32639 = vmatmul.mubr.msk.f32.gmra.mrb[144].mxu1 %vm369_vm1, %v27095_v60 }
0x1000   : > { %32641 = vmatprep.mubr.msk.f32.mxu1 %vm369_vm1, %v27096_v62 }
0x1003   : > { %32642 = vmatmul.mubr.msk.f32.gmra.mrb[146].mxu1 %vm369_vm1, %v27097_v14 }
0x1004   : > { %32644 = vmatprep.mubr.msk.f32.mxu1 %vm369_vm1, %v27098_v45 }
0x1007   : > { %32645 = vmatmul.mubr.msk.f32.gmra.mrb[148].mxu1 %vm369_vm1, %v27099_v50  ;;  %v42305_v50 = vld [vmem:[#allocation10_spill] sm:$0xff] }
0x1008   : > { %32649 = vmatprep.mubr.msk.f32.mxu1 %vm369_vm1, %v40562_v17  ;;  %v27145_v17 = vld [vmem:[%s35745_s17 + $0xf52] sm:$0xff] }
0x100b   : > { %32650 = vmatmul.mubr.msk.f32.vlgmr.msra.gmra.mrb[126].mxu1 %vm369_vm1, %v40569_v5  ;;  %v27144_v5 = vld [vmem:[%s35745_s17 + $0xf4a] sm:$0xff] }
0x100c   : > { %32652 = vmatprep.mubr.msk.f32.mxu1 %vm369_vm1, %v40572_v46  ;;  %34019 = vmatpush3.bf16.msra.mxu1 %v36328_v49  ;;  %v42301_v49 = vld [vmem:[#allocation7_spill] sm:$0xff]  ;;  %v27143_v46 = vld [vmem:[%s35745_s17 + $0xf42] sm:$0xff] }
0x100d   : > { %34020 = vmatprep.subr.bf16.mxu1 %v42178_v22 }
0x100f   : > { %32653 = vmatmul.mubr.msk.f32.gmra.mrb[128].mxu1 %vm369_vm1, %v40579_v42  ;;  %v27142_v42 = vld [vmem:[%s35745_s17 + $0xf3a] sm:$0xff] }
0x1010   : > { %32655 = vmatprep.mubr.msk.f32.mxu1 %vm369_vm1, %v40582_v13  ;;  %34022 = vmatpush3.bf16.msra.mxu1 %v42300_v63  ;;  %v42302_v13 = vld [vmem:[#allocation8_spill] sm:$0xff] }
0x1011   : > { %34023 = vmatprep.subr.bf16.mxu1 %v42178_v22 }
0x1013   : > { %32656 = vmatmul.mubr.msk.f32.gmra.mrb[130].mxu1 %vm369_vm1, %v40589_v40  ;;  %v27141_v40 = vld [vmem:[%s35745_s17 + $0xf32] sm:$0xff] }
0x1014   : > { %32658 = vmatprep.mubr.msk.f32.mxu1 %vm369_vm1, %v40592_v2  ;;  %34025 = vmatpush3.bf16.msra.mxu1 %v42301_v49  ;;  %v27146_v2 = vld [vmem:[%s35745_s17 + $0xf5a] sm:$0xff] }
0x1015   : > { %34026 = vmatprep.subr.bf16.mxu1 %v42178_v22 }
0x1017   : > { %32659 = vmatmul.mubr.msk.f32.gmra.mrb[132].mxu1 %vm369_vm1, %v40599_v31  ;;  %v27147_v31 = vld [vmem:[%s35745_s17 + $0xf62] sm:$0xff] }
0x1018   : > { %32661 = vmatprep.mubr.msk.f32.mxu1 %vm369_vm1, %v40817_v43  ;;  %34028 = vmatpush3.bf16.msra.mxu1 %v42302_v13  ;;  %v42306_v13 = vld [vmem:[#allocation11_spill] sm:$0xff] }
0x1019   : > { %34029 = vmatprep.subr.bf16.mxu1 %v42178_v22 }
0x101b   : > { %32662 = vmatmul.mubr.msk.f32.gmra.mrb[134].mxu1 %vm369_vm1, %v40824_v23 }
0x101c   : > { %32664 = vmatprep.mubr.msk.f32.mxu1 %vm369_vm1, %v40827_v12 }
0x101f   : > { %32665 = vmatmul.mubr.msk.f32.gmra.mrb[136].mxu1 %vm369_vm1, %v40834_v27 }
0x1020   : > { %32667 = vmatprep.mubr.msk.f32.mxu1 %vm369_vm1, %v40837_v19 }
0x1023   : > { %32668 = vmatmul.mubr.msk.f32.gmra.mrb[138].mxu1 %vm369_vm1, %v40844_v10 }
0x1024   : > { %32670 = vmatprep.mubr.msk.f32.mxu1 %vm369_vm1, %v40847_v58 }
0x1027   : > { %32671 = vmatmul.mubr.msk.f32.gmra.mrb[140].mxu1 %vm369_vm1, %v40854_v55 }
0x1028   : > { %32673 = vmatprep.mubr.msk.f32.mxu1 %vm369_vm1, %v27141_v40  ;;  %v42307_v40 = vld [vmem:[#allocation12_spill] sm:$0xff] }
0x102b   : > { %32674 = vmatmul.mubr.msk.f32.gmra.mrb[142].mxu1 %vm369_vm1, %v27142_v42 }
0x102c   : > { %32676 = vmatprep.mubr.msk.f32.mxu1 %vm369_vm1, %v27143_v46  ;;  %v42308_v46 = vld [vmem:[#allocation13_spill] sm:$0xff] }
0x102f   : > { %32677 = vmatmul.mubr.msk.f32.gmra.mrb[144].mxu1 %vm369_vm1, %v27144_v5  ;;  %v42309_v5 = vld [vmem:[#allocation14_spill] sm:$0xff] }
0x1030   : > { %32679 = vmatprep.mubr.msk.f32.mxu1 %vm369_vm1, %v27145_v17  ;;  %v42310_v17 = vld [vmem:[#allocation15_spill] sm:$0xff] }
0x1033   : > { %32680 = vmatmul.mubr.msk.f32.gmra.mrb[146].mxu1 %vm369_vm1, %v27146_v2  ;;  %v42311_v2 = vld [vmem:[#allocation16_spill] sm:$0xff] }
0x1034   : > { %32682 = vmatprep.mubr.msk.f32.mxu1 %vm369_vm1, %v27147_v31 }
0x1037   : > { %32683 = vmatmul.mubr.msk.f32.gmra.mrb[148].mxu1 %vm369_vm1, %v27148_v29  ;;  %v42312_v29 = vld [vmem:[#allocation17_spill] sm:$0xff] }
0x1038   : > { %33214 = vmatprep.mubr.msk.f32.mxu1 %vm35641_vm2, %v42303_v24 }
0x10de   : > { %v32651_v8 = vpop.f32.mrb[126].mxu1 }
0x10df   : > { %v20181_v52 = vadd.f32 %v41022_v7, %v32651_v8  ;;  %v20037_v51 = vpop.f32.mrb[127].mxu1  ;;  %v42313_v8 = vld [vmem:[#allocation18_spill] sm:$0xff] }
0x10e0   : > { %v20180_v32 = vadd.f32 %v41022_v7, %v20037_v51 }
0x10e1   : > { %20205 = vst.msk [vmem:[#allocation2 + $0x8] sm:$0xff] %vm3079_vm3, %v20181_v52  ;;  %v42315_v52 = vld [vmem:[#allocation20_spill] sm:$0xff] }
0x10e2   : > { %20204 = vst.msk [vmem:[#allocation2] sm:$0xff] %vm3079_vm3, %v20180_v32  ;;  %v32654_v16 = vpop.f32.mrb[128].mxu1  ;;  %v42316_v32 = vld [vmem:[#allocation21_spill] sm:$0xff] }
0x10e3   : > { %v20183_v3 = vadd.f32 %v41022_v7, %v32654_v16  ;;  %v20047_v21 = vpop.f32.mrb[129].mxu1  ;;  %v42317_v16 = vld [vmem:[#allocation22_spill] sm:$0xff] }
0x10e4   : > { %v20182_v25 = vadd.f32 %v41022_v7, %v20047_v21  ;;  %v42319_v21 = vld [vmem:[#allocation24_spill] sm:$0xff] }
0x10e5   : > { %20207 = vst.msk [vmem:[#allocation2 + $0x18] sm:$0xff] %vm3079_vm3, %v20183_v3  ;;  %v42318_v3 = vld [vmem:[#allocation23_spill] sm:$0xff] }
0x10e6   : > { %20206 = vst.msk [vmem:[#allocation2 + $0x10] sm:$0xff] %vm3079_vm3, %v20182_v25  ;;  %v32657_v15 = vpop.f32.mrb[130].mxu1 }
0x10e7   : > { %v20185_v20 = vadd.f32 %v41022_v7, %v32657_v15  ;;  %v20057_v41 = vpop.f32.mrb[131].mxu1  ;;  %v42320_v15 = vld [vmem:[#allocation25_spill] sm:$0xff] }
0x10e8   : > { %v20184_v44 = vadd.f32 %v41022_v7, %v20057_v41  ;;  %v42322_v41 = vld [vmem:[#allocation27_spill] sm:$0xff] }
0x10e9   : > { %20209 = vst.msk [vmem:[#allocation2 + $0x28] sm:$0xff] %vm3079_vm3, %v20185_v20  ;;  %v42321_v20 = vld [vmem:[#allocation26_spill] sm:$0xff] }
0x10ea   : > { %20208 = vst.msk [vmem:[#allocation2 + $0x20] sm:$0xff] %vm3079_vm3, %v20184_v44  ;;  %v32660_v33 = vpop.f32.mrb[132].mxu1  ;;  %v42323_v44 = vld [vmem:[#allocation28_spill] sm:$0xff] }
0x10eb   : > { %v20187_v0 = vadd.f32 %v41022_v7, %v32660_v33  ;;  %v20067_v18 = vpop.f32.mrb[133].mxu1 }
0x10ec   : > { %v20186_v54 = vadd.f32 %v41022_v7, %v20067_v18  ;;  %v42325_v18 = vld [vmem:[#allocation30_spill] sm:$0xff] }
0x10ed   : > { %20211 = vst.msk [vmem:[#allocation2 + $0x38] sm:$0xff] %vm3079_vm3, %v20187_v0  ;;  %v42324_v0 = vld [vmem:[#allocation29_spill] sm:$0xff] }
0x10ee   : > { %20210 = vst.msk [vmem:[#allocation2 + $0x30] sm:$0xff] %vm3079_vm3, %v20186_v54  ;;  %v32663_v4 = vpop.f32.mrb[134].mxu1  ;;  %v42326_v54 = vld [vmem:[#allocation31_spill] sm:$0xff] }
0x10ef   : > { %v20189_v28 = vadd.f32 %v41022_v7, %v32663_v4  ;;  %v20077_v6 = vpop.f32.mrb[135].mxu1  ;;  %v42327_v4 = vld [vmem:[#allocation32_spill] sm:$0xff] }
0x10f0   : > { %v20188_v61 = vadd.f32 %v41022_v7, %v20077_v6  ;;  %v42328_v6 = vld [vmem:[#allocation33_spill] sm:$0xff] }
0x10f1   : > { %20213 = vst.msk [vmem:[#allocation2 + $0x48] sm:$0xff] %vm3079_vm3, %v20189_v28 }
0x10f2   : > { %20212 = vst.msk [vmem:[#allocation2 + $0x40] sm:$0xff] %vm3079_vm3, %v20188_v61  ;;  %v32666_v47 = vpop.f32.mrb[136].mxu1  ;;  %v42329_v61 = vld [vmem:[#allocation34_spill] sm:$0xff] }
0x10f3   : > { %v20191_v59 = vadd.f32 %v41022_v7, %v32666_v47  ;;  %v20087_v36 = vpop.f32.mrb[137].mxu1  ;;  %v42330_v47 = vld [vmem:[#allocation35_spill] sm:$0xff] }
0x10f4   : > { %v20190_v11 = vadd.f32 %v41022_v7, %v20087_v36 }
0x10f5   : > { %20215 = vst.msk [vmem:[#allocation2 + $0x58] sm:$0xff] %vm3079_vm3, %v20191_v59  ;;  %v20228_v42 = vld [vmem:[#allocation2] ss:$10 sm:$0x7f] }
0x10f6   : > { %20214 = vst.msk [vmem:[#allocation2 + $0x50] sm:$0xff] %vm3079_vm3, %v20190_v11  ;;  %v32669_v43 = vpop.f32.mrb[138].mxu1  ;;  %v20451_v51 = vld [vmem:[#allocation2 + $0x1] ss:$10 sm:$0x7f] }
0x10f7   : > { %v20193_v23 = vadd.f32 %v41022_v7, %v32669_v43  ;;  %v20097_v12 = vpop.f32.mrb[139].mxu1  ;;  %v20676_v28 = vld [vmem:[#allocation2 + $0x2] ss:$10 sm:$0x7f] }
0x10f8   : > { %v20192_v27 = vadd.f32 %v41022_v7, %v20097_v12  ;;  %v42331_v59 = vld [vmem:[#allocation36_spill] sm:$0xff]  ;;  %v42332_v11 = vld [vmem:[#allocation37_spill] sm:$0xff]  ;;  %v42333_v43 = vld [vmem:[#allocation38_spill] sm:$0xff] }
0x10f9   : > { %20217 = vst.msk [vmem:[#allocation2 + $0x68] sm:$0xff] %vm3079_vm3, %v20193_v23  ;;  %v42334_v23 = vld [vmem:[#allocation39_spill] sm:$0xff]  ;;  %v42335_v12 = vld [vmem:[#allocation40_spill] sm:$0xff] }
0x10fa   : > { %20216 = vst.msk [vmem:[#allocation2 + $0x60] sm:$0xff] %vm3079_vm3, %v20192_v27  ;;  %v32672_v19 = vpop.f32.mrb[140].mxu1  ;;  %v35565_v27 = vld [vmem:[%s42060_s1 + $0x4] sm:$0x7] }
0x10fb   : > { %v20195_v10 = vadd.f32 %v41022_v7, %v32672_v19  ;;  %v20107_v58 = vpop.f32.mrb[141].mxu1  ;;  %v27207_v19 = vld [vmem:[%s35745_s17 + $0x10e1] sm:$0xff] }
0x10fc   : > { %v20194_v55 = vadd.f32 %v41022_v7, %v20107_v58  ;;  %v27208_v58 = vld [vmem:[%s35745_s17 + $0x10e9] sm:$0xff] }
0x10fd   : > { %20219 = vst.msk [vmem:[#allocation2 + $0x78] sm:$0xff] %vm3079_vm3, %v20195_v10 }
0x10fe   : > { %20218 = vst.msk [vmem:[#allocation2 + $0x70] sm:$0xff] %vm3079_vm3, %v20194_v55  ;;  %v32675_v48 = vpop.f32.mrb[142].mxu1  ;;  %v35566_v55 = vld [vmem:[%s42060_s1] sm:$0x7] }
0x10ff   : > { %v20197_v57 = vadd.f32 %v41022_v7, %v32675_v48  ;;  %v20117_v53 = vpop.f32.mrb[143].mxu1  ;;  %v27209_v48 = vld [vmem:[%s35745_s17 + $0x10f1] sm:$0xff] }
0x1100   : > { %v20196_v38 = vadd.f32 %v41022_v7, %v20117_v53  ;;  %v27211_v53 = vld [vmem:[%s35745_s17 + $0x1101] sm:$0xff] }
0x1101   : > { %20221 = vst.msk [vmem:[#allocation2 + $0x88] sm:$0xff] %vm3079_vm3, %v20197_v57  ;;  %v27210_v57 = vld [vmem:[%s35745_s17 + $0x10f9] sm:$0xff] }
0x1102   : > { %20220 = vst.msk [vmem:[#allocation2 + $0x80] sm:$0xff] %vm3079_vm3, %v20196_v38  ;;  %v32678_v35 = vpop.f32.mrb[144].mxu1  ;;  %v35567_v38 = vld [vmem:[%s42060_s1 + $0x8] sm:$0x7] }
0x1103   : > { %v20199_v26 = vadd.f32 %v41022_v7, %v32678_v35  ;;  %v20127_v56 = vpop.f32.mrb[145].mxu1  ;;  %v27212_v35 = vld [vmem:[%s35745_s17 + $0x1109] sm:$0xff] }
0x1104   : > { %v20198_v34 = vadd.f32 %v41022_v7, %v20127_v56  ;;  %v27214_v56 = vld [vmem:[%s35745_s17 + $0x1119] sm:$0xff] }
0x1105   : > { %20223 = vst.msk [vmem:[#allocation2 + $0x98] sm:$0xff] %vm3079_vm3, %v20199_v26  ;;  %v20229_v37 = vld [vmem:[#allocation2 + $0x40] ss:$10 sm:$0x7f] }
0x1106   : > { %20222 = vst.msk [vmem:[#allocation2 + $0x90] sm:$0xff] %vm3079_vm3, %v20198_v34  ;;  %v32681_v39 = vpop.f32.mrb[146].mxu1  ;;  %32702 = vmatmul.mubr.msk.f32.vlgmr.msra.gmra.mrb[108].mxu0 %vm3079_vm3, %v20229_v37  ;;  %v20452_v25 = vld [vmem:[#allocation2 + $0x41] ss:$10 sm:$0x7f] }
0x1107   : > { %v20201_v1 = vadd.f32 %v41022_v7, %v32681_v39  ;;  %33923 = vmatpush3.bf16.msra.mxu0 %v42304_v9  ;;  %v20137_v60 = vpop.f32.mrb[147].mxu1  ;;  %32720 = vmatprep.mubr.msk.f32.mxu0 %vm35641_vm2, %v42303_v24  ;;  %v20677_v36 = vld [vmem:[#allocation2 + $0x42] ss:$10 sm:$0x7f] }
0x1108   : > { %v20200_v62 = vadd.f32 %v41022_v7, %v20137_v60  ;;  %33924 = vmatprep.subr.bf16.mxu0 %v42178_v22  ;;  %v27213_v26 = vld [vmem:[%s35745_s17 + $0x1111] sm:$0xff]  ;;  %v41190_v34 = vld [vmem:[%s35745_s17 + $0x1129] sm:$0xff]  ;;  %v41199_v39 = vld [vmem:[%s35745_s17 + $0x1139] sm:$0xff] }
0x1109   : > { %20225 = vst.msk [vmem:[#allocation2 + $0xa8] sm:$0xff] %vm3079_vm3, %v20201_v1  ;;  %v41196_v37 = vld [vmem:[%s35745_s17 + $0x1131] sm:$0xff]  ;;  %v41206_v1 = vld [vmem:[%s35745_s17 + $0x1141] sm:$0xff]  ;;  %v41209_v60 = vld [vmem:[%s35745_s17 + $0x1149] sm:$0xff] }
0x110a   : > { %20224 = vst.msk [vmem:[#allocation2 + $0xa0] sm:$0xff] %vm3079_vm3, %v20200_v62  ;;  %v32684_v14 = vpop.f32.mrb[148].mxu1  ;;  %v41216_v62 = vld [vmem:[%s35745_s17 + $0x1151] sm:$0xff] }
0x110b   : > { %v20203_v45 = vadd.f32 %v41022_v7, %v32684_v14  ;;  %33926 = vmatpush3.bf16.msra.mxu0 %v42305_v50  ;;  %v20147_v63 = vpop.f32.mrb[149].mxu1  ;;  %v41219_v14 = vld [vmem:[%s35745_s17 + $0x1159] sm:$0xff] }
0x110c   : > { %v20202_v49 = vadd.f32 %v41022_v7, %v20147_v63  ;;  %33927 = vmatprep.subr.bf16.mxu0 %v42178_v22  ;;  %v42314_v7 = vld [vmem:[#allocation19_spill] sm:$0xff] }
0x110d   : > { %20227 = vst.msk [vmem:[#allocation2 + $0xb8] sm:$0xff] %vm3079_vm3, %v20203_v45  ;;  %v41226_v45 = vld [vmem:[%s35745_s17 + $0x1161] sm:$0xff]  ;;  %v41229_v63 = vld [vmem:[%s35745_s17 + $0x1171] sm:$0xff] }
0x110e   : > { %20226 = vst.msk [vmem:[#allocation2 + $0xb0] sm:$0xff] %vm3079_vm3, %v20202_v49  ;;  %v41236_v49 = vld [vmem:[%s35745_s17 + $0x1179] sm:$0xff] }
0x110f   : > { %33929 = vmatpush3.bf16.msra.mxu0 %v42306_v13 }
0x1110   : > { %33930 = vmatprep.subr.bf16.mxu0 %v42178_v22 }
0x1113   : > { %33932 = vmatpush3.bf16.msra.mxu0 %v42307_v40 }
0x1114   : > { %33933 = vmatprep.subr.bf16.mxu0 %v42178_v22 }
0x1115   : > { %v20230_v31 = vld [vmem:[#allocation2 + $0x80] ss:$10 sm:$0x7f]  ;;  %v20453_v33 = vld [vmem:[#allocation2 + $0x81] ss:$10 sm:$0x7f] }
0x1116   : > { %32721 = vmatmul.mubr.msk.f32.vlgmr.msra.gmra.mrb[110].mxu0 %vm3079_vm3, %v20228_v42  ;;  %v20678_v10 = vld [vmem:[#allocation2 + $0x82] ss:$10 sm:$0x7f] }
0x1117   : > { %33935 = vmatpush3.bf16.msra.mxu0 %v42308_v46  ;;  %32739 = vmatprep.mubr.msk.f32.mxu0 %vm35641_vm2, %v42303_v24  ;;  %v41239_v42 = vld [vmem:[%s35745_s17 + $0x1181] sm:$0xff] }
0x1118   : > { %33936 = vmatprep.subr.bf16.mxu0 %v42178_v22 }
0x111b   : > { %33938 = vmatpush3.bf16.msra.mxu0 %v42309_v5 }
0x111c   : > { %33939 = vmatprep.subr.bf16.mxu0 %v42178_v22 }
0x111f   : > { %33941 = vmatpush3.bf16.msra.mxu0 %v42310_v17 }
0x1120   : > { %33942 = vmatprep.subr.bf16.mxu0 %v42178_v22 }
0x1123   : > { %33944 = vmatpush3.bf16.msra.mxu0 %v42311_v2 }
0x1124   : > { %33945 = vmatprep.subr.bf16.mxu0 %v42178_v22 }
0x1126   : > { %32740 = vmatmul.mubr.msk.f32.vlgmr.msra.gmra.mrb[112].mxu0 %vm3079_vm3, %v20230_v31  ;;  %v41246_v31 = vld [vmem:[%s35745_s17 + $0x1189] sm:$0xff] }
0x1127   : > { %33947 = vmatpush3.bf16.msra.mxu0 %v42312_v29  ;;  %32758 = vmatprep.mubr.msk.f32.mxu0 %vm35641_vm2, %v42303_v24  ;;  %v35570_v29 = vld [vmem:[%s42060_s1 + $0x14] sm:$0x7] }
0x1128   : > { %33948 = vmatprep.subr.bf16.mxu0 %v42178_v22 }
0x112b   : > { %33950 = vmatpush3.bf16.msra.mxu0 %v42313_v8 }
0x112c   : > { %33951 = vmatprep.subr.bf16.mxu0 %v42178_v22 }
0x112f   : > { %33953 = vmatpush3.bf16.msra.mxu0 %v42314_v7 }
0x1130   : > { %33954 = vmatprep.subr.bf16.mxu0 %v42178_v22 }
0x1133   : > { %33956 = vmatpush3.bf16.msra.mxu0 %v42315_v52  ;;  %v41458_v52 = vld [vmem:[%s35745_s17 + $0x119a] sm:$0xff] }
0x1134   : > { %33957 = vmatprep.subr.bf16.mxu0 %v42178_v22 }
0x1136   : > { %32759 = vmatmul.mubr.msk.f32.vlgmr.msra.gmra.mrb[114].mxu0 %vm3079_vm3, %v20451_v51  ;;  %v41249_v51 = vld [vmem:[%s35745_s17 + $0x1191] sm:$0xff] }
0x1137   : > { %33959 = vmatpush3.bf16.msra.mxu0 %v42316_v32  ;;  %32777 = vmatprep.mubr.msk.f32.mxu0 %vm35641_vm2, %v42303_v24  ;;  %v41451_v32 = vld [vmem:[%s35745_s17 + $0x1192] sm:$0xff] }
0x1138   : > { %33960 = vmatprep.subr.bf16.mxu0 %v42178_v22 }
0x113b   : > { %33962 = vmatpush3.bf16.msra.mxu0 %v42317_v16  ;;  %v41448_v16 = vld [vmem:[%s35745_s17 + $0x118a] sm:$0xff] }
0x113c   : > { %33963 = vmatprep.subr.bf16.mxu0 %v42178_v22 }
0x113f   : > { %33965 = vmatpush3.bf16.msra.mxu0 %v42318_v3 }
0x1140   : > { %33966 = vmatprep.subr.bf16.mxu0 %v42178_v22 }
0x1143   : > { %33968 = vmatpush3.bf16.msra.mxu0 %v42319_v21 }
0x1144   : > { %33969 = vmatprep.subr.bf16.mxu0 %v42178_v22 }
0x1146   : > { %32778 = vmatmul.mubr.msk.f32.vlgmr.msra.gmra.mrb[116].mxu0 %vm3079_vm3, %v20452_v25  ;;  %v41256_v25 = vld [vmem:[%s35745_s17 + $0x1199] sm:$0xff] }
0x1147   : > { %33971 = vmatpush3.bf16.msra.mxu0 %v42320_v15  ;;  %32796 = vmatprep.mubr.msk.f32.mxu0 %vm35641_vm2, %v42303_v24 }
0x1148   : > { %33972 = vmatprep.subr.bf16.mxu0 %v42178_v22 }
0x114b   : > { %33974 = vmatpush3.bf16.msra.mxu0 %v42321_v20  ;;  %v41441_v20 = vld [vmem:[%s35745_s17 + $0x1182] sm:$0xff] }
0x114c   : > { %33975 = vmatprep.subr.bf16.mxu0 %v42178_v22 }
0x114f   : > { %33977 = vmatpush3.bf16.msra.mxu0 %v42322_v41  ;;  %v41438_v41 = vld [vmem:[%s35745_s17 + $0x117a] sm:$0xff] }
0x1150   : > { %33978 = vmatprep.subr.bf16.mxu0 %v42178_v22 }
0x1153   : > { %33980 = vmatpush3.bf16.msra.mxu0 %v42323_v44  ;;  %v41431_v44 = vld [vmem:[%s35745_s17 + $0x1172] sm:$0xff] }
0x1154   : > { %33981 = vmatprep.subr.bf16.mxu0 %v42178_v22 }
0x1156   : > { %32797 = vmatmul.mubr.msk.f32.vlgmr.msra.gmra.mrb[118].mxu0 %vm3079_vm3, %v20453_v33  ;;  %v41259_v33 = vld [vmem:[%s35745_s17 + $0x11a1] sm:$0xff] }
0x1157   : > { %33983 = vmatpush3.bf16.msra.mxu0 %v42324_v0  ;;  %32815 = vmatprep.mubr.msk.f32.mxu0 %vm35641_vm2, %v42303_v24  ;;  %v27285_v0 = vld [vmem:[%s35745_s17 + $0x1102] sm:$0xff] }
0x1158   : > { %33984 = vmatprep.subr.bf16.mxu0 %v42178_v22 }
0x115b   : > { %33986 = vmatpush3.bf16.msra.mxu0 %v42325_v18  ;;  %v27284_v18 = vld [vmem:[%s35745_s17 + $0x10fa] sm:$0xff] }
0x115c   : > { %33987 = vmatprep.subr.bf16.mxu0 %v42178_v22 }
0x115f   : > { %33989 = vmatpush3.bf16.msra.mxu0 %v42326_v54 }
0x1160   : > { %33990 = vmatprep.subr.bf16.mxu0 %v42178_v22 }
0x1163   : > { %33992 = vmatpush3.bf16.msra.mxu0 %v42327_v4 }
0x1164   : > { %33993 = vmatprep.subr.bf16.mxu0 %v42178_v22 }
0x1166   : > { %32816 = vmatmul.mubr.msk.f32.vlgmr.msra.gmra.mrb[120].mxu0 %vm3079_vm3, %v20676_v28  ;;  %v41266_v28 = vld [vmem:[%s35745_s17 + $0x11a9] sm:$0xff] }
0x1167   : > { %33995 = vmatpush3.bf16.msra.mxu0 %v42328_v6  ;;  %32834 = vmatprep.mubr.msk.f32.mxu0 %vm35641_vm2, %v42303_v24 }
0x1168   : > { %33996 = vmatprep.subr.bf16.mxu0 %v42178_v22 }
0x116b   : > { %33998 = vmatpush3.bf16.msra.mxu0 %v42329_v61  ;;  %v27283_v61 = vld [vmem:[%s35745_s17 + $0x10f2] sm:$0xff] }
0x116c   : > { %33999 = vmatprep.subr.bf16.mxu0 %v42178_v22 }
0x116f   : > { %34001 = vmatpush3.bf16.msra.mxu0 %v42330_v47  ;;  %v27282_v47 = vld [vmem:[%s35745_s17 + $0x10ea] sm:$0xff] }
0x1170   : > { %34002 = vmatprep.subr.bf16.mxu0 %v42178_v22 }
0x1173   : > { %34004 = vmatpush3.bf16.msra.mxu0 %v42331_v59  ;;  %v27281_v59 = vld [vmem:[%s35745_s17 + $0x10e2] sm:$0xff] }
0x1174   : > { %34005 = vmatprep.subr.bf16.mxu0 %v42178_v22 }
0x1176   : > { %32835 = vmatmul.mubr.msk.f32.vlgmr.msra.gmra.mrb[122].mxu0 %vm3079_vm3, %v20677_v36  ;;  %v27183_v36 = vld [vmem:[%s35745_s17 + $0x10e0] sm:$0xff] }
0x1177   : > { %34007 = vmatpush3.bf16.msra.mxu0 %v42332_v11  ;;  %32853 = vmatprep.mubr.msk.f32.mxu0 %vm35641_vm2, %v42303_v24  ;;  %v41360_v11 = vld [vmem:[%s35745_s17 + $0x11a0] sm:$0xff] }
0x1178   : > { %34008 = vmatprep.subr.bf16.mxu0 %v42178_v22 }
0x117b   : > { %34010 = vmatpush3.bf16.msra.mxu0 %v42333_v43  ;;  %v41357_v43 = vld [vmem:[%s35745_s17 + $0x1198] sm:$0xff] }
0x117c   : > { %34011 = vmatprep.subr.bf16.mxu0 %v42178_v22 }
0x117f   : > { %34013 = vmatpush3.bf16.msra.mxu0 %v42334_v23  ;;  %v41350_v23 = vld [vmem:[%s35745_s17 + $0x1190] sm:$0xff] }
0x1180   : > { %34014 = vmatprep.subr.bf16.mxu0 %v42178_v22 }
0x1183   : > { %34016 = vmatpush3.bf16.msra.mxu0 %v42335_v12  ;;  %v41347_v12 = vld [vmem:[%s35745_s17 + $0x1188] sm:$0xff] }
0x1184   : > { %32856 = vmatprep.subr.msk.mxu0 %vm442_vm0, %v35565_v27 }
0x1186   : > { %32854 = vmatmul.mubr.msk.f32.vlgmr.msra.gmra.mrb[124].mxu0 %vm3079_vm3, %v20678_v10  ;;  %v27186_v10 = vld [vmem:[%s35745_s17 + $0x10f8] sm:$0xff] }
0x1187   : > { %32857 = vmatpush3.msk.msra.mxu0 %vm442_vm0, %v35565_v27  ;;  %32858 = vmatprep.mubr.msk.f32.mxu0 %vm369_vm1, %v27207_v19  ;;  %v27184_v27 = vld [vmem:[%s35745_s17 + $0x10e8] sm:$0xff]  ;;  %v27185_v19 = vld [vmem:[%s35745_s17 + $0x10f0] sm:$0xff] }
0x1188   : > { %32894 = vmatprep.subr.msk.mxu0 %vm442_vm0, %v35566_v55 }
0x118a   : > { %32859 = vmatmul.mubr.msk.f32.vlgmr.msra.gmra.mrb[126].mxu0 %vm369_vm1, %v27208_v58  ;;  %v27187_v58 = vld [vmem:[%s35745_s17 + $0x1100] sm:$0xff] }
0x118b   : > { %32895 = vmatpush3.msk.msra.mxu0 %vm442_vm0, %v35566_v55  ;;  %32861 = vmatprep.mubr.msk.f32.mxu0 %vm369_vm1, %v27209_v48  ;;  %v35568_v55 = vld [vmem:[%s42060_s1 + $0xc] sm:$0x7] }
0x118c   : > { %32932 = vmatprep.subr.msk.mxu0 %vm442_vm0, %v35567_v38  ;;  %v27188_v48 = vld [vmem:[%s35745_s17 + $0x1108] sm:$0xff] }
0x118e   : > { %32862 = vmatmul.mubr.msk.f32.gmra.mrb[128].mxu0 %vm369_vm1, %v27210_v57  ;;  %v27189_v57 = vld [vmem:[%s35745_s17 + $0x1110] sm:$0xff] }
0x118f   : > { %32864 = vmatprep.mubr.msk.f32.mxu0 %vm369_vm1, %v27211_v53  ;;  %v27190_v53 = vld [vmem:[%s35745_s17 + $0x1118] sm:$0xff] }
0x1192   : > { %32865 = vmatmul.mubr.msk.f32.gmra.mrb[130].mxu0 %vm369_vm1, %v27212_v35  ;;  %v41297_v35 = vld [vmem:[%s35745_s17 + $0x1130] sm:$0xff] }
0x1193   : > { %32867 = vmatprep.mubr.msk.f32.mxu0 %vm369_vm1, %v27213_v26  ;;  %v41300_v26 = vld [vmem:[%s35745_s17 + $0x1138] sm:$0xff] }
0x1196   : > { %32868 = vmatmul.mubr.msk.f32.gmra.mrb[132].mxu0 %vm369_vm1, %v27214_v56  ;;  %v41307_v56 = vld [vmem:[%s35745_s17 + $0x1140] sm:$0xff] }
0x1197   : > { %32870 = vmatprep.mubr.msk.f32.mxu0 %vm369_vm1, %v41190_v34 }
0x119a   : > { %32871 = vmatmul.mubr.msk.f32.gmra.mrb[134].mxu0 %vm369_vm1, %v41196_v37 }
0x119b   : > { %32873 = vmatprep.mubr.msk.f32.mxu0 %vm369_vm1, %v41199_v39 }
0x119e   : > { %32874 = vmatmul.mubr.msk.f32.gmra.mrb[136].mxu0 %vm369_vm1, %v41206_v1 }
0x119f   : > { %32876 = vmatprep.mubr.msk.f32.mxu0 %vm369_vm1, %v41209_v60 }
0x11a2   : > { %32877 = vmatmul.mubr.msk.f32.gmra.mrb[138].mxu0 %vm369_vm1, %v41216_v62 }
0x11a3   : > { %32879 = vmatprep.mubr.msk.f32.mxu0 %vm369_vm1, %v41219_v14 }
0x11a6   : > { %32880 = vmatmul.mubr.msk.f32.gmra.mrb[140].mxu0 %vm369_vm1, %v41226_v45 }
0x11a7   : > { %32882 = vmatprep.mubr.msk.f32.mxu0 %vm369_vm1, %v41229_v63 }
0x11aa   : > { %32883 = vmatmul.mubr.msk.f32.gmra.mrb[142].mxu0 %vm369_vm1, %v41236_v49 }
0x11ab   : > { %32885 = vmatprep.mubr.msk.f32.mxu0 %vm369_vm1, %v41239_v42 }
0x11ae   : > { %32886 = vmatmul.mubr.msk.f32.gmra.mrb[144].mxu0 %vm369_vm1, %v41246_v31 }
0x11af   : > { %32888 = vmatprep.mubr.msk.f32.mxu0 %vm369_vm1, %v41249_v51 }
0x11b2   : > { %32889 = vmatmul.mubr.msk.f32.gmra.mrb[146].mxu0 %vm369_vm1, %v41256_v25 }
0x11b3   : > { %32891 = vmatprep.mubr.msk.f32.mxu0 %vm369_vm1, %v41259_v33 }
0x11b6   : > { %32892 = vmatmul.mubr.msk.f32.gmra.mrb[148].mxu0 %vm369_vm1, %v41266_v28 }
0x11b7   : > { %32896 = vmatprep.mubr.msk.f32.mxu0 %vm369_vm1, %v27183_v36  ;;  %v41310_v36 = vld [vmem:[%s35745_s17 + $0x1148] sm:$0xff] }
0x11ba   : > { %32897 = vmatmul.mubr.msk.f32.vlgmr.msra.gmra.mrb[126].mxu0 %vm369_vm1, %v27184_v27  ;;  %v41317_v27 = vld [vmem:[%s35745_s17 + $0x1150] sm:$0xff] }
0x11bb   : > { %32933 = vmatpush3.msk.msra.mxu0 %vm442_vm0, %v35567_v38  ;;  %32899 = vmatprep.mubr.msk.f32.mxu0 %vm369_vm1, %v27185_v19  ;;  %v41291_v38 = vld [vmem:[%s35745_s17 + $0x1128] sm:$0xff]  ;;  %v41320_v19 = vld [vmem:[%s35745_s17 + $0x1158] sm:$0xff] }
0x11bc   : > { %32970 = vmatprep.subr.msk.mxu0 %vm442_vm0, %v35568_v55 }
0x11be   : > { %32900 = vmatmul.mubr.msk.f32.gmra.mrb[128].mxu0 %vm369_vm1, %v27186_v10  ;;  %v41327_v10 = vld [vmem:[%s35745_s17 + $0x1160] sm:$0xff] }
0x11bf   : > { %32902 = vmatprep.mubr.msk.f32.mxu0 %vm369_vm1, %v27187_v58  ;;  %v41330_v58 = vld [vmem:[%s35745_s17 + $0x1170] sm:$0xff] }
0x11c2   : > { %32903 = vmatmul.mubr.msk.f32.gmra.mrb[130].mxu0 %vm369_vm1, %v27188_v48  ;;  %v41337_v48 = vld [vmem:[%s35745_s17 + $0x1178] sm:$0xff] }
0x11c3   : > { %32905 = vmatprep.mubr.msk.f32.mxu0 %vm369_vm1, %v27189_v57  ;;  %v41340_v57 = vld [vmem:[%s35745_s17 + $0x1180] sm:$0xff] }
0x11c6   : > { %32906 = vmatmul.mubr.msk.f32.gmra.mrb[132].mxu0 %vm369_vm1, %v27190_v53 }
0x11c7   : > { %32908 = vmatprep.mubr.msk.f32.mxu0 %vm369_vm1, %v41291_v38 }
0x11ca   : > { %32909 = vmatmul.mubr.msk.f32.gmra.mrb[134].mxu0 %vm369_vm1, %v41297_v35 }
0x11cb   : > { %32911 = vmatprep.mubr.msk.f32.mxu0 %vm369_vm1, %v41300_v26 }
0x11ce   : > { %32912 = vmatmul.mubr.msk.f32.gmra.mrb[136].mxu0 %vm369_vm1, %v41307_v56 }
0x11cf   : > { %32914 = vmatprep.mubr.msk.f32.mxu0 %vm369_vm1, %v41310_v36 }
0x11d2   : > { %32915 = vmatmul.mubr.msk.f32.gmra.mrb[138].mxu0 %vm369_vm1, %v41317_v27 }
0x11d3   : > { %32917 = vmatprep.mubr.msk.f32.mxu0 %vm369_vm1, %v41320_v19 }
0x11d6   : > { %32918 = vmatmul.mubr.msk.f32.gmra.mrb[140].mxu0 %vm369_vm1, %v41327_v10 }
0x11d7   : > { %32920 = vmatprep.mubr.msk.f32.mxu0 %vm369_vm1, %v41330_v58 }
0x11d9   : > { %v20300_v53 = vpop.f32.mrb[108].mxu0 }
0x11da   : > { %32921 = vmatmul.mubr.msk.f32.gmra.mrb[142].mxu0 %vm369_vm1, %v41337_v48  ;;  %v32703_v30 = vpop.f32.mrb[109].mxu0 }
0x11db   : > { %32923 = vmatprep.mubr.msk.f32.mxu0 %vm369_vm1, %v41340_v57  ;;  %v41367_v30 = vld [vmem:[%s35745_s17 + $0x11a8] sm:$0xff] }
0x11de   : > { %32924 = vmatmul.mubr.msk.f32.gmra.mrb[144].mxu0 %vm369_vm1, %v41347_v12 }
0x11df   : > { %32926 = vmatprep.mubr.msk.f32.mxu0 %vm369_vm1, %v41350_v23 }
0x11e2   : > { %32927 = vmatmul.mubr.msk.f32.gmra.mrb[146].mxu0 %vm369_vm1, %v41357_v43 }
0x11e3   : > { %32929 = vmatprep.mubr.msk.f32.mxu0 %vm369_vm1, %v41360_v11 }
0x11e6   : > { %32930 = vmatmul.mubr.msk.f32.gmra.mrb[148].mxu0 %vm369_vm1, %v41367_v30 }
0x11e7   : > { %32934 = vmatprep.mubr.msk.f32.mxu0 %vm369_vm1, %v27281_v59  ;;  %v35569_v59 = vld [vmem:[%s42060_s1 + $0x10] sm:$0x7] }
0x11e9   : > { %v20373_v6 = vpop.f32.mrb[110].mxu0 }
0x11ea   : > { %v20374_v4 = vadd.f32 %v20373_v6, %v20300_v53  ;;  %v32722_v54 = vpop.f32.mrb[111].mxu0  ;;  %32935 = vmatmul.mubr.msk.f32.vlgmr.msra.gmra.mrb[126].mxu0 %vm369_vm1, %v27282_v47  ;;  %v27287_v6 = vld [vmem:[%s35745_s17 + $0x1112] sm:$0xff]  ;;  %v41392_v47 = vld [vmem:[%s35745_s17 + $0x112a] sm:$0xff] }
0x11eb   : > { %32971 = vmatpush3.msk.msra.mxu0 %vm442_vm0, %v35568_v55  ;;  %32937 = vmatprep.mubr.msk.f32.mxu0 %vm369_vm1, %v27283_v61  ;;  %v27286_v54 = vld [vmem:[%s35745_s17 + $0x110a] sm:$0xff]  ;;  %v27288_v61 = vld [vmem:[%s35745_s17 + $0x111a] sm:$0xff] }
0x11ec   : > { %33008 = vmatprep.subr.msk.mxu0 %vm442_vm0, %v35569_v59 }
0x11ee   : > { %32938 = vmatmul.mubr.msk.f32.gmra.mrb[128].mxu0 %vm369_vm1, %v27284_v18  ;;  %v41401_v18 = vld [vmem:[%s35745_s17 + $0x113a] sm:$0xff] }
0x11ef   : > { %32940 = vmatprep.mubr.msk.f32.mxu0 %vm369_vm1, %v27285_v0  ;;  %v41398_v0 = vld [vmem:[%s35745_s17 + $0x1132] sm:$0xff] }
0x11f2   : > { %32941 = vmatmul.mubr.msk.f32.gmra.mrb[130].mxu0 %vm369_vm1, %v27286_v54 }
0x11f3   : > { %32943 = vmatprep.mubr.msk.f32.mxu0 %vm369_vm1, %v27287_v6  ;;  %v41408_v6 = vld [vmem:[%s35745_s17 + $0x1142] sm:$0xff] }
0x11f6   : > { %32944 = vmatmul.mubr.msk.f32.gmra.mrb[132].mxu0 %vm369_vm1, %v27288_v61  ;;  %v41411_v61 = vld [vmem:[%s35745_s17 + $0x114a] sm:$0xff] }
0x11f7   : > { %32946 = vmatprep.mubr.msk.f32.mxu0 %vm369_vm1, %v41392_v47 }
0x11f9   : > { %v20446_v55 = vpop.f32.mrb[112].mxu0 }
0x11fa   : > { %v20450_v53 = vadd.f32 %v20446_v55, %v20374_v4  ;;  %v32741_v54 = vpop.f32.mrb[113].mxu0  ;;  %32947 = vmatmul.mubr.msk.f32.gmra.mrb[134].mxu0 %vm369_vm1, %v41398_v0  ;;  %v41418_v4 = vld [vmem:[%s35745_s17 + $0x1152] sm:$0xff]  ;;  %v41421_v55 = vld [vmem:[%s35745_s17 + $0x115a] sm:$0xff] }
0x11fb   : > { %32949 = vmatprep.mubr.msk.f32.mxu0 %vm369_vm1, %v41401_v18  ;;  %v41428_v54 = vld [vmem:[%s35745_s17 + $0x1162] sm:$0xff] }
0x11fe   : > { %32950 = vmatmul.mubr.msk.f32.gmra.mrb[136].mxu0 %vm369_vm1, %v41408_v6 }
0x11ff   : > { %32952 = vmatprep.mubr.msk.f32.mxu0 %vm369_vm1, %v41411_v61 }
0x1202   : > { %32953 = vmatmul.mubr.msk.f32.gmra.mrb[138].mxu0 %vm369_vm1, %v41418_v4 }
0x1203   : > { %32955 = vmatprep.mubr.msk.f32.mxu0 %vm369_vm1, %v41421_v55 }
0x1206   : > { %32956 = vmatmul.mubr.msk.f32.gmra.mrb[140].mxu0 %vm369_vm1, %v41428_v54 }
0x1207   : > { %32958 = vmatprep.mubr.msk.f32.mxu0 %vm369_vm1, %v41431_v44 }
0x1209   : > { %v20523_v15 = vpop.f32.mrb[114].mxu0 }
0x120a   : > { %v20527_v21 = vadd.f32 %v20523_v15, %v20450_v53  ;;  %v32760_v3 = vpop.f32.mrb[115].mxu0  ;;  %32959 = vmatmul.mubr.msk.f32.gmra.mrb[142].mxu0 %vm369_vm1, %v41438_v41  ;;  %v41461_v15 = vld [vmem:[%s35745_s17 + $0x11a2] sm:$0xff] }
0x120b   : > { %32961 = vmatprep.mubr.msk.f32.mxu0 %vm369_vm1, %v41441_v20  ;;  %v41468_v3 = vld [vmem:[%s35745_s17 + $0x11aa] sm:$0xff] }
0x120e   : > { %32962 = vmatmul.mubr.msk.f32.gmra.mrb[144].mxu0 %vm369_vm1, %v41448_v16 }
0x120f   : > { %32964 = vmatprep.mubr.msk.f32.mxu0 %vm369_vm1, %v41451_v32 }
0x1212   : > { %32965 = vmatmul.mubr.msk.f32.gmra.mrb[146].mxu0 %vm369_vm1, %v41458_v52 }
0x1213   : > { %32967 = vmatprep.mubr.msk.f32.mxu0 %vm369_vm1, %v41461_v15 }
0x1216   : > { %32968 = vmatmul.mubr.msk.f32.gmra.mrb[148].mxu0 %vm369_vm1, %v41468_v3 }
0x1217   : > { %32972 = vmatprep.mubr.msk.f32.mxu0 %vm369_vm1, %v41291_v38 }
0x1219   : > { %v20597_v53 = vpop.f32.mrb[116].mxu0 }
0x121a   : > { %v20601_v7 = vadd.f32 %v20597_v53, %v20527_v21  ;;  %v32779_v8 = vpop.f32.mrb[117].mxu0  ;;  %32973 = vmatmul.mubr.msk.f32.vlgmr.msra.gmra.mrb[126].mxu0 %vm369_vm1, %v41297_v35  ;;  %v41515_v35 = vld [vmem:[%s35745_s17 + $0x11c0] sm:$0xff]  ;;  %v41538_v53 = vld [vmem:[%s35745_s17 + $0x11e8] sm:$0xff] }
0x121b   : > { %33009 = vmatpush3.msk.msra.mxu0 %vm442_vm0, %v35569_v59  ;;  %32975 = vmatprep.mubr.msk.f32.mxu0 %vm369_vm1, %v41300_v26  ;;  %v41518_v26 = vld [vmem:[%s35745_s17 + $0x11c8] sm:$0xff]  ;;  %v41535_v59 = vld [vmem:[%s35745_s17 + $0x11e0] sm:$0xff] }
0x121c   : > { %33046 = vmatprep.subr.msk.mxu0 %vm442_vm0, %v35570_v29 }
0x121e   : > { %32976 = vmatmul.mubr.msk.f32.gmra.mrb[128].mxu0 %vm369_vm1, %v41307_v56 }
0x121f   : > { %32978 = vmatprep.mubr.msk.f32.mxu0 %vm369_vm1, %v41310_v36 }
0x1222   : > { %32979 = vmatmul.mubr.msk.f32.gmra.mrb[130].mxu0 %vm369_vm1, %v41317_v27 }
0x1223   : > { %32981 = vmatprep.mubr.msk.f32.mxu0 %vm369_vm1, %v41320_v19  ;;  %v41525_v19 = vld [vmem:[%s35745_s17 + $0x11d0] sm:$0xff] }
0x1226   : > { %32982 = vmatmul.mubr.msk.f32.gmra.mrb[132].mxu0 %vm369_vm1, %v41327_v10  ;;  %v41528_v10 = vld [vmem:[%s35745_s17 + $0x11d8] sm:$0xff] }
0x1227   : > { %32984 = vmatprep.mubr.msk.f32.mxu0 %vm369_vm1, %v41330_v58 }
0x1229   : > { %v20671_v8 = vpop.f32.mrb[118].mxu0 }
0x122a   : > { %v20675_v21 = vadd.f32 %v20671_v8, %v20601_v7  ;;  %v32798_v38 = vpop.f32.mrb[119].mxu0  ;;  %32985 = vmatmul.mubr.msk.f32.gmra.mrb[134].mxu0 %vm369_vm1, %v41337_v48  ;;  %v41508_v7 = vld [vmem:[%s35745_s17 + $0x11b8] sm:$0xff]  ;;  %v41545_v8 = vld [vmem:[%s35745_s17 + $0x11f0] sm:$0xff] }
0x122b   : > { %32987 = vmatprep.mubr.msk.f32.mxu0 %vm369_vm1, %v41340_v57 }
0x122e   : > { %32988 = vmatmul.mubr.msk.f32.gmra.mrb[136].mxu0 %vm369_vm1, %v41347_v12 }
0x122f   : > { %32990 = vmatprep.mubr.msk.f32.mxu0 %vm369_vm1, %v41350_v23 }
0x1232   : > { %32991 = vmatmul.mubr.msk.f32.gmra.mrb[138].mxu0 %vm369_vm1, %v41357_v43 }
0x1233   : > { %32993 = vmatprep.mubr.msk.f32.mxu0 %vm369_vm1, %v41360_v11 }
0x1236   : > { %32994 = vmatmul.mubr.msk.f32.gmra.mrb[140].mxu0 %vm369_vm1, %v41367_v30 }
0x1237   : > { %32996 = vmatprep.mubr.msk.f32.mxu0 %vm369_vm1, %v41508_v7 }
0x1239   : > { %v20748_v56 = vpop.f32.mrb[120].mxu0 }
0x123a   : > { %v20752_v36 = vadd.f32 %v20748_v56, %v20675_v21  ;;  %v32817_v27 = vpop.f32.mrb[121].mxu0  ;;  %32997 = vmatmul.mubr.msk.f32.gmra.mrb[142].mxu0 %vm369_vm1, %v41515_v35 }
0x123b   : > { %32999 = vmatprep.mubr.msk.f32.mxu0 %vm369_vm1, %v41518_v26  ;;  %v35571_v27 = vld [vmem:[%s42060_s1 + $0x18] sm:$0x7] }
0x123e   : > { %33000 = vmatmul.mubr.msk.f32.gmra.mrb[144].mxu0 %vm369_vm1, %v41525_v19 }
0x123f   : > { %33002 = vmatprep.mubr.msk.f32.mxu0 %vm369_vm1, %v41528_v10 }
0x1242   : > { %33003 = vmatmul.mubr.msk.f32.gmra.mrb[146].mxu0 %vm369_vm1, %v41535_v59 }
0x1243   : > { %33005 = vmatprep.mubr.msk.f32.mxu0 %vm369_vm1, %v41538_v53 }
0x1246   : > { %33006 = vmatmul.mubr.msk.f32.gmra.mrb[148].mxu0 %vm369_vm1, %v41545_v8 }
0x1247   : > { %33010 = vmatprep.mubr.msk.f32.mxu0 %vm369_vm1, %v41190_v34 }
0x1249   : > { %v20822_v21 = vpop.f32.mrb[122].mxu0 }
0x124a   : > { %v20826_v38 = vadd.f32 %v20822_v21, %v20752_v36  ;;  %v32836_v56 = vpop.f32.mrb[123].mxu0  ;;  %33011 = vmatmul.mubr.msk.f32.vlgmr.msra.gmra.mrb[126].mxu0 %vm369_vm1, %v41196_v37  ;;  %v41605_v36 = vld [vmem:[%s35745_s17 + $0x11c9] sm:$0xff]  ;;  %v41612_v21 = vld [vmem:[%s35745_s17 + $0x11d1] sm:$0xff] }
0x124b   : > { %33047 = vmatpush3.msk.msra.mxu0 %vm442_vm0, %v35570_v29  ;;  %33013 = vmatprep.mubr.msk.f32.mxu0 %vm369_vm1, %v41199_v39  ;;  %v41579_v39 = vld [vmem:[%s42063_s4] ss:$0 sm:$0xff]  ;;  %v41622_v56 = vld [vmem:[%s35745_s17 + $0x11e1] sm:$0xff] }
0x124c   : > { %33084 = vmatprep.subr.msk.mxu0 %vm442_vm0, %v35571_v27 }
0x124e   : > { %33014 = vmatmul.mubr.msk.f32.gmra.mrb[128].mxu0 %vm369_vm1, %v41206_v1 }
0x124f   : > { %33016 = vmatprep.mubr.msk.f32.mxu0 %vm369_vm1, %v41209_v60  ;;  %v42336_v60 = vld [vmem:[#allocation41_spill] sm:$0xff] }
0x1252   : > { %33017 = vmatmul.mubr.msk.f32.gmra.mrb[130].mxu0 %vm369_vm1, %v41216_v62 }
0x1253   : > { %33019 = vmatprep.mubr.msk.f32.mxu0 %vm369_vm1, %v41219_v14  ;;  %v41595_v14 = vld [vmem:[%s35745_s17 + $0x11b9] sm:$0xff] }
0x1256   : > { %33020 = vmatmul.mubr.msk.f32.gmra.mrb[132].mxu0 %vm369_vm1, %v41226_v45  ;;  %v41602_v45 = vld [vmem:[%s35745_s17 + $0x11c1] sm:$0xff] }
0x1257   : > { %33022 = vmatprep.mubr.msk.f32.mxu0 %vm369_vm1, %v41229_v63 }
0x1259   : > { %v20896_v29 = vpop.f32.mrb[124].mxu0 }
0x125a   : > { %v20900_v34 = vadd.f32 %v20896_v29, %v20826_v38  ;;  %v32855_v37 = vpop.f32.mrb[125].mxu0  ;;  %33023 = vmatmul.mubr.msk.f32.gmra.mrb[134].mxu0 %vm369_vm1, %v41236_v49  ;;  %v41615_v38 = vld [vmem:[%s35745_s17 + $0x11d9] sm:$0xff]  ;;  %v41625_v29 = vld [vmem:[%s35745_s17 + $0x11e9] sm:$0xff] }
0x125b   : > { %33025 = vmatprep.mubr.msk.f32.mxu0 %vm369_vm1, %v41239_v42  ;;  %v35573_v37 = vld [vmem:[%s42060_s1 + $0x1c] sm:$0x7] }
0x125c   : > { %v41582_v1 = vadd.f32 %v41579_v39, %v20900_v34  ;;  %v41632_v34 = vld [vmem:[%s35745_s17 + $0x11f1] sm:$0xff] }
0x125e   : > { %v24373_v62 = vmax.f32 %v42336_v60, %v41582_v1  ;;  %33026 = vmatmul.mubr.msk.f32.gmra.mrb[136].mxu0 %vm369_vm1, %v41246_v31 }
0x125f   : > { %33028 = vmatprep.mubr.msk.f32.mxu0 %vm369_vm1, %v41249_v51 }
0x1262   : > { %33029 = vmatmul.mubr.msk.f32.gmra.mrb[138].mxu0 %vm369_vm1, %v41256_v25 }
0x1263   : > { %33031 = vmatprep.mubr.msk.f32.mxu0 %vm369_vm1, %v41259_v33 }
0x1266   : > { %33032 = vmatmul.mubr.msk.f32.gmra.mrb[140].mxu0 %vm369_vm1, %v41266_v28 }
0x1267   : > { %33034 = vmatprep.mubr.msk.f32.mxu0 %vm369_vm1, %v41595_v14 }
0x126a   : > { %33035 = vmatmul.mubr.msk.f32.gmra.mrb[142].mxu0 %vm369_vm1, %v41602_v45 }
0x126b   : > { %33037 = vmatprep.mubr.msk.f32.mxu0 %vm369_vm1, %v41605_v36 }
0x126e   : > { %33038 = vmatmul.mubr.msk.f32.gmra.mrb[144].mxu0 %vm369_vm1, %v41612_v21 }
0x126f   : > { %33040 = vmatprep.mubr.msk.f32.mxu0 %vm369_vm1, %v41615_v38 }
0x1272   : > { %33041 = vmatmul.mubr.msk.f32.gmra.mrb[146].mxu0 %vm369_vm1, %v41622_v56 }
0x1273   : > { %33043 = vmatprep.mubr.msk.f32.mxu0 %vm369_vm1, %v41625_v29 }
0x1276   : > { %33044 = vmatmul.mubr.msk.f32.gmra.mrb[148].mxu0 %vm369_vm1, %v41632_v34 }
0x1277   : > { %33048 = vmatprep.mubr.msk.f32.mxu0 %vm369_vm1, %v41392_v47  ;;  %v41672_v47 = vld [vmem:[%s35745_s17 + $0x11ba] sm:$0xff] }
0x127a   : > { %33049 = vmatmul.mubr.msk.f32.vlgmr.msra.gmra.mrb[126].mxu0 %vm369_vm1, %v41398_v0  ;;  %v41679_v0 = vld [vmem:[%s35745_s17 + $0x11c2] sm:$0xff] }
0x127b   : > { %33085 = vmatpush3.msk.msra.mxu0 %vm442_vm0, %v35571_v27  ;;  %33051 = vmatprep.mubr.msk.f32.mxu0 %vm369_vm1, %v41401_v18  ;;  %v41682_v18 = vld [vmem:[%s35745_s17 + $0x11ca] sm:$0xff]  ;;  %v35574_v27 = vld [vmem:[%s42060_s1 + $0x20] sm:$0x7] }
0x127c   : > { %33122 = vmatprep.subr.msk.mxu0 %vm442_vm0, %v35573_v37 }
0x127e   : > { %33052 = vmatmul.mubr.msk.f32.gmra.mrb[128].mxu0 %vm369_vm1, %v41408_v6  ;;  %v41689_v6 = vld [vmem:[%s35745_s17 + $0x11d2] sm:$0xff] }
0x127f   : > { %33054 = vmatprep.mubr.msk.f32.mxu0 %vm369_vm1, %v41411_v61  ;;  %v41692_v61 = vld [vmem:[%s35745_s17 + $0x11da] sm:$0xff] }
0x1282   : > { %33055 = vmatmul.mubr.msk.f32.gmra.mrb[130].mxu0 %vm369_vm1, %v41418_v4  ;;  %v41699_v4 = vld [vmem:[%s35745_s17 + $0x11e2] sm:$0xff] }
0x1283   : > { %33057 = vmatprep.mubr.msk.f32.mxu0 %vm369_vm1, %v41421_v55  ;;  %v41702_v55 = vld [vmem:[%s35745_s17 + $0x11ea] sm:$0xff] }
0x1286   : > { %33058 = vmatmul.mubr.msk.f32.gmra.mrb[132].mxu0 %vm369_vm1, %v41428_v54  ;;  %v41709_v54 = vld [vmem:[%s35745_s17 + $0x11f2] sm:$0xff] }
0x1287   : > { %33060 = vmatprep.mubr.msk.f32.mxu0 %vm369_vm1, %v41431_v44 }
0x128a   : > { %33061 = vmatmul.mubr.msk.f32.gmra.mrb[134].mxu0 %vm369_vm1, %v41438_v41 }
0x128b   : > { %33063 = vmatprep.mubr.msk.f32.mxu0 %vm369_vm1, %v41441_v20 }
0x128e   : > { %33064 = vmatmul.mubr.msk.f32.gmra.mrb[136].mxu0 %vm369_vm1, %v41448_v16 }
0x128f   : > { %33066 = vmatprep.mubr.msk.f32.mxu0 %vm369_vm1, %v41451_v32 }
0x1292   : > { %33067 = vmatmul.mubr.msk.f32.gmra.mrb[138].mxu0 %vm369_vm1, %v41458_v52 }
0x1293   : > { %33069 = vmatprep.mubr.msk.f32.mxu0 %vm369_vm1, %v41461_v15 }
0x1296   : > { %33070 = vmatmul.mubr.msk.f32.gmra.mrb[140].mxu0 %vm369_vm1, %v41468_v3 }
0x1297   : > { %33072 = vmatprep.mubr.msk.f32.mxu0 %vm369_vm1, %v41672_v47 }
0x129a   : > { %33073 = vmatmul.mubr.msk.f32.gmra.mrb[142].mxu0 %vm369_vm1, %v41679_v0 }
0x129b   : > { %33075 = vmatprep.mubr.msk.f32.mxu0 %vm369_vm1, %v41682_v18 }
0x129e   : > { %33076 = vmatmul.mubr.msk.f32.gmra.mrb[144].mxu0 %vm369_vm1, %v41689_v6 }
0x129f   : > { %33078 = vmatprep.mubr.msk.f32.mxu0 %vm369_vm1, %v41692_v61 }
0x12a2   : > { %33079 = vmatmul.mubr.msk.f32.gmra.mrb[146].mxu0 %vm369_vm1, %v41699_v4 }
0x12a3   : > { %33081 = vmatprep.mubr.msk.f32.mxu0 %vm369_vm1, %v41702_v55 }
0x12a6   : > { %33082 = vmatmul.mubr.msk.f32.gmra.mrb[148].mxu0 %vm369_vm1, %v41709_v54 }
0x12a7   : > { %33086 = vmatprep.mubr.msk.f32.mxu0 %vm369_vm1, %v41330_v58  ;;  %v27497_v58 = vld [vmem:[%s35745_s17 + $0x1220] sm:$0xff] }
0x12aa   : > { %33087 = vmatmul.mubr.msk.f32.vlgmr.msra.gmra.mrb[126].mxu0 %vm369_vm1, %v41337_v48  ;;  %v27498_v48 = vld [vmem:[%s35745_s17 + $0x1228] sm:$0xff] }
0x12ab   : > { %33123 = vmatpush3.msk.msra.mxu0 %vm442_vm0, %v35573_v37  ;;  %33089 = vmatprep.mubr.msk.f32.mxu0 %vm369_vm1, %v41340_v57  ;;  %v27499_v57 = vld [vmem:[%s35745_s17 + $0x1230] sm:$0xff] }
0x12ac   : > { %33160 = vmatprep.subr.msk.mxu0 %vm442_vm0, %v35574_v27 }
0x12ae   : > { %33090 = vmatmul.mubr.msk.f32.gmra.mrb[128].mxu0 %vm369_vm1, %v41347_v12  ;;  %v27496_v12 = vld [vmem:[%s35745_s17 + $0x1218] sm:$0xff] }
0x12af   : > { %33092 = vmatprep.mubr.msk.f32.mxu0 %vm369_vm1, %v41350_v23  ;;  %v27495_v23 = vld [vmem:[%s35745_s17 + $0x1210] sm:$0xff] }
0x12b2   : > { %33093 = vmatmul.mubr.msk.f32.gmra.mrb[130].mxu0 %vm369_vm1, %v41357_v43  ;;  %v27494_v43 = vld [vmem:[%s35745_s17 + $0x1208] sm:$0xff] }
0x12b3   : > { %33095 = vmatprep.mubr.msk.f32.mxu0 %vm369_vm1, %v41360_v11  ;;  %v27493_v11 = vld [vmem:[%s35745_s17 + $0x1200] sm:$0xff] }
0x12b6   : > { %33096 = vmatmul.mubr.msk.f32.gmra.mrb[132].mxu0 %vm369_vm1, %v41367_v30  ;;  %v27500_v30 = vld [vmem:[%s35745_s17 + $0x1238] sm:$0xff] }
0x12b7   : > { %33098 = vmatprep.mubr.msk.f32.mxu0 %vm369_vm1, %v41508_v7 }
0x12ba   : > { %33099 = vmatmul.mubr.msk.f32.gmra.mrb[134].mxu0 %vm369_vm1, %v41515_v35  ;;  %v41866_v35 = vld [vmem:[%s42061_s2] ss:$0 sm:$0xff] }
0x12bb   : > { %33101 = vmatprep.mubr.msk.f32.mxu0 %vm369_vm1, %v41518_v26 }
0x12be   : > { %33102 = vmatmul.mubr.msk.f32.gmra.mrb[136].mxu0 %vm369_vm1, %v41525_v19 }
0x12bf   : > { %33104 = vmatprep.mubr.msk.f32.mxu0 %vm369_vm1, %v41528_v10 }
0x12c2   : > { %33105 = vmatmul.mubr.msk.f32.gmra.mrb[138].mxu0 %vm369_vm1, %v41535_v59 }
0x12c3   : > { %33107 = vmatprep.mubr.msk.f32.mxu0 %vm369_vm1, %v41538_v53 }
0x12c6   : > { %33108 = vmatmul.mubr.msk.f32.gmra.mrb[140].mxu0 %vm369_vm1, %v41545_v8 }
0x12c7   : > { %33110 = vmatprep.mubr.msk.f32.mxu0 %vm369_vm1, %v27493_v11 }
0x12ca   : > { %33111 = vmatmul.mubr.msk.f32.gmra.mrb[142].mxu0 %vm369_vm1, %v27494_v43 }
0x12cb   : > { %33113 = vmatprep.mubr.msk.f32.mxu0 %vm369_vm1, %v27495_v23 }
0x12ce   : > { %33114 = vmatmul.mubr.msk.f32.gmra.mrb[144].mxu0 %vm369_vm1, %v27496_v12 }
0x12cf   : > { %33116 = vmatprep.mubr.msk.f32.mxu0 %vm369_vm1, %v27497_v58 }
0x12d2   : > { %33117 = vmatmul.mubr.msk.f32.gmra.mrb[146].mxu0 %vm369_vm1, %v27498_v48 }
0x12d3   : > { %33119 = vmatprep.mubr.msk.f32.mxu0 %vm369_vm1, %v27499_v57 }
0x12d6   : > { %33120 = vmatmul.mubr.msk.f32.gmra.mrb[148].mxu0 %vm369_vm1, %v27500_v30 }
0x12d7   : > { %33124 = vmatprep.mubr.msk.f32.mxu0 %vm369_vm1, %v41229_v63  ;;  %v27542_v63 = vld [vmem:[%s35745_s17 + $0x1201] sm:$0xff] }
0x12da   : > { %33125 = vmatmul.mubr.msk.f32.vlgmr.msra.gmra.mrb[126].mxu0 %vm369_vm1, %v41236_v49  ;;  %v27543_v49 = vld [vmem:[%s35745_s17 + $0x1209] sm:$0xff] }
0x12db   : > { %33161 = vmatpush3.msk.msra.mxu0 %vm442_vm0, %v35574_v27  ;;  %33127 = vmatprep.mubr.msk.f32.mxu0 %vm369_vm1, %v41239_v42  ;;  %v27544_v42 = vld [vmem:[%s35745_s17 + $0x1211] sm:$0xff] }
0x12de   : > { %33128 = vmatmul.mubr.msk.f32.gmra.mrb[128].mxu0 %vm369_vm1, %v41246_v31  ;;  %v27545_v31 = vld [vmem:[%s35745_s17 + $0x1219] sm:$0xff] }
0x12df   : > { %33130 = vmatprep.mubr.msk.f32.mxu0 %vm369_vm1, %v41249_v51  ;;  %v27546_v51 = vld [vmem:[%s35745_s17 + $0x1221] sm:$0xff] }
0x12e2   : > { %33131 = vmatmul.mubr.msk.f32.gmra.mrb[130].mxu0 %vm369_vm1, %v41256_v25  ;;  %v27547_v25 = vld [vmem:[%s35745_s17 + $0x1229] sm:$0xff] }
0x12e3   : > { %33133 = vmatprep.mubr.msk.f32.mxu0 %vm369_vm1, %v41259_v33  ;;  %v27548_v33 = vld [vmem:[%s35745_s17 + $0x1231] sm:$0xff] }
0x12e6   : > { %33134 = vmatmul.mubr.msk.f32.gmra.mrb[132].mxu0 %vm369_vm1, %v41266_v28  ;;  %v27549_v28 = vld [vmem:[%s35745_s17 + $0x1239] sm:$0xff] }
0x12e7   : > { %33136 = vmatprep.mubr.msk.f32.mxu0 %vm369_vm1, %v41595_v14 }
0x12ea   : > { %33137 = vmatmul.mubr.msk.f32.gmra.mrb[134].mxu0 %vm369_vm1, %v41602_v45 }
0x12eb   : > { %33139 = vmatprep.mubr.msk.f32.mxu0 %vm369_vm1, %v41605_v36 }
0x12ee   : > { %33140 = vmatmul.mubr.msk.f32.gmra.mrb[136].mxu0 %vm369_vm1, %v41612_v21 }
0x12ef   : > { %33142 = vmatprep.mubr.msk.f32.mxu0 %vm369_vm1, %v41615_v38 }
0x12f2   : > { %33143 = vmatmul.mubr.msk.f32.gmra.mrb[138].mxu0 %vm369_vm1, %v41622_v56 }
0x12f3   : > { %33145 = vmatprep.mubr.msk.f32.mxu0 %vm369_vm1, %v41625_v29 }
0x12f6   : > { %33146 = vmatmul.mubr.msk.f32.gmra.mrb[140].mxu0 %vm369_vm1, %v41632_v34 }
0x12f7   : > { %33148 = vmatprep.mubr.msk.f32.mxu0 %vm369_vm1, %v27542_v63 }
0x12fa   : > { %33149 = vmatmul.mubr.msk.f32.gmra.mrb[142].mxu0 %vm369_vm1, %v27543_v49 }
0x12fb   : > { %33151 = vmatprep.mubr.msk.f32.mxu0 %vm369_vm1, %v27544_v42 }
0x12fe   : > { %33152 = vmatmul.mubr.msk.f32.gmra.mrb[144].mxu0 %vm369_vm1, %v27545_v31 }
0x12ff   : > { %33154 = vmatprep.mubr.msk.f32.mxu0 %vm369_vm1, %v27546_v51 }
0x1302   : > { %33155 = vmatmul.mubr.msk.f32.gmra.mrb[146].mxu0 %vm369_vm1, %v27547_v25 }
0x1303   : > { %33157 = vmatprep.mubr.msk.f32.mxu0 %vm369_vm1, %v27548_v33 }
0x1306   : > { %33158 = vmatmul.mubr.msk.f32.gmra.mrb[148].mxu0 %vm369_vm1, %v27549_v28 }
0x1307   : > { %33162 = vmatprep.mubr.msk.f32.mxu0 %vm369_vm1, %v41431_v44  ;;  %v27596_v44 = vld [vmem:[%s35745_s17 + $0x122a] sm:$0xff] }
0x130a   : > { %33163 = vmatmul.mubr.msk.f32.vlgmr.msra.gmra.mrb[126].mxu0 %vm369_vm1, %v41438_v41  ;;  %v27595_v41 = vld [vmem:[%s35745_s17 + $0x1222] sm:$0xff] }
0x130b   : > { %33165 = vmatprep.mubr.msk.f32.mxu0 %vm369_vm1, %v41441_v20  ;;  %v27594_v20 = vld [vmem:[%s35745_s17 + $0x121a] sm:$0xff] }
0x130e   : > { %33166 = vmatmul.mubr.msk.f32.gmra.mrb[128].mxu0 %vm369_vm1, %v41448_v16  ;;  %v27593_v16 = vld [vmem:[%s35745_s17 + $0x1212] sm:$0xff] }
0x130f   : > { %33168 = vmatprep.mubr.msk.f32.mxu0 %vm369_vm1, %v41451_v32  ;;  %v27592_v32 = vld [vmem:[%s35745_s17 + $0x120a] sm:$0xff] }
0x1312   : > { %33169 = vmatmul.mubr.msk.f32.gmra.mrb[130].mxu0 %vm369_vm1, %v41458_v52  ;;  %v27591_v52 = vld [vmem:[%s35745_s17 + $0x1202] sm:$0xff] }
0x1313   : > { %33171 = vmatprep.mubr.msk.f32.mxu0 %vm369_vm1, %v41461_v15  ;;  %v27597_v15 = vld [vmem:[%s35745_s17 + $0x1232] sm:$0xff] }
0x1316   : > { %33172 = vmatmul.mubr.msk.f32.gmra.mrb[132].mxu0 %vm369_vm1, %v41468_v3  ;;  %v27598_v3 = vld [vmem:[%s35745_s17 + $0x123a] sm:$0xff]  ;;  %s215_s17 = sand.u32 1, %s35630_s19  }
0x1317   : > { %33174 = vmatprep.mubr.msk.f32.mxu0 %vm369_vm1, %v41672_v47  ;;  %s216_s26 = scalar_lea.vmem [#allocation3], %s215_s17  ;;  %s24409_s9 = scalar_lea.sflag [#allocation4], %s215_s17 }
0x1318   : > { %s24421_s30 = sshll.u32 %s216_s26, 4  ;;  %s42019_s30 = int_to_ptr.vmem [resolvable:$true] %s24421_s30 }
0x1319   : > { %s35576_s10 = scalar_lea.vmem %s42019_s30, 16  ;;  %p35583_p0 = scmp.lt.s32.totalorder %s42019_s30, %s35581_s11 }
0x131a   : > { %33175 = vmatmul.mubr.msk.f32.gmra.mrb[134].mxu0 %vm369_vm1, %v41679_v0  ;;  %p35577_p11 = scmp.ne.s32.totalorder %s42019_s30, %s35576_s10  ;;  %p35584_p1 = scmp.lt.s32.totalorder %s35582_s12, %s35576_s10 }
0x131b   : > { %33177 = vmatprep.mubr.msk.f32.mxu0 %vm369_vm1, %v41682_v18 }
0x131c   : > { %p35578_p12 = pnand %p35577_p11, %p35712_p5  ;;  %p35585_p2 = por %p35584_p1, %p35583_p0 }
0x131e   : > { %33178 = vmatmul.mubr.msk.f32.gmra.mrb[136].mxu0 %vm369_vm1, %v41689_v6  ;;  %p35579_p13 = pneg %p35578_p12 }
0x131f   : > { %33180 = vmatprep.mubr.msk.f32.mxu0 %vm369_vm1, %v41692_v61 }
0x1320   : > { %p35586_p3 = pnand %p35585_p2, %p35579_p13 }
0x1322   : > { %33181 = vmatmul.mubr.msk.f32.gmra.mrb[138].mxu0 %vm369_vm1, %v41699_v4 }
0x1323   : > { %33183 = vmatprep.mubr.msk.f32.mxu0 %vm369_vm1, %v41702_v55 }
0x1326   : > { %33184 = vmatmul.mubr.msk.f32.gmra.mrb[140].mxu0 %vm369_vm1, %v41709_v54 }
0x1327   : > { %33186 = vmatprep.mubr.msk.f32.mxu0 %vm369_vm1, %v27591_v52 }
0x132a   : > { %33187 = vmatmul.mubr.msk.f32.gmra.mrb[142].mxu0 %vm369_vm1, %v27592_v32 }
0x132b   : > { %33189 = vmatprep.mubr.msk.f32.mxu0 %vm369_vm1, %v27593_v16 }
0x132e   : > { %33190 = vmatmul.mubr.msk.f32.gmra.mrb[144].mxu0 %vm369_vm1, %v27594_v20 }
0x132f   : > { %33192 = vmatprep.mubr.msk.f32.mxu0 %vm369_vm1, %v27595_v41 }
0x1332   : > { %33193 = vmatmul.mubr.msk.f32.gmra.mrb[146].mxu0 %vm369_vm1, %v27596_v44 }
0x1333   : > { %33195 = vmatprep.mubr.msk.f32.mxu0 %vm369_vm1, %v27597_v15 }
0x1336   : > { %33196 = vmatmul.mubr.msk.f32.gmra.mrb[148].mxu0 %vm369_vm1, %v27598_v3 }
0x13dd   : > { %v33164_v7 = vpop.f32.mrb[126].mxu0 }
0x13de   : > { %v23603_v26 = vadd.f32 %v41866_v35, %v33164_v7  ;;  %v23459_v19 = vpop.f32.mrb[127].mxu0  ;;  %v42342_v7 = vld [vmem:[#allocation22_spill] sm:$0xff] }
0x13df   : > { %v23602_v10 = vadd.f32 %v41866_v35, %v23459_v19 }
0x13e0   : > { %23627 = vst.msk [vmem:[#allocation2 + $0x8] sm:$0xff] %vm3079_vm3, %v23603_v26  ;;  %v42344_v26 = vld [vmem:[#allocation24_spill] sm:$0xff] }
0x13e1   : > { %23626 = vst.msk [vmem:[#allocation2] sm:$0xff] %vm3079_vm3, %v23602_v10  ;;  %v33167_v59 = vpop.f32.mrb[128].mxu0  ;;  %v42345_v10 = vld [vmem:[#allocation25_spill] sm:$0xff] }
0x13e2   : > { %v23605_v53 = vadd.f32 %v41866_v35, %v33167_v59  ;;  %v23469_v8 = vpop.f32.mrb[129].mxu0  ;;  %v42346_v59 = vld [vmem:[#allocation26_spill] sm:$0xff] }
0x13e3   : > { %v23604_v14 = vadd.f32 %v41866_v35, %v23469_v8  ;;  %v42348_v8 = vld [vmem:[#allocation28_spill] sm:$0xff] }
0x13e4   : > { %23629 = vst.msk [vmem:[#allocation2 + $0x18] sm:$0xff] %vm3079_vm3, %v23605_v53  ;;  %v42347_v53 = vld [vmem:[#allocation27_spill] sm:$0xff] }
0x13e5   : > { %23628 = vst.msk [vmem:[#allocation2 + $0x10] sm:$0xff] %vm3079_vm3, %v23604_v14  ;;  %v33170_v45 = vpop.f32.mrb[130].mxu0 }
0x13e6   : > { %v23607_v36 = vadd.f32 %v41866_v35, %v33170_v45  ;;  %v23479_v21 = vpop.f32.mrb[131].mxu0  ;;  %v42349_v45 = vld [vmem:[#allocation29_spill] sm:$0xff] }
0x13e7   : > { %v23606_v38 = vadd.f32 %v41866_v35, %v23479_v21  ;;  %v42351_v21 = vld [vmem:[#allocation31_spill] sm:$0xff] }
0x13e8   : > { %23631 = vst.msk [vmem:[#allocation2 + $0x28] sm:$0xff] %vm3079_vm3, %v23607_v36  ;;  %v42350_v36 = vld [vmem:[#allocation30_spill] sm:$0xff] }
0x13e9   : > { %23630 = vst.msk [vmem:[#allocation2 + $0x20] sm:$0xff] %vm3079_vm3, %v23606_v38  ;;  %v33173_v56 = vpop.f32.mrb[132].mxu0  ;;  %v42352_v38 = vld [vmem:[#allocation32_spill] sm:$0xff] }
0x13ea   : > { %v23609_v29 = vadd.f32 %v41866_v35, %v33173_v56  ;;  %v23489_v34 = vpop.f32.mrb[133].mxu0 }
0x13eb   : > { %v23608_v37 = vadd.f32 %v41866_v35, %v23489_v34  ;;  %v42354_v34 = vld [vmem:[#allocation34_spill] sm:$0xff] }
0x13ec   : > { %23633 = vst.msk [vmem:[#allocation2 + $0x38] sm:$0xff] %vm3079_vm3, %v23609_v29  ;;  %v42353_v29 = vld [vmem:[#allocation33_spill] sm:$0xff] }
0x13ed   : > { %23632 = vst.msk [vmem:[#allocation2 + $0x30] sm:$0xff] %vm3079_vm3, %v23608_v37  ;;  %v33176_v47 = vpop.f32.mrb[134].mxu0  ;;  %v42355_v37 = vld [vmem:[#allocation35_spill] sm:$0xff] }
0x13ee   : > { %v23611_v0 = vadd.f32 %v41866_v35, %v33176_v47  ;;  %v23499_v18 = vpop.f32.mrb[135].mxu0  ;;  %v42356_v47 = vld [vmem:[#allocation36_spill] sm:$0xff] }
0x13ef   : > { %v23610_v6 = vadd.f32 %v41866_v35, %v23499_v18  ;;  %v42357_v18 = vld [vmem:[#allocation37_spill] sm:$0xff] }
0x13f0   : > { %23635 = vst.msk [vmem:[#allocation2 + $0x48] sm:$0xff] %vm3079_vm3, %v23611_v0 }
0x13f1   : > { %23634 = vst.msk [vmem:[#allocation2 + $0x40] sm:$0xff] %vm3079_vm3, %v23610_v6  ;;  %v33179_v61 = vpop.f32.mrb[136].mxu0  ;;  %v42358_v6 = vld [vmem:[#allocation38_spill] sm:$0xff] }
0x13f2   : > { %v23613_v4 = vadd.f32 %v41866_v35, %v33179_v61  ;;  %v23509_v55 = vpop.f32.mrb[137].mxu0  ;;  %v42359_v61 = vld [vmem:[#allocation39_spill] sm:$0xff] }
0x13f3   : > { %v23612_v54 = vadd.f32 %v41866_v35, %v23509_v55 }
0x13f4   : > { %23637 = vst.msk [vmem:[#allocation2 + $0x58] sm:$0xff] %vm3079_vm3, %v23613_v4  ;;  %v23650_v3 = vld [vmem:[#allocation2] ss:$10 sm:$0x7f] }
0x13f5   : > { %23636 = vst.msk [vmem:[#allocation2 + $0x50] sm:$0xff] %vm3079_vm3, %v23612_v54  ;;  %v33182_v27 = vpop.f32.mrb[138].mxu0  ;;  %v24098_v56 = vld [vmem:[#allocation2 + $0x2] ss:$10 sm:$0x7f] }
0x13f6   : > { %v23615_v11 = vadd.f32 %v41866_v35, %v33182_v27  ;;  %v23519_v43 = vpop.f32.mrb[139].mxu0  ;;  %v42360_v4 = vld [vmem:[#allocation40_spill] sm:$0xff] }
0x13f7   : > { %v23614_v23 = vadd.f32 %v41866_v35, %v23519_v43 }
0x13f8   : > { %23639 = vst.msk [vmem:[#allocation2 + $0x68] sm:$0xff] %vm3079_vm3, %v23615_v11 }
0x13f9   : > { %23638 = vst.msk [vmem:[#allocation2 + $0x60] sm:$0xff] %vm3079_vm3, %v23614_v23  ;;  %v33185_v12 = vpop.f32.mrb[140].mxu0 }
0x13fa   : > { %v23617_v58 = vadd.f32 %v41866_v35, %v33185_v12  ;;  %v23529_v48 = vpop.f32.mrb[141].mxu0 }
0x13fb   : > { %v23616_v57 = vadd.f32 %v41866_v35, %v23529_v48 }
0x13fc   : > { %23641 = vst.msk [vmem:[#allocation2 + $0x78] sm:$0xff] %vm3079_vm3, %v23617_v58 }
0x13fd   : > { %23640 = vst.msk [vmem:[#allocation2 + $0x70] sm:$0xff] %vm3079_vm3, %v23616_v57  ;;  %v33188_v30 = vpop.f32.mrb[142].mxu0 }
0x13fe   : > { %v23619_v63 = vadd.f32 %v41866_v35, %v33188_v30  ;;  %v23539_v49 = vpop.f32.mrb[143].mxu0 }
0x13ff   : > { %v23618_v42 = vadd.f32 %v41866_v35, %v23539_v49 }
0x1400   : > { %23643 = vst.msk [vmem:[#allocation2 + $0x88] sm:$0xff] %vm3079_vm3, %v23619_v63 }
0x1401   : > { %23642 = vst.msk [vmem:[#allocation2 + $0x80] sm:$0xff] %vm3079_vm3, %v23618_v42  ;;  %v33191_v31 = vpop.f32.mrb[144].mxu0 }
0x1402   : > { %v23621_v51 = vadd.f32 %v41866_v35, %v33191_v31  ;;  %v23549_v25 = vpop.f32.mrb[145].mxu0 }
0x1403   : > { %v23620_v33 = vadd.f32 %v41866_v35, %v23549_v25 }
0x1404   : > { %23645 = vst.msk [vmem:[#allocation2 + $0x98] sm:$0xff] %vm3079_vm3, %v23621_v51  ;;  %v23651_v28 = vld [vmem:[#allocation2 + $0x40] ss:$10 sm:$0x7f] }
0x1405   : > { %23644 = vst.msk [vmem:[#allocation2 + $0x90] sm:$0xff] %vm3079_vm3, %v23620_v33  ;;  %v33194_v52 = vpop.f32.mrb[146].mxu0  ;;  %33215 = vmatmul.mubr.msk.f32.vlgmr.msra.gmra.mrb[150].mxu1 %vm3079_vm3, %v23651_v28  ;;  %v23874_v19 = vld [vmem:[#allocation2 + $0x41] ss:$10 sm:$0x7f] }
0x1406   : > { %v23623_v32 = vadd.f32 %v41866_v35, %v33194_v52  ;;  %34031 = vmatpush3.bf16.msra.mxu1 %v42304_v9  ;;  %v23559_v16 = vpop.f32.mrb[147].mxu0  ;;  %33233 = vmatprep.mubr.msk.f32.mxu1 %vm35641_vm2, %v42303_v24  ;;  %v24099_v0 = vld [vmem:[#allocation2 + $0x42] ss:$10 sm:$0x7f] }
0x1407   : > { %v23622_v20 = vadd.f32 %v41866_v35, %v23559_v16  ;;  %34032 = vmatprep.subr.bf16.mxu1 %v42178_v22 }
0x1408   : > { %23647 = vst.msk [vmem:[#allocation2 + $0xa8] sm:$0xff] %vm3079_vm3, %v23623_v32 }
0x1409   : > { %23646 = vst.msk [vmem:[#allocation2 + $0xa0] sm:$0xff] %vm3079_vm3, %v23622_v20  ;;  %v33197_v41 = vpop.f32.mrb[148].mxu0 }
0x140a   : > { %v23625_v44 = vadd.f32 %v41866_v35, %v33197_v41  ;;  %34034 = vmatpush3.bf16.msra.mxu1 %v42305_v50  ;;  %v23569_v15 = vpop.f32.mrb[149].mxu0 }
0x140b   : > { %v23624_v9 = vadd.f32 %v41866_v35, %v23569_v15  ;;  %34035 = vmatprep.subr.bf16.mxu1 %v42178_v22  ;;  %v42343_v35 = vld [vmem:[#allocation23_spill] sm:$0xff] }
0x140c   : > { %23649 = vst.msk [vmem:[#allocation2 + $0xb8] sm:$0xff] %vm3079_vm3, %v23625_v44 }
0x140d   : > { %23648 = vst.msk [vmem:[#allocation2 + $0xb0] sm:$0xff] %vm3079_vm3, %v23624_v9 }
0x140e   : > { %34037 = vmatpush3.bf16.msra.mxu1 %v42306_v13  ;;  %v42337_v13 = vld [vmem:[#allocation17_spill] sm:$0xff] }
0x140f   : > { %34038 = vmatprep.subr.bf16.mxu1 %v42178_v22 }
0x1412   : > { %34040 = vmatpush3.bf16.msra.mxu1 %v42307_v40  ;;  %v42338_v40 = vld [vmem:[#allocation18_spill] sm:$0xff] }
0x1413   : > { %34041 = vmatprep.subr.bf16.mxu1 %v42178_v22 }
0x1414   : > { %v23652_v50 = vld [vmem:[#allocation2 + $0x80] ss:$10 sm:$0x7f]  ;;  %v23875_v14 = vld [vmem:[#allocation2 + $0x81] ss:$10 sm:$0x7f] }
0x1415   : > { %33234 = vmatmul.mubr.msk.f32.vlgmr.msra.gmra.mrb[152].mxu1 %vm3079_vm3, %v23650_v3  ;;  %v24100_v55 = vld [vmem:[#allocation2 + $0x82] ss:$10 sm:$0x7f] }
0x1416   : > { %34043 = vmatpush3.bf16.msra.mxu1 %v42308_v46  ;;  %33252 = vmatprep.mubr.msk.f32.mxu1 %vm35641_vm2, %v42303_v24  ;;  %v42339_v46 = vld [vmem:[#allocation19_spill] sm:$0xff] }
0x1417   : > { %34044 = vmatprep.subr.bf16.mxu1 %v42178_v22 }
0x141a   : > { %34046 = vmatpush3.bf16.msra.mxu1 %v42309_v5  ;;  %v42340_v5 = vld [vmem:[#allocation20_spill] sm:$0xff] }
0x141b   : > { %34047 = vmatprep.subr.bf16.mxu1 %v42178_v22 }
0x141e   : > { %34049 = vmatpush3.bf16.msra.mxu1 %v42310_v17  ;;  %v23873_v17 = vld [vmem:[#allocation2 + $0x1] ss:$10 sm:$0x7f] }
0x141f   : > { %34050 = vmatprep.subr.bf16.mxu1 %v42178_v22 }
0x1422   : > { %34052 = vmatpush3.bf16.msra.mxu1 %v42311_v2  ;;  %v42341_v2 = vld [vmem:[#allocation21_spill] sm:$0xff] }
0x1423   : > { %34053 = vmatprep.subr.bf16.mxu1 %v42178_v22 }
0x1425   : > { %33253 = vmatmul.mubr.msk.f32.vlgmr.msra.gmra.mrb[154].mxu1 %vm3079_vm3, %v23652_v50 }
0x1426   : > { %34055 = vmatpush3.bf16.msra.mxu1 %v42337_v13  ;;  %33271 = vmatprep.mubr.msk.f32.mxu1 %vm35641_vm2, %v42303_v24 }
0x1427   : > { %34056 = vmatprep.subr.bf16.mxu1 %v42178_v22 }
0x142a   : > { %34058 = vmatpush3.bf16.msra.mxu1 %v42338_v40 }
0x142b   : > { %34059 = vmatprep.subr.bf16.mxu1 %v42178_v22 }
0x142e   : > { %34061 = vmatpush3.bf16.msra.mxu1 %v42339_v46 }
0x142f   : > { %34062 = vmatprep.subr.bf16.mxu1 %v42178_v22 }
0x1432   : > { %34064 = vmatpush3.bf16.msra.mxu1 %v42340_v5 }
0x1433   : > { %34065 = vmatprep.subr.bf16.mxu1 %v42178_v22 }
0x1435   : > { %33272 = vmatmul.mubr.msk.f32.vlgmr.msra.gmra.mrb[156].mxu1 %vm3079_vm3, %v23873_v17 }
0x1436   : > { %34067 = vmatpush3.bf16.msra.mxu1 %v42341_v2  ;;  %33290 = vmatprep.mubr.msk.f32.mxu1 %vm35641_vm2, %v42303_v24 }
0x1437   : > { %34068 = vmatprep.subr.bf16.mxu1 %v42178_v22 }
0x143a   : > { %34070 = vmatpush3.bf16.msra.mxu1 %v42342_v7 }
0x143b   : > { %34071 = vmatprep.subr.bf16.mxu1 %v42178_v22 }
0x143e   : > { %34073 = vmatpush3.bf16.msra.mxu1 %v42343_v35 }
0x143f   : > { %34074 = vmatprep.subr.bf16.mxu1 %v42178_v22 }
0x1442   : > { %34076 = vmatpush3.bf16.msra.mxu1 %v42344_v26 }
0x1443   : > { %34077 = vmatprep.subr.bf16.mxu1 %v42178_v22 }
0x1445   : > { %33291 = vmatmul.mubr.msk.f32.vlgmr.msra.gmra.mrb[158].mxu1 %vm3079_vm3, %v23874_v19 }
0x1446   : > { %34079 = vmatpush3.bf16.msra.mxu1 %v42345_v10  ;;  %33309 = vmatprep.mubr.msk.f32.mxu1 %vm35641_vm2, %v42303_v24 }
0x1447   : > { %34080 = vmatprep.subr.bf16.mxu1 %v42178_v22 }
0x144a   : > { %34082 = vmatpush3.bf16.msra.mxu1 %v42346_v59 }
0x144b   : > { %34083 = vmatprep.subr.bf16.mxu1 %v42178_v22 }
0x144e   : > { %34085 = vmatpush3.bf16.msra.mxu1 %v42347_v53 }
0x144f   : > { %34086 = vmatprep.subr.bf16.mxu1 %v42178_v22 }
0x1452   : > { %34088 = vmatpush3.bf16.msra.mxu1 %v42348_v8 }
0x1453   : > { %34089 = vmatprep.subr.bf16.mxu1 %v42178_v22 }
0x1455   : > { %33310 = vmatmul.mubr.msk.f32.vlgmr.msra.gmra.mrb[160].mxu1 %vm3079_vm3, %v23875_v14  ;;  %v42361_v14 = vld [vmem:[#allocation42_spill] sm:$0xff] }
0x1456   : > { %34091 = vmatpush3.bf16.msra.mxu1 %v42349_v45  ;;  %33328 = vmatprep.mubr.msk.f32.mxu1 %vm35641_vm2, %v42303_v24 }
0x1457   : > { %34092 = vmatprep.subr.bf16.mxu1 %v42178_v22 }
0x145a   : > { %34094 = vmatpush3.bf16.msra.mxu1 %v42350_v36 }
0x145b   : > { %34095 = vmatprep.subr.bf16.mxu1 %v42178_v22 }
0x145e   : > { %34097 = vmatpush3.bf16.msra.mxu1 %v42351_v21 }
0x145f   : > { %34098 = vmatprep.subr.bf16.mxu1 %v42178_v22 }
0x1462   : > { %34100 = vmatpush3.bf16.msra.mxu1 %v42352_v38 }
0x1463   : > { %34101 = vmatprep.subr.bf16.mxu1 %v42178_v22 }
0x1465   : > { %33329 = vmatmul.mubr.msk.f32.vlgmr.msra.gmra.mrb[162].mxu1 %vm3079_vm3, %v24098_v56 }
0x1466   : > { %34103 = vmatpush3.bf16.msra.mxu1 %v42353_v29  ;;  %33347 = vmatprep.mubr.msk.f32.mxu1 %vm35641_vm2, %v42303_v24 }
0x1467   : > { %34104 = vmatprep.subr.bf16.mxu1 %v42178_v22 }
0x146a   : > { %34106 = vmatpush3.bf16.msra.mxu1 %v42354_v34 }
0x146b   : > { %34107 = vmatprep.subr.bf16.mxu1 %v42178_v22 }
0x146e   : > { %34109 = vmatpush3.bf16.msra.mxu1 %v42355_v37 }
0x146f   : > { %34110 = vmatprep.subr.bf16.mxu1 %v42178_v22 }
0x1472   : > { %34112 = vmatpush3.bf16.msra.mxu1 %v42356_v47 }
0x1473   : > { %34113 = vmatprep.subr.bf16.mxu1 %v42178_v22 }
0x1475   : > { %33348 = vmatmul.mubr.msk.f32.vlgmr.msra.gmra.mrb[164].mxu1 %vm3079_vm3, %v24099_v0 }
0x1476   : > { %34115 = vmatpush3.bf16.msra.mxu1 %v42357_v18  ;;  %33366 = vmatprep.mubr.msk.f32.mxu1 %vm35641_vm2, %v42303_v24 }
0x1477   : > { %34116 = vmatprep.subr.bf16.mxu1 %v42178_v22 }
0x147a   : > { %34118 = vmatpush3.bf16.msra.mxu1 %v42358_v6 }
0x147b   : > { %34119 = vmatprep.subr.bf16.mxu1 %v42178_v22 }
0x147e   : > { %34121 = vmatpush3.bf16.msra.mxu1 %v42359_v61 }
0x147f   : > { %34122 = vmatprep.subr.bf16.mxu1 %v42178_v22 }
0x1482   : > { %34124 = vmatpush3.bf16.msra.mxu1 %v42360_v4 }
0x1485   : > { %33367 = vmatmul.mubr.msk.f32.vlgmr.msra.gmra.mrb[166].mxu1 %vm3079_vm3, %v24100_v55 }
0x14d8   : > { %v23722_v54 = vpop.f32.mrb[150].mxu1 }
0x14d9   : > { %v33216_v27 = vpop.f32.mrb[151].mxu1 }
0x14e8   : > { %v23795_v11 = vpop.f32.mrb[152].mxu1 }
0x14e9   : > { %v23796_v43 = vadd.f32 %v23795_v11, %v23722_v54  ;;  %v33235_v24 = vpop.f32.mrb[153].mxu1 }
0x14f8   : > { %v23868_v23 = vpop.f32.mrb[154].mxu1 }
0x14f9   : > { %v23872_v12 = vadd.f32 %v23868_v23, %v23796_v43  ;;  %v33254_v58 = vpop.f32.mrb[155].mxu1 }
0x1508   : > { %v23945_v48 = vpop.f32.mrb[156].mxu1 }
0x1509   : > { %v23949_v57 = vadd.f32 %v23945_v48, %v23872_v12  ;;  %v33273_v30 = vpop.f32.mrb[157].mxu1 }
0x1518   : > { %v24019_v63 = vpop.f32.mrb[158].mxu1 }
0x1519   : > { %v24023_v49 = vadd.f32 %v24019_v63, %v23949_v57  ;;  %v33292_v42 = vpop.f32.mrb[159].mxu1 }
0x1528   : > { %v24093_v22 = vpop.f32.mrb[160].mxu1 }
0x1529   : > { %v24097_v31 = vadd.f32 %v24093_v22, %v24023_v49  ;;  %v33311_v51 = vpop.f32.mrb[161].mxu1 }
0x1538   : > { %v24170_v25 = vpop.f32.mrb[162].mxu1 }
0x1539   : > { %v24174_v33 = vadd.f32 %v24170_v25, %v24097_v31  ;;  %v33330_v28 = vpop.f32.mrb[163].mxu1 }
0x1548   : > { %v24244_v52 = vpop.f32.mrb[164].mxu1 }
0x1549   : > { %v24248_v32 = vadd.f32 %v24244_v52, %v24174_v33  ;;  %v33349_v16 = vpop.f32.mrb[165].mxu1 }
0x1558   : > { %v24318_v20 = vpop.f32.mrb[166].mxu1 }
0x1559   : > { %v24322_v41 = vadd.f32 %v24318_v20, %v24248_v32  ;;  %v33368_v44 = vpop.f32.mrb[167].mxu1 }
0x155b   : > { %v24323_v15 = vadd.f32 %v41579_v39, %v24322_v41 }
0x155d   : > { %v24374_v9 = vmax.f32 %v24373_v62, %v24323_v15 }
0x155f   : > { %v24375_v3 = vsel %vm24326_vm4, %v24374_v9, -inf  ;;  %v24382_v50 = vsel %vm24334_vm5, %v24374_v9, -inf  ;;  %v24389_v13 = vsel %vm24342_vm6, %v24374_v9, -inf }
0x1560   : > { %v24376_v40 = vrot.slane %v24375_v3, 4  ;;  %v24383_v46 = vrot.slane %v24382_v50, 4  ;;  %v24390_v5 = vrot.slane %v24389_v13, 4 }
0x1562   : > { %v24377_v17 = vmax.f32 %v24375_v3, %v24376_v40  ;;  %v24384_v2 = vmax.f32 %v24382_v50, %v24383_v46  ;;  %v24391_v7 = vmax.f32 %v24389_v13, %v24390_v5 }
0x1564   : > { %v24378_v35 = vrot.slane %v24377_v17, 2  ;;  %v24385_v39 = vrot.slane %v24384_v2, 2  ;;  %v24392_v26 = vrot.slane %v24391_v7, 2 }
0x1566   : > { %v24379_v19 = vmax.f32 %v24377_v17, %v24378_v35  ;;  %v24386_v1 = vmax.f32 %v24384_v2, %v24385_v39  ;;  %v24393_v60 = vmax.f32 %v24391_v7, %v24392_v26 }
0x1568   : > { %v24380_v62 = vrot.slane %v24379_v19, 1  ;;  %v24387_v10 = vrot.slane %v24386_v1, 1  ;;  %v24394_v53 = vrot.slane %v24393_v60, 1 }
0x156a   : > { %v24381_v59 = vmax.f32 %v24379_v19, %v24380_v62  ;;  %v24388_v8 = vmax.f32 %v24386_v1, %v24387_v10  ;;  %v24395_v36 = vmax.f32 %v24393_v60, %v24394_v53 }
0x156c   : > { %v24401_v45 = vadd.f32 %v42361_v14, %v24381_v59 }
0x156e   : > { %v24402_v21 = vadd.f32 %v24401_v45, %v24388_v8 }
0x1570   : > { %v24403_v38 = vadd.f32 %v24402_v21, %v24395_v36 }
0x1572   : > { %v24404_v56 = vmul.f32 0.11111111, %v24403_v38 }
0x1574   : > { %v24405_v29 = vmax.f32 %v24404_v56, 0.0 }
0x1576   : > { %24407 = vst.msk [vmem:[%s216_s26] sm:$0x1] %vm24406_vm7, %v24405_v29 }
0x1577   : > { %35589 = shalt.err (!%p35586_p3)
}
0x1578   : > { %s35590_s13 = scalar_lea.hbm %s42017_s8, 16  ;;  %s35594_s16 = scalar_lea.hbm %s42064_s5, 32 }
0x1579   : > { %p35591_p4 = scmp.ne.s32.totalorder %s42017_s8, %s35590_s13  ;;  %p35595_p9 = scmp.lt.u32.totalorder %s42017_s8, %s42064_s5 }
0x157a   : > { %p35596_p10 = scmp.lt.u32.totalorder %s35594_s16, %s35590_s13  ;;  %p35598_p12 = scmp.lt.u32.totalorder %s35590_s13, %s42017_s8 }
0x157b   : > { %p35592_p7 = pnand %p35591_p4, %p35712_p5 }
0x157c   : > { %p35597_p11 = por %p35596_p10, %p35595_p9 }
0x157d   : > { %p35593_p8 = pneg %p35592_p7 }
0x157e   : > { %p35599_p13 = por %p35598_p12, %p35597_p11 }
0x1580   : > { %p35600_p0 = pnand %p35599_p13, %p35593_p8 }
0x1582   : > { %35603 = shalt.err (!%p35600_p0)
}
0x1583   : > { %35470 = dma.vmem_to_hbm [thread:$0]  (%p35712_p5), %s42019_s30, 16, %s42017_s8, %s24409_s9  }
0x1584 PF: > { %p35476_p1 = scmp.ge.s32.totalorder %s35638_s21, 2  ;;  %s24433_s25 = sand.u32 1, %s35626_s18  }
0x1585   : > { %s24434_s26 = scalar_lea.sflag [#allocation4], %s24433_s25 }
0x1586   : > { %p35473_p2 = pnand %p35476_p1, %p35716_p6 }
0x1588   : > { %35621 = dma.done.wait (!%p35473_p2), %s24434_s26, 16  }
0x1589   : > { %35623 = vsyncadd (!%p35473_p2), %s24434_s26, 4294967280  ;;  %p15_p3 = scmp.ge.s32.totalorder %s35699_s24, 4   ;;  %s42362_s18 = smov %s35630_s19 }
0x158a   : > { %s42363_s19 = smov %s35634_s20  ;;  %s42364_s20 = smov %s35710_s27 }
0x158b   : > { %s42365_s21 = smov %s35699_s24  ;;  %17 = sbr.rel (!%p15_p3) target bundleno = 3 (0x3), region = 119 }
0x1592   :  { %24438 = vsyncpa [#allocation4], 1 }
0x1593   :  { %24440 = vsyncpa [#allocation4 + $0x1], 1 }

</bundles_post_ra>
